<compile_context>
chip_gen: v7x
topology: tpu7x:2x2x1
jax: 0.10.0
libtpu: 0.0.40
codegen_flags: <defaults>
</compile_context>

<pallas_src>
import jax
import jax.numpy as jnp
from jax.experimental import pallas as pl
from jax.experimental.pallas import tpu as pltpu

EPS = 1e-5
LANE = 128
MATMUL_DTYPE = jnp.bfloat16  # MXU operand dtype; accumulation stays f32.


def _round_up(x, m):
    return (x + m - 1) // m * m


def conv_block_kernel(xpad_ref, w1_ref, g1_ref, bt1_ref,
                      w2_ref, g2_ref, bt2_ref,
                      o_ref, ypad_ref, p1_ref, p2_ref):
    # xpad_ref : (N, H+2, W+2, Cin)   f32, zero-padded input (NHWC)
    # w1_ref   : (K1, Cpad)           bf16, packed conv1 weights (K1 = rnd_up(9*Cin,128))
    # w2_ref   : (K2, Cpad)           bf16, packed conv2 weights (K2 = 9*Cpad)
    # g*/bt*   : (1, Cpad)            f32, BN affine params (zero-padded)
    # o_ref    : (N, H, W, Cpad)      f32, lane-dense output (sliced to Cout outside)
    # ypad_ref : (N, H+2, W+2, Cpad)  f32 scratch: zero-halo intermediate for conv2
    # p1_ref   : (M, K1)              f32 scratch: conv1 im2col patches
    # p2_ref   : (M, K2)              f32 scratch: conv2 im2col patches
    N, Hp, Wp, Cin = xpad_ref.shape
    H, W = Hp - 2, Wp - 2
    K1, Cpad = w1_ref.shape
    M = N * H * W
    inv_m = 1.0 / M

    def bn_relu(acc, g_ref, bt_ref):
        # One-pass batch statistics: biased var = E[x^2] - E[x]^2 (matches
        # training-mode nn.BatchNorm2d), folded into one scale/shift epilogue.
        s = jnp.sum(acc, axis=0, keepdims=True)
        ss = jnp.sum(acc * acc, axis=0, keepdims=True)
        mean = s * inv_m
        var = jnp.maximum(ss * inv_m - mean * mean, 0.0)
        scale = jax.lax.rsqrt(var + EPS) * g_ref[...]
        shift = bt_ref[...] - mean * scale
        return jnp.maximum(acc * scale + shift, 0.0)

    # ------------- conv1: im2col -> one (M, K1) @ (K1, Cpad) matmul ---------
    x = xpad_ref[...]
    if 9 * Cin < K1:  # zero the K-padding columns once (weights there are 0)
        p1_ref[:, 9 * Cin:] = jnp.zeros((M, K1 - 9 * Cin), p1_ref.dtype)
    for dy in range(3):
        for dx in range(3):
            col = (dy * 3 + dx) * Cin
            p1_ref[:, col:col + Cin] = (
                x[:, dy:dy + H, dx:dx + W, :].reshape(M, Cin))
    acc1 = jnp.dot(p1_ref[...].astype(MATMUL_DTYPE), w1_ref[...],
                   preferred_element_type=jnp.float32)           # (M, Cpad) f32
    # Conv bias omitted: BN's batch-mean subtraction cancels it exactly.
    y1 = bn_relu(acc1, g1_ref, bt1_ref)

    # ------------- zero-pad intermediate: halo only, interior once ----------
    ypad_ref[:, 0:1, :, :] = jnp.zeros((N, 1, Wp, Cpad), ypad_ref.dtype)
    ypad_ref[:, Hp - 1:Hp, :, :] = jnp.zeros((N, 1, Wp, Cpad), ypad_ref.dtype)
    ypad_ref[:, :, 0:1, :] = jnp.zeros((N, Hp, 1, Cpad), ypad_ref.dtype)
    ypad_ref[:, :, Wp - 1:Wp, :] = jnp.zeros((N, Hp, 1, Cpad), ypad_ref.dtype)
    ypad_ref[:, 1:1 + H, 1:1 + W, :] = y1.reshape(N, H, W, Cpad)

    # ------------- conv2: im2col -> one (M, K2) @ (K2, Cpad) matmul ---------
    yp = ypad_ref[...]
    for dy in range(3):
        for dx in range(3):
            col = (dy * 3 + dx) * Cpad
            p2_ref[:, col:col + Cpad] = (
                yp[:, dy:dy + H, dx:dx + W, :].reshape(M, Cpad))
    acc2 = jnp.dot(p2_ref[...].astype(MATMUL_DTYPE), w2_ref[...],
                   preferred_element_type=jnp.float32)           # (M, Cpad) f32
    y2 = bn_relu(acc2, g2_ref, bt2_ref)

    o_ref[...] = y2.reshape(N, H, W, Cpad)


def conv_block_forward(x_nchw, params):
    """x_nchw: (N, Cin, H, W) float32.  Returns (N, Cout, H, W)."""
    (w1, b1, g1, bt1, w2, b2, g2, bt2) = params
    del b1, b2  # cancelled exactly by BN's batch-mean subtraction
    N, Cin, H, W = x_nchw.shape
    Cout = w1.shape[-1]
    Cpad = _round_up(Cout, LANE)
    K1 = _round_up(9 * Cin, LANE)
    K2 = 9 * Cpad
    M = N * H * W

    # NCHW -> NHWC, zero-pad spatial dims by 1 (glue).
    x = jnp.transpose(x_nchw, (0, 2, 3, 1)).astype(jnp.float32)
    x_pad = jnp.pad(x, ((0, 0), (1, 1), (1, 1), (0, 0)))

    # Pack weights once into lane-dense (K, Cpad) bf16 matrices matching the
    # im2col (dy, dx, cin) K ordering; pad BN params to Cpad lanes.
    w1_p = jnp.zeros((K1, Cpad), MATMUL_DTYPE).at[:9 * Cin, :Cout].set(
        w1.reshape(9 * Cin, Cout).astype(MATMUL_DTYPE))
    w2_p = jnp.zeros((3, 3, Cpad, Cpad), MATMUL_DTYPE).at[:, :, :Cout, :Cout].set(
        w2.astype(MATMUL_DTYPE)).reshape(K2, Cpad)

    def pad_c(v):
        return jnp.zeros((1, Cpad), jnp.float32).at[:, :Cout].set(
            v.reshape(1, Cout).astype(jnp.float32))

    g1_p, bt1_p, g2_p, bt2_p = pad_c(g1), pad_c(bt1), pad_c(g2), pad_c(bt2)

    # Rough VMEM budget (inputs + output + scratch + matmul temporaries) with
    # 2x headroom; stays far below v7x's 64 MiB at these shapes.
    f32b, bf16b = 4, 2
    vmem_bytes = (x_pad.size * f32b + w1_p.size * bf16b + w2_p.size * bf16b
                  + 4 * Cpad * f32b
                  + N * H * W * Cpad * f32b                # output
                  + N * (H + 2) * (W + 2) * Cpad * f32b    # ypad scratch
                  + M * (K1 + K2) * f32b                   # im2col scratch
                  + 6 * M * Cpad * f32b)                   # acc / y temporaries
    vmem_limit = int(min(max(2 * vmem_bytes, 8 << 20), 100 << 20))

    flops = 2 * M * K1 * Cpad + 2 * M * K2 * Cpad
    bytes_accessed = int(x_pad.size * f32b + w1_p.size * bf16b
                         + w2_p.size * bf16b + N * H * W * Cpad * f32b)

    vmem = pl.BlockSpec(memory_space=pltpu.MemorySpace.VMEM)
    out = pl.pallas_call(
        conv_block_kernel,
        out_shape=jax.ShapeDtypeStruct((N, H, W, Cpad), jnp.float32),
        in_specs=[vmem] * 7,
        out_specs=vmem,
        scratch_shapes=[
            pltpu.VMEM((N, H + 2, W + 2, Cpad), jnp.float32),
            pltpu.VMEM((M, K1), jnp.float32),
            pltpu.VMEM((M, K2), jnp.float32),
        ],
        compiler_params=pltpu.CompilerParams(vmem_limit_bytes=vmem_limit),
        cost_estimate=pl.CostEstimate(flops=flops, transcendentals=2 * Cpad,
                                      bytes_accessed=bytes_accessed),
    )(x_pad, w1_p, g1_p, bt1_p, w2_p, g2_p, bt2_p)

    # Drop channel padding, NHWC -> NCHW to match the PyTorch convention.
    return jnp.transpose(out[..., :Cout], (0, 3, 1, 2))


def reference_forward(x_nchw, params):
    """Pure-JAX f32 reference of the same semantics (for verification)."""
    (w1, b1, g1, bt1, w2, b2, g2, bt2) = params

    def conv(x, w, b):  # x NHWC, w HWIO
        y = jax.lax.conv_general_dilated(
            x, w, window_strides=(1, 1), padding=((1, 1), (1, 1)),
            dimension_numbers=("NHWC", "HWIO", "NHWC"))
        return y + b.reshape(1, 1, 1, -1)

    def bn_relu(x, g, bt):
        mean = jnp.mean(x, axis=(0, 1, 2), keepdims=True)
        var = jnp.mean((x - mean) ** 2, axis=(0, 1, 2), keepdims=True)
        y = (x - mean) * jax.lax.rsqrt(var + EPS) * g.reshape(1, 1, 1, -1) \
            + bt.reshape(1, 1, 1, -1)
        return jnp.maximum(y, 0.0)

    x = jnp.transpose(x_nchw, (0, 2, 3, 1))
    x = bn_relu(conv(x, w1, b1), g1, bt1)
    x = bn_relu(conv(x, w2, b2), g2, bt2)
    return jnp.transpose(x, (0, 3, 1, 2))


def make_params(key, in_c, out_c):
    k = jax.random.split(key, 8)
    w1 = jax.random.normal(k[0], (3, 3, in_c, out_c), jnp.float32) * 0.1
    b1 = jax.random.normal(k[1], (1, out_c), jnp.float32) * 0.01
    w2 = jax.random.normal(k[2], (3, 3, out_c, out_c), jnp.float32) * 0.1
    b2 = jax.random.normal(k[3], (1, out_c), jnp.float32) * 0.01
    g1 = 1.0 + 0.1 * jax.random.normal(k[4], (1, out_c), jnp.float32)
    bt1 = 0.1 * jax.random.normal(k[5], (1, out_c), jnp.float32)
    g2 = 1.0 + 0.1 * jax.random.normal(k[6], (1, out_c), jnp.float32)
    bt2 = 0.1 * jax.random.normal(k[7], (1, out_c), jnp.float32)
    return (w1, b1, g1, bt1, w2, b2, g2, bt2)


if __name__ == "__main__":
    N, Cin, Cout, H, W = 2, 4, 8, 16, 16
    key = jax.random.PRNGKey(0)
    kx, kp = jax.random.split(key)
    x = jax.random.normal(kx, (N, Cin, H, W), jnp.float32)
    params = make_params(kp, Cin, Cout)

    out = jax.block_until_ready(conv_block_forward(x, params))
    ref = jax.block_until_ready(reference_forward(x, params))

    assert out.shape == (N, Cout, H, W)
    # bf16 MXU operands vs. a full-f32 reference -> loosen tolerance (~1e-2).
    assert jnp.allclose(out, ref, atol=3e-2, rtol=3e-2), "mismatch vs reference"
    assert bool(jnp.all(jnp.isfinite(out))), "non-finite output"
    print("KERNEL_OK")
</pallas_src>

<mosaic_0001>
module attributes {stable_mosaic.version = 11 : i64} {
  func.func @conv_block_kernel(%arg0: memref<2x18x18x4xf32, #tpu.memory_space<vmem>>, %arg1: memref<128x128xbf16, #tpu.memory_space<vmem>>, %arg2: memref<1x128xf32, #tpu.memory_space<vmem>>, %arg3: memref<1x128xf32, #tpu.memory_space<vmem>>, %arg4: memref<1152x128xbf16, #tpu.memory_space<vmem>>, %arg5: memref<1x128xf32, #tpu.memory_space<vmem>>, %arg6: memref<1x128xf32, #tpu.memory_space<vmem>>, %arg7: memref<2x16x16x128xf32, #tpu.memory_space<vmem>>, %arg8: memref<2x18x18x128xf32, #tpu.memory_space<vmem>>, %arg9: memref<512x128xf32, #tpu.memory_space<vmem>>, %arg10: memref<512x1152xf32, #tpu.memory_space<vmem>>) attributes {dimension_semantics = [], scalar_prefetch = 0 : i64, scratch_operands = 3 : i64, tpu.core_type = #tpu.core_type<tc>} {
    %c0 = arith.constant 0 : index
    %c0_0 = arith.constant 0 : index
    %c0_1 = arith.constant 0 : index
    %c0_2 = arith.constant 0 : index
    %0 = vector.load %arg0[%c0, %c0_0, %c0_1, %c0_2] : memref<2x18x18x4xf32, #tpu.memory_space<vmem>>, vector<2x18x18x4xf32>
    %cst = arith.constant 0.000000e+00 : f32
    %1 = vector.broadcast %cst : f32 to vector<512x92xf32>
    %c0_3 = arith.constant 0 : index
    %c36 = arith.constant 36 : index
    %2 = vector.load %arg9[%c0_3, %c36] : memref<512x128xf32, #tpu.memory_space<vmem>>, vector<512x92xf32>
    tpu.vector_store %arg9[%c0_3, %c36], %1 {strides = array<i32>} : memref<512x128xf32, #tpu.memory_space<vmem>>, vector<512x92xf32>,
    %3 = vector.extract_strided_slice %0 {offsets = [0, 0, 0, 0], sizes = [2, 16, 16, 4], strides = [1, 1, 1, 1]} : vector<2x18x18x4xf32> to vector<2x16x16x4xf32>
    %4 = vector.shape_cast %3 : vector<2x16x16x4xf32> to vector<512x4xf32>
    %c0_4 = arith.constant 0 : index
    %c0_5 = arith.constant 0 : index
    %5 = vector.load %arg9[%c0_4, %c0_5] : memref<512x128xf32, #tpu.memory_space<vmem>>, vector<512x4xf32>
    tpu.vector_store %arg9[%c0_4, %c0_5], %4 {strides = array<i32>} : memref<512x128xf32, #tpu.memory_space<vmem>>, vector<512x4xf32>,
    %6 = vector.extract_strided_slice %0 {offsets = [0, 0, 1, 0], sizes = [2, 16, 16, 4], strides = [1, 1, 1, 1]} : vector<2x18x18x4xf32> to vector<2x16x16x4xf32>
    %7 = vector.shape_cast %6 : vector<2x16x16x4xf32> to vector<512x4xf32>
    %c0_6 = arith.constant 0 : index
    %c4 = arith.constant 4 : index
    %8 = vector.load %arg9[%c0_6, %c4] : memref<512x128xf32, #tpu.memory_space<vmem>>, vector<512x4xf32>
    tpu.vector_store %arg9[%c0_6, %c4], %7 {strides = array<i32>} : memref<512x128xf32, #tpu.memory_space<vmem>>, vector<512x4xf32>,
    %9 = vector.extract_strided_slice %0 {offsets = [0, 0, 2, 0], sizes = [2, 16, 16, 4], strides = [1, 1, 1, 1]} : vector<2x18x18x4xf32> to vector<2x16x16x4xf32>
    %10 = vector.shape_cast %9 : vector<2x16x16x4xf32> to vector<512x4xf32>
    %c0_7 = arith.constant 0 : index
    %c8 = arith.constant 8 : index
    %11 = vector.load %arg9[%c0_7, %c8] : memref<512x128xf32, #tpu.memory_space<vmem>>, vector<512x4xf32>
    tpu.vector_store %arg9[%c0_7, %c8], %10 {strides = array<i32>} : memref<512x128xf32, #tpu.memory_space<vmem>>, vector<512x4xf32>,
    %12 = vector.extract_strided_slice %0 {offsets = [0, 1, 0, 0], sizes = [2, 16, 16, 4], strides = [1, 1, 1, 1]} : vector<2x18x18x4xf32> to vector<2x16x16x4xf32>
    %13 = vector.shape_cast %12 : vector<2x16x16x4xf32> to vector<512x4xf32>
    %c0_8 = arith.constant 0 : index
    %c12 = arith.constant 12 : index
    %14 = vector.load %arg9[%c0_8, %c12] : memref<512x128xf32, #tpu.memory_space<vmem>>, vector<512x4xf32>
    tpu.vector_store %arg9[%c0_8, %c12], %13 {strides = array<i32>} : memref<512x128xf32, #tpu.memory_space<vmem>>, vector<512x4xf32>,
    %15 = vector.extract_strided_slice %0 {offsets = [0, 1, 1, 0], sizes = [2, 16, 16, 4], strides = [1, 1, 1, 1]} : vector<2x18x18x4xf32> to vector<2x16x16x4xf32>
    %16 = vector.shape_cast %15 : vector<2x16x16x4xf32> to vector<512x4xf32>
    %c0_9 = arith.constant 0 : index
    %c16 = arith.constant 16 : index
    %17 = vector.load %arg9[%c0_9, %c16] : memref<512x128xf32, #tpu.memory_space<vmem>>, vector<512x4xf32>
    tpu.vector_store %arg9[%c0_9, %c16], %16 {strides = array<i32>} : memref<512x128xf32, #tpu.memory_space<vmem>>, vector<512x4xf32>,
    %18 = vector.extract_strided_slice %0 {offsets = [0, 1, 2, 0], sizes = [2, 16, 16, 4], strides = [1, 1, 1, 1]} : vector<2x18x18x4xf32> to vector<2x16x16x4xf32>
    %19 = vector.shape_cast %18 : vector<2x16x16x4xf32> to vector<512x4xf32>
    %c0_10 = arith.constant 0 : index
    %c20 = arith.constant 20 : index
    %20 = vector.load %arg9[%c0_10, %c20] : memref<512x128xf32, #tpu.memory_space<vmem>>, vector<512x4xf32>
    tpu.vector_store %arg9[%c0_10, %c20], %19 {strides = array<i32>} : memref<512x128xf32, #tpu.memory_space<vmem>>, vector<512x4xf32>,
    %21 = vector.extract_strided_slice %0 {offsets = [0, 2, 0, 0], sizes = [2, 16, 16, 4], strides = [1, 1, 1, 1]} : vector<2x18x18x4xf32> to vector<2x16x16x4xf32>
    %22 = vector.shape_cast %21 : vector<2x16x16x4xf32> to vector<512x4xf32>
    %c0_11 = arith.constant 0 : index
    %c24 = arith.constant 24 : index
    %23 = vector.load %arg9[%c0_11, %c24] : memref<512x128xf32, #tpu.memory_space<vmem>>, vector<512x4xf32>
    tpu.vector_store %arg9[%c0_11, %c24], %22 {strides = array<i32>} : memref<512x128xf32, #tpu.memory_space<vmem>>, vector<512x4xf32>,
    %24 = vector.extract_strided_slice %0 {offsets = [0, 2, 1, 0], sizes = [2, 16, 16, 4], strides = [1, 1, 1, 1]} : vector<2x18x18x4xf32> to vector<2x16x16x4xf32>
    %25 = vector.shape_cast %24 : vector<2x16x16x4xf32> to vector<512x4xf32>
    %c0_12 = arith.constant 0 : index
    %c28 = arith.constant 28 : index
    %26 = vector.load %arg9[%c0_12, %c28] : memref<512x128xf32, #tpu.memory_space<vmem>>, vector<512x4xf32>
    tpu.vector_store %arg9[%c0_12, %c28], %25 {strides = array<i32>} : memref<512x128xf32, #tpu.memory_space<vmem>>, vector<512x4xf32>,
    %27 = vector.extract_strided_slice %0 {offsets = [0, 2, 2, 0], sizes = [2, 16, 16, 4], strides = [1, 1, 1, 1]} : vector<2x18x18x4xf32> to vector<2x16x16x4xf32>
    %28 = vector.shape_cast %27 : vector<2x16x16x4xf32> to vector<512x4xf32>
    %c0_13 = arith.constant 0 : index
    %c32 = arith.constant 32 : index
    %29 = vector.load %arg9[%c0_13, %c32] : memref<512x128xf32, #tpu.memory_space<vmem>>, vector<512x4xf32>
    tpu.vector_store %arg9[%c0_13, %c32], %28 {strides = array<i32>} : memref<512x128xf32, #tpu.memory_space<vmem>>, vector<512x4xf32>,
    %c0_14 = arith.constant 0 : index
    %c0_15 = arith.constant 0 : index
    %30 = vector.load %arg9[%c0_14, %c0_15] : memref<512x128xf32, #tpu.memory_space<vmem>>, vector<512x128xf32>
    %31 = arith.truncf %30 : vector<512x128xf32> to vector<512x128xbf16>
    %c0_16 = arith.constant 0 : index
    %c0_17 = arith.constant 0 : index
    %32 = vector.load %arg1[%c0_16, %c0_17] : memref<128x128xbf16, #tpu.memory_space<vmem>>, vector<128x128xbf16>
    %cst_18 = arith.constant dense<0.000000e+00> : vector<512x128xf32>
    %33 = tpu.matmul %31, %32, %cst_18 {dimension_numbers = #tpu.dot_dimension_numbers<[1], [0], [0], [1], [0, 0, 1, 1], [], []>} : vector<512x128xbf16>, vector<128x128xbf16>, vector<512x128xf32> -> vector<512x128xf32>
    %cst_19 = arith.constant dense<0.000000e+00> : vector<128xf32>
    %34 = vector.multi_reduction <add>, %33, %cst_19 [0] : vector<512x128xf32> to vector<128xf32>
    %35 = vector.shape_cast %34 : vector<128xf32> to vector<1x128xf32>
    %36 = arith.mulf %33, %33 : vector<512x128xf32>
    %cst_20 = arith.constant dense<0.000000e+00> : vector<128xf32>
    %37 = vector.multi_reduction <add>, %36, %cst_20 [0] : vector<512x128xf32> to vector<128xf32>
    %38 = vector.shape_cast %37 : vector<128xf32> to vector<1x128xf32>
    %cst_21 = arith.constant 0.001953125 : f32
    %39 = vector.broadcast %cst_21 : f32 to vector<1x128xf32>
    %40 = arith.mulf %35, %39 : vector<1x128xf32>
    %cst_22 = arith.constant 0.001953125 : f32
    %41 = vector.broadcast %cst_22 : f32 to vector<1x128xf32>
    %42 = arith.mulf %38, %41 : vector<1x128xf32>
    %43 = arith.mulf %40, %40 : vector<1x128xf32>
    %44 = arith.subf %42, %43 : vector<1x128xf32>
    %cst_23 = arith.constant 0.000000e+00 : f32
    %45 = vector.broadcast %cst_23 : f32 to vector<1x128xf32>
    %46 = arith.maximumf %44, %45 : vector<1x128xf32>
    %cst_24 = arith.constant 9.99999974E-6 : f32
    %47 = vector.broadcast %cst_24 : f32 to vector<1x128xf32>
    %48 = arith.addf %46, %47 : vector<1x128xf32>
    %49 = math.rsqrt %48 : vector<1x128xf32>
    %c0_25 = arith.constant 0 : index
    %c0_26 = arith.constant 0 : index
    %50 = vector.load %arg2[%c0_25, %c0_26] : memref<1x128xf32, #tpu.memory_space<vmem>>, vector<1x128xf32>
    %51 = arith.mulf %49, %50 : vector<1x128xf32>
    %c0_27 = arith.constant 0 : index
    %c0_28 = arith.constant 0 : index
    %52 = vector.load %arg3[%c0_27, %c0_28] : memref<1x128xf32, #tpu.memory_space<vmem>>, vector<1x128xf32>
    %53 = arith.mulf %40, %51 : vector<1x128xf32>
    %54 = arith.subf %52, %53 : vector<1x128xf32>
    %55 = vector.broadcast %51 : vector<1x128xf32> to vector<512x128xf32>
    %56 = arith.mulf %33, %55 : vector<512x128xf32>
    %57 = vector.broadcast %54 : vector<1x128xf32> to vector<512x128xf32>
    %58 = arith.addf %56, %57 : vector<512x128xf32>
    %cst_29 = arith.constant 0.000000e+00 : f32
    %59 = vector.broadcast %cst_29 : f32 to vector<512x128xf32>
    %60 = arith.maximumf %58, %59 : vector<512x128xf32>
    %cst_30 = arith.constant 0.000000e+00 : f32
    %61 = vector.broadcast %cst_30 : f32 to vector<2x1x18x128xf32>
    %c0_31 = arith.constant 0 : index
    %c0_32 = arith.constant 0 : index
    %c0_33 = arith.constant 0 : index
    %c0_34 = arith.constant 0 : index
    %62 = vector.load %arg8[%c0_31, %c0_32, %c0_33, %c0_34] : memref<2x18x18x128xf32, #tpu.memory_space<vmem>>, vector<2x1x18x128xf32>
    tpu.vector_store %arg8[%c0_31, %c0_32, %c0_33, %c0_34], %61 {strides = array<i32>} : memref<2x18x18x128xf32, #tpu.memory_space<vmem>>, vector<2x1x18x128xf32>,
    %cst_35 = arith.constant 0.000000e+00 : f32
    %63 = vector.broadcast %cst_35 : f32 to vector<2x1x18x128xf32>
    %c0_36 = arith.constant 0 : index
    %c17 = arith.constant 17 : index
    %c0_37 = arith.constant 0 : index
    %c0_38 = arith.constant 0 : index
    %64 = vector.load %arg8[%c0_36, %c17, %c0_37, %c0_38] : memref<2x18x18x128xf32, #tpu.memory_space<vmem>>, vector<2x1x18x128xf32>
    tpu.vector_store %arg8[%c0_36, %c17, %c0_37, %c0_38], %63 {strides = array<i32>} : memref<2x18x18x128xf32, #tpu.memory_space<vmem>>, vector<2x1x18x128xf32>,
    %cst_39 = arith.constant 0.000000e+00 : f32
    %65 = vector.broadcast %cst_39 : f32 to vector<2x18x1x128xf32>
    %c0_40 = arith.constant 0 : index
    %c0_41 = arith.constant 0 : index
    %c0_42 = arith.constant 0 : index
    %c0_43 = arith.constant 0 : index
    %66 = vector.load %arg8[%c0_40, %c0_41, %c0_42, %c0_43] : memref<2x18x18x128xf32, #tpu.memory_space<vmem>>, vector<2x18x1x128xf32>
    tpu.vector_store %arg8[%c0_40, %c0_41, %c0_42, %c0_43], %65 {strides = array<i32>} : memref<2x18x18x128xf32, #tpu.memory_space<vmem>>, vector<2x18x1x128xf32>,
    %cst_44 = arith.constant 0.000000e+00 : f32
    %67 = vector.broadcast %cst_44 : f32 to vector<2x18x1x128xf32>
    %c0_45 = arith.constant 0 : index
    %c0_46 = arith.constant 0 : index
    %c17_47 = arith.constant 17 : index
    %c0_48 = arith.constant 0 : index
    %68 = vector.load %arg8[%c0_45, %c0_46, %c17_47, %c0_48] : memref<2x18x18x128xf32, #tpu.memory_space<vmem>>, vector<2x18x1x128xf32>
    tpu.vector_store %arg8[%c0_45, %c0_46, %c17_47, %c0_48], %67 {strides = array<i32>} : memref<2x18x18x128xf32, #tpu.memory_space<vmem>>, vector<2x18x1x128xf32>,
    %69 = vector.shape_cast %60 : vector<512x128xf32> to vector<2x16x16x128xf32>
    %c0_49 = arith.constant 0 : index
    %c1 = arith.constant 1 : index
    %c1_50 = arith.constant 1 : index
    %c0_51 = arith.constant 0 : index
    %70 = vector.load %arg8[%c0_49, %c1, %c1_50, %c0_51] : memref<2x18x18x128xf32, #tpu.memory_space<vmem>>, vector<2x16x16x128xf32>
    tpu.vector_store %arg8[%c0_49, %c1, %c1_50, %c0_51], %69 {strides = array<i32>} : memref<2x18x18x128xf32, #tpu.memory_space<vmem>>, vector<2x16x16x128xf32>,
    %c0_52 = arith.constant 0 : index
    %c0_53 = arith.constant 0 : index
    %c0_54 = arith.constant 0 : index
    %c0_55 = arith.constant 0 : index
    %71 = vector.load %arg8[%c0_52, %c0_53, %c0_54, %c0_55] : memref<2x18x18x128xf32, #tpu.memory_space<vmem>>, vector<2x18x18x128xf32>
    %72 = vector.extract_strided_slice %71 {offsets = [0, 0, 0, 0], sizes = [2, 16, 16, 128], strides = [1, 1, 1, 1]} : vector<2x18x18x128xf32> to vector<2x16x16x128xf32>
    %73 = vector.shape_cast %72 : vector<2x16x16x128xf32> to vector<512x128xf32>
    %c0_56 = arith.constant 0 : index
    %c0_57 = arith.constant 0 : index
    %74 = vector.load %arg10[%c0_56, %c0_57] : memref<512x1152xf32, #tpu.memory_space<vmem>>, vector<512x128xf32>
    tpu.vector_store %arg10[%c0_56, %c0_57], %73 {strides = array<i32>} : memref<512x1152xf32, #tpu.memory_space<vmem>>, vector<512x128xf32>,
    %75 = vector.extract_strided_slice %71 {offsets = [0, 0, 1, 0], sizes = [2, 16, 16, 128], strides = [1, 1, 1, 1]} : vector<2x18x18x128xf32> to vector<2x16x16x128xf32>
    %76 = vector.shape_cast %75 : vector<2x16x16x128xf32> to vector<512x128xf32>
    %c0_58 = arith.constant 0 : index
    %c128 = arith.constant 128 : index
    %77 = vector.load %arg10[%c0_58, %c128] : memref<512x1152xf32, #tpu.memory_space<vmem>>, vector<512x128xf32>
    tpu.vector_store %arg10[%c0_58, %c128], %76 {strides = array<i32>} : memref<512x1152xf32, #tpu.memory_space<vmem>>, vector<512x128xf32>,
    %78 = vector.extract_strided_slice %71 {offsets = [0, 0, 2, 0], sizes = [2, 16, 16, 128], strides = [1, 1, 1, 1]} : vector<2x18x18x128xf32> to vector<2x16x16x128xf32>
    %79 = vector.shape_cast %78 : vector<2x16x16x128xf32> to vector<512x128xf32>
    %c0_59 = arith.constant 0 : index
    %c256 = arith.constant 256 : index
    %80 = vector.load %arg10[%c0_59, %c256] : memref<512x1152xf32, #tpu.memory_space<vmem>>, vector<512x128xf32>
    tpu.vector_store %arg10[%c0_59, %c256], %79 {strides = array<i32>} : memref<512x1152xf32, #tpu.memory_space<vmem>>, vector<512x128xf32>,
    %81 = vector.extract_strided_slice %71 {offsets = [0, 1, 0, 0], sizes = [2, 16, 16, 128], strides = [1, 1, 1, 1]} : vector<2x18x18x128xf32> to vector<2x16x16x128xf32>
    %82 = vector.shape_cast %81 : vector<2x16x16x128xf32> to vector<512x128xf32>
    %c0_60 = arith.constant 0 : index
    %c384 = arith.constant 384 : index
    %83 = vector.load %arg10[%c0_60, %c384] : memref<512x1152xf32, #tpu.memory_space<vmem>>, vector<512x128xf32>
    tpu.vector_store %arg10[%c0_60, %c384], %82 {strides = array<i32>} : memref<512x1152xf32, #tpu.memory_space<vmem>>, vector<512x128xf32>,
    %84 = vector.extract_strided_slice %71 {offsets = [0, 1, 1, 0], sizes = [2, 16, 16, 128], strides = [1, 1, 1, 1]} : vector<2x18x18x128xf32> to vector<2x16x16x128xf32>
    %85 = vector.shape_cast %84 : vector<2x16x16x128xf32> to vector<512x128xf32>
    %c0_61 = arith.constant 0 : index
    %c512 = arith.constant 512 : index
    %86 = vector.load %arg10[%c0_61, %c512] : memref<512x1152xf32, #tpu.memory_space<vmem>>, vector<512x128xf32>
    tpu.vector_store %arg10[%c0_61, %c512], %85 {strides = array<i32>} : memref<512x1152xf32, #tpu.memory_space<vmem>>, vector<512x128xf32>,
    %87 = vector.extract_strided_slice %71 {offsets = [0, 1, 2, 0], sizes = [2, 16, 16, 128], strides = [1, 1, 1, 1]} : vector<2x18x18x128xf32> to vector<2x16x16x128xf32>
    %88 = vector.shape_cast %87 : vector<2x16x16x128xf32> to vector<512x128xf32>
    %c0_62 = arith.constant 0 : index
    %c640 = arith.constant 640 : index
    %89 = vector.load %arg10[%c0_62, %c640] : memref<512x1152xf32, #tpu.memory_space<vmem>>, vector<512x128xf32>
    tpu.vector_store %arg10[%c0_62, %c640], %88 {strides = array<i32>} : memref<512x1152xf32, #tpu.memory_space<vmem>>, vector<512x128xf32>,
    %90 = vector.extract_strided_slice %71 {offsets = [0, 2, 0, 0], sizes = [2, 16, 16, 128], strides = [1, 1, 1, 1]} : vector<2x18x18x128xf32> to vector<2x16x16x128xf32>
    %91 = vector.shape_cast %90 : vector<2x16x16x128xf32> to vector<512x128xf32>
    %c0_63 = arith.constant 0 : index
    %c768 = arith.constant 768 : index
    %92 = vector.load %arg10[%c0_63, %c768] : memref<512x1152xf32, #tpu.memory_space<vmem>>, vector<512x128xf32>
    tpu.vector_store %arg10[%c0_63, %c768], %91 {strides = array<i32>} : memref<512x1152xf32, #tpu.memory_space<vmem>>, vector<512x128xf32>,
    %93 = vector.extract_strided_slice %71 {offsets = [0, 2, 1, 0], sizes = [2, 16, 16, 128], strides = [1, 1, 1, 1]} : vector<2x18x18x128xf32> to vector<2x16x16x128xf32>
    %94 = vector.shape_cast %93 : vector<2x16x16x128xf32> to vector<512x128xf32>
    %c0_64 = arith.constant 0 : index
    %c896 = arith.constant 896 : index
    %95 = vector.load %arg10[%c0_64, %c896] : memref<512x1152xf32, #tpu.memory_space<vmem>>, vector<512x128xf32>
    tpu.vector_store %arg10[%c0_64, %c896], %94 {strides = array<i32>} : memref<512x1152xf32, #tpu.memory_space<vmem>>, vector<512x128xf32>,
    %96 = vector.extract_strided_slice %71 {offsets = [0, 2, 2, 0], sizes = [2, 16, 16, 128], strides = [1, 1, 1, 1]} : vector<2x18x18x128xf32> to vector<2x16x16x128xf32>
    %97 = vector.shape_cast %96 : vector<2x16x16x128xf32> to vector<512x128xf32>
    %c0_65 = arith.constant 0 : index
    %c1024 = arith.constant 1024 : index
    %98 = vector.load %arg10[%c0_65, %c1024] : memref<512x1152xf32, #tpu.memory_space<vmem>>, vector<512x128xf32>
    tpu.vector_store %arg10[%c0_65, %c1024], %97 {strides = array<i32>} : memref<512x1152xf32, #tpu.memory_space<vmem>>, vector<512x128xf32>,
    %c0_66 = arith.constant 0 : index
    %c0_67 = arith.constant 0 : index
    %99 = vector.load %arg10[%c0_66, %c0_67] : memref<512x1152xf32, #tpu.memory_space<vmem>>, vector<512x1152xf32>
    %100 = arith.truncf %99 : vector<512x1152xf32> to vector<512x1152xbf16>
    %c0_68 = arith.constant 0 : index
    %c0_69 = arith.constant 0 : index
    %101 = vector.load %arg4[%c0_68, %c0_69] : memref<1152x128xbf16, #tpu.memory_space<vmem>>, vector<1152x128xbf16>
    %cst_70 = arith.constant dense<0.000000e+00> : vector<512x128xf32>
    %102 = tpu.matmul %100, %101, %cst_70 {dimension_numbers = #tpu.dot_dimension_numbers<[1], [0], [0], [1], [0, 0, 1, 1], [], []>} : vector<512x1152xbf16>, vector<1152x128xbf16>, vector<512x128xf32> -> vector<512x128xf32>
    %cst_71 = arith.constant dense<0.000000e+00> : vector<128xf32>
    %103 = vector.multi_reduction <add>, %102, %cst_71 [0] : vector<512x128xf32> to vector<128xf32>
    %104 = vector.shape_cast %103 : vector<128xf32> to vector<1x128xf32>
    %105 = arith.mulf %102, %102 : vector<512x128xf32>
    %cst_72 = arith.constant dense<0.000000e+00> : vector<128xf32>
    %106 = vector.multi_reduction <add>, %105, %cst_72 [0] : vector<512x128xf32> to vector<128xf32>
    %107 = vector.shape_cast %106 : vector<128xf32> to vector<1x128xf32>
    %cst_73 = arith.constant 0.001953125 : f32
    %108 = vector.broadcast %cst_73 : f32 to vector<1x128xf32>
    %109 = arith.mulf %104, %108 : vector<1x128xf32>
    %cst_74 = arith.constant 0.001953125 : f32
    %110 = vector.broadcast %cst_74 : f32 to vector<1x128xf32>
    %111 = arith.mulf %107, %110 : vector<1x128xf32>
    %112 = arith.mulf %109, %109 : vector<1x128xf32>
    %113 = arith.subf %111, %112 : vector<1x128xf32>
    %cst_75 = arith.constant 0.000000e+00 : f32
    %114 = vector.broadcast %cst_75 : f32 to vector<1x128xf32>
    %115 = arith.maximumf %113, %114 : vector<1x128xf32>
    %cst_76 = arith.constant 9.99999974E-6 : f32
    %116 = vector.broadcast %cst_76 : f32 to vector<1x128xf32>
    %117 = arith.addf %115, %116 : vector<1x128xf32>
    %118 = math.rsqrt %117 : vector<1x128xf32>
    %c0_77 = arith.constant 0 : index
    %c0_78 = arith.constant 0 : index
    %119 = vector.load %arg5[%c0_77, %c0_78] : memref<1x128xf32, #tpu.memory_space<vmem>>, vector<1x128xf32>
    %120 = arith.mulf %118, %119 : vector<1x128xf32>
    %c0_79 = arith.constant 0 : index
    %c0_80 = arith.constant 0 : index
    %121 = vector.load %arg6[%c0_79, %c0_80] : memref<1x128xf32, #tpu.memory_space<vmem>>, vector<1x128xf32>
    %122 = arith.mulf %109, %120 : vector<1x128xf32>
    %123 = arith.subf %121, %122 : vector<1x128xf32>
    %124 = vector.broadcast %120 : vector<1x128xf32> to vector<512x128xf32>
    %125 = arith.mulf %102, %124 : vector<512x128xf32>
    %126 = vector.broadcast %123 : vector<1x128xf32> to vector<512x128xf32>
    %127 = arith.addf %125, %126 : vector<512x128xf32>
    %cst_81 = arith.constant 0.000000e+00 : f32
    %128 = vector.broadcast %cst_81 : f32 to vector<512x128xf32>
    %129 = arith.maximumf %127, %128 : vector<512x128xf32>
    %130 = vector.shape_cast %129 : vector<512x128xf32> to vector<2x16x16x128xf32>
    %c0_82 = arith.constant 0 : index
    %c0_83 = arith.constant 0 : index
    %c0_84 = arith.constant 0 : index
    %c0_85 = arith.constant 0 : index
    %131 = vector.load %arg7[%c0_82, %c0_83, %c0_84, %c0_85] : memref<2x16x16x128xf32, #tpu.memory_space<vmem>>, vector<2x16x16x128xf32>
    tpu.vector_store %arg7[%c0_82, %c0_83, %c0_84, %c0_85], %130 {strides = array<i32>} : memref<2x16x16x128xf32, #tpu.memory_space<vmem>>, vector<2x16x16x128xf32>,
    return
  }
}

</mosaic_0001>

<bundles_post_ra>
// kernel: tpu_custom_call.1
= control target key start
LH: loop header
LB: loop body
LE: loop exit
PB: predicated region body
PF: predicated region fallthrough
CT: control target
= control target key end

     0   :  { %vm362_vm0 = vcmask 1046528   ;;  %s9283_s13 = smov 4   ;;  %vm780_vm1 = vcmask 1045504   ;;  %s9284_s14 = smov 8   ;;  %vm136_vm2 = vcmask 1047840   ;;  %v9285_v34 = vmov 0.0   ;;  %s15876_s0 = inlined_call_operand.vmem [shape: f32[2,18,18,4], index: 0, kind: input, shape index: {}]   ;;  %s15877_s1 = inlined_call_operand.vmem [shape: bf16[128,128], index: 1, kind: input, shape index: {}]   ;;  %s15878_s2 = inlined_call_operand.vmem [shape: f32[1,128], index: 2, kind: input, shape index: {}]   ;;  %s15879_s3 = inlined_call_operand.vmem [shape: f32[1,128], index: 3, kind: input, shape index: {}]   ;;  %s15880_s4 = inlined_call_operand.vmem [shape: bf16[1152,128], index: 4, kind: input, shape index: {}]   ;;  %s15881_s5 = inlined_call_operand.vmem [shape: f32[1,128], index: 5, kind: input, shape index: {}]   ;;  %s15882_s6 = inlined_call_operand.vmem [shape: f32[1,128], index: 6, kind: input, shape index: {}]   ;;  %s15883_s7 = inlined_call_operand.hbm [shape: f32[2,16,16,128], index: 7, kind: output, shape index: {}]  }
   0x1   :  { %v9338_v0 = vld [vmem:[%s15876_s0 + $0x18] sm:$0xff]  ;;  %v9343_v1 = vld [vmem:[%s15876_s0 + $0x20] sm:$0xff]  ;;  %v9355_v5 = vld [vmem:[%s15876_s0 + $0x8] sm:$0xff]  ;;  %139 = vst.msk [vmem:[#allocation3 + $0x10] sm:$0xff] %vm136_vm2, %v9285_v34  ;;  %vm201_vm3 = vcmask 31744   ;;  %s9286_s10 = smov 12  }
   0x2   :  { %v9348_v2 = vld [vmem:[%s15876_s0] sm:$0xff]  ;;  %v368_v3 = vrot.slane %v9338_v0, 1  ;;  %v369_v4 = vrot.slane %v9343_v1, 1  ;;  %v33_v7 = vld [vmem:[%s15876_s0 + $0x28] sm:$0x3]  ;;  %v364_v8 = vrot.slane %v9355_v5, 1 }
   0x3   :  { %v363_v6 = vrot.slane %v9348_v2, 1  ;;  %v371_v9 = vrot.slane %v33_v7, 1  ;;  %v30_v10 = vld [vmem:[%s15876_s0 + $0x10] sm:$0x3]  ;;  %v782_v15 = vrot.slane %v9355_v5, 2  ;;  %v781_v18 = vrot.slane %v9348_v2, 2 }
   0x4   :  { %v9366_v11 = vsel %vm362_vm0, %v368_v3, %v369_v4  ;;  %v366_v12 = vrot.slane %v30_v10, 1  ;;  %v784_v16 = vrot.slane %v30_v10, 2  ;;  %v787_v20 = vrot.slane %v9343_v1, 2  ;;  %v9389_v24 = vld [vmem:[%s15876_s0 + $0x38] sm:$0xff]  ;;  %v9394_v25 = vld [vmem:[%s15876_s0 + $0x30] sm:$0xff]  ;;  %v9404_v27 = vld [vmem:[%s15876_s0 + $0x48] sm:$0xff] }
   0x5   :  { %527 = vrot.lane.b32.xlu1 %v9366_v11, %s9283_s13  ;;  %v365_v13 = vsel %vm362_vm0, %v363_v6, %v364_v8  ;;  %v9373_v14 = vsel %vm362_vm0, %v369_v4, %v371_v9  ;;  %v789_v21 = vrot.slane %v33_v7, 2  ;;  %v783_v22 = vsel %vm780_vm1, %v781_v18, %v782_v15  ;;  %v9399_v26 = vld [vmem:[%s15876_s0 + $0x50] sm:$0xff]  ;;  %v9409_v28 = vld [vmem:[%s15876_s0 + $0x68] sm:$0xff]  ;;  %v9414_v29 = vld [vmem:[%s15876_s0 + $0x60] sm:$0xff]  ;;  %137 = vst.msk [vmem:[#allocation3] sm:$0xff] %vm136_vm2, %v9285_v34  ;;  %s9287_s17 = smov 16  }
   0x6   :  { %523 = vrot.lane.b32.xlu0 %v365_v13, %s9283_s13  ;;  %v367_v17 = vsel %vm362_vm0, %v364_v8, %v366_v12  ;;  %v785_v19 = vsel %vm780_vm1, %v782_v15, %v784_v16  ;;  %v786_v23 = vrot.slane %v9338_v0, 2  ;;  %v9419_v30 = vld [vmem:[%s15876_s0 + $0x80] sm:$0xff]  ;;  %v9431_v33 = vld [vmem:[%s15876_s0 + $0x78] sm:$0xff]  ;;  %138 = vst.msk [vmem:[#allocation3 + $0x8] sm:$0xff] %vm136_vm2, %v9285_v34  ;;  %140 = vst.msk [vmem:[#allocation3 + $0x18] sm:$0xff] %vm136_vm2, %v9285_v34  ;;  %v374_v36 = vrot.slane %v9389_v24, 1 }
   0x7   :  { %v9423_v31 = vsel %vm780_vm1, %v787_v20, %v789_v21  ;;  %141 = vst.msk [vmem:[#allocation3 + $0x20] sm:$0xff] %vm136_vm2, %v9285_v34  ;;  %142 = vst.msk [vmem:[#allocation3 + $0x28] sm:$0xff] %vm136_vm2, %v9285_v34  ;;  %v36_v35 = vld [vmem:[%s15876_s0 + $0x40] sm:$0x3]  ;;  %v373_v38 = vrot.slane %v9394_v25, 1  ;;  %v9684_v39 = vld [vmem:[%s15876_s0 + $0x98] sm:$0xff] }
   0x8   :  { %v9426_v32 = vsel %vm780_vm1, %v786_v23, %v787_v20  ;;  %143 = vst.msk [vmem:[#allocation3 + $0x30] sm:$0xff] %vm136_vm2, %v9285_v34  ;;  %144 = vst.msk [vmem:[#allocation3 + $0x38] sm:$0xff] %vm136_vm2, %v9285_v34  ;;  %v376_v37 = vrot.slane %v36_v35, 1  ;;  %v9689_v40 = vld [vmem:[%s15876_s0 + $0x90] sm:$0xff]  ;;  %v792_v43 = vrot.slane %v9389_v24, 2  ;;  %v794_v44 = vrot.slane %v36_v35, 2 }
   0x9   :  { %529 = vrot.lane.b32.xlu1 %v9373_v14, %s9283_s13  ;;  %145 = vst.msk [vmem:[#allocation3 + $0x40] sm:$0xff] %vm136_vm2, %v9285_v34  ;;  %146 = vst.msk [vmem:[#allocation3 + $0x48] sm:$0xff] %vm136_vm2, %v9285_v34  ;;  %v9705_v42 = vsel %vm362_vm0, %v373_v38, %v374_v36  ;;  %v791_v45 = vrot.slane %v9394_v25, 2  ;;  %v9168_v46 = vld [vmem:[%s15877_s1] sm:$0xff]   ;;  %s9288_s20 = smov 20   ;;  %v9169_v47 = vld [vmem:[%s15877_s1 + $0x8] sm:$0xff]  }
   0xa   :  { %525 = vrot.lane.b32.xlu0 %v367_v17, %s9283_s13  ;;  %147 = vst.msk [vmem:[#allocation3 + $0x50] sm:$0xff] %vm136_vm2, %v9285_v34  ;;  %148 = vst.msk [vmem:[#allocation3 + $0x58] sm:$0xff] %vm136_vm2, %v9285_v34  ;;  %v9702_v41 = vsel %vm362_vm0, %v374_v36, %v376_v37  ;;  %8644 = vmatprep.subr.bf16.mxu0 %v9168_v46  ;;  %v795_v48 = vsel %vm780_vm1, %v792_v43, %v794_v44  ;;  %v9170_v50 = vld [vmem:[%s15877_s1 + $0x10] sm:$0xff]   ;;  %s9289_s25 = smov 24   ;;  %v9171_v51 = vld [vmem:[%s15877_s1 + $0x18] sm:$0xff]   ;;  %v379_v53 = vrot.slane %v9399_v26, 1 }
   0xb   :  { %149 = vst.msk [vmem:[#allocation3 + $0x60] sm:$0xff] %vm136_vm2, %v9285_v34  ;;  %150 = vst.msk [vmem:[#allocation3 + $0x68] sm:$0xff] %vm136_vm2, %v9285_v34  ;;  %8645 = vmatpush3.bf16.msra.mxu0 %v9168_v46  ;;  %v793_v49 = vsel %vm780_vm1, %v791_v45, %v792_v43  ;;  %v39_v52 = vld [vmem:[%s15876_s0 + $0x58] sm:$0x3]  ;;  %v378_v55 = vrot.slane %v9404_v27, 1  ;;  %v9747_v56 = vld [vmem:[%s15876_s0 + $0xb0] sm:$0xff] }
   0xc   :  { %151 = vst.msk [vmem:[#allocation3 + $0x70] sm:$0xff] %vm136_vm2, %v9285_v34  ;;  %152 = vst.msk [vmem:[#allocation3 + $0x78] sm:$0xff] %vm136_vm2, %v9285_v34  ;;  %8646 = vmatprep.subr.bf16.mxu0 %v9169_v47  ;;  %v381_v54 = vrot.slane %v39_v52, 1  ;;  %v9752_v57 = vld [vmem:[%s15876_s0 + $0xa8] sm:$0xff]  ;;  %v9172_v58 = vld [vmem:[%s15877_s1 + $0x20] sm:$0xff]   ;;  %s9290_s16 = smov 28  }
   0xd   :  { %943 = vrot.lane.b32.xlu1 %v785_v19, %s9284_s14  ;;  %153 = vst.msk [vmem:[#allocation3 + $0x80] sm:$0xff] %vm136_vm2, %v9285_v34  ;;  %154 = vst.msk [vmem:[#allocation3 + $0x88] sm:$0xff] %vm136_vm2, %v9285_v34  ;;  %v9173_v59 = vld [vmem:[%s15877_s1 + $0x28] sm:$0xff]   ;;  %v380_v61 = vsel %vm362_vm0, %v378_v55, %v379_v53  ;;  %v797_v62 = vrot.slane %v9399_v26, 2  ;;  %v799_v63 = vrot.slane %v39_v52, 2  ;;  %s9291_s23 = smov 32  }
   0xe   :  { %941 = vrot.lane.b32.xlu0 %v783_v22, %s9284_s14  ;;  %155 = vst.msk [vmem:[#allocation3 + $0x90] sm:$0xff] %vm136_vm2, %v9285_v34  ;;  %156 = vst.msk [vmem:[#allocation3 + $0x98] sm:$0xff] %vm136_vm2, %v9285_v34  ;;  %v382_v60 = vsel %vm362_vm0, %v379_v53, %v381_v54 }
   0xf   :  { %157 = vst.msk [vmem:[#allocation3 + $0xa0] sm:$0xff] %vm136_vm2, %v9285_v34  ;;  %158 = vst.msk [vmem:[#allocation3 + $0xa8] sm:$0xff] %vm136_vm2, %v9285_v34  ;;  %8647 = vmatpush3.bf16.msra.mxu0 %v9169_v47  ;;  %v800_v3 = vsel %vm780_vm1, %v797_v62, %v799_v63 }
  0x10   :  { %159 = vst.msk [vmem:[#allocation3 + $0xb0] sm:$0xff] %vm136_vm2, %v9285_v34  ;;  %160 = vst.msk [vmem:[#allocation3 + $0xb8] sm:$0xff] %vm136_vm2, %v9285_v34  ;;  %8648 = vmatprep.subr.bf16.mxu0 %v9170_v50 }
  0x11   :  { %161 = vst.msk [vmem:[#allocation3 + $0xc0] sm:$0xff] %vm136_vm2, %v9285_v34  ;;  %162 = vst.msk [vmem:[#allocation3 + $0xc8] sm:$0xff] %vm136_vm2, %v9285_v34  ;;  %947 = vrot.lane.b32.xlu1 %v9423_v31, %s9284_s14 }
  0x12   :  { %163 = vst.msk [vmem:[#allocation3 + $0xd0] sm:$0xff] %vm136_vm2, %v9285_v34  ;;  %164 = vst.msk [vmem:[#allocation3 + $0xd8] sm:$0xff] %vm136_vm2, %v9285_v34  ;;  %945 = vrot.lane.b32.xlu0 %v9426_v32, %s9284_s14 }
  0x13   :  { %165 = vst.msk [vmem:[#allocation3 + $0xe0] sm:$0xff] %vm136_vm2, %v9285_v34  ;;  %166 = vst.msk [vmem:[#allocation3 + $0xe8] sm:$0xff] %vm136_vm2, %v9285_v34  ;;  %8649 = vmatpush3.bf16.msra.mxu0 %v9170_v50 }
  0x14   :  { %167 = vst.msk [vmem:[#allocation3 + $0xf0] sm:$0xff] %vm136_vm2, %v9285_v34  ;;  %168 = vst.msk [vmem:[#allocation3 + $0xf8] sm:$0xff] %vm136_vm2, %v9285_v34  ;;  %8650 = vmatprep.subr.bf16.mxu0 %v9171_v51 }
  0x15   :  { %169 = vst.msk [vmem:[#allocation3 + $0x100] sm:$0xff] %vm136_vm2, %v9285_v34  ;;  %170 = vst.msk [vmem:[#allocation3 + $0x108] sm:$0xff] %vm136_vm2, %v9285_v34  ;;  %1204 = vrot.lane.b32.xlu1 %v9343_v1, %s9286_s10 }
  0x16   :  { %171 = vst.msk [vmem:[#allocation3 + $0x110] sm:$0xff] %vm136_vm2, %v9285_v34  ;;  %172 = vst.msk [vmem:[#allocation3 + $0x118] sm:$0xff] %vm136_vm2, %v9285_v34  ;;  %1202 = vrot.lane.b32.xlu0 %v9338_v0, %s9286_s10 }
  0x17   :  { %173 = vst.msk [vmem:[#allocation3 + $0x120] sm:$0xff] %vm136_vm2, %v9285_v34  ;;  %174 = vst.msk [vmem:[#allocation3 + $0x128] sm:$0xff] %vm136_vm2, %v9285_v34  ;;  %8651 = vmatpush3.bf16.msra.mxu0 %v9171_v51 }
  0x18   :  { %175 = vst.msk [vmem:[#allocation3 + $0x130] sm:$0xff] %vm136_vm2, %v9285_v34  ;;  %176 = vst.msk [vmem:[#allocation3 + $0x138] sm:$0xff] %vm136_vm2, %v9285_v34  ;;  %8652 = vmatprep.subr.bf16.mxu0 %v9172_v58 }
  0x19   :  { %177 = vst.msk [vmem:[#allocation3 + $0x140] sm:$0xff] %vm136_vm2, %v9285_v34  ;;  %178 = vst.msk [vmem:[#allocation3 + $0x148] sm:$0xff] %vm136_vm2, %v9285_v34  ;;  %1208 = vrot.lane.b32.xlu1 %v9389_v24, %s9286_s10 }
  0x1a   :  { %179 = vst.msk [vmem:[#allocation3 + $0x150] sm:$0xff] %vm136_vm2, %v9285_v34  ;;  %180 = vst.msk [vmem:[#allocation3 + $0x158] sm:$0xff] %vm136_vm2, %v9285_v34  ;;  %1206 = vrot.lane.b32.xlu0 %v9394_v25, %s9286_s10 }
  0x1b   :  { %181 = vst.msk [vmem:[#allocation3 + $0x160] sm:$0xff] %vm136_vm2, %v9285_v34  ;;  %182 = vst.msk [vmem:[#allocation3 + $0x168] sm:$0xff] %vm136_vm2, %v9285_v34  ;;  %8653 = vmatpush3.bf16.msra.mxu0 %v9172_v58 }
  0x1c   :  { %183 = vst.msk [vmem:[#allocation3 + $0x170] sm:$0xff] %vm136_vm2, %v9285_v34  ;;  %184 = vst.msk [vmem:[#allocation3 + $0x178] sm:$0xff] %vm136_vm2, %v9285_v34  ;;  %8654 = vmatprep.subr.bf16.mxu0 %v9173_v59 }
  0x1d   :  { %185 = vst.msk [vmem:[#allocation3 + $0x180] sm:$0xff] %vm136_vm2, %v9285_v34  ;;  %186 = vst.msk [vmem:[#allocation3 + $0x188] sm:$0xff] %vm136_vm2, %v9285_v34  ;;  %1473 = vrot.lane.b32.xlu1 %v9373_v14, %s9287_s17 }
  0x1e   :  { %187 = vst.msk [vmem:[#allocation3 + $0x190] sm:$0xff] %vm136_vm2, %v9285_v34  ;;  %188 = vst.msk [vmem:[#allocation3 + $0x198] sm:$0xff] %vm136_vm2, %v9285_v34  ;;  %1471 = vrot.lane.b32.xlu0 %v9366_v11, %s9287_s17 }
  0x1f   :  { %189 = vst.msk [vmem:[#allocation3 + $0x1a0] sm:$0xff] %vm136_vm2, %v9285_v34  ;;  %190 = vst.msk [vmem:[#allocation3 + $0x1a8] sm:$0xff] %vm136_vm2, %v9285_v34  ;;  %8655 = vmatpush3.bf16.msra.mxu0 %v9173_v59 }
  0x20   :  { %191 = vst.msk [vmem:[#allocation3 + $0x1b0] sm:$0xff] %vm136_vm2, %v9285_v34  ;;  %192 = vst.msk [vmem:[#allocation3 + $0x1b8] sm:$0xff] %vm136_vm2, %v9285_v34 }
  0x21   :  { %193 = vst.msk [vmem:[#allocation3 + $0x1c0] sm:$0xff] %vm136_vm2, %v9285_v34  ;;  %194 = vst.msk [vmem:[#allocation3 + $0x1c8] sm:$0xff] %vm136_vm2, %v9285_v34  ;;  %1477 = vrot.lane.b32.xlu1 %v9702_v41, %s9287_s17 }
  0x22   :  { %195 = vst.msk [vmem:[#allocation3 + $0x1d0] sm:$0xff] %vm136_vm2, %v9285_v34  ;;  %196 = vst.msk [vmem:[#allocation3 + $0x1d8] sm:$0xff] %vm136_vm2, %v9285_v34  ;;  %1475 = vrot.lane.b32.xlu0 %v9705_v42, %s9287_s17 }
  0x23   :  { %197 = vst.msk [vmem:[#allocation3 + $0x1e0] sm:$0xff] %vm136_vm2, %v9285_v34  ;;  %198 = vst.msk [vmem:[#allocation3 + $0x1e8] sm:$0xff] %vm136_vm2, %v9285_v34 }
  0x24   :  { %199 = vst.msk [vmem:[#allocation3 + $0x1f0] sm:$0xff] %vm136_vm2, %v9285_v34  ;;  %200 = vst.msk [vmem:[#allocation3 + $0x1f8] sm:$0xff] %vm136_vm2, %v9285_v34 }
  0x25   :  { %3657 = vst [vmem:[#allocation2] sm:$0xff] %v9285_v34  ;;  %3658 = vst [vmem:[#allocation2 + $0x8] sm:$0xff] %v9285_v34  ;;  %1740 = vrot.lane.b32.xlu1 %v9423_v31, %s9288_s20 }
  0x26   :  { %3659 = vst [vmem:[#allocation2 + $0x10] sm:$0x3] %v9285_v34  ;;  %3660 = vst [vmem:[#allocation2 + $0x1b0] sm:$0xff] %v9285_v34  ;;  %1738 = vrot.lane.b32.xlu0 %v9426_v32, %s9288_s20 }
  0x27   :  { %3662 = vst [vmem:[#allocation2 + $0x1c0] sm:$0x3] %v9285_v34  ;;  %3664 = vst [vmem:[#allocation2 + $0x198] sm:$0xff] %v9285_v34 }
  0x28   :  { %3666 = vst [vmem:[#allocation2 + $0x1a8] sm:$0x3] %v9285_v34  ;;  %3667 = vst [vmem:[#allocation2 + $0x348] sm:$0xff] %v9285_v34 }
  0x29   :  { %3669 = vst [vmem:[#allocation2 + $0x358] sm:$0x3] %v9285_v34  ;;  %3671 = vst [vmem:[#allocation2 + $0x18] sm:$0x1] %v9285_v34  ;;  %1744 = vrot.lane.b32.xlu1 %v795_v48, %s9288_s20 }
  0x2a   :  { %3672 = vst [vmem:[#allocation2 + $0x30] sm:$0x1] %v9285_v34  ;;  %3673 = vst [vmem:[#allocation2 + $0x48] sm:$0x1] %v9285_v34  ;;  %1742 = vrot.lane.b32.xlu0 %v793_v49, %s9288_s20 }
  0x2b   :  { %3674 = vst [vmem:[#allocation2 + $0x60] sm:$0x1] %v9285_v34  ;;  %3675 = vst [vmem:[#allocation2 + $0x78] sm:$0x1] %v9285_v34 }
  0x2c   :  { %3676 = vst [vmem:[#allocation2 + $0x90] sm:$0x1] %v9285_v34  ;;  %3677 = vst [vmem:[#allocation2 + $0xa8] sm:$0x1] %v9285_v34 }
  0x2d   :  { %3678 = vst [vmem:[#allocation2 + $0xc0] sm:$0x1] %v9285_v34  ;;  %3679 = vst [vmem:[#allocation2 + $0xd8] sm:$0x1] %v9285_v34  ;;  %2001 = vrot.lane.b32.xlu1 %v9389_v24, %s9289_s25 }
  0x2e   :  { %3680 = vst [vmem:[#allocation2 + $0xf0] sm:$0x1] %v9285_v34  ;;  %3681 = vst [vmem:[#allocation2 + $0x108] sm:$0x1] %v9285_v34  ;;  %1999 = vrot.lane.b32.xlu0 %v9394_v25, %s9289_s25 }
  0x2f   :  { %3682 = vst [vmem:[#allocation2 + $0x120] sm:$0x1] %v9285_v34  ;;  %3683 = vst [vmem:[#allocation2 + $0x138] sm:$0x1] %v9285_v34 }
  0x30   :  { %3684 = vst [vmem:[#allocation2 + $0x150] sm:$0x1] %v9285_v34  ;;  %3685 = vst [vmem:[#allocation2 + $0x168] sm:$0x1] %v9285_v34 }
  0x31   :  { %3686 = vst [vmem:[#allocation2 + $0x180] sm:$0x1] %v9285_v34  ;;  %3689 = vst [vmem:[#allocation2 + $0x1c8] sm:$0x1] %v9285_v34  ;;  %2005 = vrot.lane.b32.xlu1 %v9399_v26, %s9289_s25 }
  0x32   :  { %3690 = vst [vmem:[#allocation2 + $0x1e0] sm:$0x1] %v9285_v34  ;;  %3691 = vst [vmem:[#allocation2 + $0x1f8] sm:$0x1] %v9285_v34  ;;  %2003 = vrot.lane.b32.xlu0 %v9404_v27, %s9289_s25 }
  0x33   :  { %3692 = vst [vmem:[#allocation2 + $0x210] sm:$0x1] %v9285_v34  ;;  %3693 = vst [vmem:[#allocation2 + $0x228] sm:$0x1] %v9285_v34 }
  0x34   :  { %3694 = vst [vmem:[#allocation2 + $0x240] sm:$0x1] %v9285_v34  ;;  %3695 = vst [vmem:[#allocation2 + $0x258] sm:$0x1] %v9285_v34 }
  0x35   :  { %3696 = vst [vmem:[#allocation2 + $0x270] sm:$0x1] %v9285_v34  ;;  %3697 = vst [vmem:[#allocation2 + $0x288] sm:$0x1] %v9285_v34  ;;  %2270 = vrot.lane.b32.xlu1 %v9702_v41, %s9290_s16 }
  0x36   :  { %3698 = vst [vmem:[#allocation2 + $0x2a0] sm:$0x1] %v9285_v34  ;;  %3699 = vst [vmem:[#allocation2 + $0x2b8] sm:$0x1] %v9285_v34  ;;  %2268 = vrot.lane.b32.xlu0 %v9705_v42, %s9290_s16 }
  0x37   :  { %3700 = vst [vmem:[#allocation2 + $0x2d0] sm:$0x1] %v9285_v34  ;;  %3701 = vst [vmem:[#allocation2 + $0x2e8] sm:$0x1] %v9285_v34 }
  0x38   :  { %3702 = vst [vmem:[#allocation2 + $0x300] sm:$0x1] %v9285_v34  ;;  %3703 = vst [vmem:[#allocation2 + $0x318] sm:$0x1] %v9285_v34 }
  0x39   :  { %3704 = vst [vmem:[#allocation2 + $0x330] sm:$0x1] %v9285_v34  ;;  %3707 = vst [vmem:[#allocation2 + $0x29] sm:$0x1] %v9285_v34  ;;  %2274 = vrot.lane.b32.xlu1 %v382_v60, %s9290_s16 }
  0x3a   :  { %3708 = vst [vmem:[#allocation2 + $0x41] sm:$0x1] %v9285_v34  ;;  %3709 = vst [vmem:[#allocation2 + $0x59] sm:$0x1] %v9285_v34  ;;  %2272 = vrot.lane.b32.xlu0 %v380_v61, %s9290_s16 }
  0x3b   :  { %3710 = vst [vmem:[#allocation2 + $0x71] sm:$0x1] %v9285_v34  ;;  %3711 = vst [vmem:[#allocation2 + $0x89] sm:$0x1] %v9285_v34 }
  0x3c   :  { %3712 = vst [vmem:[#allocation2 + $0xa1] sm:$0x1] %v9285_v34  ;;  %3713 = vst [vmem:[#allocation2 + $0xb9] sm:$0x1] %v9285_v34 }
  0x3d   :  { %3714 = vst [vmem:[#allocation2 + $0xd1] sm:$0x1] %v9285_v34  ;;  %3715 = vst [vmem:[#allocation2 + $0xe9] sm:$0x1] %v9285_v34  ;;  %2537 = vrot.lane.b32.xlu1 %v795_v48, %s9291_s23 }
  0x3e   :  { %3716 = vst [vmem:[#allocation2 + $0x101] sm:$0x1] %v9285_v34  ;;  %3717 = vst [vmem:[#allocation2 + $0x119] sm:$0x1] %v9285_v34  ;;  %2535 = vrot.lane.b32.xlu0 %v793_v49, %s9291_s23 }
  0x3f   :  { %3718 = vst [vmem:[#allocation2 + $0x131] sm:$0x1] %v9285_v34  ;;  %3719 = vst [vmem:[#allocation2 + $0x149] sm:$0x1] %v9285_v34 }
  0x40   :  { %3720 = vst [vmem:[#allocation2 + $0x161] sm:$0x1] %v9285_v34  ;;  %3721 = vst [vmem:[#allocation2 + $0x179] sm:$0x1] %v9285_v34 }
  0x41   :  { %3722 = vst [vmem:[#allocation2 + $0x191] sm:$0x1] %v9285_v34  ;;  %3725 = vst [vmem:[#allocation2 + $0x1d9] sm:$0x1] %v9285_v34  ;;  %533 = vrot.lane.b32.xlu1 %v9702_v41, %s9283_s13 }
  0x42   :  { %3726 = vst [vmem:[#allocation2 + $0x1f1] sm:$0x1] %v9285_v34  ;;  %3727 = vst [vmem:[#allocation2 + $0x209] sm:$0x1] %v9285_v34  ;;  %531 = vrot.lane.b32.xlu0 %v9705_v42, %s9283_s13 }
  0x43   :  { %3728 = vst [vmem:[#allocation2 + $0x221] sm:$0x1] %v9285_v34  ;;  %3729 = vst [vmem:[#allocation2 + $0x239] sm:$0x1] %v9285_v34 }
  0x44   :  { %3730 = vst [vmem:[#allocation2 + $0x251] sm:$0x1] %v9285_v34  ;;  %3731 = vst [vmem:[#allocation2 + $0x269] sm:$0x1] %v9285_v34 }
  0x45   :  { %3732 = vst [vmem:[#allocation2 + $0x281] sm:$0x1] %v9285_v34  ;;  %3733 = vst [vmem:[#allocation2 + $0x299] sm:$0x1] %v9285_v34  ;;  %2541 = vrot.lane.b32.xlu1 %v800_v3, %s9291_s23 }
  0x46   :  { %3734 = vst [vmem:[#allocation2 + $0x2b1] sm:$0x1] %v9285_v34  ;;  %3735 = vst [vmem:[#allocation2 + $0x2c9] sm:$0x1] %v9285_v34 }
  0x47   :  { %3736 = vst [vmem:[#allocation2 + $0x2e1] sm:$0x1] %v9285_v34  ;;  %3737 = vst [vmem:[#allocation2 + $0x2f9] sm:$0x1] %v9285_v34 }
  0x48   :  { %3738 = vst [vmem:[#allocation2 + $0x311] sm:$0x1] %v9285_v34  ;;  %3739 = vst [vmem:[#allocation2 + $0x329] sm:$0x1] %v9285_v34 }
  0x49   :  { %3740 = vst [vmem:[#allocation2 + $0x341] sm:$0x1] %v9285_v34  ;;  %204 = vst.msk [vmem:[#allocation3 + $0x10] sm:$0xff] %vm201_vm3, %v9338_v0  ;;  %v9174_v0 = vld [vmem:[%s15877_s1 + $0x30] sm:$0xff]   ;;  %537 = vrot.lane.b32.xlu1 %v382_v60, %s9283_s13 }
  0x4a   :  { %202 = vst.msk [vmem:[#allocation3] sm:$0xff] %vm201_vm3, %v9348_v2  ;;  %203 = vst.msk [vmem:[#allocation3 + $0x8] sm:$0xff] %vm201_vm3, %v9355_v5  ;;  %8656 = vmatprep.subr.bf16.mxu0 %v9174_v0  ;;  %v9175_v2 = vld [vmem:[%s15877_s1 + $0x38] sm:$0xff]  }
  0x4b   :  { %205 = vst.msk [vmem:[#allocation3 + $0x18] sm:$0xff] %vm201_vm3, %v9343_v1  ;;  %206 = vst.msk [vmem:[#allocation3 + $0x20] sm:$0xff] %vm201_vm3, %v9394_v25  ;;  %8657 = vmatpush3.bf16.msra.mxu0 %v9174_v0  ;;  %v796_v1 = vrot.slane %v9404_v27, 2 }
  0x4c   :  { %207 = vst.msk [vmem:[#allocation3 + $0x28] sm:$0xff] %vm201_vm3, %v9389_v24  ;;  %208 = vst.msk [vmem:[#allocation3 + $0x30] sm:$0xff] %vm201_vm3, %v9404_v27  ;;  %8658 = vmatprep.subr.bf16.mxu0 %v9175_v2 }
  0x4d   :  { %209 = vst.msk [vmem:[#allocation3 + $0x38] sm:$0xff] %vm201_vm3, %v9399_v26  ;;  %210 = vst.msk [vmem:[#allocation3 + $0x40] sm:$0xff] %vm201_vm3, %v9414_v29  ;;  %v798_v4 = vsel %vm780_vm1, %v796_v1, %v797_v62 }
  0x4e   :  { %211 = vst.msk [vmem:[#allocation3 + $0x48] sm:$0xff] %vm201_vm3, %v9409_v28  ;;  %212 = vst.msk [vmem:[#allocation3 + $0x50] sm:$0xff] %vm201_vm3, %v9431_v33  ;;  %2539 = vrot.lane.b32.xlu0 %v798_v4, %s9291_s23 }
  0x4f   :  { %213 = vst.msk [vmem:[#allocation3 + $0x58] sm:$0xff] %vm201_vm3, %v9419_v30  ;;  %3670 = vst [vmem:[#allocation2] sm:$0x1] %v9285_v34  ;;  %8659 = vmatpush3.bf16.msra.mxu0 %v9175_v2 }
  0x50   :  { %3687 = vst [vmem:[#allocation2 + $0x198] sm:$0x1] %v9285_v34  ;;  %3688 = vst [vmem:[#allocation2 + $0x1b0] sm:$0x1] %v9285_v34 }
  0x51   :  { %3705 = vst [vmem:[#allocation2 + $0x348] sm:$0x1] %v9285_v34  ;;  %3706 = vst [vmem:[#allocation2 + $0x11] sm:$0x1] %v9285_v34 }
  0x52   :  { %3723 = vst [vmem:[#allocation2 + $0x1a9] sm:$0x1] %v9285_v34  ;;  %3724 = vst [vmem:[#allocation2 + $0x1c1] sm:$0x1] %v9285_v34  ;;  %535 = vrot.lane.b32.xlu0 %v380_v61, %s9283_s13 }
  0x53   :  { %3741 = vst [vmem:[#allocation2 + $0x359] sm:$0x1] %v9285_v34  ;;  %215 = vst.msk [vmem:[#allocation3 + $0x68] sm:$0xff] %vm201_vm3, %v9684_v39 }
  0x54   :  { %214 = vst.msk [vmem:[#allocation3 + $0x60] sm:$0xff] %vm201_vm3, %v9689_v40  ;;  %217 = vst.msk [vmem:[#allocation3 + $0x78] sm:$0xff] %vm201_vm3, %v9747_v56 }
  0x55   :  { %216 = vst.msk [vmem:[#allocation3 + $0x70] sm:$0xff] %vm201_vm3, %v9752_v57 }
  0x56   :  { %12 = vsyncpa [#allocation6], 0  ;;  %951 = vrot.lane.b32.xlu1 %v795_v48, %s9284_s14  ;;  %949 = vrot.lane.b32.xlu0 %v793_v49, %s9284_s14  ;;  %v42_v5 = vld [vmem:[%s15876_s0 + $0x70] sm:$0x3]  ;;  %v9810_v6 = vld [vmem:[%s15876_s0 + $0xc8] sm:$0xff]  ;;  %v384_v8 = vrot.slane %v9409_v28, 1 }
  0x57   :  { %v9815_v7 = vld [vmem:[%s15876_s0 + $0xc0] sm:$0xff]  ;;  %v386_v9 = vrot.slane %v42_v5, 1  ;;  %219 = vst.msk [vmem:[#allocation3 + $0x88] sm:$0xff] %vm201_vm3, %v9810_v6  ;;  %v383_v10 = vrot.slane %v9414_v29, 1  ;;  %v802_v13 = vrot.slane %v9409_v28, 2  ;;  %v804_v14 = vrot.slane %v42_v5, 2 }
  0x58   :  { %218 = vst.msk [vmem:[#allocation3 + $0x80] sm:$0xff] %vm201_vm3, %v9815_v7  ;;  %v801_v15 = vrot.slane %v9414_v29, 2  ;;  %v45_v18 = vld [vmem:[%s15876_s0 + $0x88] sm:$0x3]  ;;  %v9851_v19 = vld [vmem:[%s15876_s0 + $0xe0] sm:$0xff]  ;;  %v9856_v20 = vld [vmem:[%s15876_s0 + $0xd8] sm:$0xff] }
  0x59   :  { %v387_v11 = vsel %vm362_vm0, %v384_v8, %v386_v9  ;;  %v385_v12 = vsel %vm362_vm0, %v383_v10, %v384_v8  ;;  %v805_v16 = vsel %vm780_vm1, %v802_v13, %v804_v14  ;;  %v389_v21 = vrot.slane %v9419_v30, 1  ;;  %221 = vst.msk [vmem:[#allocation3 + $0x98] sm:$0xff] %vm201_vm3, %v9851_v19  ;;  %220 = vst.msk [vmem:[#allocation3 + $0x90] sm:$0xff] %vm201_vm3, %v9856_v20  ;;  %v48_v52 = vld [vmem:[%s15876_s0 + $0xa0] sm:$0x3] }
  0x5a   :  { %955 = vrot.lane.b32.xlu1 %v800_v3, %s9284_s14  ;;  %953 = vrot.lane.b32.xlu0 %v798_v4, %s9284_s14  ;;  %v803_v17 = vsel %vm780_vm1, %v801_v15, %v802_v13  ;;  %v391_v22 = vrot.slane %v45_v18, 1  ;;  %v388_v23 = vrot.slane %v9431_v33, 1  ;;  %vm715_vm4 = vcmask 64544   ;;  %v51_v15 = vld [vmem:[%s15876_s0 + $0xb8] sm:$0x3] }
  0x5b   :  { %vm1133_vm5 = vcmask 97344   ;;  %v807_v31 = vrot.slane %v9419_v30, 2  ;;  %v809_v32 = vrot.slane %v45_v18, 2  ;;  %v806_v35 = vrot.slane %v9431_v33, 2 }
  0x5c   :  { %v9869_v24 = vsel %vm362_vm0, %v389_v21, %v391_v22  ;;  %vm1394_vm6 = vcmask 130144   ;;  %vm1663_vm7 = vcmask 162944   ;;  %vm1930_vm8 = vcmask 195744  }
  0x5d   :  { %v9891_v37 = vsel %vm780_vm1, %v807_v31, %v809_v32  ;;  %v9894_v41 = vsel %vm780_vm1, %v806_v35, %v807_v31  ;;  %v394_v54 = vrot.slane %v9684_v39, 1  ;;  %v396_v55 = vrot.slane %v48_v52, 1 }
  0x5e   :  { %1212 = vrot.lane.b32.xlu1 %v9399_v26, %s9286_s10  ;;  %1210 = vrot.lane.b32.xlu0 %v9404_v27, %s9286_s10  ;;  %v9872_v26 = vsel %vm362_vm0, %v388_v23, %v389_v21  ;;  %v393_v59 = vrot.slane %v9689_v40, 1  ;;  %vm2191_vm9 = vcmask 228544   ;;  %v812_v1 = vrot.slane %v9684_v39, 2 }
  0x5f   :  { %v814_v2 = vrot.slane %v48_v52, 2  ;;  %vm2460_vm10 = vcmask 261344   ;;  %vm2727_vm11 = vcmask 294144   ;;  %v401_v18 = vrot.slane %v51_v15, 1 }
  0x60   :  { %v9959_v63 = vsel %vm362_vm0, %v393_v59, %v394_v54  ;;  %v398_v22 = vrot.slane %v9752_v57, 1  ;;  %v817_v35 = vrot.slane %v9747_v56, 2 }
  0x61   :  { %v9976_v8 = vsel %vm780_vm1, %v812_v1, %v814_v2 }
  0x62   :  { %1216 = vrot.lane.b32.xlu1 %v9409_v28, %s9286_s10  ;;  %1214 = vrot.lane.b32.xlu0 %v9414_v29, %s9286_s10 }
  0x66   :  { %1481 = vrot.lane.b32.xlu1 %v382_v60, %s9287_s17  ;;  %1479 = vrot.lane.b32.xlu0 %v380_v61, %s9287_s17  ;;  %v9956_v61 = vsel %vm362_vm0, %v394_v54, %v396_v55 }
  0x6a   :  { %1485 = vrot.lane.b32.xlu1 %v387_v11, %s9287_s17  ;;  %1483 = vrot.lane.b32.xlu0 %v385_v12, %s9287_s17 }
  0x6e   :  { %1748 = vrot.lane.b32.xlu1 %v800_v3, %s9288_s20  ;;  %1746 = vrot.lane.b32.xlu0 %v798_v4, %s9288_s20  ;;  %v811_v4 = vrot.slane %v9689_v40, 2 }
  0x70   :  { %v9979_v10 = vsel %vm780_vm1, %v811_v4, %v812_v1  ;;  %v403_v1 = vrot.slane %v9815_v7, 1 }
  0x72   :  { %1752 = vrot.lane.b32.xlu1 %v805_v16, %s9288_s20  ;;  %1750 = vrot.lane.b32.xlu0 %v803_v17, %s9288_s20 }
  0x76   :  { %2009 = vrot.lane.b32.xlu1 %v9409_v28, %s9289_s25  ;;  %2007 = vrot.lane.b32.xlu0 %v9414_v29, %s9289_s25 }
  0x77   :  { %v528_v25 = vpop.permute.xlu1 %527 }
  0x78   :  { %718 = vst.msk [vmem:[#allocation3 + $0x10] sm:$0xff] %vm715_vm4, %v528_v25  ;;  %v524_v27 = vpop.permute.xlu0 %523 }
  0x79   :  { %716 = vst.msk [vmem:[#allocation3] sm:$0xff] %vm715_vm4, %v524_v27 }
  0x7a   :  { %2013 = vrot.lane.b32.xlu1 %v9419_v30, %s9289_s25  ;;  %2011 = vrot.lane.b32.xlu0 %v9431_v33, %s9289_s25 }
  0x7b   :  { %v530_v28 = vpop.permute.xlu1 %529 }
  0x7c   :  { %719 = vst.msk [vmem:[#allocation3 + $0x18] sm:$0xff] %vm715_vm4, %v530_v28  ;;  %v526_v29 = vpop.permute.xlu0 %525 }
  0x7d   :  { %717 = vst.msk [vmem:[#allocation3 + $0x8] sm:$0xff] %vm715_vm4, %v526_v29 }
  0x7e   :  { %2278 = vrot.lane.b32.xlu1 %v387_v11, %s9290_s16  ;;  %2276 = vrot.lane.b32.xlu0 %v385_v12, %s9290_s16 }
  0x7f   :  { %v944_v34 = vpop.permute.xlu1 %943 }
  0x80   :  { %1135 = vst.msk [vmem:[#allocation3 + $0x8] sm:$0xff] %vm1133_vm5, %v944_v34  ;;  %v942_v36 = vpop.permute.xlu0 %941 }
  0x81   :  { %1134 = vst.msk [vmem:[#allocation3] sm:$0xff] %vm1133_vm5, %v942_v36  ;;  %v819_v36 = vrot.slane %v51_v15, 2 }
  0x82   :  { %2282 = vrot.lane.b32.xlu1 %v9869_v24, %s9290_s16  ;;  %2280 = vrot.lane.b32.xlu0 %v9872_v26, %s9290_s16 }
  0x83   :  { %v948_v38 = vpop.permute.xlu1 %947 }
  0x84   :  { %1137 = vst.msk [vmem:[#allocation3 + $0x18] sm:$0xff] %vm1133_vm5, %v948_v38  ;;  %v946_v42 = vpop.permute.xlu0 %945 }
  0x85   :  { %1136 = vst.msk [vmem:[#allocation3 + $0x10] sm:$0xff] %vm1133_vm5, %v946_v42 }
  0x86   :  { %2545 = vrot.lane.b32.xlu1 %v805_v16, %s9291_s23  ;;  %2543 = vrot.lane.b32.xlu0 %v803_v17, %s9291_s23 }
  0x87   :  { %v1205_v43 = vpop.permute.xlu1 %1204 }
  0x88   :  { %1396 = vst.msk [vmem:[#allocation3 + $0x8] sm:$0xff] %vm1394_vm6, %v1205_v43  ;;  %v1203_v44 = vpop.permute.xlu0 %1202 }
  0x89   :  { %1395 = vst.msk [vmem:[#allocation3] sm:$0xff] %vm1394_vm6, %v1203_v44 }
  0x8a   :  { %541 = vrot.lane.b32.xlu1 %v387_v11, %s9283_s13  ;;  %539 = vrot.lane.b32.xlu0 %v385_v12, %s9283_s13 }
  0x8b   :  { %v1209_v45 = vpop.permute.xlu1 %1208 }
  0x8c   :  { %1398 = vst.msk [vmem:[#allocation3 + $0x18] sm:$0xff] %vm1394_vm6, %v1209_v45  ;;  %v1207_v46 = vpop.permute.xlu0 %1206  ;;  %v10051_v45 = vsel %vm780_vm1, %v817_v35, %v819_v36 }
  0x8d   :  { %1397 = vst.msk [vmem:[#allocation3 + $0x10] sm:$0xff] %vm1394_vm6, %v1207_v46 }
  0x8e   :  { %2549 = vrot.lane.b32.xlu1 %v9891_v37, %s9291_s23  ;;  %2547 = vrot.lane.b32.xlu0 %v9894_v41, %s9291_s23 }
  0x8f   :  { %v1474_v47 = vpop.permute.xlu1 %1473 }
  0x90   :  { %1665 = vst.msk [vmem:[#allocation3 + $0x8] sm:$0xff] %vm1663_vm7, %v1474_v47  ;;  %v1472_v48 = vpop.permute.xlu0 %1471 }
  0x91   :  { %1664 = vst.msk [vmem:[#allocation3] sm:$0xff] %vm1663_vm7, %v1472_v48 }
  0x92   :  { %545 = vrot.lane.b32.xlu1 %v9869_v24, %s9283_s13  ;;  %543 = vrot.lane.b32.xlu0 %v9872_v26, %s9283_s13 }
  0x93   :  { %v1478_v49 = vpop.permute.xlu1 %1477 }
  0x94   :  { %1667 = vst.msk [vmem:[#allocation3 + $0x18] sm:$0xff] %vm1663_vm7, %v1478_v49  ;;  %v1476_v50 = vpop.permute.xlu0 %1475 }
  0x95   :  { %1666 = vst.msk [vmem:[#allocation3 + $0x10] sm:$0xff] %vm1663_vm7, %v1476_v50 }
  0x96   :  { %959 = vrot.lane.b32.xlu1 %v805_v16, %s9284_s14  ;;  %957 = vrot.lane.b32.xlu0 %v803_v17, %s9284_s14  ;;  %v399_v17 = vrot.slane %v9747_v56, 1 }
  0x97   :  { %v1741_v51 = vpop.permute.xlu1 %1740 }
  0x98   :  { %1932 = vst.msk [vmem:[#allocation3 + $0x8] sm:$0xff] %vm1930_vm8, %v1741_v51  ;;  %v1739_v53 = vpop.permute.xlu0 %1738 }
  0x99   :  { %1931 = vst.msk [vmem:[#allocation3] sm:$0xff] %vm1930_vm8, %v1739_v53 }
  0x9a   :  { %963 = vrot.lane.b32.xlu1 %v9891_v37, %s9284_s14  ;;  %961 = vrot.lane.b32.xlu0 %v9894_v41, %s9284_s14 }
  0x9b   :  { %v1745_v58 = vpop.permute.xlu1 %1744 }
  0x9c   :  { %1934 = vst.msk [vmem:[#allocation3 + $0x18] sm:$0xff] %vm1930_vm8, %v1745_v58  ;;  %v1743_v60 = vpop.permute.xlu0 %1742 }
  0x9d   :  { %1933 = vst.msk [vmem:[#allocation3 + $0x10] sm:$0xff] %vm1930_vm8, %v1743_v60  ;;  %v54_v60 = vld [vmem:[%s15876_s0 + $0xd0] sm:$0x3] }
  0x9e   :  { %1220 = vrot.lane.b32.xlu1 %v9419_v30, %s9286_s10  ;;  %1218 = vrot.lane.b32.xlu0 %v9431_v33, %s9286_s10  ;;  %v9934_v30 = vld [vmem:[%s15876_s0 + $0xf8] sm:$0xff]  ;;  %v9939_v33 = vld [vmem:[%s15876_s0 + $0xf0] sm:$0xff] }
  0x9f   :  { %223 = vst.msk [vmem:[#allocation3 + $0xa8] sm:$0xff] %vm201_vm3, %v9934_v30  ;;  %222 = vst.msk [vmem:[#allocation3 + $0xa0] sm:$0xff] %vm201_vm3, %v9939_v33  ;;  %v2002_v62 = vpop.permute.xlu1 %2001 }
  0xa0   :  { %2193 = vst.msk [vmem:[#allocation3 + $0x8] sm:$0xff] %vm2191_vm9, %v2002_v62  ;;  %v2000_v0 = vpop.permute.xlu0 %1999  ;;  %v404_v62 = vrot.slane %v9810_v6, 1 }
  0xa1   :  { %2192 = vst.msk [vmem:[#allocation3] sm:$0xff] %vm2191_vm9, %v2000_v0 }
  0xa2   :  { %1224 = vrot.lane.b32.xlu1 %v9684_v39, %s9286_s10  ;;  %1222 = vrot.lane.b32.xlu0 %v9689_v40, %s9286_s10 }
  0xa3   :  { %v2006_v3 = vpop.permute.xlu1 %2005 }
  0xa4   :  { %2195 = vst.msk [vmem:[#allocation3 + $0x18] sm:$0xff] %vm2191_vm9, %v2006_v3  ;;  %v2004_v5 = vpop.permute.xlu0 %2003 }
  0xa5   :  { %2194 = vst.msk [vmem:[#allocation3 + $0x10] sm:$0xff] %vm2191_vm9, %v2004_v5  ;;  %v10121_v5 = vsel %vm362_vm0, %v403_v1, %v404_v62 }
  0xa6   :  { %1489 = vrot.lane.b32.xlu1 %v9869_v24, %s9287_s17  ;;  %1487 = vrot.lane.b32.xlu0 %v9872_v26, %s9287_s17  ;;  %v10025_v24 = vsel %vm362_vm0, %v399_v17, %v401_v18  ;;  %v10028_v26 = vsel %vm362_vm0, %v398_v22, %v399_v17 }
  0xa7   :  { %v2271_v9 = vpop.permute.xlu1 %2270 }
  0xa8   :  { %2462 = vst.msk [vmem:[#allocation3 + $0x8] sm:$0xff] %vm2460_vm10, %v2271_v9  ;;  %v2269_v11 = vpop.permute.xlu0 %2268  ;;  %v822_v9 = vrot.slane %v9810_v6, 2 }
  0xa9   :  { %2461 = vst.msk [vmem:[#allocation3] sm:$0xff] %vm2460_vm10, %v2269_v11 }
  0xaa   :  { %1493 = vrot.lane.b32.xlu1 %v9956_v61, %s9287_s17  ;;  %1491 = vrot.lane.b32.xlu0 %v9959_v63, %s9287_s17 }
  0xab   :  { %v2275_v12 = vpop.permute.xlu1 %2274 }
  0xac   :  { %2464 = vst.msk [vmem:[#allocation3 + $0x18] sm:$0xff] %vm2460_vm10, %v2275_v12  ;;  %v2273_v13 = vpop.permute.xlu0 %2272  ;;  %v821_v12 = vrot.slane %v9815_v7, 2 }
  0xad   :  { %2463 = vst.msk [vmem:[#allocation3 + $0x10] sm:$0xff] %vm2460_vm10, %v2273_v13 }
  0xae   :  { %1756 = vrot.lane.b32.xlu1 %v9891_v37, %s9288_s20  ;;  %1754 = vrot.lane.b32.xlu0 %v9894_v41, %s9288_s20  ;;  %v816_v41 = vrot.slane %v9752_v57, 2 }
  0xaf   :  { %v2538_v14 = vpop.permute.xlu1 %2537 }
  0xb0   :  { %2729 = vst.msk [vmem:[#allocation3 + $0x8] sm:$0xff] %vm2727_vm11, %v2538_v14  ;;  %v2536_v16 = vpop.permute.xlu0 %2535  ;;  %v10054_v47 = vsel %vm780_vm1, %v816_v41, %v817_v35 }
  0xb1   :  { %2728 = vst.msk [vmem:[#allocation3] sm:$0xff] %vm2727_vm11, %v2536_v16  ;;  %v10141_v16 = vsel %vm780_vm1, %v821_v12, %v822_v9 }
  0xb2   :  { %1760 = vrot.lane.b32.xlu1 %v9976_v8, %s9288_s20  ;;  %1758 = vrot.lane.b32.xlu0 %v9979_v10, %s9288_s20 }
  0xb3   :  { %v534_v21 = vpop.permute.xlu1 %533 }
  0xb4   :  { %721 = vst.msk [vmem:[#allocation3 + $0x28] sm:$0xff] %vm715_vm4, %v534_v21  ;;  %v532_v23 = vpop.permute.xlu0 %531 }
  0xb5   :  { %720 = vst.msk [vmem:[#allocation3 + $0x20] sm:$0xff] %vm715_vm4, %v532_v23  ;;  %v57_v23 = vld [vmem:[%s15876_s0 + $0xe8] sm:$0x3] }
  0xb6   :  { %2017 = vrot.lane.b32.xlu1 %v9684_v39, %s9289_s25  ;;  %2015 = vrot.lane.b32.xlu0 %v9689_v40, %s9289_s25  ;;  %v10003_v39 = vld [vmem:[%s15876_s0 + $0x110] sm:$0xff]  ;;  %v10008_v40 = vld [vmem:[%s15876_s0 + $0x108] sm:$0xff] }
  0xb7   :  { %225 = vst.msk [vmem:[#allocation3 + $0xb8] sm:$0xff] %vm201_vm3, %v10003_v39  ;;  %224 = vst.msk [vmem:[#allocation3 + $0xb0] sm:$0xff] %vm201_vm3, %v10008_v40  ;;  %v2542_v25 = vpop.permute.xlu1 %2541  ;;  %v2793_v27 = vld [vmem:[#allocation3 + $0x8] sm:$0xff] }
  0xb8   :  { %2731 = vst.msk [vmem:[#allocation3 + $0x18] sm:$0xff] %vm2727_vm11, %v2542_v25  ;;  %v2792_v29 = vld [vmem:[#allocation3] sm:$0xff]  ;;  %v409_v25 = vrot.slane %v9851_v19, 1 }
  0xb9   :  { %v2856_v31 = vpack.c.bf16 %v2793_v27, %v2792_v29 }
  0xba   :  { %2021 = vrot.lane.b32.xlu1 %v9747_v56, %s9289_s25  ;;  %2019 = vrot.lane.b32.xlu0 %v9752_v57, %s9289_s25 }
  0xbb   :  { %8660 = vmatprep.mubr.bf16.mxu0 %v2856_v31  ;;  %v538_v32 = vpop.permute.xlu1 %537 }
  0xbc   :  { %723 = vst.msk [vmem:[#allocation3 + $0x38] sm:$0xff] %vm715_vm4, %v538_v32 }
  0xbe   :  { %2286 = vrot.lane.b32.xlu1 %v9956_v61, %s9290_s16  ;;  %2284 = vrot.lane.b32.xlu0 %v9959_v63, %s9290_s16 }
  0xbf   :  { %v2795_v38 = vld [vmem:[#allocation3 + $0x18] sm:$0xff] }
  0xc0   :  { %v2540_v28 = vpop.permute.xlu0 %2539 }
  0xc1   :  { %2730 = vst.msk [vmem:[#allocation3 + $0x10] sm:$0xff] %vm2727_vm11, %v2540_v28  ;;  %v408_v28 = vrot.slane %v9856_v20, 1 }
  0xc2   :  { %2290 = vrot.lane.b32.xlu1 %v10025_v24, %s9290_s16  ;;  %2288 = vrot.lane.b32.xlu0 %v10028_v26, %s9290_s16 }
  0xc4   :  { %v536_v34 = vpop.permute.xlu0 %535 }
  0xc5   :  { %722 = vst.msk [vmem:[#allocation3 + $0x30] sm:$0xff] %vm715_vm4, %v536_v34  ;;  %v10190_v34 = vsel %vm362_vm0, %v408_v28, %v409_v25 }
  0xc6   :  { %2553 = vrot.lane.b32.xlu1 %v9976_v8, %s9291_s23  ;;  %2551 = vrot.lane.b32.xlu0 %v9979_v10, %s9291_s23 }
  0xc8   :  { %v952_v37 = vpop.permute.xlu1 %951  ;;  %v950_v42 = vpop.permute.xlu0 %949  ;;  %v2794_v43 = vld [vmem:[#allocation3 + $0x10] sm:$0xff] }
  0xc9   :  { %1139 = vst.msk [vmem:[#allocation3 + $0x28] sm:$0xff] %vm1133_vm5, %v952_v37  ;;  %1138 = vst.msk [vmem:[#allocation3 + $0x20] sm:$0xff] %vm1133_vm5, %v950_v42  ;;  %v2857_v44 = vpack.c.bf16 %v2795_v38, %v2794_v43  ;;  %v827_v43 = vrot.slane %v9851_v19, 2 }
  0xca   :  { %549 = vrot.lane.b32.xlu1 %v9956_v61, %s9283_s13  ;;  %547 = vrot.lane.b32.xlu0 %v9959_v63, %s9283_s13  ;;  %v406_v63 = vrot.slane %v54_v60, 1 }
  0xcb   :  { %8661 = vmatmul.mubr.bf16.vlgmr.msra.gmra.mrb[0].mxu0 %v2857_v44  ;;  %v829_v44 = vrot.slane %v57_v23, 2 }
  0xcc   :  { %v956_v46 = vpop.permute.xlu1 %955  ;;  %v954_v48 = vpop.permute.xlu0 %953  ;;  %v10118_v3 = vsel %vm362_vm0, %v404_v62, %v406_v63 }
  0xcd   :  { %1141 = vst.msk [vmem:[#allocation3 + $0x38] sm:$0xff] %vm1133_vm5, %v956_v46  ;;  %1140 = vst.msk [vmem:[#allocation3 + $0x30] sm:$0xff] %vm1133_vm5, %v954_v48 }
  0xce   :  { %2557 = vrot.lane.b32.xlu1 %v10051_v45, %s9291_s23  ;;  %2555 = vrot.lane.b32.xlu0 %v10054_v47, %s9291_s23 }
  0xd0   :  { %v1213_v49 = vpop.permute.xlu1 %1212  ;;  %v1211_v50 = vpop.permute.xlu0 %1210 }
  0xd1   :  { %1400 = vst.msk [vmem:[#allocation3 + $0x28] sm:$0xff] %vm1394_vm6, %v1213_v49  ;;  %1399 = vst.msk [vmem:[#allocation3 + $0x20] sm:$0xff] %vm1394_vm6, %v1211_v50 }
  0xd2   :  { %553 = vrot.lane.b32.xlu1 %v10025_v24, %s9283_s13  ;;  %551 = vrot.lane.b32.xlu0 %v10028_v26, %s9283_s13 }
  0xd4   :  { %v1217_v51 = vpop.permute.xlu1 %1216  ;;  %v1215_v52 = vpop.permute.xlu0 %1214 }
  0xd5   :  { %1402 = vst.msk [vmem:[#allocation3 + $0x38] sm:$0xff] %vm1394_vm6, %v1217_v51  ;;  %1401 = vst.msk [vmem:[#allocation3 + $0x30] sm:$0xff] %vm1394_vm6, %v1215_v52  ;;  %v10213_v51 = vsel %vm780_vm1, %v827_v43, %v829_v44 }
  0xd6   :  { %967 = vrot.lane.b32.xlu1 %v9976_v8, %s9284_s14  ;;  %965 = vrot.lane.b32.xlu0 %v9979_v10, %s9284_s14  ;;  %v824_v10 = vrot.slane %v54_v60, 2 }
  0xd8   :  { %v1482_v53 = vpop.permute.xlu1 %1481  ;;  %v1480_v54 = vpop.permute.xlu0 %1479  ;;  %v10138_v14 = vsel %vm780_vm1, %v822_v9, %v824_v10  ;;  %v413_v9 = vrot.slane %v9939_v33, 1 }
  0xd9   :  { %1669 = vst.msk [vmem:[#allocation3 + $0x28] sm:$0xff] %vm1663_vm7, %v1482_v53  ;;  %1668 = vst.msk [vmem:[#allocation3 + $0x20] sm:$0xff] %vm1663_vm7, %v1480_v54 }
  0xda   :  { %971 = vrot.lane.b32.xlu1 %v10051_v45, %s9284_s14  ;;  %969 = vrot.lane.b32.xlu0 %v10054_v47, %s9284_s14 }
  0xdc   :  { %v1486_v55 = vpop.permute.xlu1 %1485  ;;  %v1484_v58 = vpop.permute.xlu0 %1483 }
  0xdd   :  { %1671 = vst.msk [vmem:[#allocation3 + $0x38] sm:$0xff] %vm1663_vm7, %v1486_v55  ;;  %1670 = vst.msk [vmem:[#allocation3 + $0x30] sm:$0xff] %vm1663_vm7, %v1484_v58 }
  0xde   :  { %1228 = vrot.lane.b32.xlu1 %v9747_v56, %s9286_s10  ;;  %1226 = vrot.lane.b32.xlu0 %v9752_v57, %s9286_s10  ;;  %v10096_v56 = vld [vmem:[%s15876_s0 + $0x128] sm:$0xff]  ;;  %v10101_v57 = vld [vmem:[%s15876_s0 + $0x120] sm:$0xff] }
  0xdf   :  { %227 = vst.msk [vmem:[#allocation3 + $0xc8] sm:$0xff] %vm201_vm3, %v10096_v56  ;;  %226 = vst.msk [vmem:[#allocation3 + $0xc0] sm:$0xff] %vm201_vm3, %v10101_v57 }
  0xe0   :  { %v1749_v59 = vpop.permute.xlu1 %1748  ;;  %v1747_v61 = vpop.permute.xlu0 %1746 }
  0xe1   :  { %1936 = vst.msk [vmem:[#allocation3 + $0x28] sm:$0xff] %vm1930_vm8, %v1749_v59  ;;  %1935 = vst.msk [vmem:[#allocation3 + $0x20] sm:$0xff] %vm1930_vm8, %v1747_v61 }
  0xe2   :  { %1232 = vrot.lane.b32.xlu1 %v9810_v6, %s9286_s10  ;;  %1230 = vrot.lane.b32.xlu0 %v9815_v7, %s9286_s10 }
  0xe4   :  { %v1753_v0 = vpop.permute.xlu1 %1752  ;;  %v1751_v2 = vpop.permute.xlu0 %1750 }
  0xe5   :  { %1938 = vst.msk [vmem:[#allocation3 + $0x38] sm:$0xff] %vm1930_vm8, %v1753_v0  ;;  %1937 = vst.msk [vmem:[#allocation3 + $0x30] sm:$0xff] %vm1930_vm8, %v1751_v2  ;;  %v60_v2 = vld [vmem:[%s15876_s0 + $0x100] sm:$0x3] }
  0xe6   :  { %1497 = vrot.lane.b32.xlu1 %v10025_v24, %s9287_s17  ;;  %1495 = vrot.lane.b32.xlu0 %v10028_v26, %s9287_s17  ;;  %v411_v26 = vrot.slane %v57_v23, 1 }
  0xe8   :  { %v2010_v4 = vpop.permute.xlu1 %2009  ;;  %v2008_v8 = vpop.permute.xlu0 %2007  ;;  %v10187_v31 = vsel %vm362_vm0, %v409_v25, %v411_v26 }
  0xe9   :  { %2197 = vst.msk [vmem:[#allocation3 + $0x28] sm:$0xff] %vm2191_vm9, %v2010_v4  ;;  %2196 = vst.msk [vmem:[#allocation3 + $0x20] sm:$0xff] %vm2191_vm9, %v2008_v8  ;;  %v414_v4 = vrot.slane %v9934_v30, 1 }
  0xea   :  { %1501 = vrot.lane.b32.xlu1 %v10118_v3, %s9287_s17  ;;  %1499 = vrot.lane.b32.xlu0 %v10121_v5, %s9287_s17 }
  0xec   :  { %v2014_v11 = vpop.permute.xlu1 %2013  ;;  %v2012_v13 = vpop.permute.xlu0 %2011 }
  0xed   :  { %2199 = vst.msk [vmem:[#allocation3 + $0x38] sm:$0xff] %vm2191_vm9, %v2014_v11  ;;  %2198 = vst.msk [vmem:[#allocation3 + $0x30] sm:$0xff] %vm2191_vm9, %v2012_v13  ;;  %v10283_v13 = vsel %vm362_vm0, %v413_v9, %v414_v4 }
  0xee   :  { %1764 = vrot.lane.b32.xlu1 %v10051_v45, %s9288_s20  ;;  %1762 = vrot.lane.b32.xlu0 %v10054_v47, %s9288_s20  ;;  %v826_v47 = vrot.slane %v9856_v20, 2 }
  0xf0   :  { %v2279_v15 = vpop.permute.xlu1 %2278  ;;  %v2277_v17 = vpop.permute.xlu0 %2276  ;;  %v10216_v53 = vsel %vm780_vm1, %v826_v47, %v827_v43 }
  0xf1   :  { %2466 = vst.msk [vmem:[#allocation3 + $0x28] sm:$0xff] %vm2460_vm10, %v2279_v15  ;;  %2465 = vst.msk [vmem:[#allocation3 + $0x20] sm:$0xff] %vm2460_vm10, %v2277_v17  ;;  %v832_v15 = vrot.slane %v9934_v30, 2 }
  0xf2   :  { %1768 = vrot.lane.b32.xlu1 %v10138_v14, %s9288_s20  ;;  %1766 = vrot.lane.b32.xlu0 %v10141_v16, %s9288_s20 }
  0xf4   :  { %v2283_v18 = vpop.permute.xlu1 %2282  ;;  %v2281_v21 = vpop.permute.xlu0 %2280 }
  0xf5   :  { %2468 = vst.msk [vmem:[#allocation3 + $0x38] sm:$0xff] %vm2460_vm10, %v2283_v18  ;;  %2467 = vst.msk [vmem:[#allocation3 + $0x30] sm:$0xff] %vm2460_vm10, %v2281_v21  ;;  %v831_v18 = vrot.slane %v9939_v33, 2 }
  0xf6   :  { %2025 = vrot.lane.b32.xlu1 %v9810_v6, %s9289_s25  ;;  %2023 = vrot.lane.b32.xlu0 %v9815_v7, %s9289_s25  ;;  %v10165_v6 = vld [vmem:[%s15876_s0 + $0x140] sm:$0xff]  ;;  %v10170_v7 = vld [vmem:[%s15876_s0 + $0x138] sm:$0xff] }
  0xf7   :  { %229 = vst.msk [vmem:[#allocation3 + $0xd8] sm:$0xff] %vm201_vm3, %v10165_v6  ;;  %228 = vst.msk [vmem:[#allocation3 + $0xd0] sm:$0xff] %vm201_vm3, %v10170_v7 }
  0xf8   :  { %v2546_v22 = vpop.permute.xlu1 %2545  ;;  %v2544_v24 = vpop.permute.xlu0 %2543 }
  0xf9   :  { %2733 = vst.msk [vmem:[#allocation3 + $0x28] sm:$0xff] %vm2727_vm11, %v2546_v22  ;;  %2732 = vst.msk [vmem:[#allocation3 + $0x20] sm:$0xff] %vm2727_vm11, %v2544_v24  ;;  %v10303_v24 = vsel %vm780_vm1, %v831_v18, %v832_v15 }
  0xfa   :  { %2029 = vrot.lane.b32.xlu1 %v9851_v19, %s9289_s25  ;;  %2027 = vrot.lane.b32.xlu0 %v9856_v20, %s9289_s25 }
  0xfc   :  { %v542_v27 = vpop.permute.xlu1 %541  ;;  %v540_v29 = vpop.permute.xlu0 %539 }
  0xfd   :  { %725 = vst.msk [vmem:[#allocation3 + $0x48] sm:$0xff] %vm715_vm4, %v542_v27  ;;  %724 = vst.msk [vmem:[#allocation3 + $0x40] sm:$0xff] %vm715_vm4, %v540_v29  ;;  %v63_v29 = vld [vmem:[%s15876_s0 + $0x118] sm:$0x3] }
  0xfe   :  { %2294 = vrot.lane.b32.xlu1 %v10118_v3, %s9290_s16  ;;  %2292 = vrot.lane.b32.xlu0 %v10121_v5, %s9290_s16 }
 0x100   :  { %v2550_v32 = vpop.permute.xlu1 %2549  ;;  %v2797_v35 = vld [vmem:[#allocation3 + $0x28] sm:$0xff]  ;;  %v2548_v36 = vpop.permute.xlu0 %2547  ;;  %v2796_v37 = vld [vmem:[#allocation3 + $0x20] sm:$0xff] }
 0x101   :  { %2735 = vst.msk [vmem:[#allocation3 + $0x38] sm:$0xff] %vm2727_vm11, %v2550_v32  ;;  %2734 = vst.msk [vmem:[#allocation3 + $0x30] sm:$0xff] %vm2727_vm11, %v2548_v36  ;;  %v2858_v38 = vpack.c.bf16 %v2797_v35, %v2796_v37  ;;  %v419_v32 = vrot.slane %v10003_v39, 1  ;;  %v418_v36 = vrot.slane %v10008_v40, 1 }
 0x102   :  { %2298 = vrot.lane.b32.xlu1 %v10187_v31, %s9290_s16  ;;  %2296 = vrot.lane.b32.xlu0 %v10190_v34, %s9290_s16 }
 0x103   :  { %8664 = vmatprep.mubr.bf16.mxu0 %v2858_v38 }
 0x104   :  { %v546_v41 = vpop.permute.xlu1 %545  ;;  %v544_v42 = vpop.permute.xlu0 %543 }
 0x105   :  { %727 = vst.msk [vmem:[#allocation3 + $0x58] sm:$0xff] %vm715_vm4, %v546_v41  ;;  %726 = vst.msk [vmem:[#allocation3 + $0x50] sm:$0xff] %vm715_vm4, %v544_v42  ;;  %v10352_v42 = vsel %vm362_vm0, %v418_v36, %v419_v32 }
 0x106   :  { %2561 = vrot.lane.b32.xlu1 %v10138_v14, %s9291_s23  ;;  %2559 = vrot.lane.b32.xlu0 %v10141_v16, %s9291_s23 }
 0x108   :  { %v960_v45 = vpop.permute.xlu1 %959  ;;  %v2799_v46 = vld [vmem:[#allocation3 + $0x38] sm:$0xff]  ;;  %v958_v48 = vpop.permute.xlu0 %957  ;;  %v2798_v49 = vld [vmem:[#allocation3 + $0x30] sm:$0xff] }
 0x109   :  { %1143 = vst.msk [vmem:[#allocation3 + $0x48] sm:$0xff] %vm1133_vm5, %v960_v45  ;;  %1142 = vst.msk [vmem:[#allocation3 + $0x40] sm:$0xff] %vm1133_vm5, %v958_v48  ;;  %v2859_v50 = vpack.c.bf16 %v2799_v46, %v2798_v49  ;;  %v837_v49 = vrot.slane %v10003_v39, 2 }
 0x10a   :  { %557 = vrot.lane.b32.xlu1 %v10118_v3, %s9283_s13  ;;  %555 = vrot.lane.b32.xlu0 %v10121_v5, %s9283_s13  ;;  %v416_v5 = vrot.slane %v60_v2, 1 }
 0x10b   :  { %8665 = vmatmul.mubr.bf16.gmra.mrb[4].mxu0 %v2859_v50  ;;  %v839_v50 = vrot.slane %v63_v29, 2 }
 0x10c   :  { %v964_v52 = vpop.permute.xlu1 %963  ;;  %v962_v54 = vpop.permute.xlu0 %961  ;;  %v10280_v11 = vsel %vm362_vm0, %v414_v4, %v416_v5 }
 0x10d   :  { %1145 = vst.msk [vmem:[#allocation3 + $0x58] sm:$0xff] %vm1133_vm5, %v964_v52  ;;  %1144 = vst.msk [vmem:[#allocation3 + $0x50] sm:$0xff] %vm1133_vm5, %v962_v54 }
 0x10e   :  { %2565 = vrot.lane.b32.xlu1 %v10213_v51, %s9291_s23  ;;  %2563 = vrot.lane.b32.xlu0 %v10216_v53, %s9291_s23 }
 0x110   :  { %v1221_v55 = vpop.permute.xlu1 %1220  ;;  %v1219_v58 = vpop.permute.xlu0 %1218 }
 0x111   :  { %1404 = vst.msk [vmem:[#allocation3 + $0x48] sm:$0xff] %vm1394_vm6, %v1221_v55  ;;  %1403 = vst.msk [vmem:[#allocation3 + $0x40] sm:$0xff] %vm1394_vm6, %v1219_v58 }
 0x112   :  { %561 = vrot.lane.b32.xlu1 %v10187_v31, %s9283_s13  ;;  %559 = vrot.lane.b32.xlu0 %v10190_v34, %s9283_s13 }
 0x114   :  { %v1225_v59 = vpop.permute.xlu1 %1224  ;;  %v1223_v60 = vpop.permute.xlu0 %1222 }
 0x115   :  { %1406 = vst.msk [vmem:[#allocation3 + $0x58] sm:$0xff] %vm1394_vm6, %v1225_v59  ;;  %1405 = vst.msk [vmem:[#allocation3 + $0x50] sm:$0xff] %vm1394_vm6, %v1223_v60  ;;  %v10375_v59 = vsel %vm780_vm1, %v837_v49, %v839_v50 }
 0x116   :  { %975 = vrot.lane.b32.xlu1 %v10138_v14, %s9284_s14  ;;  %973 = vrot.lane.b32.xlu0 %v10141_v16, %s9284_s14  ;;  %v834_v16 = vrot.slane %v60_v2, 2 }
 0x118   :  { %v1490_v61 = vpop.permute.xlu1 %1489  ;;  %v1488_v62 = vpop.permute.xlu0 %1487  ;;  %v10300_v22 = vsel %vm780_vm1, %v832_v15, %v834_v16 }
 0x119   :  { %1673 = vst.msk [vmem:[#allocation3 + $0x48] sm:$0xff] %vm1663_vm7, %v1490_v61  ;;  %1672 = vst.msk [vmem:[#allocation3 + $0x40] sm:$0xff] %vm1663_vm7, %v1488_v62 }
 0x11a   :  { %979 = vrot.lane.b32.xlu1 %v10213_v51, %s9284_s14  ;;  %977 = vrot.lane.b32.xlu0 %v10216_v53, %s9284_s14 }
 0x11c   :  { %v1494_v63 = vpop.permute.xlu1 %1493  ;;  %v1492_v0 = vpop.permute.xlu0 %1491 }
 0x11d   :  { %1675 = vst.msk [vmem:[#allocation3 + $0x58] sm:$0xff] %vm1663_vm7, %v1494_v63  ;;  %1674 = vst.msk [vmem:[#allocation3 + $0x50] sm:$0xff] %vm1663_vm7, %v1492_v0 }
 0x11e   :  { %1236 = vrot.lane.b32.xlu1 %v9851_v19, %s9286_s10  ;;  %1234 = vrot.lane.b32.xlu0 %v9856_v20, %s9286_s10  ;;  %v10258_v19 = vld [vmem:[%s15876_s0 + $0x158] sm:$0xff]  ;;  %v10263_v20 = vld [vmem:[%s15876_s0 + $0x150] sm:$0xff] }
 0x11f   :  { %231 = vst.msk [vmem:[#allocation3 + $0xe8] sm:$0xff] %vm201_vm3, %v10258_v19  ;;  %230 = vst.msk [vmem:[#allocation3 + $0xe0] sm:$0xff] %vm201_vm3, %v10263_v20 }
 0x120   :  { %v1757_v1 = vpop.permute.xlu1 %1756  ;;  %v1755_v3 = vpop.permute.xlu0 %1754 }
 0x121   :  { %1940 = vst.msk [vmem:[#allocation3 + $0x48] sm:$0xff] %vm1930_vm8, %v1757_v1  ;;  %1939 = vst.msk [vmem:[#allocation3 + $0x40] sm:$0xff] %vm1930_vm8, %v1755_v3 }
 0x122   :  { %1240 = vrot.lane.b32.xlu1 %v9934_v30, %s9286_s10  ;;  %1238 = vrot.lane.b32.xlu0 %v9939_v33, %s9286_s10 }
 0x124   :  { %v1761_v8 = vpop.permute.xlu1 %1760  ;;  %v1759_v10 = vpop.permute.xlu0 %1758 }
 0x125   :  { %1942 = vst.msk [vmem:[#allocation3 + $0x58] sm:$0xff] %vm1930_vm8, %v1761_v8  ;;  %1941 = vst.msk [vmem:[#allocation3 + $0x50] sm:$0xff] %vm1930_vm8, %v1759_v10  ;;  %v66_v10 = vld [vmem:[%s15876_s0 + $0x130] sm:$0x3] }
 0x126   :  { %1505 = vrot.lane.b32.xlu1 %v10187_v31, %s9287_s17  ;;  %1503 = vrot.lane.b32.xlu0 %v10190_v34, %s9287_s17  ;;  %v421_v34 = vrot.slane %v63_v29, 1 }
 0x128   :  { %v2018_v12 = vpop.permute.xlu1 %2017  ;;  %v2016_v14 = vpop.permute.xlu0 %2015  ;;  %v10349_v38 = vsel %vm362_vm0, %v419_v32, %v421_v34 }
 0x129   :  { %2201 = vst.msk [vmem:[#allocation3 + $0x48] sm:$0xff] %vm2191_vm9, %v2018_v12  ;;  %2200 = vst.msk [vmem:[#allocation3 + $0x40] sm:$0xff] %vm2191_vm9, %v2016_v14  ;;  %v426_v12 = vrot.slane %v66_v10, 1 }
 0x12a   :  { %1509 = vrot.lane.b32.xlu1 %v10280_v11, %s9287_s17  ;;  %1507 = vrot.lane.b32.xlu0 %v10283_v13, %s9287_s17 }
 0x12c   :  { %v2022_v17 = vpop.permute.xlu1 %2021  ;;  %v2020_v21 = vpop.permute.xlu0 %2019 }
 0x12d   :  { %2203 = vst.msk [vmem:[#allocation3 + $0x58] sm:$0xff] %vm2191_vm9, %v2022_v17  ;;  %2202 = vst.msk [vmem:[#allocation3 + $0x50] sm:$0xff] %vm2191_vm9, %v2020_v21  ;;  %v842_v21 = vrot.slane %v10096_v56, 2 }
 0x12e   :  { %1772 = vrot.lane.b32.xlu1 %v10213_v51, %s9288_s20  ;;  %1770 = vrot.lane.b32.xlu0 %v10216_v53, %s9288_s20  ;;  %v836_v53 = vrot.slane %v10008_v40, 2 }
 0x130   :  { %v2287_v23 = vpop.permute.xlu1 %2286  ;;  %v2285_v25 = vpop.permute.xlu0 %2284  ;;  %v838_v61 = vsel %vm780_vm1, %v836_v53, %v837_v49  ;;  %v10499_v53 = vld [vmem:[%s15876_s0 + $0x1b8] sm:$0xff] }
 0x131   :  { %2470 = vst.msk [vmem:[#allocation3 + $0x48] sm:$0xff] %vm2460_vm10, %v2287_v23  ;;  %2469 = vst.msk [vmem:[#allocation3 + $0x40] sm:$0xff] %vm2460_vm10, %v2285_v25 }
 0x132   :  { %1776 = vrot.lane.b32.xlu1 %v10300_v22, %s9288_s20  ;;  %1774 = vrot.lane.b32.xlu0 %v10303_v24, %s9288_s20  ;;  %235 = vst.msk [vmem:[#allocation3 + $0x108] sm:$0xff] %vm201_vm3, %v10499_v53 }
 0x134   :  { %v2291_v26 = vpop.permute.xlu1 %2290  ;;  %v2289_v27 = vpop.permute.xlu0 %2288 }
 0x135   :  { %2472 = vst.msk [vmem:[#allocation3 + $0x58] sm:$0xff] %vm2460_vm10, %v2291_v26  ;;  %2471 = vst.msk [vmem:[#allocation3 + $0x50] sm:$0xff] %vm2460_vm10, %v2289_v27 }
 0x136   :  { %2033 = vrot.lane.b32.xlu1 %v9934_v30, %s9289_s25  ;;  %2031 = vrot.lane.b32.xlu0 %v9939_v33, %s9289_s25  ;;  %v10327_v30 = vld [vmem:[%s15876_s0 + $0x170] sm:$0xff]  ;;  %v10332_v33 = vld [vmem:[%s15876_s0 + $0x168] sm:$0xff] }
 0x137   :  { %233 = vst.msk [vmem:[#allocation3 + $0xf8] sm:$0xff] %vm201_vm3, %v10327_v30  ;;  %232 = vst.msk [vmem:[#allocation3 + $0xf0] sm:$0xff] %vm201_vm3, %v10332_v33 }
 0x138   :  { %v2554_v28 = vpop.permute.xlu1 %2553  ;;  %v2552_v31 = vpop.permute.xlu0 %2551 }
 0x139   :  { %2737 = vst.msk [vmem:[#allocation3 + $0x48] sm:$0xff] %vm2727_vm11, %v2554_v28  ;;  %2736 = vst.msk [vmem:[#allocation3 + $0x40] sm:$0xff] %vm2727_vm11, %v2552_v31 }
 0x13a   :  { %2037 = vrot.lane.b32.xlu1 %v10003_v39, %s9289_s25  ;;  %2035 = vrot.lane.b32.xlu0 %v10008_v40, %s9289_s25 }
 0x13c   :  { %v550_v35 = vpop.permute.xlu1 %549  ;;  %v548_v37 = vpop.permute.xlu0 %547 }
 0x13d   :  { %729 = vst.msk [vmem:[#allocation3 + $0x68] sm:$0xff] %vm715_vm4, %v550_v35  ;;  %728 = vst.msk [vmem:[#allocation3 + $0x60] sm:$0xff] %vm715_vm4, %v548_v37  ;;  %v69_v35 = vld [vmem:[%s15876_s0 + $0x148] sm:$0x3] }
 0x13e   :  { %2302 = vrot.lane.b32.xlu1 %v10280_v11, %s9290_s16  ;;  %2300 = vrot.lane.b32.xlu0 %v10283_v13, %s9290_s16  ;;  %v431_v37 = vrot.slane %v69_v35, 1 }
 0x140   :  { %v2558_v41 = vpop.permute.xlu1 %2557  ;;  %v2801_v43 = vld [vmem:[#allocation3 + $0x48] sm:$0xff]  ;;  %v2556_v44 = vpop.permute.xlu0 %2555  ;;  %v2800_v45 = vld [vmem:[#allocation3 + $0x40] sm:$0xff] }
 0x141   :  { %2739 = vst.msk [vmem:[#allocation3 + $0x58] sm:$0xff] %vm2727_vm11, %v2558_v41  ;;  %2738 = vst.msk [vmem:[#allocation3 + $0x50] sm:$0xff] %vm2727_vm11, %v2556_v44  ;;  %v2860_v46 = vpack.c.bf16 %v2801_v43, %v2800_v45 }
 0x142   :  { %2306 = vrot.lane.b32.xlu1 %v10349_v38, %s9290_s16  ;;  %2304 = vrot.lane.b32.xlu0 %v10352_v42, %s9290_s16 }
 0x143   :  { %8668 = vmatprep.mubr.bf16.mxu0 %v2860_v46 }
 0x144   :  { %v554_v47 = vpop.permute.xlu1 %553  ;;  %v552_v48 = vpop.permute.xlu0 %551 }
 0x145   :  { %731 = vst.msk [vmem:[#allocation3 + $0x78] sm:$0xff] %vm715_vm4, %v554_v47  ;;  %730 = vst.msk [vmem:[#allocation3 + $0x70] sm:$0xff] %vm715_vm4, %v552_v48 }
 0x146   :  { %2569 = vrot.lane.b32.xlu1 %v10300_v22, %s9291_s23  ;;  %2567 = vrot.lane.b32.xlu0 %v10303_v24, %s9291_s23 }
 0x148   :  { %v968_v51 = vpop.permute.xlu1 %967  ;;  %v2803_v52 = vld [vmem:[#allocation3 + $0x58] sm:$0xff]  ;;  %v966_v54 = vpop.permute.xlu0 %965  ;;  %v2802_v55 = vld [vmem:[#allocation3 + $0x50] sm:$0xff] }
 0x149   :  { %1147 = vst.msk [vmem:[#allocation3 + $0x68] sm:$0xff] %vm1133_vm5, %v968_v51  ;;  %1146 = vst.msk [vmem:[#allocation3 + $0x60] sm:$0xff] %vm1133_vm5, %v966_v54  ;;  %v2861_v58 = vpack.c.bf16 %v2803_v52, %v2802_v55  ;;  %v847_v51 = vrot.slane %v10165_v6, 2  ;;  %v849_v52 = vrot.slane %v69_v35, 2  ;;  %v82_v54 = vld [vmem:[%s15876_s0 + $0x1b0] sm:$0xff] }
 0x14a   :  { %565 = vrot.lane.b32.xlu1 %v10280_v11, %s9283_s13  ;;  %563 = vrot.lane.b32.xlu0 %v10283_v13, %s9283_s13  ;;  %v423_v13 = vrot.slane %v10101_v57, 1  ;;  %234 = vst.msk [vmem:[#allocation3 + $0x100] sm:$0xff] %vm201_vm3, %v82_v54 }
 0x14b   :  { %8669 = vmatmul.mubr.bf16.gmra.mrb[8].mxu0 %v2861_v58 }
 0x14c   :  { %v972_v60 = vpop.permute.xlu1 %971  ;;  %v970_v62 = vpop.permute.xlu0 %969 }
 0x14d   :  { %1149 = vst.msk [vmem:[#allocation3 + $0x78] sm:$0xff] %vm1133_vm5, %v972_v60  ;;  %1148 = vst.msk [vmem:[#allocation3 + $0x70] sm:$0xff] %vm1133_vm5, %v970_v62  ;;  %v444_v60 = vrot.slane %v10499_v53, 1 }
 0x14e   :  { %2573 = vrot.lane.b32.xlu1 %v10375_v59, %s9291_s23  ;;  %2571 = vrot.lane.b32.xlu0 %v838_v61, %s9291_s23 }
 0x150   :  { %v1229_v63 = vpop.permute.xlu1 %1228  ;;  %v1227_v0 = vpop.permute.xlu0 %1226 }
 0x151   :  { %1408 = vst.msk [vmem:[#allocation3 + $0x68] sm:$0xff] %vm1394_vm6, %v1229_v63  ;;  %1407 = vst.msk [vmem:[#allocation3 + $0x60] sm:$0xff] %vm1394_vm6, %v1227_v0 }
 0x152   :  { %569 = vrot.lane.b32.xlu1 %v10349_v38, %s9283_s13  ;;  %567 = vrot.lane.b32.xlu0 %v10352_v42, %s9283_s13 }
 0x154   :  { %v1233_v1 = vpop.permute.xlu1 %1232  ;;  %v1231_v2 = vpop.permute.xlu0 %1230 }
 0x155   :  { %1410 = vst.msk [vmem:[#allocation3 + $0x78] sm:$0xff] %vm1394_vm6, %v1233_v1  ;;  %1409 = vst.msk [vmem:[#allocation3 + $0x70] sm:$0xff] %vm1394_vm6, %v1231_v2  ;;  %v10521_v2 = vsel %vm780_vm1, %v847_v51, %v849_v52  ;;  %v851_v52 = vrot.slane %v10263_v20, 2 }
 0x156   :  { %983 = vrot.lane.b32.xlu1 %v10300_v22, %s9284_s14  ;;  %981 = vrot.lane.b32.xlu0 %v10303_v24, %s9284_s14  ;;  %v844_v22 = vrot.slane %v66_v10, 2  ;;  %v841_v24 = vrot.slane %v10101_v57, 2 }
 0x158   :  { %v1498_v3 = vpop.permute.xlu1 %1497  ;;  %v1496_v4 = vpop.permute.xlu0 %1495  ;;  %v10443_v26 = vsel %vm780_vm1, %v842_v21, %v844_v22  ;;  %v10446_v28 = vsel %vm780_vm1, %v841_v24, %v842_v21  ;;  %v72_v24 = vld [vmem:[%s15876_s0 + $0x160] sm:$0x3] }
 0x159   :  { %1677 = vst.msk [vmem:[#allocation3 + $0x68] sm:$0xff] %vm1663_vm7, %v1498_v3  ;;  %1676 = vst.msk [vmem:[#allocation3 + $0x60] sm:$0xff] %vm1663_vm7, %v1496_v4 }
 0x15a   :  { %987 = vrot.lane.b32.xlu1 %v10375_v59, %s9284_s14  ;;  %985 = vrot.lane.b32.xlu0 %v838_v61, %s9284_s14 }
 0x15c   :  { %v1502_v5 = vpop.permute.xlu1 %1501  ;;  %v1500_v8 = vpop.permute.xlu0 %1499 }
 0x15d   :  { %1679 = vst.msk [vmem:[#allocation3 + $0x78] sm:$0xff] %vm1663_vm7, %v1502_v5  ;;  %1678 = vst.msk [vmem:[#allocation3 + $0x70] sm:$0xff] %vm1663_vm7, %v1500_v8  ;;  %v10535_v8 = vld [vmem:[%s15876_s0 + $0x1d0] sm:$0xff] }
 0x15e   :  { %1244 = vrot.lane.b32.xlu1 %v10003_v39, %s9286_s10  ;;  %1242 = vrot.lane.b32.xlu0 %v10008_v40, %s9286_s10  ;;  %v424_v39 = vrot.slane %v10096_v56, 1  ;;  %237 = vst.msk [vmem:[#allocation3 + $0x118] sm:$0xff] %vm201_vm3, %v10535_v8 }
 0x160   :  { %v1765_v9 = vpop.permute.xlu1 %1764  ;;  %v1763_v11 = vpop.permute.xlu0 %1762  ;;  %v10424_v15 = vsel %vm362_vm0, %v424_v39, %v426_v12  ;;  %v10427_v17 = vsel %vm362_vm0, %v423_v13, %v424_v39  ;;  %v862_v12 = vrot.slane %v10499_v53, 2 }
 0x161   :  { %1944 = vst.msk [vmem:[#allocation3 + $0x68] sm:$0xff] %vm1930_vm8, %v1765_v9  ;;  %1943 = vst.msk [vmem:[#allocation3 + $0x60] sm:$0xff] %vm1930_vm8, %v1763_v11  ;;  %v10540_v9 = vld [vmem:[%s15876_s0 + $0x1c8] sm:$0xff] }
 0x162   :  { %1248 = vrot.lane.b32.xlu1 %v10096_v56, %s9286_s10  ;;  %1246 = vrot.lane.b32.xlu0 %v10101_v57, %s9286_s10  ;;  %236 = vst.msk [vmem:[#allocation3 + $0x110] sm:$0xff] %vm201_vm3, %v10540_v9 }
 0x164   :  { %v1769_v40 = vpop.permute.xlu1 %1768  ;;  %v1767_v14 = vpop.permute.xlu0 %1766 }
 0x165   :  { %1946 = vst.msk [vmem:[#allocation3 + $0x78] sm:$0xff] %vm1930_vm8, %v1769_v40  ;;  %1945 = vst.msk [vmem:[#allocation3 + $0x70] sm:$0xff] %vm1930_vm8, %v1767_v14  ;;  %v861_v40 = vrot.slane %v82_v54, 2 }
 0x166   :  { %1513 = vrot.lane.b32.xlu1 %v10349_v38, %s9287_s17  ;;  %1511 = vrot.lane.b32.xlu0 %v10352_v42, %s9287_s17  ;;  %v428_v38 = vrot.slane %v10170_v7, 1 }
 0x167   :  { %v10560_v14 = vsel %vm780_vm1, %v861_v40, %v862_v12 }
 0x168   :  { %v2026_v16 = vpop.permute.xlu1 %2025  ;;  %v2024_v18 = vpop.permute.xlu0 %2023 }
 0x169   :  { %2205 = vst.msk [vmem:[#allocation3 + $0x68] sm:$0xff] %vm2191_vm9, %v2026_v16  ;;  %2204 = vst.msk [vmem:[#allocation3 + $0x60] sm:$0xff] %vm2191_vm9, %v2024_v18 }
 0x16a   :  { %1517 = vrot.lane.b32.xlu1 %v10424_v15, %s9287_s17  ;;  %1515 = vrot.lane.b32.xlu0 %v10427_v17, %s9287_s17 }
 0x16c   :  { %v2030_v23 = vpop.permute.xlu1 %2029  ;;  %v2028_v25 = vpop.permute.xlu0 %2027 }
 0x16d   :  { %2207 = vst.msk [vmem:[#allocation3 + $0x78] sm:$0xff] %vm2191_vm9, %v2030_v23  ;;  %2206 = vst.msk [vmem:[#allocation3 + $0x70] sm:$0xff] %vm2191_vm9, %v2028_v25 }
 0x16e   :  { %1780 = vrot.lane.b32.xlu1 %v10375_v59, %s9288_s20  ;;  %1778 = vrot.lane.b32.xlu0 %v838_v61, %s9288_s20  ;;  %v846_v59 = vrot.slane %v10170_v7, 2  ;;  %v443_v61 = vrot.slane %v82_v54, 1 }
 0x170   :  { %v2295_v27 = vpop.permute.xlu1 %2294  ;;  %v2293_v29 = vpop.permute.xlu0 %2292  ;;  %v10516_v1 = vsel %vm362_vm0, %v443_v61, %v444_v60  ;;  %v10524_v4 = vsel %vm780_vm1, %v846_v59, %v847_v51 }
 0x171   :  { %2474 = vst.msk [vmem:[#allocation3 + $0x68] sm:$0xff] %vm2460_vm10, %v2295_v27  ;;  %2473 = vst.msk [vmem:[#allocation3 + $0x60] sm:$0xff] %vm2460_vm10, %v2293_v29  ;;  %v10595_v27 = vld [vmem:[%s15876_s0 + $0x1e8] sm:$0xff] }
 0x172   :  { %1784 = vrot.lane.b32.xlu1 %v10443_v26, %s9288_s20  ;;  %1782 = vrot.lane.b32.xlu0 %v10446_v28, %s9288_s20  ;;  %239 = vst.msk [vmem:[#allocation3 + $0x128] sm:$0xff] %vm201_vm3, %v10595_v27 }
 0x174   :  { %v2299_v31 = vpop.permute.xlu1 %2298  ;;  %v2297_v32 = vpop.permute.xlu0 %2296 }
 0x175   :  { %2476 = vst.msk [vmem:[#allocation3 + $0x78] sm:$0xff] %vm2460_vm10, %v2299_v31  ;;  %2475 = vst.msk [vmem:[#allocation3 + $0x70] sm:$0xff] %vm2460_vm10, %v2297_v32 }
 0x176   :  { %2041 = vrot.lane.b32.xlu1 %v10096_v56, %s9289_s25  ;;  %2039 = vrot.lane.b32.xlu0 %v10101_v57, %s9289_s25  ;;  %v429_v56 = vrot.slane %v10165_v6, 1 }
 0x178   :  { %v2562_v34 = vpop.permute.xlu1 %2561  ;;  %v2560_v36 = vpop.permute.xlu0 %2559  ;;  %v10478_v42 = vsel %vm362_vm0, %v429_v56, %v431_v37  ;;  %v10481_v44 = vsel %vm362_vm0, %v428_v38, %v429_v56 }
 0x179   :  { %2741 = vst.msk [vmem:[#allocation3 + $0x68] sm:$0xff] %vm2727_vm11, %v2562_v34  ;;  %2740 = vst.msk [vmem:[#allocation3 + $0x60] sm:$0xff] %vm2727_vm11, %v2560_v36  ;;  %v436_v34 = vrot.slane %v72_v24, 1  ;;  %v433_v36 = vrot.slane %v10263_v20, 1 }
 0x17a   :  { %2045 = vrot.lane.b32.xlu1 %v10165_v6, %s9289_s25  ;;  %2043 = vrot.lane.b32.xlu0 %v10170_v7, %s9289_s25 }
 0x17c   :  { %v558_v57 = vpop.permute.xlu1 %557  ;;  %v556_v41 = vpop.permute.xlu0 %555 }
 0x17d   :  { %733 = vst.msk [vmem:[#allocation3 + $0x88] sm:$0xff] %vm715_vm4, %v558_v57  ;;  %732 = vst.msk [vmem:[#allocation3 + $0x80] sm:$0xff] %vm715_vm4, %v556_v41 }
 0x17e   :  { %2310 = vrot.lane.b32.xlu1 %v10424_v15, %s9290_s16  ;;  %2308 = vrot.lane.b32.xlu0 %v10427_v17, %s9290_s16 }
 0x180   :  { %v2566_v43 = vpop.permute.xlu1 %2565  ;;  %v2805_v45 = vld [vmem:[#allocation3 + $0x68] sm:$0xff]  ;;  %v2564_v46 = vpop.permute.xlu0 %2563  ;;  %v2804_v47 = vld [vmem:[#allocation3 + $0x60] sm:$0xff] }
 0x181   :  { %2743 = vst.msk [vmem:[#allocation3 + $0x78] sm:$0xff] %vm2727_vm11, %v2566_v43  ;;  %2742 = vst.msk [vmem:[#allocation3 + $0x70] sm:$0xff] %vm2727_vm11, %v2564_v46  ;;  %v2862_v48 = vpack.c.bf16 %v2805_v45, %v2804_v47 }
 0x182   :  { %2314 = vrot.lane.b32.xlu1 %v10478_v42, %s9290_s16  ;;  %2312 = vrot.lane.b32.xlu0 %v10481_v44, %s9290_s16 }
 0x183   :  { %8672 = vmatprep.mubr.bf16.mxu0 %v2862_v48 }
 0x184   :  { %v562_v49 = vpop.permute.xlu1 %561  ;;  %v560_v50 = vpop.permute.xlu0 %559 }
 0x185   :  { %735 = vst.msk [vmem:[#allocation3 + $0x98] sm:$0xff] %vm715_vm4, %v562_v49  ;;  %734 = vst.msk [vmem:[#allocation3 + $0x90] sm:$0xff] %vm715_vm4, %v560_v50  ;;  %v854_v50 = vrot.slane %v72_v24, 2 }
 0x186   :  { %2577 = vrot.lane.b32.xlu1 %v10443_v26, %s9291_s23  ;;  %2575 = vrot.lane.b32.xlu0 %v10446_v28, %s9291_s23 }
 0x188   :  { %v976_v55 = vpop.permute.xlu1 %975  ;;  %v2807_v58 = vld [vmem:[#allocation3 + $0x78] sm:$0xff]  ;;  %v974_v62 = vpop.permute.xlu0 %973  ;;  %v2806_v63 = vld [vmem:[#allocation3 + $0x70] sm:$0xff] }
 0x189   :  { %1151 = vst.msk [vmem:[#allocation3 + $0x88] sm:$0xff] %vm1133_vm5, %v976_v55  ;;  %1150 = vst.msk [vmem:[#allocation3 + $0x80] sm:$0xff] %vm1133_vm5, %v974_v62  ;;  %v2863_v0 = vpack.c.bf16 %v2807_v58, %v2806_v63 }
 0x18a   :  { %573 = vrot.lane.b32.xlu1 %v10424_v15, %s9283_s13  ;;  %571 = vrot.lane.b32.xlu0 %v10427_v17, %s9283_s13 }
 0x18b   :  { %8673 = vmatmul.mubr.bf16.gmra.mrb[12].mxu0 %v2863_v0 }
 0x18c   :  { %v980_v3 = vpop.permute.xlu1 %979  ;;  %v978_v5 = vpop.permute.xlu0 %977 }
 0x18d   :  { %1153 = vst.msk [vmem:[#allocation3 + $0x98] sm:$0xff] %vm1133_vm5, %v980_v3  ;;  %1152 = vst.msk [vmem:[#allocation3 + $0x90] sm:$0xff] %vm1133_vm5, %v978_v5 }
 0x18e   :  { %2581 = vrot.lane.b32.xlu1 %v10521_v2, %s9291_s23  ;;  %2579 = vrot.lane.b32.xlu0 %v10524_v4, %s9291_s23 }
 0x190   :  { %v1237_v10 = vpop.permute.xlu1 %1236  ;;  %v1235_v11 = vpop.permute.xlu0 %1234 }
 0x191   :  { %1412 = vst.msk [vmem:[#allocation3 + $0x88] sm:$0xff] %vm1394_vm6, %v1237_v10  ;;  %1411 = vst.msk [vmem:[#allocation3 + $0x80] sm:$0xff] %vm1394_vm6, %v1235_v11  ;;  %v438_v11 = vrot.slane %v10332_v33, 1 }
 0x192   :  { %577 = vrot.lane.b32.xlu1 %v10478_v42, %s9283_s13  ;;  %575 = vrot.lane.b32.xlu0 %v10481_v44, %s9283_s13 }
 0x194   :  { %v1241_v39 = vpop.permute.xlu1 %1240  ;;  %v1239_v13 = vpop.permute.xlu0 %1238 }
 0x195   :  { %1414 = vst.msk [vmem:[#allocation3 + $0x98] sm:$0xff] %vm1394_vm6, %v1241_v39  ;;  %1413 = vst.msk [vmem:[#allocation3 + $0x90] sm:$0xff] %vm1394_vm6, %v1239_v13 }
 0x196   :  { %991 = vrot.lane.b32.xlu1 %v10443_v26, %s9284_s14  ;;  %989 = vrot.lane.b32.xlu0 %v10446_v28, %s9284_s14  ;;  %v10600_v28 = vld [vmem:[%s15876_s0 + $0x1e0] sm:$0xff] }
 0x197   :  { %238 = vst.msk [vmem:[#allocation3 + $0x120] sm:$0xff] %vm201_vm3, %v10600_v28 }
 0x198   :  { %v1506_v15 = vpop.permute.xlu1 %1505  ;;  %v1504_v16 = vpop.permute.xlu0 %1503 }
 0x199   :  { %1681 = vst.msk [vmem:[#allocation3 + $0x88] sm:$0xff] %vm1663_vm7, %v1506_v15  ;;  %1680 = vst.msk [vmem:[#allocation3 + $0x80] sm:$0xff] %vm1663_vm7, %v1504_v16 }
 0x19a   :  { %995 = vrot.lane.b32.xlu1 %v10521_v2, %s9284_s14  ;;  %993 = vrot.lane.b32.xlu0 %v10524_v4, %s9284_s14 }
 0x19c   :  { %v1510_v17 = vpop.permute.xlu1 %1509  ;;  %v1508_v18 = vpop.permute.xlu0 %1507 }
 0x19d   :  { %1683 = vst.msk [vmem:[#allocation3 + $0x98] sm:$0xff] %vm1663_vm7, %v1510_v17  ;;  %1682 = vst.msk [vmem:[#allocation3 + $0x90] sm:$0xff] %vm1663_vm7, %v1508_v18 }
 0x19e   :  { %1252 = vrot.lane.b32.xlu1 %v10165_v6, %s9286_s10  ;;  %1250 = vrot.lane.b32.xlu0 %v10170_v7, %s9286_s10  ;;  %v10576_v21 = vpop.f32.mrb[0].mxu0  ;;  %v434_v7 = vrot.slane %v10258_v19, 1 }
 0x19f   :  { %v10578_v22 = vpop.f32.mrb[1].mxu0  ;;  %v3312_v56 = vmul.f32 %v10576_v21, %v10576_v21 }
 0x1a0   :  { %v1773_v23 = vpop.permute.xlu1 %1772  ;;  %v1771_v25 = vpop.permute.xlu0 %1770  ;;  %v3310_v29 = vmul.f32 %v10578_v22, %v10578_v22  ;;  %v10627_v45 = vsel %vm362_vm0, %v434_v7, %v436_v34  ;;  %v10633_v48 = vsel %vm362_vm0, %v433_v36, %v434_v7  ;;  %v857_v7 = vrot.slane %v10327_v30, 2 }
 0x1a1   :  { %1948 = vst.msk [vmem:[#allocation3 + $0x88] sm:$0xff] %vm1930_vm8, %v1773_v23  ;;  %v10584_v26 = vpop.f32.mrb[2].mxu0  ;;  %1947 = vst.msk [vmem:[#allocation3 + $0x80] sm:$0xff] %vm1930_vm8, %v1771_v25  ;;  %v856_v34 = vrot.slane %v10332_v33, 2 }
 0x1a2   :  { %v10587_v6 = vpop.f32.mrb[3].mxu0  ;;  %1256 = vrot.lane.b32.xlu1 %v10258_v19, %s9286_s10  ;;  %1254 = vrot.lane.b32.xlu0 %v10263_v20, %s9286_s10  ;;  %v3313_v41 = vmul.f32 %v10584_v26, %v10584_v26 }
 0x1a3   :  { %v3241_v31 = vadd.f32 %v10587_v6, %v10578_v22  ;;  %v3311_v32 = vmul.f32 %v10587_v6, %v10587_v6 }
 0x1a4   :  { %v1777_v35 = vpop.permute.xlu1 %1776  ;;  %v1775_v38 = vpop.permute.xlu0 %1774 }
 0x1a5   :  { %v3242_v37 = vadd.f32 %v10576_v21, %v3241_v31  ;;  %v3374_v57 = vadd.f32 %v3311_v32, %v3310_v29  ;;  %1950 = vst.msk [vmem:[#allocation3 + $0x98] sm:$0xff] %vm1930_vm8, %v1777_v35  ;;  %1949 = vst.msk [vmem:[#allocation3 + $0x90] sm:$0xff] %vm1930_vm8, %v1775_v38  ;;  %v10730_v38 = vsel %vm780_vm1, %v856_v34, %v857_v7 }
 0x1a6   :  { %1521 = vrot.lane.b32.xlu1 %v10478_v42, %s9287_s17  ;;  %1519 = vrot.lane.b32.xlu0 %v10481_v44, %s9287_s17  ;;  %v852_v44 = vrot.slane %v10258_v19, 2 }
 0x1a7   :  { %v3375_v43 = vadd.f32 %v3374_v57, %v3312_v56  ;;  %v10630_v46 = vadd.f32 %v10584_v26, %v3242_v37 }
 0x1a8   :  { %v2034_v47 = vpop.permute.xlu1 %2033  ;;  %v2032_v42 = vpop.permute.xlu0 %2031  ;;  %v10652_v55 = vsel %vm780_vm1, %v852_v44, %v854_v50  ;;  %v10655_v59 = vsel %vm780_vm1, %v851_v52, %v852_v44 }
 0x1a9   :  { %2209 = vst.msk [vmem:[#allocation3 + $0x88] sm:$0xff] %vm2191_vm9, %v2034_v47  ;;  %v10636_v49 = vadd.f32 %v3375_v43, %v3313_v41  ;;  %2208 = vst.msk [vmem:[#allocation3 + $0x80] sm:$0xff] %vm2191_vm9, %v2032_v42 }
 0x1aa   :  { %1525 = vrot.lane.b32.xlu1 %v10627_v45, %s9287_s17  ;;  %1523 = vrot.lane.b32.xlu0 %v10633_v48, %s9287_s17 }
 0x1ac   :  { %v2038_v51 = vpop.permute.xlu1 %2037  ;;  %v2036_v54 = vpop.permute.xlu0 %2035 }
 0x1ad   :  { %2211 = vst.msk [vmem:[#allocation3 + $0x98] sm:$0xff] %vm2191_vm9, %v2038_v51  ;;  %2210 = vst.msk [vmem:[#allocation3 + $0x90] sm:$0xff] %vm2191_vm9, %v2036_v54  ;;  %v10767_v54 = vld [vmem:[%s15876_s0 + $0x188] sm:$0xff] }
 0x1ae   :  { %1788 = vrot.lane.b32.xlu1 %v10521_v2, %s9288_s20  ;;  %1786 = vrot.lane.b32.xlu0 %v10524_v4, %s9288_s20  ;;  %v75_v2 = vld [vmem:[%s15876_s0 + $0x178] sm:$0x3]  ;;  %v439_v4 = vrot.slane %v10327_v30, 1 }
 0x1af   :  { %v441_v5 = vrot.slane %v75_v2, 1  ;;  %v859_v29 = vrot.slane %v75_v2, 2  ;;  %v1462_v2 = vrot.slane %v10767_v54, 1 }
 0x1b0   :  { %v2303_v58 = vpop.permute.xlu1 %2302  ;;  %v2301_v61 = vpop.permute.xlu0 %2300  ;;  %v10704_v15 = vsel %vm362_vm0, %v438_v11, %v439_v4 }
 0x1b1   :  { %2478 = vst.msk [vmem:[#allocation3 + $0x88] sm:$0xff] %vm2460_vm10, %v2303_v58  ;;  %2477 = vst.msk [vmem:[#allocation3 + $0x80] sm:$0xff] %vm2460_vm10, %v2301_v61  ;;  %v10701_v40 = vsel %vm362_vm0, %v439_v4, %v441_v5  ;;  %v10727_v37 = vsel %vm780_vm1, %v857_v7, %v859_v29 }
 0x1b2   :  { %1792 = vrot.lane.b32.xlu1 %v10652_v55, %s9288_s20  ;;  %1790 = vrot.lane.b32.xlu0 %v10655_v59, %s9288_s20 }
 0x1b4   :  { %v2307_v62 = vpop.permute.xlu1 %2306  ;;  %v2305_v63 = vpop.permute.xlu0 %2304 }
 0x1b5   :  { %2480 = vst.msk [vmem:[#allocation3 + $0x98] sm:$0xff] %vm2460_vm10, %v2307_v62  ;;  %2479 = vst.msk [vmem:[#allocation3 + $0x90] sm:$0xff] %vm2460_vm10, %v2305_v63 }
 0x1b6   :  { %2049 = vrot.lane.b32.xlu1 %v10258_v19, %s9289_s25  ;;  %2047 = vrot.lane.b32.xlu0 %v10263_v20, %s9289_s25  ;;  %v10679_v19 = vld [vmem:[%s15876_s0 + $0x200] sm:$0xff]  ;;  %v10684_v20 = vld [vmem:[%s15876_s0 + $0x1f8] sm:$0xff] }
 0x1b7   :  { %241 = vst.msk [vmem:[#allocation3 + $0x138] sm:$0xff] %vm201_vm3, %v10679_v19  ;;  %240 = vst.msk [vmem:[#allocation3 + $0x130] sm:$0xff] %vm201_vm3, %v10684_v20 }
 0x1b8   :  { %v2570_v0 = vpop.permute.xlu1 %2569  ;;  %v2568_v3 = vpop.permute.xlu0 %2567 }
 0x1b9   :  { %2745 = vst.msk [vmem:[#allocation3 + $0x88] sm:$0xff] %vm2727_vm11, %v2570_v0  ;;  %2744 = vst.msk [vmem:[#allocation3 + $0x80] sm:$0xff] %vm2727_vm11, %v2568_v3  ;;  %v10800_v3 = vld [vmem:[%s15876_s0 + $0x210] sm:$0xff] }
 0x1ba   :  { %2053 = vrot.lane.b32.xlu1 %v10327_v30, %s9289_s25  ;;  %2051 = vrot.lane.b32.xlu0 %v10332_v33, %s9289_s25  ;;  %242 = vst.msk [vmem:[#allocation3 + $0x140] sm:$0xff] %vm201_vm3, %v10800_v3 }
 0x1bc   :  { %v566_v10 = vpop.permute.xlu1 %565  ;;  %v564_v39 = vpop.permute.xlu0 %563 }
 0x1bd   :  { %737 = vst.msk [vmem:[#allocation3 + $0xa8] sm:$0xff] %vm715_vm4, %v566_v10  ;;  %736 = vst.msk [vmem:[#allocation3 + $0xa0] sm:$0xff] %vm715_vm4, %v564_v39 }
 0x1be   :  { %2318 = vrot.lane.b32.xlu1 %v10627_v45, %s9290_s16  ;;  %2316 = vrot.lane.b32.xlu0 %v10633_v48, %s9290_s16 }
 0x1c0   :  { %v2574_v13 = vpop.permute.xlu1 %2573  ;;  %v2809_v16 = vld [vmem:[#allocation3 + $0x88] sm:$0xff]  ;;  %v2572_v17 = vpop.permute.xlu0 %2571  ;;  %v2808_v18 = vld [vmem:[#allocation3 + $0x80] sm:$0xff] }
 0x1c1   :  { %2747 = vst.msk [vmem:[#allocation3 + $0x98] sm:$0xff] %vm2727_vm11, %v2574_v13  ;;  %2746 = vst.msk [vmem:[#allocation3 + $0x90] sm:$0xff] %vm2727_vm11, %v2572_v17  ;;  %v2864_v23 = vpack.c.bf16 %v2809_v16, %v2808_v18 }
 0x1c2   :  { %2322 = vrot.lane.b32.xlu1 %v10701_v40, %s9290_s16  ;;  %2320 = vrot.lane.b32.xlu0 %v10704_v15, %s9290_s16 }
 0x1c3   :  { %8676 = vmatprep.mubr.bf16.mxu0 %v2864_v23 }
 0x1c4   :  { %v570_v24 = vpop.permute.xlu1 %569  ;;  %v568_v25 = vpop.permute.xlu0 %567 }
 0x1c5   :  { %739 = vst.msk [vmem:[#allocation3 + $0xb8] sm:$0xff] %vm715_vm4, %v570_v24  ;;  %738 = vst.msk [vmem:[#allocation3 + $0xb0] sm:$0xff] %vm715_vm4, %v568_v25 }
 0x1c6   :  { %2585 = vrot.lane.b32.xlu1 %v10652_v55, %s9291_s23  ;;  %2583 = vrot.lane.b32.xlu0 %v10655_v59, %s9291_s23 }
 0x1c8   :  { %v984_v31 = vpop.permute.xlu1 %983  ;;  %v2811_v32 = vld [vmem:[#allocation3 + $0x98] sm:$0xff]  ;;  %v982_v35 = vpop.permute.xlu0 %981  ;;  %v2810_v36 = vld [vmem:[#allocation3 + $0x90] sm:$0xff] }
 0x1c9   :  { %1155 = vst.msk [vmem:[#allocation3 + $0xa8] sm:$0xff] %vm1133_vm5, %v984_v31  ;;  %1154 = vst.msk [vmem:[#allocation3 + $0xa0] sm:$0xff] %vm1133_vm5, %v982_v35  ;;  %v2865_v56 = vpack.c.bf16 %v2811_v32, %v2810_v36 }
 0x1ca   :  { %581 = vrot.lane.b32.xlu1 %v10627_v45, %s9283_s13  ;;  %579 = vrot.lane.b32.xlu0 %v10633_v48, %s9283_s13 }
 0x1cb   :  { %8677 = vmatmul.mubr.bf16.gmra.mrb[16].mxu0 %v2865_v56 }
 0x1cc   :  { %v988_v57 = vpop.permute.xlu1 %987  ;;  %v986_v41 = vpop.permute.xlu0 %985 }
 0x1cd   :  { %1157 = vst.msk [vmem:[#allocation3 + $0xb8] sm:$0xff] %vm1133_vm5, %v988_v57  ;;  %1156 = vst.msk [vmem:[#allocation3 + $0xb0] sm:$0xff] %vm1133_vm5, %v986_v41 }
 0x1ce   :  { %2589 = vrot.lane.b32.xlu1 %v10727_v37, %s9291_s23  ;;  %2587 = vrot.lane.b32.xlu0 %v10730_v38, %s9291_s23 }
 0x1d0   :  { %v1245_v43 = vpop.permute.xlu1 %1244  ;;  %v1243_v45 = vpop.permute.xlu0 %1242 }
 0x1d1   :  { %1416 = vst.msk [vmem:[#allocation3 + $0xa8] sm:$0xff] %vm1394_vm6, %v1245_v43  ;;  %1415 = vst.msk [vmem:[#allocation3 + $0xa0] sm:$0xff] %vm1394_vm6, %v1243_v45 }
 0x1d2   :  { %585 = vrot.lane.b32.xlu1 %v10701_v40, %s9283_s13  ;;  %583 = vrot.lane.b32.xlu0 %v10704_v15, %s9283_s13 }
 0x1d4   :  { %v1249_v47 = vpop.permute.xlu1 %1248  ;;  %v1247_v48 = vpop.permute.xlu0 %1246 }
 0x1d5   :  { %1418 = vst.msk [vmem:[#allocation3 + $0xb8] sm:$0xff] %vm1394_vm6, %v1249_v47  ;;  %1417 = vst.msk [vmem:[#allocation3 + $0xb0] sm:$0xff] %vm1394_vm6, %v1247_v48 }
 0x1d6   :  { %999 = vrot.lane.b32.xlu1 %v10652_v55, %s9284_s14  ;;  %997 = vrot.lane.b32.xlu0 %v10655_v59, %s9284_s14  ;;  %v10774_v59 = vld [vmem:[%s15876_s0 + $0x180] sm:$0xff] }
 0x1d7   :  { %v1461_v39 = vrot.slane %v10774_v59, 1  ;;  %v1728_v35 = vrot.slane %v10774_v59, 2 }
 0x1d8   :  { %v1514_v42 = vpop.permute.xlu1 %1513  ;;  %v1512_v44 = vpop.permute.xlu0 %1511 }
 0x1d9   :  { %1685 = vst.msk [vmem:[#allocation3 + $0xa8] sm:$0xff] %vm1663_vm7, %v1514_v42  ;;  %1684 = vst.msk [vmem:[#allocation3 + $0xa0] sm:$0xff] %vm1663_vm7, %v1512_v44  ;;  %v1463_v31 = vsel %vm362_vm0, %v1461_v39, %v1462_v2  ;;  %v79_v42 = vld [vmem:[%s15876_s0 + $0x198] sm:$0xff]  ;;  %v81_v44 = vld [vmem:[%s15876_s0 + $0x1a8] sm:$0x3] }
 0x1da   :  { %1003 = vrot.lane.b32.xlu1 %v10727_v37, %s9284_s14  ;;  %1001 = vrot.lane.b32.xlu0 %v10730_v38, %s9284_s14 }
 0x1dc   :  { %v1518_v50 = vpop.permute.xlu1 %1517  ;;  %v1516_v51 = vpop.permute.xlu0 %1515 }
 0x1dd   :  { %1687 = vst.msk [vmem:[#allocation3 + $0xb8] sm:$0xff] %vm1663_vm7, %v1518_v50  ;;  %1686 = vst.msk [vmem:[#allocation3 + $0xb0] sm:$0xff] %vm1663_vm7, %v1516_v51  ;;  %v10873_v51 = vld [vmem:[%s15876_s0 + $0x230] sm:$0xff] }
 0x1de   :  { %1260 = vrot.lane.b32.xlu1 %v10327_v30, %s9286_s10  ;;  %1258 = vrot.lane.b32.xlu0 %v10332_v33, %s9286_s10  ;;  %v10762_v52 = vpop.f32.mrb[4].mxu0  ;;  %v78_v30 = vld [vmem:[%s15876_s0 + $0x190] sm:$0x3]  ;;  %245 = vst.msk [vmem:[#allocation3 + $0x158] sm:$0xff] %vm201_vm3, %v10873_v51 }
 0x1df   :  { %v10769_v55 = vpop.f32.mrb[5].mxu0  ;;  %v1464_v11 = vrot.slane %v78_v30, 1 }
 0x1e0   :  { %v1781_v58 = vpop.permute.xlu1 %1780  ;;  %v3244_v33 = vadd.f32 %v10630_v46, %v10769_v55  ;;  %v3314_v61 = vmul.f32 %v10769_v55, %v10769_v55  ;;  %v1779_v62 = vpop.permute.xlu0 %1778  ;;  %v10795_v46 = vld [vmem:[%s15876_s0 + $0x218] sm:$0xff] }
 0x1e1   :  { %1952 = vst.msk [vmem:[#allocation3 + $0xa8] sm:$0xff] %vm1930_vm8, %v1781_v58  ;;  %v10784_v63 = vpop.f32.mrb[6].mxu0  ;;  %1951 = vst.msk [vmem:[#allocation3 + $0xa0] sm:$0xff] %vm1930_vm8, %v1779_v62  ;;  %v1465_v25 = vsel %vm362_vm0, %v1462_v2, %v1464_v11 }
 0x1e2   :  { %v10787_v0 = vpop.f32.mrb[7].mxu0  ;;  %1264 = vrot.lane.b32.xlu1 %v10767_v54, %s9286_s10  ;;  %v3377_v4 = vadd.f32 %v10636_v49, %v3314_v61  ;;  %1262 = vrot.lane.b32.xlu0 %v10774_v59, %s9286_s10  ;;  %243 = vst.msk [vmem:[#allocation3 + $0x148] sm:$0xff] %vm201_vm3, %v10795_v46  ;;  %v3316_v49 = vmul.f32 %v10762_v52, %v10762_v52 }
 0x1e3   :  { %v3245_v5 = vadd.f32 %v3244_v33, %v10787_v0  ;;  %v3315_v10 = vmul.f32 %v10787_v0, %v10787_v0  ;;  %v3317_v23 = vmul.f32 %v10784_v63, %v10784_v63 }
 0x1e4   :  { %v1785_v13 = vpop.permute.xlu1 %1784  ;;  %v1783_v18 = vpop.permute.xlu0 %1782 }
 0x1e5   :  { %v3246_v16 = vadd.f32 %v10762_v52, %v3245_v5  ;;  %v3378_v17 = vadd.f32 %v3377_v4, %v3315_v10  ;;  %1954 = vst.msk [vmem:[#allocation3 + $0xb8] sm:$0xff] %vm1930_vm8, %v1785_v13  ;;  %1953 = vst.msk [vmem:[#allocation3 + $0xb0] sm:$0xff] %vm1930_vm8, %v1783_v18  ;;  %v84_v10 = vld [vmem:[%s15876_s0 + $0x1c0] sm:$0x3] }
 0x1e6   :  { %1529 = vrot.lane.b32.xlu1 %v10701_v40, %s9287_s17  ;;  %1527 = vrot.lane.b32.xlu0 %v10704_v15, %s9287_s17  ;;  %v1729_v40 = vrot.slane %v10767_v54, 2  ;;  %v1731_v15 = vrot.slane %v78_v30, 2  ;;  %v2258_v30 = vrot.slane %v79_v42, 1 }
 0x1e7   :  { %v3379_v24 = vadd.f32 %v3378_v17, %v3316_v49  ;;  %v10826_v7 = vadd.f32 %v10784_v63, %v3246_v16  ;;  %v446_v49 = vrot.slane %v84_v10, 1 }
 0x1e8   :  { %v2042_v29 = vpop.permute.xlu1 %2041  ;;  %v2040_v32 = vpop.permute.xlu0 %2039  ;;  %v1732_v57 = vsel %vm780_vm1, %v1729_v40, %v1731_v15  ;;  %v1730_v43 = vsel %vm780_vm1, %v1728_v35, %v1729_v40 }
 0x1e9   :  { %2213 = vst.msk [vmem:[#allocation3 + $0xa8] sm:$0xff] %vm2191_vm9, %v2042_v29  ;;  %v10830_v34 = vadd.f32 %v3379_v24, %v3317_v23  ;;  %2212 = vst.msk [vmem:[#allocation3 + $0xa0] sm:$0xff] %vm2191_vm9, %v2040_v32  ;;  %v447_v23 = vsel %vm362_vm0, %v444_v60, %v446_v49  ;;  %v2528_v24 = vrot.slane %v81_v44, 2  ;;  %v87_v32 = vld [vmem:[%s15876_s0 + $0x1d8] sm:$0x3]  ;;  %v454_v49 = vrot.slane %v10595_v27, 1 }
 0x1ea   :  { %1533 = vrot.lane.b32.xlu1 %v1465_v25, %s9287_s17  ;;  %1531 = vrot.lane.b32.xlu0 %v1463_v31, %s9287_s17 }
 0x1ec   :  { %v2046_v36 = vpop.permute.xlu1 %2045  ;;  %v2044_v56 = vpop.permute.xlu0 %2043 }
 0x1ed   :  { %2215 = vst.msk [vmem:[#allocation3 + $0xb8] sm:$0xff] %vm2191_vm9, %v2046_v36  ;;  %2214 = vst.msk [vmem:[#allocation3 + $0xb0] sm:$0xff] %vm2191_vm9, %v2044_v56  ;;  %v449_v36 = vrot.slane %v10535_v8, 1  ;;  %v451_v56 = vrot.slane %v87_v32, 1 }
 0x1ee   :  { %1796 = vrot.lane.b32.xlu1 %v10727_v37, %s9288_s20  ;;  %1794 = vrot.lane.b32.xlu0 %v10730_v38, %s9288_s20  ;;  %v10858_v38 = vld [vmem:[%s15876_s0 + $0x1a0] sm:$0xff] }
 0x1ef   :  { %v2259_v58 = vrot.slane %v10858_v38, 1  ;;  %v2526_v18 = vrot.slane %v10858_v38, 2 }
 0x1f0   :  { %v2311_v41 = vpop.permute.xlu1 %2310  ;;  %v2309_v45 = vpop.permute.xlu0 %2308 }
 0x1f1   :  { %2482 = vst.msk [vmem:[#allocation3 + $0xa8] sm:$0xff] %vm2460_vm10, %v2311_v41  ;;  %2481 = vst.msk [vmem:[#allocation3 + $0xa0] sm:$0xff] %vm2460_vm10, %v2309_v45  ;;  %v2260_v4 = vsel %vm362_vm0, %v2258_v30, %v2259_v58  ;;  %v2529_v60 = vsel %vm780_vm1, %v2526_v18, %v2528_v24 }
 0x1f2   :  { %1800 = vrot.lane.b32.xlu1 %v1732_v57, %s9288_s20  ;;  %1798 = vrot.lane.b32.xlu0 %v1730_v43, %s9288_s20 }
 0x1f4   :  { %v2315_v47 = vpop.permute.xlu1 %2314  ;;  %v2313_v37 = vpop.permute.xlu0 %2312 }
 0x1f5   :  { %2484 = vst.msk [vmem:[#allocation3 + $0xb8] sm:$0xff] %vm2460_vm10, %v2315_v47  ;;  %2483 = vst.msk [vmem:[#allocation3 + $0xb0] sm:$0xff] %vm2460_vm10, %v2313_v37  ;;  %v864_v47 = vrot.slane %v84_v10, 2  ;;  %v90_v10 = vld [vmem:[%s15876_s0 + $0x1f0] sm:$0x3] }
 0x1f6   :  { %2057 = vrot.lane.b32.xlu1 %v10767_v54, %s9289_s25  ;;  %2055 = vrot.lane.b32.xlu0 %v10774_v59, %s9289_s25  ;;  %v10878_v54 = vld [vmem:[%s15876_s0 + $0x228] sm:$0xff]  ;;  %v2261_v59 = vrot.slane %v81_v44, 1  ;;  %v867_v44 = vrot.slane %v10535_v8, 2  ;;  %v456_v24 = vrot.slane %v90_v10, 1 }
 0x1f7   :  { %244 = vst.msk [vmem:[#allocation3 + $0x150] sm:$0xff] %vm201_vm3, %v10878_v54 }
 0x1f8   :  { %v2578_v48 = vpop.permute.xlu1 %2577  ;;  %v2576_v50 = vpop.permute.xlu0 %2575  ;;  %v2262_v62 = vsel %vm362_vm0, %v2259_v58, %v2261_v59  ;;  %v866_v59 = vrot.slane %v10540_v9, 2 }
 0x1f9   :  { %2749 = vst.msk [vmem:[#allocation3 + $0xa8] sm:$0xff] %vm2727_vm11, %v2578_v48  ;;  %2748 = vst.msk [vmem:[#allocation3 + $0xa0] sm:$0xff] %vm2727_vm11, %v2576_v50  ;;  %v869_v50 = vrot.slane %v87_v32, 2 }
 0x1fa   :  { %2061 = vrot.lane.b32.xlu1 %v10858_v38, %s9289_s25  ;;  %2059 = vrot.lane.b32.xlu0 %v79_v42, %s9289_s25 }
 0x1fb   :  { %v10946_v53 = vsel %vm780_vm1, %v867_v44, %v869_v50 }
 0x1fc   :  { %v574_v33 = vpop.permute.xlu1 %573  ;;  %v572_v61 = vpop.permute.xlu0 %571 }
 0x1fd   :  { %741 = vst.msk [vmem:[#allocation3 + $0xc8] sm:$0xff] %vm715_vm4, %v574_v33  ;;  %740 = vst.msk [vmem:[#allocation3 + $0xc0] sm:$0xff] %vm715_vm4, %v572_v61  ;;  %v10949_v33 = vsel %vm780_vm1, %v866_v59, %v867_v44 }
 0x1fe   :  { %2326 = vrot.lane.b32.xlu1 %v1465_v25, %s9290_s16  ;;  %2324 = vrot.lane.b32.xlu0 %v1463_v31, %s9290_s16  ;;  %v2525_v25 = vrot.slane %v79_v42, 2  ;;  %v865_v42 = vsel %vm780_vm1, %v862_v12, %v864_v47 }
 0x200   :  { %v2582_v2 = vpop.permute.xlu1 %2581  ;;  %v2813_v5 = vld [vmem:[#allocation3 + $0xa8] sm:$0xff]  ;;  %v2580_v11 = vpop.permute.xlu0 %2579  ;;  %v2812_v39 = vld [vmem:[#allocation3 + $0xa0] sm:$0xff]  ;;  %v2527_v41 = vsel %vm780_vm1, %v2525_v25, %v2526_v18 }
 0x201   :  { %2751 = vst.msk [vmem:[#allocation3 + $0xb8] sm:$0xff] %vm2727_vm11, %v2582_v2  ;;  %2750 = vst.msk [vmem:[#allocation3 + $0xb0] sm:$0xff] %vm2727_vm11, %v2580_v11  ;;  %v2866_v13 = vpack.c.bf16 %v2813_v5, %v2812_v39 }
 0x202   :  { %2330 = vrot.lane.b32.xlu1 %v2262_v62, %s9290_s16  ;;  %2328 = vrot.lane.b32.xlu0 %v2260_v4, %s9290_s16 }
 0x203   :  { %8680 = vmatprep.mubr.bf16.mxu0 %v2866_v13 }
 0x204   :  { %v578_v16 = vpop.permute.xlu1 %577  ;;  %v576_v17 = vpop.permute.xlu0 %575 }
 0x205   :  { %743 = vst.msk [vmem:[#allocation3 + $0xd8] sm:$0xff] %vm715_vm4, %v578_v16  ;;  %742 = vst.msk [vmem:[#allocation3 + $0xd0] sm:$0xff] %vm715_vm4, %v576_v17  ;;  %v10991_v16 = vld [vmem:[%s15876_s0 + $0x240] sm:$0xff] }
 0x206   :  { %2593 = vrot.lane.b32.xlu1 %v1732_v57, %s9291_s23  ;;  %2591 = vrot.lane.b32.xlu0 %v1730_v43, %s9291_s23  ;;  %v448_v43 = vrot.slane %v10540_v9, 1  ;;  %246 = vst.msk [vmem:[#allocation3 + $0x160] sm:$0xff] %vm201_vm3, %v10991_v16 }
 0x208   :  { %v992_v29 = vpop.permute.xlu1 %991  ;;  %v2815_v31 = vld [vmem:[#allocation3 + $0xb8] sm:$0xff]  ;;  %v990_v40 = vpop.permute.xlu0 %989  ;;  %v2814_v15 = vld [vmem:[#allocation3 + $0xb0] sm:$0xff]  ;;  %v10927_v38 = vsel %vm362_vm0, %v448_v43, %v449_v36 }
 0x209   :  { %1159 = vst.msk [vmem:[#allocation3 + $0xc8] sm:$0xff] %vm1133_vm5, %v992_v29  ;;  %1158 = vst.msk [vmem:[#allocation3 + $0xc0] sm:$0xff] %vm1133_vm5, %v990_v40  ;;  %v2867_v35 = vpack.c.bf16 %v2815_v31, %v2814_v15  ;;  %v453_v29 = vrot.slane %v10600_v28, 1 }
 0x20a   :  { %589 = vrot.lane.b32.xlu1 %v447_v23, %s9283_s13  ;;  %587 = vrot.lane.b32.xlu0 %v10516_v1, %s9283_s13  ;;  %v10924_v1 = vsel %vm362_vm0, %v449_v36, %v451_v56 }
 0x20b   :  { %8681 = vmatmul.mubr.bf16.gmra.mrb[20].mxu0 %v2867_v35 }
 0x20c   :  { %v996_v57 = vpop.permute.xlu1 %995  ;;  %v994_v45 = vpop.permute.xlu0 %993 }
 0x20d   :  { %1161 = vst.msk [vmem:[#allocation3 + $0xd8] sm:$0xff] %vm1133_vm5, %v996_v57  ;;  %1160 = vst.msk [vmem:[#allocation3 + $0xd0] sm:$0xff] %vm1133_vm5, %v994_v45  ;;  %v11022_v57 = vsel %vm362_vm0, %v453_v29, %v454_v49  ;;  %v872_v45 = vrot.slane %v10595_v27, 2 }
 0x20e   :  { %2597 = vrot.lane.b32.xlu1 %v2529_v60, %s9291_s23  ;;  %2595 = vrot.lane.b32.xlu0 %v2527_v41, %s9291_s23  ;;  %v11016_v60 = vsel %vm362_vm0, %v454_v49, %v456_v24 }
 0x210   :  { %v1253_v37 = vpop.permute.xlu1 %1252  ;;  %v1251_v48 = vpop.permute.xlu0 %1250 }
 0x211   :  { %1420 = vst.msk [vmem:[#allocation3 + $0xc8] sm:$0xff] %vm1394_vm6, %v1253_v37  ;;  %1419 = vst.msk [vmem:[#allocation3 + $0xc0] sm:$0xff] %vm1394_vm6, %v1251_v48  ;;  %v871_v37 = vrot.slane %v10600_v28, 2 }
 0x212   :  { %593 = vrot.lane.b32.xlu1 %v10924_v1, %s9283_s13  ;;  %591 = vrot.lane.b32.xlu0 %v10927_v38, %s9283_s13 }
 0x213   :  { %v11044_v44 = vsel %vm780_vm1, %v871_v37, %v872_v45 }
 0x214   :  { %v1257_v58 = vpop.permute.xlu1 %1256  ;;  %v1255_v30 = vpop.permute.xlu0 %1254 }
 0x215   :  { %1422 = vst.msk [vmem:[#allocation3 + $0xd8] sm:$0xff] %vm1394_vm6, %v1257_v58  ;;  %1421 = vst.msk [vmem:[#allocation3 + $0xd0] sm:$0xff] %vm1394_vm6, %v1255_v30 }
 0x216   :  { %1007 = vrot.lane.b32.xlu1 %v865_v42, %s9284_s14  ;;  %1005 = vrot.lane.b32.xlu0 %v10560_v14, %s9284_s14 }
 0x218   :  { %v1522_v12 = vpop.permute.xlu1 %1521  ;;  %v1520_v61 = vpop.permute.xlu0 %1519 }
 0x219   :  { %1689 = vst.msk [vmem:[#allocation3 + $0xc8] sm:$0xff] %vm1663_vm7, %v1522_v12  ;;  %1688 = vst.msk [vmem:[#allocation3 + $0xc0] sm:$0xff] %vm1663_vm7, %v1520_v61 }
 0x21a   :  { %1011 = vrot.lane.b32.xlu1 %v10946_v53, %s9284_s14  ;;  %1009 = vrot.lane.b32.xlu0 %v10949_v33, %s9284_s14 }
 0x21c   :  { %v1526_v62 = vpop.permute.xlu1 %1525  ;;  %v1524_v14 = vpop.permute.xlu0 %1523 }
 0x21d   :  { %1691 = vst.msk [vmem:[#allocation3 + $0xd8] sm:$0xff] %vm1663_vm7, %v1526_v62  ;;  %1690 = vst.msk [vmem:[#allocation3 + $0xd0] sm:$0xff] %vm1663_vm7, %v1524_v14  ;;  %v458_v14 = vrot.slane %v10684_v20, 1 }
 0x21e   :  { %1268 = vrot.lane.b32.xlu1 %v10535_v8, %s9286_s10  ;;  %1266 = vrot.lane.b32.xlu0 %v10540_v9, %s9286_s10  ;;  %v10963_v2 = vpop.f32.mrb[8].mxu0 }
 0x21f   :  { %v10965_v4 = vpop.f32.mrb[9].mxu0 }
 0x220   :  { %v1789_v5 = vpop.permute.xlu1 %1788  ;;  %v3248_v11 = vadd.f32 %v10826_v7, %v10965_v4  ;;  %v3318_v39 = vmul.f32 %v10965_v4, %v10965_v4  ;;  %v1787_v8 = vpop.permute.xlu0 %1786  ;;  %v10986_v7 = vld [vmem:[%s15876_s0 + $0x248] sm:$0xff] }
 0x221   :  { %1956 = vst.msk [vmem:[#allocation3 + $0xc8] sm:$0xff] %vm1930_vm8, %v1789_v5  ;;  %v10975_v13 = vpop.f32.mrb[10].mxu0  ;;  %1955 = vst.msk [vmem:[#allocation3 + $0xc0] sm:$0xff] %vm1930_vm8, %v1787_v8 }
 0x222   :  { %v10978_v9 = vpop.f32.mrb[11].mxu0  ;;  %1272 = vrot.lane.b32.xlu1 %v10595_v27, %s9286_s10  ;;  %v3381_v17 = vadd.f32 %v10830_v34, %v3318_v39  ;;  %1270 = vrot.lane.b32.xlu0 %v10600_v28, %s9286_s10  ;;  %247 = vst.msk [vmem:[#allocation3 + $0x168] sm:$0xff] %vm201_vm3, %v10986_v7  ;;  %v3320_v34 = vmul.f32 %v10963_v2, %v10963_v2 }
 0x223   :  { %v3249_v18 = vadd.f32 %v3248_v11, %v10978_v9  ;;  %v3319_v23 = vmul.f32 %v10978_v9, %v10978_v9  ;;  %v3321_v15 = vmul.f32 %v10975_v13, %v10975_v13 }
 0x224   :  { %v1793_v25 = vpop.permute.xlu1 %1792  ;;  %v1791_v40 = vpop.permute.xlu0 %1790 }
 0x225   :  { %v3250_v31 = vadd.f32 %v10963_v2, %v3249_v18  ;;  %v3382_v32 = vadd.f32 %v3381_v17, %v3319_v23  ;;  %1958 = vst.msk [vmem:[#allocation3 + $0xd8] sm:$0xff] %vm1930_vm8, %v1793_v25  ;;  %1957 = vst.msk [vmem:[#allocation3 + $0xd0] sm:$0xff] %vm1930_vm8, %v1791_v40  ;;  %v877_v25 = vrot.slane %v10679_v19, 2 }
 0x226   :  { %1537 = vrot.lane.b32.xlu1 %v10924_v1, %s9287_s17  ;;  %1535 = vrot.lane.b32.xlu0 %v10927_v38, %s9287_s17  ;;  %v874_v1 = vrot.slane %v90_v10, 2 }
 0x227   :  { %v3383_v35 = vadd.f32 %v3382_v32, %v3320_v34  ;;  %v11019_v36 = vadd.f32 %v10975_v13, %v3250_v31  ;;  %v876_v32 = vrot.slane %v10684_v20, 2 }
 0x228   :  { %v2050_v56 = vpop.permute.xlu1 %2049  ;;  %v2048_v41 = vpop.permute.xlu0 %2047  ;;  %v11041_v48 = vsel %vm780_vm1, %v872_v45, %v874_v1 }
 0x229   :  { %2217 = vst.msk [vmem:[#allocation3 + $0xc8] sm:$0xff] %vm2191_vm9, %v2050_v56  ;;  %v11025_v43 = vadd.f32 %v3383_v35, %v3321_v15  ;;  %2216 = vst.msk [vmem:[#allocation3 + $0xc0] sm:$0xff] %vm2191_vm9, %v2048_v41  ;;  %v11119_v45 = vsel %vm780_vm1, %v876_v32, %v877_v25 }
 0x22a   :  { %1541 = vrot.lane.b32.xlu1 %v11016_v60, %s9287_s17  ;;  %1539 = vrot.lane.b32.xlu0 %v11022_v57, %s9287_s17 }
 0x22c   :  { %v2054_v47 = vpop.permute.xlu1 %2053  ;;  %v2052_v38 = vpop.permute.xlu0 %2051 }
 0x22d   :  { %2219 = vst.msk [vmem:[#allocation3 + $0xd8] sm:$0xff] %vm2191_vm9, %v2054_v47  ;;  %2218 = vst.msk [vmem:[#allocation3 + $0xd0] sm:$0xff] %vm2191_vm9, %v2052_v38 }
 0x22e   :  { %1804 = vrot.lane.b32.xlu1 %v10946_v53, %s9288_s20  ;;  %1802 = vrot.lane.b32.xlu0 %v10949_v33, %s9288_s20  ;;  %v93_v53 = vld [vmem:[%s15876_s0 + $0x208] sm:$0x3]  ;;  %v459_v33 = vrot.slane %v10679_v19, 1 }
 0x22f   :  { %v461_v61 = vrot.slane %v93_v53, 1  ;;  %v879_v29 = vrot.slane %v93_v53, 2 }
 0x230   :  { %v2319_v42 = vpop.permute.xlu1 %2318  ;;  %v2317_v50 = vpop.permute.xlu0 %2316  ;;  %v11093_v39 = vsel %vm362_vm0, %v458_v14, %v459_v33 }
 0x231   :  { %2486 = vst.msk [vmem:[#allocation3 + $0xc8] sm:$0xff] %vm2460_vm10, %v2319_v42  ;;  %2485 = vst.msk [vmem:[#allocation3 + $0xc0] sm:$0xff] %vm2460_vm10, %v2317_v50  ;;  %v11090_v10 = vsel %vm362_vm0, %v459_v33, %v461_v61  ;;  %v11116_v56 = vsel %vm780_vm1, %v877_v25, %v879_v29  ;;  %v464_v61 = vrot.slane %v10795_v46, 1 }
 0x232   :  { %1808 = vrot.lane.b32.xlu1 %v11041_v48, %s9288_s20  ;;  %1806 = vrot.lane.b32.xlu0 %v11044_v44, %s9288_s20 }
 0x234   :  { %v2323_v58 = vpop.permute.xlu1 %2322  ;;  %v2321_v59 = vpop.permute.xlu0 %2320 }
 0x235   :  { %2488 = vst.msk [vmem:[#allocation3 + $0xd8] sm:$0xff] %vm2460_vm10, %v2323_v58  ;;  %2487 = vst.msk [vmem:[#allocation3 + $0xd0] sm:$0xff] %vm2460_vm10, %v2321_v59 }
 0x236   :  { %2065 = vrot.lane.b32.xlu1 %v10595_v27, %s9289_s25  ;;  %2063 = vrot.lane.b32.xlu0 %v10600_v28, %s9289_s25  ;;  %v11068_v27 = vld [vmem:[%s15876_s0 + $0x260] sm:$0xff]  ;;  %v11073_v28 = vld [vmem:[%s15876_s0 + $0x258] sm:$0xff] }
 0x237   :  { %249 = vst.msk [vmem:[#allocation3 + $0x178] sm:$0xff] %vm201_vm3, %v11068_v27  ;;  %248 = vst.msk [vmem:[#allocation3 + $0x170] sm:$0xff] %vm201_vm3, %v11073_v28 }
 0x238   :  { %v2586_v30 = vpop.permute.xlu1 %2585  ;;  %v2584_v12 = vpop.permute.xlu0 %2583 }
 0x239   :  { %2753 = vst.msk [vmem:[#allocation3 + $0xc8] sm:$0xff] %vm2727_vm11, %v2586_v30  ;;  %2752 = vst.msk [vmem:[#allocation3 + $0xc0] sm:$0xff] %vm2727_vm11, %v2584_v12  ;;  %v96_v30 = vld [vmem:[%s15876_s0 + $0x220] sm:$0x3] }
 0x23a   :  { %2069 = vrot.lane.b32.xlu1 %v10679_v19, %s9289_s25  ;;  %2067 = vrot.lane.b32.xlu0 %v10684_v20, %s9289_s25 }
 0x23c   :  { %v582_v62 = vpop.permute.xlu1 %581  ;;  %v580_v5 = vpop.permute.xlu0 %579 }
 0x23d   :  { %745 = vst.msk [vmem:[#allocation3 + $0xe8] sm:$0xff] %vm715_vm4, %v582_v62  ;;  %744 = vst.msk [vmem:[#allocation3 + $0xe0] sm:$0xff] %vm715_vm4, %v580_v5  ;;  %v11179_v62 = vld [vmem:[%s15876_s0 + $0x270] sm:$0xff] }
 0x23e   :  { %2334 = vrot.lane.b32.xlu1 %v11016_v60, %s9290_s16  ;;  %2332 = vrot.lane.b32.xlu0 %v11022_v57, %s9290_s16  ;;  %250 = vst.msk [vmem:[#allocation3 + $0x180] sm:$0xff] %vm201_vm3, %v11179_v62 }
 0x240   :  { %v2590_v11 = vpop.permute.xlu1 %2589  ;;  %v2817_v8 = vld [vmem:[#allocation3 + $0xc8] sm:$0xff]  ;;  %v2588_v49 = vpop.permute.xlu0 %2587  ;;  %v2816_v17 = vld [vmem:[#allocation3 + $0xc0] sm:$0xff] }
 0x241   :  { %2755 = vst.msk [vmem:[#allocation3 + $0xd8] sm:$0xff] %vm2727_vm11, %v2590_v11  ;;  %2754 = vst.msk [vmem:[#allocation3 + $0xd0] sm:$0xff] %vm2727_vm11, %v2588_v49  ;;  %v2868_v18 = vpack.c.bf16 %v2817_v8, %v2816_v17  ;;  %v466_v8 = vrot.slane %v96_v30, 1  ;;  %v463_v17 = vrot.slane %v10800_v3, 1 }
 0x242   :  { %2338 = vrot.lane.b32.xlu1 %v11090_v10, %s9290_s16  ;;  %2336 = vrot.lane.b32.xlu0 %v11093_v39, %s9290_s16 }
 0x243   :  { %8684 = vmatprep.mubr.bf16.mxu0 %v2868_v18 }
 0x244   :  { %v586_v23 = vpop.permute.xlu1 %585  ;;  %v584_v24 = vpop.permute.xlu0 %583 }
 0x245   :  { %747 = vst.msk [vmem:[#allocation3 + $0xf8] sm:$0xff] %vm715_vm4, %v586_v23  ;;  %746 = vst.msk [vmem:[#allocation3 + $0xf0] sm:$0xff] %vm715_vm4, %v584_v24 }
 0x246   :  { %2601 = vrot.lane.b32.xlu1 %v11041_v48, %s9291_s23  ;;  %2599 = vrot.lane.b32.xlu0 %v11044_v44, %s9291_s23 }
 0x248   :  { %v1000_v34 = vpop.permute.xlu1 %999  ;;  %v2819_v31 = vld [vmem:[#allocation3 + $0xd8] sm:$0xff]  ;;  %v998_v40 = vpop.permute.xlu0 %997  ;;  %v2818_v15 = vld [vmem:[#allocation3 + $0xd0] sm:$0xff] }
 0x249   :  { %1163 = vst.msk [vmem:[#allocation3 + $0xe8] sm:$0xff] %vm1133_vm5, %v1000_v34  ;;  %1162 = vst.msk [vmem:[#allocation3 + $0xe0] sm:$0xff] %vm1133_vm5, %v998_v40  ;;  %v2869_v35 = vpack.c.bf16 %v2819_v31, %v2818_v15  ;;  %v11204_v34 = vsel %vm362_vm0, %v464_v61, %v466_v8  ;;  %v11210_v40 = vsel %vm362_vm0, %v463_v17, %v464_v61 }
 0x24a   :  { %597 = vrot.lane.b32.xlu1 %v11016_v60, %s9283_s13  ;;  %595 = vrot.lane.b32.xlu0 %v11022_v57, %s9283_s13 }
 0x24b   :  { %8685 = vmatmul.mubr.bf16.gmra.mrb[24].mxu0 %v2869_v35  ;;  %v884_v35 = vrot.slane %v96_v30, 2 }
 0x24c   :  { %v1004_v41 = vpop.permute.xlu1 %1003  ;;  %v1002_v1 = vpop.permute.xlu0 %1001 }
 0x24d   :  { %1165 = vst.msk [vmem:[#allocation3 + $0xf8] sm:$0xff] %vm1133_vm5, %v1004_v41  ;;  %1164 = vst.msk [vmem:[#allocation3 + $0xf0] sm:$0xff] %vm1133_vm5, %v1002_v1  ;;  %v881_v1 = vrot.slane %v10800_v3, 2 }
 0x24e   :  { %2605 = vrot.lane.b32.xlu1 %v11116_v56, %s9291_s23  ;;  %2603 = vrot.lane.b32.xlu0 %v11119_v45, %s9291_s23 }
 0x250   :  { %v1261_v60 = vpop.permute.xlu1 %1260  ;;  %v1259_v57 = vpop.permute.xlu0 %1258 }
 0x251   :  { %1424 = vst.msk [vmem:[#allocation3 + $0xe8] sm:$0xff] %vm1394_vm6, %v1261_v60  ;;  %1423 = vst.msk [vmem:[#allocation3 + $0xe0] sm:$0xff] %vm1394_vm6, %v1259_v57 }
 0x252   :  { %601 = vrot.lane.b32.xlu1 %v11090_v10, %s9283_s13  ;;  %599 = vrot.lane.b32.xlu0 %v11093_v39, %s9283_s13 }
 0x254   :  { %v1265_v47 = vpop.permute.xlu1 %1264  ;;  %v1263_v37 = vpop.permute.xlu0 %1262 }
 0x255   :  { %1426 = vst.msk [vmem:[#allocation3 + $0xf8] sm:$0xff] %vm1394_vm6, %v1265_v47  ;;  %1425 = vst.msk [vmem:[#allocation3 + $0xf0] sm:$0xff] %vm1394_vm6, %v1263_v37 }
 0x256   :  { %1015 = vrot.lane.b32.xlu1 %v11041_v48, %s9284_s14  ;;  %1013 = vrot.lane.b32.xlu0 %v11044_v44, %s9284_s14 }
 0x258   :  { %v1530_v38 = vpop.permute.xlu1 %1529  ;;  %v1528_v42 = vpop.permute.xlu0 %1527 }
 0x259   :  { %1693 = vst.msk [vmem:[#allocation3 + $0xe8] sm:$0xff] %vm1663_vm7, %v1530_v38  ;;  %1692 = vst.msk [vmem:[#allocation3 + $0xe0] sm:$0xff] %vm1663_vm7, %v1528_v42 }
 0x25a   :  { %1019 = vrot.lane.b32.xlu1 %v11116_v56, %s9284_s14  ;;  %1017 = vrot.lane.b32.xlu0 %v11119_v45, %s9284_s14 }
 0x25c   :  { %v1534_v50 = vpop.permute.xlu1 %1533  ;;  %v1532_v58 = vpop.permute.xlu0 %1531 }
 0x25d   :  { %1695 = vst.msk [vmem:[#allocation3 + $0xf8] sm:$0xff] %vm1663_vm7, %v1534_v50  ;;  %1694 = vst.msk [vmem:[#allocation3 + $0xf0] sm:$0xff] %vm1663_vm7, %v1532_v58  ;;  %v99_v50 = vld [vmem:[%s15876_s0 + $0x238] sm:$0x3] }
 0x25e   :  { %1276 = vrot.lane.b32.xlu1 %v10679_v19, %s9286_s10  ;;  %1274 = vrot.lane.b32.xlu0 %v10684_v20, %s9286_s10  ;;  %v11151_v48 = vpop.f32.mrb[12].mxu0  ;;  %v471_v30 = vrot.slane %v99_v50, 1 }
 0x25f   :  { %v11153_v44 = vpop.f32.mrb[13].mxu0 }
 0x260   :  { %v1797_v59 = vpop.permute.xlu1 %1796  ;;  %v3252_v53 = vadd.f32 %v11019_v36, %v11153_v44  ;;  %v3322_v12 = vmul.f32 %v11153_v44, %v11153_v44  ;;  %v1795_v19 = vpop.permute.xlu0 %1794  ;;  %v11174_v36 = vld [vmem:[%s15876_s0 + $0x278] sm:$0xff] }
 0x261   :  { %1960 = vst.msk [vmem:[#allocation3 + $0xe8] sm:$0xff] %vm1930_vm8, %v1797_v59  ;;  %v11163_v33 = vpop.f32.mrb[14].mxu0  ;;  %1959 = vst.msk [vmem:[#allocation3 + $0xe0] sm:$0xff] %vm1930_vm8, %v1795_v19  ;;  %v469_v59 = vrot.slane %v10873_v51, 1 }
 0x262   :  { %v11166_v20 = vpop.f32.mrb[15].mxu0  ;;  %1280 = vrot.lane.b32.xlu1 %v10795_v46, %s9286_s10  ;;  %v3385_v14 = vadd.f32 %v11025_v43, %v3322_v12  ;;  %1278 = vrot.lane.b32.xlu0 %v10800_v3, %s9286_s10  ;;  %251 = vst.msk [vmem:[#allocation3 + $0x188] sm:$0xff] %vm201_vm3, %v11174_v36  ;;  %v3324_v43 = vmul.f32 %v11151_v48, %v11151_v48  ;;  %v468_v12 = vrot.slane %v10878_v54, 1 }
 0x263   :  { %v3253_v5 = vadd.f32 %v3252_v53, %v11166_v20  ;;  %v3323_v11 = vmul.f32 %v11166_v20, %v11166_v20  ;;  %v3325_v25 = vmul.f32 %v11163_v33, %v11163_v33  ;;  %v11278_v61 = vsel %vm362_vm0, %v469_v59, %v471_v30  ;;  %v102_v30 = vld [vmem:[%s15876_s0 + $0x250] sm:$0x3] }
 0x264   :  { %v1801_v49 = vpop.permute.xlu1 %1800  ;;  %v1799_v24 = vpop.permute.xlu0 %1798 }
 0x265   :  { %v3254_v18 = vadd.f32 %v11151_v48, %v3253_v5  ;;  %v3386_v23 = vadd.f32 %v3385_v14, %v3323_v11  ;;  %1962 = vst.msk [vmem:[#allocation3 + $0xf8] sm:$0xff] %vm1930_vm8, %v1801_v49  ;;  %1961 = vst.msk [vmem:[#allocation3 + $0xf0] sm:$0xff] %vm1930_vm8, %v1799_v24  ;;  %v11281_v5 = vsel %vm362_vm0, %v468_v12, %v469_v59  ;;  %v889_v24 = vrot.slane %v99_v50, 2 }
 0x266   :  { %1545 = vrot.lane.b32.xlu1 %v11090_v10, %s9287_s17  ;;  %1543 = vrot.lane.b32.xlu0 %v11093_v39, %s9287_s17  ;;  %v882_v39 = vrot.slane %v10795_v46, 2 }
 0x267   :  { %v3387_v29 = vadd.f32 %v3386_v23, %v3324_v43  ;;  %v11207_v31 = vadd.f32 %v11163_v33, %v3254_v18  ;;  %v887_v23 = vrot.slane %v10873_v51, 2 }
 0x268   :  { %v2058_v32 = vpop.permute.xlu1 %2057  ;;  %v2056_v10 = vpop.permute.xlu0 %2055  ;;  %v11229_v57 = vsel %vm780_vm1, %v882_v39, %v884_v35  ;;  %v11232_v37 = vsel %vm780_vm1, %v881_v1, %v882_v39 }
 0x269   :  { %2221 = vst.msk [vmem:[#allocation3 + $0xe8] sm:$0xff] %vm2191_vm9, %v2058_v32  ;;  %v11213_v15 = vadd.f32 %v3387_v29, %v3325_v25  ;;  %2220 = vst.msk [vmem:[#allocation3 + $0xe0] sm:$0xff] %vm2191_vm9, %v2056_v10  ;;  %v886_v32 = vrot.slane %v10878_v54, 2 }
 0x26a   :  { %1549 = vrot.lane.b32.xlu1 %v11204_v34, %s9287_s17  ;;  %1547 = vrot.lane.b32.xlu0 %v11210_v40, %s9287_s17 }
 0x26c   :  { %v2062_v41 = vpop.permute.xlu1 %2061  ;;  %v2060_v60 = vpop.permute.xlu0 %2059 }
 0x26d   :  { %2223 = vst.msk [vmem:[#allocation3 + $0xf8] sm:$0xff] %vm2191_vm9, %v2062_v41  ;;  %2222 = vst.msk [vmem:[#allocation3 + $0xf0] sm:$0xff] %vm2191_vm9, %v2060_v60  ;;  %v11304_v41 = vsel %vm780_vm1, %v887_v23, %v889_v24  ;;  %v11307_v60 = vsel %vm780_vm1, %v886_v32, %v887_v23  ;;  %v473_v23 = vrot.slane %v10991_v16, 1 }
 0x26e   :  { %1812 = vrot.lane.b32.xlu1 %v11116_v56, %s9288_s20  ;;  %1810 = vrot.lane.b32.xlu0 %v11119_v45, %s9288_s20 }
 0x270   :  { %v2327_v47 = vpop.permute.xlu1 %2326  ;;  %v2325_v38 = vpop.permute.xlu0 %2324 }
 0x271   :  { %2490 = vst.msk [vmem:[#allocation3 + $0xe8] sm:$0xff] %vm2460_vm10, %v2327_v47  ;;  %2489 = vst.msk [vmem:[#allocation3 + $0xe0] sm:$0xff] %vm2460_vm10, %v2325_v38 }
 0x272   :  { %1816 = vrot.lane.b32.xlu1 %v11229_v57, %s9288_s20  ;;  %1814 = vrot.lane.b32.xlu0 %v11232_v37, %s9288_s20 }
 0x274   :  { %v2331_v56 = vpop.permute.xlu1 %2330  ;;  %v2329_v45 = vpop.permute.xlu0 %2328 }
 0x275   :  { %2492 = vst.msk [vmem:[#allocation3 + $0xf8] sm:$0xff] %vm2460_vm10, %v2331_v56  ;;  %2491 = vst.msk [vmem:[#allocation3 + $0xf0] sm:$0xff] %vm2460_vm10, %v2329_v45 }
 0x276   :  { %2073 = vrot.lane.b32.xlu1 %v10795_v46, %s9289_s25  ;;  %2071 = vrot.lane.b32.xlu0 %v10800_v3, %s9289_s25  ;;  %v11256_v46 = vld [vmem:[%s15876_s0 + $0x290] sm:$0xff]  ;;  %v11261_v3 = vld [vmem:[%s15876_s0 + $0x288] sm:$0xff] }
 0x277   :  { %253 = vst.msk [vmem:[#allocation3 + $0x198] sm:$0xff] %vm201_vm3, %v11256_v46  ;;  %252 = vst.msk [vmem:[#allocation3 + $0x190] sm:$0xff] %vm201_vm3, %v11261_v3 }
 0x278   :  { %v2594_v42 = vpop.permute.xlu1 %2593  ;;  %v2592_v58 = vpop.permute.xlu0 %2591 }
 0x279   :  { %2757 = vst.msk [vmem:[#allocation3 + $0xe8] sm:$0xff] %vm2727_vm11, %v2594_v42  ;;  %2756 = vst.msk [vmem:[#allocation3 + $0xe0] sm:$0xff] %vm2727_vm11, %v2592_v58 }
 0x27a   :  { %2077 = vrot.lane.b32.xlu1 %v10873_v51, %s9289_s25  ;;  %2075 = vrot.lane.b32.xlu0 %v10878_v54, %s9289_s25 }
 0x27c   :  { %v590_v53 = vpop.permute.xlu1 %589  ;;  %v588_v19 = vpop.permute.xlu0 %587 }
 0x27d   :  { %749 = vst.msk [vmem:[#allocation3 + $0x108] sm:$0xff] %vm715_vm4, %v590_v53  ;;  %748 = vst.msk [vmem:[#allocation3 + $0x100] sm:$0xff] %vm715_vm4, %v588_v19 }
 0x27e   :  { %2342 = vrot.lane.b32.xlu1 %v11204_v34, %s9290_s16  ;;  %2340 = vrot.lane.b32.xlu0 %v11210_v40, %s9290_s16 }
 0x280   :  { %v2598_v14 = vpop.permute.xlu1 %2597  ;;  %v2821_v11 = vld [vmem:[#allocation3 + $0xe8] sm:$0xff]  ;;  %v2596_v8 = vpop.permute.xlu0 %2595  ;;  %v2820_v49 = vld [vmem:[#allocation3 + $0xe0] sm:$0xff] }
 0x281   :  { %2759 = vst.msk [vmem:[#allocation3 + $0xf8] sm:$0xff] %vm2727_vm11, %v2598_v14  ;;  %2758 = vst.msk [vmem:[#allocation3 + $0xf0] sm:$0xff] %vm2727_vm11, %v2596_v8  ;;  %v2870_v17 = vpack.c.bf16 %v2821_v11, %v2820_v49  ;;  %v474_v14 = vrot.slane %v10986_v7, 1  ;;  %v11367_v11 = vld [vmem:[%s15876_s0 + $0x2a0] sm:$0xff] }
 0x282   :  { %2346 = vrot.lane.b32.xlu1 %v11278_v61, %s9290_s16  ;;  %2344 = vrot.lane.b32.xlu0 %v11281_v5, %s9290_s16  ;;  %254 = vst.msk [vmem:[#allocation3 + $0x1a0] sm:$0xff] %vm201_vm3, %v11367_v11 }
 0x283   :  { %8688 = vmatprep.mubr.bf16.mxu0 %v2870_v17 }
 0x284   :  { %v594_v43 = vpop.permute.xlu1 %593  ;;  %v592_v18 = vpop.permute.xlu0 %591 }
 0x285   :  { %751 = vst.msk [vmem:[#allocation3 + $0x118] sm:$0xff] %vm715_vm4, %v594_v43  ;;  %750 = vst.msk [vmem:[#allocation3 + $0x110] sm:$0xff] %vm715_vm4, %v592_v18  ;;  %v476_v43 = vrot.slane %v102_v30, 1 }
 0x286   :  { %2609 = vrot.lane.b32.xlu1 %v11229_v57, %s9291_s23  ;;  %2607 = vrot.lane.b32.xlu0 %v11232_v37, %s9291_s23 }
 0x288   :  { %v1008_v25 = vpop.permute.xlu1 %1007  ;;  %v2823_v29 = vld [vmem:[#allocation3 + $0xf8] sm:$0xff]  ;;  %v1006_v10 = vpop.permute.xlu0 %1005  ;;  %v2822_v39 = vld [vmem:[#allocation3 + $0xf0] sm:$0xff] }
 0x289   :  { %1167 = vst.msk [vmem:[#allocation3 + $0x108] sm:$0xff] %vm1133_vm5, %v1008_v25  ;;  %1166 = vst.msk [vmem:[#allocation3 + $0x100] sm:$0xff] %vm1133_vm5, %v1006_v10  ;;  %v2871_v35 = vpack.c.bf16 %v2823_v29, %v2822_v39  ;;  %v11392_v39 = vsel %vm362_vm0, %v474_v14, %v476_v43 }
 0x28a   :  { %605 = vrot.lane.b32.xlu1 %v11204_v34, %s9283_s13  ;;  %603 = vrot.lane.b32.xlu0 %v11210_v40, %s9283_s13 }
 0x28b   :  { %8689 = vmatmul.mubr.bf16.gmra.mrb[28].mxu0 %v2871_v35 }
 0x28c   :  { %v1012_v1 = vpop.permute.xlu1 %1011  ;;  %v1010_v47 = vpop.permute.xlu0 %1009 }
 0x28d   :  { %1169 = vst.msk [vmem:[#allocation3 + $0x118] sm:$0xff] %vm1133_vm5, %v1012_v1  ;;  %1168 = vst.msk [vmem:[#allocation3 + $0x110] sm:$0xff] %vm1133_vm5, %v1010_v47  ;;  %v11398_v47 = vsel %vm362_vm0, %v473_v23, %v474_v14 }
 0x28e   :  { %2613 = vrot.lane.b32.xlu1 %v11304_v41, %s9291_s23  ;;  %2611 = vrot.lane.b32.xlu0 %v11307_v60, %s9291_s23 }
 0x290   :  { %v1269_v34 = vpop.permute.xlu1 %1268  ;;  %v1267_v40 = vpop.permute.xlu0 %1266 }
 0x291   :  { %1428 = vst.msk [vmem:[#allocation3 + $0x108] sm:$0xff] %vm1394_vm6, %v1269_v34  ;;  %1427 = vst.msk [vmem:[#allocation3 + $0x100] sm:$0xff] %vm1394_vm6, %v1267_v40  ;;  %v894_v40 = vrot.slane %v102_v30, 2 }
 0x292   :  { %609 = vrot.lane.b32.xlu1 %v11278_v61, %s9283_s13  ;;  %607 = vrot.lane.b32.xlu0 %v11281_v5, %s9283_s13 }
 0x294   :  { %v1273_v38 = vpop.permute.xlu1 %1272  ;;  %v1271_v56 = vpop.permute.xlu0 %1270 }
 0x295   :  { %1430 = vst.msk [vmem:[#allocation3 + $0x118] sm:$0xff] %vm1394_vm6, %v1273_v38  ;;  %1429 = vst.msk [vmem:[#allocation3 + $0x110] sm:$0xff] %vm1394_vm6, %v1271_v56  ;;  %v891_v56 = vrot.slane %v10991_v16, 2 }
 0x296   :  { %1023 = vrot.lane.b32.xlu1 %v11229_v57, %s9284_s14  ;;  %1021 = vrot.lane.b32.xlu0 %v11232_v37, %s9284_s14 }
 0x298   :  { %v1538_v45 = vpop.permute.xlu1 %1537  ;;  %v1536_v42 = vpop.permute.xlu0 %1535 }
 0x299   :  { %1697 = vst.msk [vmem:[#allocation3 + $0x108] sm:$0xff] %vm1663_vm7, %v1538_v45  ;;  %1696 = vst.msk [vmem:[#allocation3 + $0x100] sm:$0xff] %vm1663_vm7, %v1536_v42 }
 0x29a   :  { %1027 = vrot.lane.b32.xlu1 %v11304_v41, %s9284_s14  ;;  %1025 = vrot.lane.b32.xlu0 %v11307_v60, %s9284_s14 }
 0x29c   :  { %v1542_v50 = vpop.permute.xlu1 %1541  ;;  %v1540_v58 = vpop.permute.xlu0 %1539 }
 0x29d   :  { %1699 = vst.msk [vmem:[#allocation3 + $0x118] sm:$0xff] %vm1663_vm7, %v1542_v50  ;;  %1698 = vst.msk [vmem:[#allocation3 + $0x110] sm:$0xff] %vm1663_vm7, %v1540_v58 }
 0x29e   :  { %1284 = vrot.lane.b32.xlu1 %v10873_v51, %s9286_s10  ;;  %1282 = vrot.lane.b32.xlu0 %v10878_v54, %s9286_s10  ;;  %v11339_v57 = vpop.f32.mrb[16].mxu0 }
 0x29f   :  { %v11341_v37 = vpop.f32.mrb[17].mxu0 }
 0x2a0   :  { %v1805_v59 = vpop.permute.xlu1 %1804  ;;  %v3256_v53 = vadd.f32 %v11207_v31, %v11341_v37  ;;  %v3326_v12 = vmul.f32 %v11341_v37, %v11341_v37  ;;  %v1803_v51 = vpop.permute.xlu0 %1802  ;;  %v11362_v31 = vld [vmem:[%s15876_s0 + $0x2a8] sm:$0xff] }
 0x2a1   :  { %1964 = vst.msk [vmem:[#allocation3 + $0x108] sm:$0xff] %vm1930_vm8, %v1805_v59  ;;  %v11351_v19 = vpop.f32.mrb[18].mxu0  ;;  %1963 = vst.msk [vmem:[#allocation3 + $0x100] sm:$0xff] %vm1930_vm8, %v1803_v51  ;;  %v479_v51 = vrot.slane %v11068_v27, 1 }
 0x2a2   :  { %v11354_v54 = vpop.f32.mrb[19].mxu0  ;;  %1288 = vrot.lane.b32.xlu1 %v10986_v7, %s9286_s10  ;;  %v3389_v8 = vadd.f32 %v11213_v15, %v3326_v12  ;;  %1286 = vrot.lane.b32.xlu0 %v10991_v16, %s9286_s10  ;;  %255 = vst.msk [vmem:[#allocation3 + $0x1a8] sm:$0xff] %vm201_vm3, %v11362_v31  ;;  %v3328_v15 = vmul.f32 %v11339_v57, %v11339_v57 }
 0x2a3   :  { %v3257_v49 = vadd.f32 %v3256_v53, %v11354_v54  ;;  %v3327_v17 = vmul.f32 %v11354_v54, %v11354_v54  ;;  %v3329_v32 = vmul.f32 %v11351_v19, %v11351_v19  ;;  %v105_v53 = vld [vmem:[%s15876_s0 + $0x268] sm:$0x3] }
 0x2a4   :  { %v1809_v18 = vpop.permute.xlu1 %1808  ;;  %v1807_v29 = vpop.permute.xlu0 %1806  ;;  %v481_v14 = vrot.slane %v105_v53, 1 }
 0x2a5   :  { %v3258_v24 = vadd.f32 %v11339_v57, %v3257_v49  ;;  %v3390_v25 = vadd.f32 %v3389_v8, %v3327_v17  ;;  %1966 = vst.msk [vmem:[#allocation3 + $0x118] sm:$0xff] %vm1930_vm8, %v1809_v18  ;;  %1965 = vst.msk [vmem:[#allocation3 + $0x110] sm:$0xff] %vm1930_vm8, %v1807_v29  ;;  %v478_v49 = vrot.slane %v11073_v28, 1 }
 0x2a6   :  { %1553 = vrot.lane.b32.xlu1 %v11278_v61, %s9287_s17  ;;  %1551 = vrot.lane.b32.xlu0 %v11281_v5, %s9287_s17  ;;  %v892_v5 = vrot.slane %v10986_v7, 2  ;;  %v11466_v43 = vsel %vm362_vm0, %v479_v51, %v481_v14 }
 0x2a7   :  { %v3391_v10 = vadd.f32 %v3390_v25, %v3328_v15  ;;  %v11395_v35 = vadd.f32 %v11351_v19, %v3258_v24  ;;  %v11469_v23 = vsel %vm362_vm0, %v478_v49, %v479_v51 }
 0x2a8   :  { %v2066_v1 = vpop.permute.xlu1 %2065  ;;  %v2064_v61 = vpop.permute.xlu0 %2063  ;;  %v11417_v42 = vsel %vm780_vm1, %v892_v5, %v894_v40  ;;  %v11420_v58 = vsel %vm780_vm1, %v891_v56, %v892_v5 }
 0x2a9   :  { %2225 = vst.msk [vmem:[#allocation3 + $0x108] sm:$0xff] %vm2191_vm9, %v2066_v1  ;;  %v11401_v34 = vadd.f32 %v3391_v10, %v3329_v32  ;;  %2224 = vst.msk [vmem:[#allocation3 + $0x100] sm:$0xff] %vm2191_vm9, %v2064_v61  ;;  %v897_v1 = vrot.slane %v11068_v27, 2  ;;  %v899_v61 = vrot.slane %v105_v53, 2 }
 0x2aa   :  { %1557 = vrot.lane.b32.xlu1 %v11392_v39, %s9287_s17  ;;  %1555 = vrot.lane.b32.xlu0 %v11398_v47, %s9287_s17 }
 0x2ac   :  { %v2070_v38 = vpop.permute.xlu1 %2069  ;;  %v2068_v45 = vpop.permute.xlu0 %2067 }
 0x2ad   :  { %2227 = vst.msk [vmem:[#allocation3 + $0x118] sm:$0xff] %vm2191_vm9, %v2070_v38  ;;  %2226 = vst.msk [vmem:[#allocation3 + $0x110] sm:$0xff] %vm2191_vm9, %v2068_v45  ;;  %v896_v38 = vrot.slane %v11073_v28, 2 }
 0x2ae   :  { %1820 = vrot.lane.b32.xlu1 %v11304_v41, %s9288_s20  ;;  %1818 = vrot.lane.b32.xlu0 %v11307_v60, %s9288_s20 }
 0x2b0   :  { %v2335_v50 = vpop.permute.xlu1 %2334  ;;  %v2333_v59 = vpop.permute.xlu0 %2332 }
 0x2b1   :  { %2494 = vst.msk [vmem:[#allocation3 + $0x108] sm:$0xff] %vm2460_vm10, %v2335_v50  ;;  %2493 = vst.msk [vmem:[#allocation3 + $0x100] sm:$0xff] %vm2460_vm10, %v2333_v59  ;;  %v11492_v59 = vsel %vm780_vm1, %v897_v1, %v899_v61 }
 0x2b2   :  { %1824 = vrot.lane.b32.xlu1 %v11417_v42, %s9288_s20  ;;  %1822 = vrot.lane.b32.xlu0 %v11420_v58, %s9288_s20 }
 0x2b4   :  { %v2339_v41 = vpop.permute.xlu1 %2338  ;;  %v2337_v60 = vpop.permute.xlu0 %2336 }
 0x2b5   :  { %2496 = vst.msk [vmem:[#allocation3 + $0x118] sm:$0xff] %vm2460_vm10, %v2339_v41  ;;  %2495 = vst.msk [vmem:[#allocation3 + $0x110] sm:$0xff] %vm2460_vm10, %v2337_v60  ;;  %v11495_v60 = vsel %vm780_vm1, %v896_v38, %v897_v1  ;;  %v483_v38 = vrot.slane %v11179_v62, 1 }
 0x2b6   :  { %2081 = vrot.lane.b32.xlu1 %v10986_v7, %s9289_s25  ;;  %2079 = vrot.lane.b32.xlu0 %v10991_v16, %s9289_s25  ;;  %v11444_v7 = vld [vmem:[%s15876_s0 + $0x2c0] sm:$0xff]  ;;  %v11449_v16 = vld [vmem:[%s15876_s0 + $0x2b8] sm:$0xff] }
 0x2b7   :  { %257 = vst.msk [vmem:[#allocation3 + $0x1b8] sm:$0xff] %vm201_vm3, %v11444_v7  ;;  %256 = vst.msk [vmem:[#allocation3 + $0x1b0] sm:$0xff] %vm201_vm3, %v11449_v16 }
 0x2b8   :  { %v2602_v30 = vpop.permute.xlu1 %2601  ;;  %v2600_v12 = vpop.permute.xlu0 %2599 }
 0x2b9   :  { %2761 = vst.msk [vmem:[#allocation3 + $0x108] sm:$0xff] %vm2727_vm11, %v2602_v30  ;;  %2760 = vst.msk [vmem:[#allocation3 + $0x100] sm:$0xff] %vm2727_vm11, %v2600_v12 }
 0x2ba   :  { %2085 = vrot.lane.b32.xlu1 %v11068_v27, %s9289_s25  ;;  %2083 = vrot.lane.b32.xlu0 %v11073_v28, %s9289_s25 }
 0x2bc   :  { %v598_v8 = vpop.permute.xlu1 %597  ;;  %v596_v17 = vpop.permute.xlu0 %595 }
 0x2bd   :  { %753 = vst.msk [vmem:[#allocation3 + $0x128] sm:$0xff] %vm715_vm4, %v598_v8  ;;  %752 = vst.msk [vmem:[#allocation3 + $0x120] sm:$0xff] %vm715_vm4, %v596_v17 }
 0x2be   :  { %2350 = vrot.lane.b32.xlu1 %v11392_v39, %s9290_s16  ;;  %2348 = vrot.lane.b32.xlu0 %v11398_v47, %s9290_s16 }
 0x2c0   :  { %v2606_v18 = vpop.permute.xlu1 %2605  ;;  %v2825_v15 = vld [vmem:[#allocation3 + $0x108] sm:$0xff]  ;;  %v2604_v24 = vpop.permute.xlu0 %2603  ;;  %v2824_v25 = vld [vmem:[#allocation3 + $0x100] sm:$0xff] }
 0x2c1   :  { %2763 = vst.msk [vmem:[#allocation3 + $0x118] sm:$0xff] %vm2727_vm11, %v2606_v18  ;;  %2762 = vst.msk [vmem:[#allocation3 + $0x110] sm:$0xff] %vm2727_vm11, %v2604_v24  ;;  %v2872_v29 = vpack.c.bf16 %v2825_v15, %v2824_v25  ;;  %v108_v18 = vld [vmem:[%s15876_s0 + $0x280] sm:$0x3] }
 0x2c2   :  { %2354 = vrot.lane.b32.xlu1 %v11466_v43, %s9290_s16  ;;  %2352 = vrot.lane.b32.xlu0 %v11469_v23, %s9290_s16 }
 0x2c3   :  { %8692 = vmatprep.mubr.bf16.mxu0 %v2872_v29  ;;  %v484_v29 = vrot.slane %v11174_v36, 1 }
 0x2c4   :  { %v602_v32 = vpop.permute.xlu1 %601  ;;  %v600_v10 = vpop.permute.xlu0 %599 }
 0x2c5   :  { %755 = vst.msk [vmem:[#allocation3 + $0x138] sm:$0xff] %vm715_vm4, %v602_v32  ;;  %754 = vst.msk [vmem:[#allocation3 + $0x130] sm:$0xff] %vm715_vm4, %v600_v10  ;;  %v11555_v32 = vld [vmem:[%s15876_s0 + $0x2d0] sm:$0xff] }
 0x2c6   :  { %2617 = vrot.lane.b32.xlu1 %v11417_v42, %s9291_s23  ;;  %2615 = vrot.lane.b32.xlu0 %v11420_v58, %s9291_s23  ;;  %258 = vst.msk [vmem:[#allocation3 + $0x1c0] sm:$0xff] %vm201_vm3, %v11555_v32 }
 0x2c8   :  { %v1016_v5 = vpop.permute.xlu1 %1015  ;;  %v2827_v40 = vld [vmem:[#allocation3 + $0x118] sm:$0xff]  ;;  %v1014_v56 = vpop.permute.xlu0 %1013  ;;  %v2826_v45 = vld [vmem:[#allocation3 + $0x110] sm:$0xff] }
 0x2c9   :  { %1171 = vst.msk [vmem:[#allocation3 + $0x128] sm:$0xff] %vm1133_vm5, %v1016_v5  ;;  %1170 = vst.msk [vmem:[#allocation3 + $0x120] sm:$0xff] %vm1133_vm5, %v1014_v56  ;;  %v2873_v50 = vpack.c.bf16 %v2827_v40, %v2826_v45  ;;  %v486_v5 = vrot.slane %v108_v18, 1 }
 0x2ca   :  { %613 = vrot.lane.b32.xlu1 %v11392_v39, %s9283_s13  ;;  %611 = vrot.lane.b32.xlu0 %v11398_v47, %s9283_s13 }
 0x2cb   :  { %8693 = vmatmul.mubr.bf16.gmra.mrb[32].mxu0 %v2873_v50 }
 0x2cc   :  { %v1020_v41 = vpop.permute.xlu1 %1019  ;;  %v1018_v30 = vpop.permute.xlu0 %1017 }
 0x2cd   :  { %1173 = vst.msk [vmem:[#allocation3 + $0x138] sm:$0xff] %vm1133_vm5, %v1020_v41  ;;  %1172 = vst.msk [vmem:[#allocation3 + $0x130] sm:$0xff] %vm1133_vm5, %v1018_v30 }
 0x2ce   :  { %2621 = vrot.lane.b32.xlu1 %v11492_v59, %s9291_s23  ;;  %2619 = vrot.lane.b32.xlu0 %v11495_v60, %s9291_s23 }
 0x2d0   :  { %v1277_v39 = vpop.permute.xlu1 %1276  ;;  %v1275_v47 = vpop.permute.xlu0 %1274 }
 0x2d1   :  { %1432 = vst.msk [vmem:[#allocation3 + $0x128] sm:$0xff] %vm1394_vm6, %v1277_v39  ;;  %1431 = vst.msk [vmem:[#allocation3 + $0x120] sm:$0xff] %vm1394_vm6, %v1275_v47  ;;  %v11580_v39 = vsel %vm362_vm0, %v484_v29, %v486_v5 }
 0x2d2   :  { %617 = vrot.lane.b32.xlu1 %v11466_v43, %s9283_s13  ;;  %615 = vrot.lane.b32.xlu0 %v11469_v23, %s9283_s13 }
 0x2d4   :  { %v1281_v53 = vpop.permute.xlu1 %1280  ;;  %v1279_v12 = vpop.permute.xlu0 %1278 }
 0x2d5   :  { %1434 = vst.msk [vmem:[#allocation3 + $0x138] sm:$0xff] %vm1394_vm6, %v1281_v53  ;;  %1433 = vst.msk [vmem:[#allocation3 + $0x130] sm:$0xff] %vm1394_vm6, %v1279_v12  ;;  %v11586_v12 = vsel %vm362_vm0, %v483_v38, %v484_v29  ;;  %v488_v38 = vrot.slane %v11261_v3, 1 }
 0x2d6   :  { %1031 = vrot.lane.b32.xlu1 %v11417_v42, %s9284_s14  ;;  %1029 = vrot.lane.b32.xlu0 %v11420_v58, %s9284_s14 }
 0x2d8   :  { %v1546_v51 = vpop.permute.xlu1 %1545  ;;  %v1544_v14 = vpop.permute.xlu0 %1543 }
 0x2d9   :  { %1701 = vst.msk [vmem:[#allocation3 + $0x128] sm:$0xff] %vm1663_vm7, %v1546_v51  ;;  %1700 = vst.msk [vmem:[#allocation3 + $0x120] sm:$0xff] %vm1663_vm7, %v1544_v14  ;;  %v904_v14 = vrot.slane %v108_v18, 2 }
 0x2da   :  { %1035 = vrot.lane.b32.xlu1 %v11492_v59, %s9284_s14  ;;  %1033 = vrot.lane.b32.xlu0 %v11495_v60, %s9284_s14 }
 0x2dc   :  { %v1550_v8 = vpop.permute.xlu1 %1549  ;;  %v1548_v49 = vpop.permute.xlu0 %1547 }
 0x2dd   :  { %1703 = vst.msk [vmem:[#allocation3 + $0x138] sm:$0xff] %vm1663_vm7, %v1550_v8  ;;  %1702 = vst.msk [vmem:[#allocation3 + $0x130] sm:$0xff] %vm1663_vm7, %v1548_v49  ;;  %v901_v49 = vrot.slane %v11179_v62, 2 }
 0x2de   :  { %1292 = vrot.lane.b32.xlu1 %v11068_v27, %s9286_s10  ;;  %1290 = vrot.lane.b32.xlu0 %v11073_v28, %s9286_s10  ;;  %v11527_v42 = vpop.f32.mrb[20].mxu0 }
 0x2df   :  { %v11529_v58 = vpop.f32.mrb[21].mxu0 }
 0x2e0   :  { %v1813_v17 = vpop.permute.xlu1 %1812  ;;  %v3260_v15 = vadd.f32 %v11395_v35, %v11529_v58  ;;  %v3330_v24 = vmul.f32 %v11529_v58, %v11529_v58  ;;  %v1811_v27 = vpop.permute.xlu0 %1810  ;;  %v11550_v35 = vld [vmem:[%s15876_s0 + $0x2d8] sm:$0xff] }
 0x2e1   :  { %1968 = vst.msk [vmem:[#allocation3 + $0x128] sm:$0xff] %vm1930_vm8, %v1813_v17  ;;  %v11539_v25 = vpop.f32.mrb[22].mxu0  ;;  %1967 = vst.msk [vmem:[#allocation3 + $0x120] sm:$0xff] %vm1930_vm8, %v1811_v27 }
 0x2e2   :  { %v11542_v28 = vpop.f32.mrb[23].mxu0  ;;  %1296 = vrot.lane.b32.xlu1 %v11174_v36, %s9286_s10  ;;  %v3393_v10 = vadd.f32 %v11401_v34, %v3330_v24  ;;  %1294 = vrot.lane.b32.xlu0 %v11179_v62, %s9286_s10  ;;  %259 = vst.msk [vmem:[#allocation3 + $0x1c8] sm:$0xff] %vm201_vm3, %v11550_v35  ;;  %v3332_v34 = vmul.f32 %v11527_v42, %v11527_v42 }
 0x2e3   :  { %v3261_v1 = vadd.f32 %v3260_v15, %v11542_v28  ;;  %v3331_v61 = vmul.f32 %v11542_v28, %v11542_v28  ;;  %v3333_v41 = vmul.f32 %v11539_v25, %v11539_v25 }
 0x2e4   :  { %v1817_v40 = vpop.permute.xlu1 %1816  ;;  %v1815_v50 = vpop.permute.xlu0 %1814 }
 0x2e5   :  { %v3262_v56 = vadd.f32 %v11527_v42, %v3261_v1  ;;  %v3394_v45 = vadd.f32 %v3393_v10, %v3331_v61  ;;  %1970 = vst.msk [vmem:[#allocation3 + $0x138] sm:$0xff] %vm1930_vm8, %v1817_v40  ;;  %1969 = vst.msk [vmem:[#allocation3 + $0x130] sm:$0xff] %vm1930_vm8, %v1815_v50  ;;  %v111_v10 = vld [vmem:[%s15876_s0 + $0x298] sm:$0x3]  ;;  %v489_v61 = vrot.slane %v11256_v46, 1 }
 0x2e6   :  { %1561 = vrot.lane.b32.xlu1 %v11466_v43, %s9287_s17  ;;  %1559 = vrot.lane.b32.xlu0 %v11469_v23, %s9287_s17  ;;  %v902_v23 = vrot.slane %v11174_v36, 2  ;;  %v491_v5 = vrot.slane %v111_v10, 1 }
 0x2e7   :  { %v3395_v30 = vadd.f32 %v3394_v45, %v3332_v34  ;;  %v11583_v47 = vadd.f32 %v11539_v25, %v3262_v56  ;;  %v11657_v50 = vsel %vm362_vm0, %v488_v38, %v489_v61 }
 0x2e8   :  { %v2074_v53 = vpop.permute.xlu1 %2073  ;;  %v2072_v43 = vpop.permute.xlu0 %2071  ;;  %v11605_v15 = vsel %vm780_vm1, %v902_v23, %v904_v14  ;;  %v11608_v18 = vsel %vm780_vm1, %v901_v49, %v902_v23  ;;  %v11654_v56 = vsel %vm362_vm0, %v489_v61, %v491_v5  ;;  %v909_v49 = vrot.slane %v111_v10, 2 }
 0x2e9   :  { %2229 = vst.msk [vmem:[#allocation3 + $0x128] sm:$0xff] %vm2191_vm9, %v2074_v53  ;;  %v11589_v51 = vadd.f32 %v3395_v30, %v3333_v41  ;;  %2228 = vst.msk [vmem:[#allocation3 + $0x120] sm:$0xff] %vm2191_vm9, %v2072_v43 }
 0x2ea   :  { %1565 = vrot.lane.b32.xlu1 %v11580_v39, %s9287_s17  ;;  %1563 = vrot.lane.b32.xlu0 %v11586_v12, %s9287_s17 }
 0x2ec   :  { %v2078_v8 = vpop.permute.xlu1 %2077  ;;  %v2076_v17 = vpop.permute.xlu0 %2075 }
 0x2ed   :  { %2231 = vst.msk [vmem:[#allocation3 + $0x138] sm:$0xff] %vm2191_vm9, %v2078_v8  ;;  %2230 = vst.msk [vmem:[#allocation3 + $0x130] sm:$0xff] %vm2191_vm9, %v2076_v17  ;;  %v907_v8 = vrot.slane %v11256_v46, 2 }
 0x2ee   :  { %1828 = vrot.lane.b32.xlu1 %v11492_v59, %s9288_s20  ;;  %1826 = vrot.lane.b32.xlu0 %v11495_v60, %s9288_s20 }
 0x2f0   :  { %v2343_v24 = vpop.permute.xlu1 %2342  ;;  %v2341_v27 = vpop.permute.xlu0 %2340 }
 0x2f1   :  { %2498 = vst.msk [vmem:[#allocation3 + $0x128] sm:$0xff] %vm2460_vm10, %v2343_v24  ;;  %2497 = vst.msk [vmem:[#allocation3 + $0x120] sm:$0xff] %vm2460_vm10, %v2341_v27  ;;  %v906_v27 = vrot.slane %v11261_v3, 2 }
 0x2f2   :  { %1832 = vrot.lane.b32.xlu1 %v11605_v15, %s9288_s20  ;;  %1830 = vrot.lane.b32.xlu0 %v11608_v18, %s9288_s20 }
 0x2f3   :  { %v11683_v61 = vsel %vm780_vm1, %v906_v27, %v907_v8 }
 0x2f4   :  { %v2347_v59 = vpop.permute.xlu1 %2346  ;;  %v2345_v60 = vpop.permute.xlu0 %2344 }
 0x2f5   :  { %2500 = vst.msk [vmem:[#allocation3 + $0x138] sm:$0xff] %vm2460_vm10, %v2347_v59  ;;  %2499 = vst.msk [vmem:[#allocation3 + $0x130] sm:$0xff] %vm2460_vm10, %v2345_v60 }
 0x2f6   :  { %2089 = vrot.lane.b32.xlu1 %v11174_v36, %s9289_s25  ;;  %2087 = vrot.lane.b32.xlu0 %v11179_v62, %s9289_s25  ;;  %v11632_v36 = vld [vmem:[%s15876_s0 + $0x2f0] sm:$0xff]  ;;  %v11637_v62 = vld [vmem:[%s15876_s0 + $0x2e8] sm:$0xff] }
 0x2f7   :  { %261 = vst.msk [vmem:[#allocation3 + $0x1d8] sm:$0xff] %vm201_vm3, %v11632_v36  ;;  %260 = vst.msk [vmem:[#allocation3 + $0x1d0] sm:$0xff] %vm201_vm3, %v11637_v62 }
 0x2f8   :  { %v2610_v29 = vpop.permute.xlu1 %2609  ;;  %v2608_v1 = vpop.permute.xlu0 %2607 }
 0x2f9   :  { %2765 = vst.msk [vmem:[#allocation3 + $0x128] sm:$0xff] %vm2727_vm11, %v2610_v29  ;;  %2764 = vst.msk [vmem:[#allocation3 + $0x120] sm:$0xff] %vm2727_vm11, %v2608_v1  ;;  %v11680_v1 = vsel %vm780_vm1, %v907_v8, %v909_v49  ;;  %v494_v49 = vrot.slane %v11362_v31, 1 }
 0x2fa   :  { %2093 = vrot.lane.b32.xlu1 %v11256_v46, %s9289_s25  ;;  %2091 = vrot.lane.b32.xlu0 %v11261_v3, %s9289_s25 }
 0x2fc   :  { %v606_v40 = vpop.permute.xlu1 %605  ;;  %v604_v34 = vpop.permute.xlu0 %603 }
 0x2fd   :  { %757 = vst.msk [vmem:[#allocation3 + $0x148] sm:$0xff] %vm715_vm4, %v606_v40  ;;  %756 = vst.msk [vmem:[#allocation3 + $0x140] sm:$0xff] %vm715_vm4, %v604_v34 }
 0x2fe   :  { %2358 = vrot.lane.b32.xlu1 %v11580_v39, %s9290_s16  ;;  %2356 = vrot.lane.b32.xlu0 %v11586_v12, %s9290_s16 }
 0x300   :  { %v2614_v45 = vpop.permute.xlu1 %2613  ;;  %v2829_v41 = vld [vmem:[#allocation3 + $0x128] sm:$0xff]  ;;  %v2612_v30 = vpop.permute.xlu0 %2611  ;;  %v2828_v53 = vld [vmem:[#allocation3 + $0x120] sm:$0xff] }
 0x301   :  { %2767 = vst.msk [vmem:[#allocation3 + $0x138] sm:$0xff] %vm2727_vm11, %v2614_v45  ;;  %2766 = vst.msk [vmem:[#allocation3 + $0x130] sm:$0xff] %vm2727_vm11, %v2612_v30  ;;  %v2874_v43 = vpack.c.bf16 %v2829_v41, %v2828_v53 }
 0x302   :  { %2362 = vrot.lane.b32.xlu1 %v11654_v56, %s9290_s16  ;;  %2360 = vrot.lane.b32.xlu0 %v11657_v50, %s9290_s16 }
 0x303   :  { %8696 = vmatprep.mubr.bf16.mxu0 %v2874_v43  ;;  %v114_v43 = vld [vmem:[%s15876_s0 + $0x2b0] sm:$0x3] }
 0x304   :  { %v610_v23 = vpop.permute.xlu1 %609  ;;  %v608_v14 = vpop.permute.xlu0 %607 }
 0x305   :  { %759 = vst.msk [vmem:[#allocation3 + $0x158] sm:$0xff] %vm715_vm4, %v610_v23  ;;  %758 = vst.msk [vmem:[#allocation3 + $0x150] sm:$0xff] %vm715_vm4, %v608_v14 }
 0x306   :  { %2625 = vrot.lane.b32.xlu1 %v11605_v15, %s9291_s23  ;;  %2623 = vrot.lane.b32.xlu0 %v11608_v18, %s9291_s23 }
 0x308   :  { %v1024_v17 = vpop.permute.xlu1 %1023  ;;  %v2831_v24 = vld [vmem:[#allocation3 + $0x138] sm:$0xff]  ;;  %v1022_v59 = vpop.permute.xlu0 %1021  ;;  %v2830_v60 = vld [vmem:[#allocation3 + $0x130] sm:$0xff] }
 0x309   :  { %1175 = vst.msk [vmem:[#allocation3 + $0x148] sm:$0xff] %vm1133_vm5, %v1024_v17  ;;  %1174 = vst.msk [vmem:[#allocation3 + $0x140] sm:$0xff] %vm1133_vm5, %v1022_v59  ;;  %v2875_v29 = vpack.c.bf16 %v2831_v24, %v2830_v60  ;;  %v11743_v17 = vld [vmem:[%s15876_s0 + $0x300] sm:$0xff]  ;;  %v496_v60 = vrot.slane %v114_v43, 1 }
 0x30a   :  { %621 = vrot.lane.b32.xlu1 %v11580_v39, %s9283_s13  ;;  %619 = vrot.lane.b32.xlu0 %v11586_v12, %s9283_s13  ;;  %262 = vst.msk [vmem:[#allocation3 + $0x1e0] sm:$0xff] %vm201_vm3, %v11743_v17 }
 0x30b   :  { %8697 = vmatmul.mubr.bf16.gmra.mrb[36].mxu0 %v2875_v29 }
 0x30c   :  { %v1028_v10 = vpop.permute.xlu1 %1027  ;;  %v1026_v5 = vpop.permute.xlu0 %1025 }
 0x30d   :  { %1177 = vst.msk [vmem:[#allocation3 + $0x158] sm:$0xff] %vm1133_vm5, %v1028_v10  ;;  %1176 = vst.msk [vmem:[#allocation3 + $0x150] sm:$0xff] %vm1133_vm5, %v1026_v5  ;;  %v493_v10 = vrot.slane %v11367_v11, 1 }
 0x30e   :  { %2629 = vrot.lane.b32.xlu1 %v11680_v1, %s9291_s23  ;;  %2627 = vrot.lane.b32.xlu0 %v11683_v61, %s9291_s23 }
 0x310   :  { %v1285_v39 = vpop.permute.xlu1 %1284  ;;  %v1283_v12 = vpop.permute.xlu0 %1282 }
 0x311   :  { %1436 = vst.msk [vmem:[#allocation3 + $0x148] sm:$0xff] %vm1394_vm6, %v1285_v39  ;;  %1435 = vst.msk [vmem:[#allocation3 + $0x140] sm:$0xff] %vm1394_vm6, %v1283_v12 }
 0x312   :  { %625 = vrot.lane.b32.xlu1 %v11654_v56, %s9283_s13  ;;  %623 = vrot.lane.b32.xlu0 %v11657_v50, %s9283_s13 }
 0x314   :  { %v1289_v40 = vpop.permute.xlu1 %1288  ;;  %v1287_v38 = vpop.permute.xlu0 %1286 }
 0x315   :  { %1438 = vst.msk [vmem:[#allocation3 + $0x158] sm:$0xff] %vm1394_vm6, %v1289_v40  ;;  %1437 = vst.msk [vmem:[#allocation3 + $0x150] sm:$0xff] %vm1394_vm6, %v1287_v38 }
 0x316   :  { %1039 = vrot.lane.b32.xlu1 %v11605_v15, %s9284_s14  ;;  %1037 = vrot.lane.b32.xlu0 %v11608_v18, %s9284_s14 }
 0x318   :  { %v1554_v34 = vpop.permute.xlu1 %1553  ;;  %v1552_v45 = vpop.permute.xlu0 %1551 }
 0x319   :  { %1705 = vst.msk [vmem:[#allocation3 + $0x148] sm:$0xff] %vm1663_vm7, %v1554_v34  ;;  %1704 = vst.msk [vmem:[#allocation3 + $0x140] sm:$0xff] %vm1663_vm7, %v1552_v45  ;;  %v11768_v34 = vsel %vm362_vm0, %v494_v49, %v496_v60 }
 0x31a   :  { %1043 = vrot.lane.b32.xlu1 %v11680_v1, %s9284_s14  ;;  %1041 = vrot.lane.b32.xlu0 %v11683_v61, %s9284_s14 }
 0x31c   :  { %v1558_v41 = vpop.permute.xlu1 %1557  ;;  %v1556_v30 = vpop.permute.xlu0 %1555 }
 0x31d   :  { %1707 = vst.msk [vmem:[#allocation3 + $0x158] sm:$0xff] %vm1663_vm7, %v1558_v41  ;;  %1706 = vst.msk [vmem:[#allocation3 + $0x150] sm:$0xff] %vm1663_vm7, %v1556_v30  ;;  %v11774_v30 = vsel %vm362_vm0, %v493_v10, %v494_v49 }
 0x31e   :  { %1300 = vrot.lane.b32.xlu1 %v11256_v46, %s9286_s10  ;;  %1298 = vrot.lane.b32.xlu0 %v11261_v3, %s9286_s10  ;;  %v11715_v15 = vpop.f32.mrb[24].mxu0 }
 0x31f   :  { %v11717_v18 = vpop.f32.mrb[25].mxu0 }
 0x320   :  { %v1821_v53 = vpop.permute.xlu1 %1820  ;;  %v3264_v23 = vadd.f32 %v11583_v47, %v11717_v18  ;;  %v3334_v14 = vmul.f32 %v11717_v18, %v11717_v18  ;;  %v1819_v46 = vpop.permute.xlu0 %1818  ;;  %v11738_v47 = vld [vmem:[%s15876_s0 + $0x308] sm:$0xff] }
 0x321   :  { %1972 = vst.msk [vmem:[#allocation3 + $0x148] sm:$0xff] %vm1930_vm8, %v1821_v53  ;;  %v11727_v8 = vpop.f32.mrb[26].mxu0  ;;  %1971 = vst.msk [vmem:[#allocation3 + $0x140] sm:$0xff] %vm1930_vm8, %v1819_v46  ;;  %v911_v46 = vrot.slane %v11367_v11, 2 }
 0x322   :  { %v11730_v3 = vpop.f32.mrb[27].mxu0  ;;  %1304 = vrot.lane.b32.xlu1 %v11362_v31, %s9286_s10  ;;  %v3397_v24 = vadd.f32 %v11589_v51, %v3334_v14  ;;  %1302 = vrot.lane.b32.xlu0 %v11367_v11, %s9286_s10  ;;  %263 = vst.msk [vmem:[#allocation3 + $0x1e8] sm:$0xff] %vm201_vm3, %v11738_v47  ;;  %v3336_v51 = vmul.f32 %v11715_v15, %v11715_v15 }
 0x323   :  { %v3265_v27 = vadd.f32 %v3264_v23, %v11730_v3  ;;  %v3335_v59 = vmul.f32 %v11730_v3, %v11730_v3  ;;  %v3337_v40 = vmul.f32 %v11727_v8, %v11727_v8  ;;  %v914_v23 = vrot.slane %v114_v43, 2 }
 0x324   :  { %v1825_v29 = vpop.permute.xlu1 %1824  ;;  %v1823_v12 = vpop.permute.xlu0 %1822 }
 0x325   :  { %v3266_v5 = vadd.f32 %v11715_v15, %v3265_v27  ;;  %v3398_v39 = vadd.f32 %v3397_v24, %v3335_v59  ;;  %1974 = vst.msk [vmem:[#allocation3 + $0x158] sm:$0xff] %vm1930_vm8, %v1825_v29  ;;  %1973 = vst.msk [vmem:[#allocation3 + $0x150] sm:$0xff] %vm1930_vm8, %v1823_v12  ;;  %v117_v29 = vld [vmem:[%s15876_s0 + $0x2c8] sm:$0x3]  ;;  %v498_v12 = vrot.slane %v11449_v16, 1 }
 0x326   :  { %1569 = vrot.lane.b32.xlu1 %v11654_v56, %s9287_s17  ;;  %1567 = vrot.lane.b32.xlu0 %v11657_v50, %s9287_s17  ;;  %v912_v50 = vrot.slane %v11362_v31, 2 }
 0x327   :  { %v3399_v38 = vadd.f32 %v3398_v39, %v3336_v51  ;;  %v11771_v45 = vadd.f32 %v11727_v8, %v3266_v5  ;;  %v499_v51 = vrot.slane %v11444_v7, 1  ;;  %v501_v5 = vrot.slane %v117_v29, 1 }
 0x328   :  { %v2082_v41 = vpop.permute.xlu1 %2081  ;;  %v2080_v56 = vpop.permute.xlu0 %2079  ;;  %v11793_v24 = vsel %vm780_vm1, %v912_v50, %v914_v23  ;;  %v11796_v43 = vsel %vm780_vm1, %v911_v46, %v912_v50 }
 0x329   :  { %2233 = vst.msk [vmem:[#allocation3 + $0x148] sm:$0xff] %vm2191_vm9, %v2082_v41  ;;  %v11777_v53 = vadd.f32 %v3399_v38, %v3337_v40  ;;  %2232 = vst.msk [vmem:[#allocation3 + $0x140] sm:$0xff] %vm2191_vm9, %v2080_v56  ;;  %v11842_v38 = vsel %vm362_vm0, %v499_v51, %v501_v5  ;;  %v11845_v56 = vsel %vm362_vm0, %v498_v12, %v499_v51 }
 0x32a   :  { %1573 = vrot.lane.b32.xlu1 %v11768_v34, %s9287_s17  ;;  %1571 = vrot.lane.b32.xlu0 %v11774_v30, %s9287_s17 }
 0x32c   :  { %v2086_v14 = vpop.permute.xlu1 %2085  ;;  %v2084_v49 = vpop.permute.xlu0 %2083 }
 0x32d   :  { %2235 = vst.msk [vmem:[#allocation3 + $0x158] sm:$0xff] %vm2191_vm9, %v2086_v14  ;;  %2234 = vst.msk [vmem:[#allocation3 + $0x150] sm:$0xff] %vm2191_vm9, %v2084_v49 }
 0x32e   :  { %1836 = vrot.lane.b32.xlu1 %v11680_v1, %s9288_s20  ;;  %1834 = vrot.lane.b32.xlu0 %v11683_v61, %s9288_s20 }
 0x330   :  { %v2351_v27 = vpop.permute.xlu1 %2350  ;;  %v2349_v59 = vpop.permute.xlu0 %2348 }
 0x331   :  { %2502 = vst.msk [vmem:[#allocation3 + $0x148] sm:$0xff] %vm2460_vm10, %v2351_v27  ;;  %2501 = vst.msk [vmem:[#allocation3 + $0x140] sm:$0xff] %vm2460_vm10, %v2349_v59  ;;  %v917_v59 = vrot.slane %v11444_v7, 2 }
 0x332   :  { %1840 = vrot.lane.b32.xlu1 %v11793_v24, %s9288_s20  ;;  %1838 = vrot.lane.b32.xlu0 %v11796_v43, %s9288_s20 }
 0x334   :  { %v2355_v1 = vpop.permute.xlu1 %2354  ;;  %v2353_v61 = vpop.permute.xlu0 %2352 }
 0x335   :  { %2504 = vst.msk [vmem:[#allocation3 + $0x158] sm:$0xff] %vm2460_vm10, %v2355_v1  ;;  %2503 = vst.msk [vmem:[#allocation3 + $0x150] sm:$0xff] %vm2460_vm10, %v2353_v61  ;;  %v919_v1 = vrot.slane %v117_v29, 2 }
 0x336   :  { %2097 = vrot.lane.b32.xlu1 %v11362_v31, %s9289_s25  ;;  %2095 = vrot.lane.b32.xlu0 %v11367_v11, %s9289_s25  ;;  %v11820_v31 = vld [vmem:[%s15876_s0 + $0x320] sm:$0xff]  ;;  %v11825_v11 = vld [vmem:[%s15876_s0 + $0x318] sm:$0xff] }
 0x337   :  { %265 = vst.msk [vmem:[#allocation3 + $0x1f8] sm:$0xff] %vm201_vm3, %v11820_v31  ;;  %264 = vst.msk [vmem:[#allocation3 + $0x1f0] sm:$0xff] %vm201_vm3, %v11825_v11  ;;  %v11868_v12 = vsel %vm780_vm1, %v917_v59, %v919_v1  ;;  %v120_v1 = vld [vmem:[%s15876_s0 + $0x2e0] sm:$0x3] }
 0x338   :  { %v2618_v60 = vpop.permute.xlu1 %2617  ;;  %v2616_v10 = vpop.permute.xlu0 %2615 }
 0x339   :  { %2769 = vst.msk [vmem:[#allocation3 + $0x148] sm:$0xff] %vm2727_vm11, %v2618_v60  ;;  %2768 = vst.msk [vmem:[#allocation3 + $0x140] sm:$0xff] %vm2727_vm11, %v2616_v10  ;;  %v916_v10 = vrot.slane %v11449_v16, 2 }
 0x33a   :  { %2101 = vrot.lane.b32.xlu1 %v11444_v7, %s9289_s25  ;;  %2099 = vrot.lane.b32.xlu0 %v11449_v16, %s9289_s25 }
 0x33c   :  { %v614_v39 = vpop.permute.xlu1 %613  ;;  %v612_v40 = vpop.permute.xlu0 %611 }
 0x33d   :  { %761 = vst.msk [vmem:[#allocation3 + $0x168] sm:$0xff] %vm715_vm4, %v614_v39  ;;  %760 = vst.msk [vmem:[#allocation3 + $0x160] sm:$0xff] %vm715_vm4, %v612_v40  ;;  %v11871_v40 = vsel %vm780_vm1, %v916_v10, %v917_v59 }
 0x33e   :  { %2366 = vrot.lane.b32.xlu1 %v11768_v34, %s9290_s16  ;;  %2364 = vrot.lane.b32.xlu0 %v11774_v30, %s9290_s16 }
 0x340   :  { %v2622_v41 = vpop.permute.xlu1 %2621  ;;  %v2833_v50 = vld [vmem:[#allocation3 + $0x148] sm:$0xff]  ;;  %v2620_v23 = vpop.permute.xlu0 %2619  ;;  %v2832_v14 = vld [vmem:[#allocation3 + $0x140] sm:$0xff] }
 0x341   :  { %2771 = vst.msk [vmem:[#allocation3 + $0x158] sm:$0xff] %vm2727_vm11, %v2622_v41  ;;  %2770 = vst.msk [vmem:[#allocation3 + $0x150] sm:$0xff] %vm2727_vm11, %v2620_v23  ;;  %v2876_v46 = vpack.c.bf16 %v2833_v50, %v2832_v14 }
 0x342   :  { %2370 = vrot.lane.b32.xlu1 %v11842_v38, %s9290_s16  ;;  %2368 = vrot.lane.b32.xlu0 %v11845_v56, %s9290_s16 }
 0x343   :  { %8700 = vmatprep.mubr.bf16.mxu0 %v2876_v46 }
 0x344   :  { %v618_v49 = vpop.permute.xlu1 %617  ;;  %v616_v27 = vpop.permute.xlu0 %615 }
 0x345   :  { %763 = vst.msk [vmem:[#allocation3 + $0x178] sm:$0xff] %vm715_vm4, %v618_v49  ;;  %762 = vst.msk [vmem:[#allocation3 + $0x170] sm:$0xff] %vm715_vm4, %v616_v27 }
 0x346   :  { %2633 = vrot.lane.b32.xlu1 %v11793_v24, %s9291_s23  ;;  %2631 = vrot.lane.b32.xlu0 %v11796_v43, %s9291_s23 }
 0x348   :  { %v1032_v61 = vpop.permute.xlu1 %1031  ;;  %v2835_v60 = vld [vmem:[#allocation3 + $0x158] sm:$0xff]  ;;  %v1030_v51 = vpop.permute.xlu0 %1029  ;;  %v2834_v5 = vld [vmem:[#allocation3 + $0x150] sm:$0xff] }
 0x349   :  { %1179 = vst.msk [vmem:[#allocation3 + $0x168] sm:$0xff] %vm1133_vm5, %v1032_v61  ;;  %1178 = vst.msk [vmem:[#allocation3 + $0x160] sm:$0xff] %vm1133_vm5, %v1030_v51  ;;  %v2877_v39 = vpack.c.bf16 %v2835_v60, %v2834_v5  ;;  %v504_v51 = vrot.slane %v11550_v35, 1 }
 0x34a   :  { %629 = vrot.lane.b32.xlu1 %v11768_v34, %s9283_s13  ;;  %627 = vrot.lane.b32.xlu0 %v11774_v30, %s9283_s13 }
 0x34b   :  { %8701 = vmatmul.mubr.bf16.gmra.mrb[40].mxu0 %v2877_v39 }
 0x34c   :  { %v1036_v29 = vpop.permute.xlu1 %1035  ;;  %v1034_v41 = vpop.permute.xlu0 %1033 }
 0x34d   :  { %1181 = vst.msk [vmem:[#allocation3 + $0x178] sm:$0xff] %vm1133_vm5, %v1036_v29  ;;  %1180 = vst.msk [vmem:[#allocation3 + $0x170] sm:$0xff] %vm1133_vm5, %v1034_v41  ;;  %v506_v29 = vrot.slane %v120_v1, 1 }
 0x34e   :  { %2637 = vrot.lane.b32.xlu1 %v11868_v12, %s9291_s23  ;;  %2635 = vrot.lane.b32.xlu0 %v11871_v40, %s9291_s23 }
 0x350   :  { %v1293_v34 = vpop.permute.xlu1 %1292  ;;  %v1291_v30 = vpop.permute.xlu0 %1290 }
 0x351   :  { %1440 = vst.msk [vmem:[#allocation3 + $0x168] sm:$0xff] %vm1394_vm6, %v1293_v34  ;;  %1439 = vst.msk [vmem:[#allocation3 + $0x160] sm:$0xff] %vm1394_vm6, %v1291_v30  ;;  %v503_v34 = vrot.slane %v11555_v32, 1 }
 0x352   :  { %633 = vrot.lane.b32.xlu1 %v11842_v38, %s9283_s13  ;;  %631 = vrot.lane.b32.xlu0 %v11845_v56, %s9283_s13 }
 0x354   :  { %v1297_v50 = vpop.permute.xlu1 %1296  ;;  %v1295_v23 = vpop.permute.xlu0 %1294 }
 0x355   :  { %1442 = vst.msk [vmem:[#allocation3 + $0x178] sm:$0xff] %vm1394_vm6, %v1297_v50  ;;  %1441 = vst.msk [vmem:[#allocation3 + $0x170] sm:$0xff] %vm1394_vm6, %v1295_v23 }
 0x356   :  { %1047 = vrot.lane.b32.xlu1 %v11793_v24, %s9284_s14  ;;  %1045 = vrot.lane.b32.xlu0 %v11796_v43, %s9284_s14 }
 0x358   :  { %v1562_v14 = vpop.permute.xlu1 %1561  ;;  %v1560_v46 = vpop.permute.xlu0 %1559 }
 0x359   :  { %1709 = vst.msk [vmem:[#allocation3 + $0x168] sm:$0xff] %vm1663_vm7, %v1562_v14  ;;  %1708 = vst.msk [vmem:[#allocation3 + $0x160] sm:$0xff] %vm1663_vm7, %v1560_v46 }
 0x35a   :  { %1051 = vrot.lane.b32.xlu1 %v11868_v12, %s9284_s14  ;;  %1049 = vrot.lane.b32.xlu0 %v11871_v40, %s9284_s14 }
 0x35c   :  { %v1566_v49 = vpop.permute.xlu1 %1565  ;;  %v1564_v27 = vpop.permute.xlu0 %1563 }
 0x35d   :  { %1711 = vst.msk [vmem:[#allocation3 + $0x178] sm:$0xff] %vm1663_vm7, %v1566_v49  ;;  %1710 = vst.msk [vmem:[#allocation3 + $0x170] sm:$0xff] %vm1663_vm7, %v1564_v27  ;;  %v11942_v49 = vsel %vm362_vm0, %v504_v51, %v506_v29 }
 0x35e   :  { %1308 = vrot.lane.b32.xlu1 %v11444_v7, %s9286_s10  ;;  %1306 = vrot.lane.b32.xlu0 %v11449_v16, %s9286_s10  ;;  %v11903_v24 = vpop.f32.mrb[28].mxu0 }
 0x35f   :  { %v11905_v43 = vpop.f32.mrb[29].mxu0  ;;  %v3340_v30 = vmul.f32 %v11903_v24, %v11903_v24 }
 0x360   :  { %v1829_v59 = vpop.permute.xlu1 %1828  ;;  %v3268_v61 = vadd.f32 %v11771_v45, %v11905_v43  ;;  %v3338_v60 = vmul.f32 %v11905_v43, %v11905_v43  ;;  %v1827_v7 = vpop.permute.xlu0 %1826 }
 0x361   :  { %1976 = vst.msk [vmem:[#allocation3 + $0x168] sm:$0xff] %vm1930_vm8, %v1829_v59  ;;  %v11915_v10 = vpop.f32.mrb[30].mxu0  ;;  %1975 = vst.msk [vmem:[#allocation3 + $0x160] sm:$0xff] %vm1930_vm8, %v1827_v7  ;;  %v924_v7 = vrot.slane %v120_v1, 2 }
 0x362   :  { %v11918_v16 = vpop.f32.mrb[31].mxu0  ;;  %1312 = vrot.lane.b32.xlu1 %v11550_v35, %s9286_s10  ;;  %v3401_v5 = vadd.f32 %v11777_v53, %v3338_v60  ;;  %1310 = vrot.lane.b32.xlu0 %v11555_v32, %s9286_s10  ;;  %v3341_v14 = vmul.f32 %v11915_v10, %v11915_v10 }
 0x363   :  { %v3269_v45 = vadd.f32 %v3268_v61, %v11918_v16  ;;  %v3339_v39 = vmul.f32 %v11918_v16, %v11918_v16  ;;  %v11948_v61 = vsel %vm362_vm0, %v503_v34, %v504_v51  ;;  %v921_v51 = vrot.slane %v11555_v32, 2 }
 0x364   :  { %v1833_v41 = vpop.permute.xlu1 %1832  ;;  %v1831_v53 = vpop.permute.xlu0 %1830 }
 0x365   :  { %v3270_v50 = vadd.f32 %v11903_v24, %v3269_v45  ;;  %v3402_v23 = vadd.f32 %v3401_v5, %v3339_v39  ;;  %1978 = vst.msk [vmem:[#allocation3 + $0x178] sm:$0xff] %vm1930_vm8, %v1833_v41  ;;  %1977 = vst.msk [vmem:[#allocation3 + $0x170] sm:$0xff] %vm1930_vm8, %v1831_v53  ;;  %v508_v53 = vrot.slane %v11637_v62, 1 }
 0x366   :  { %1577 = vrot.lane.b32.xlu1 %v11842_v38, %s9287_s17  ;;  %1575 = vrot.lane.b32.xlu0 %v11845_v56, %s9287_s17  ;;  %v922_v56 = vrot.slane %v11550_v35, 2 }
 0x367   :  { %v3403_v46 = vadd.f32 %v3402_v23, %v3340_v30  ;;  %v11945_v27 = vadd.f32 %v11915_v10, %v3270_v50  ;;  %v123_v30 = vld [vmem:[%s15876_s0 + $0x2f8] sm:$0x3] }
 0x368   :  { %v2090_v59 = vpop.permute.xlu1 %2089  ;;  %v2088_v38 = vpop.permute.xlu0 %2087  ;;  %v11967_v39 = vsel %vm780_vm1, %v922_v56, %v924_v7  ;;  %v11970_v1 = vsel %vm780_vm1, %v921_v51, %v922_v56  ;;  %v511_v23 = vrot.slane %v123_v30, 1 }
 0x369   :  { %2237 = vst.msk [vmem:[#allocation3 + $0x168] sm:$0xff] %vm2191_vm9, %v2090_v59  ;;  %v11951_v60 = vadd.f32 %v3403_v46, %v3341_v14  ;;  %2236 = vst.msk [vmem:[#allocation3 + $0x160] sm:$0xff] %vm2191_vm9, %v2088_v38 }
 0x36a   :  { %1581 = vrot.lane.b32.xlu1 %v11942_v49, %s9287_s17  ;;  %1579 = vrot.lane.b32.xlu0 %v11948_v61, %s9287_s17 }
 0x36c   :  { %v2094_v5 = vpop.permute.xlu1 %2093  ;;  %v2092_v45 = vpop.permute.xlu0 %2091 }
 0x36d   :  { %2239 = vst.msk [vmem:[#allocation3 + $0x178] sm:$0xff] %vm2191_vm9, %v2094_v5  ;;  %2238 = vst.msk [vmem:[#allocation3 + $0x170] sm:$0xff] %vm2191_vm9, %v2092_v45 }
 0x36e   :  { %1844 = vrot.lane.b32.xlu1 %v11868_v12, %s9288_s20  ;;  %1842 = vrot.lane.b32.xlu0 %v11871_v40, %s9288_s20 }
 0x370   :  { %v2359_v29 = vpop.permute.xlu1 %2358  ;;  %v2357_v41 = vpop.permute.xlu0 %2356 }
 0x371   :  { %2506 = vst.msk [vmem:[#allocation3 + $0x168] sm:$0xff] %vm2460_vm10, %v2359_v29  ;;  %2505 = vst.msk [vmem:[#allocation3 + $0x160] sm:$0xff] %vm2460_vm10, %v2357_v41  ;;  %v927_v41 = vrot.slane %v11632_v36, 2 }
 0x372   :  { %1848 = vrot.lane.b32.xlu1 %v11967_v39, %s9288_s20  ;;  %1846 = vrot.lane.b32.xlu0 %v11970_v1, %s9288_s20 }
 0x374   :  { %v2363_v12 = vpop.permute.xlu1 %2362  ;;  %v2361_v40 = vpop.permute.xlu0 %2360 }
 0x375   :  { %2508 = vst.msk [vmem:[#allocation3 + $0x178] sm:$0xff] %vm2460_vm10, %v2363_v12  ;;  %2507 = vst.msk [vmem:[#allocation3 + $0x170] sm:$0xff] %vm2460_vm10, %v2361_v40  ;;  %v929_v12 = vrot.slane %v123_v30, 2 }
 0x376   :  { %2105 = vrot.lane.b32.xlu1 %v11550_v35, %s9289_s25  ;;  %2103 = vrot.lane.b32.xlu0 %v11555_v32, %s9289_s25  ;;  %v509_v35 = vrot.slane %v11632_v36, 1 }
 0x378   :  { %v2626_v34 = vpop.permute.xlu1 %2625  ;;  %v2624_v50 = vpop.permute.xlu0 %2623  ;;  %v12002_v46 = vsel %vm362_vm0, %v509_v35, %v511_v23  ;;  %v12005_v38 = vsel %vm362_vm0, %v508_v53, %v509_v35  ;;  %v12028_v53 = vsel %vm780_vm1, %v927_v41, %v929_v12  ;;  %v126_v12 = vld [vmem:[%s15876_s0 + $0x310] sm:$0x3] }
 0x379   :  { %2773 = vst.msk [vmem:[#allocation3 + $0x168] sm:$0xff] %vm2727_vm11, %v2626_v34  ;;  %2772 = vst.msk [vmem:[#allocation3 + $0x160] sm:$0xff] %vm2727_vm11, %v2624_v50  ;;  %v926_v50 = vrot.slane %v11637_v62, 2 }
 0x37a   :  { %2109 = vrot.lane.b32.xlu1 %v11632_v36, %s9289_s25  ;;  %2107 = vrot.lane.b32.xlu0 %v11637_v62, %s9289_s25 }
 0x37c   :  { %v622_v32 = vpop.permute.xlu1 %621  ;;  %v620_v14 = vpop.permute.xlu0 %619 }
 0x37d   :  { %765 = vst.msk [vmem:[#allocation3 + $0x188] sm:$0xff] %vm715_vm4, %v622_v32  ;;  %764 = vst.msk [vmem:[#allocation3 + $0x180] sm:$0xff] %vm715_vm4, %v620_v14  ;;  %v12031_v14 = vsel %vm780_vm1, %v926_v50, %v927_v41 }
 0x37e   :  { %2374 = vrot.lane.b32.xlu1 %v11942_v49, %s9290_s16  ;;  %2372 = vrot.lane.b32.xlu0 %v11948_v61, %s9290_s16 }
 0x380   :  { %v2630_v59 = vpop.permute.xlu1 %2629  ;;  %v2837_v56 = vld [vmem:[#allocation3 + $0x168] sm:$0xff]  ;;  %v2628_v7 = vpop.permute.xlu0 %2627  ;;  %v2836_v5 = vld [vmem:[#allocation3 + $0x160] sm:$0xff] }
 0x381   :  { %2775 = vst.msk [vmem:[#allocation3 + $0x178] sm:$0xff] %vm2727_vm11, %v2630_v59  ;;  %2774 = vst.msk [vmem:[#allocation3 + $0x170] sm:$0xff] %vm2727_vm11, %v2628_v7  ;;  %v2878_v51 = vpack.c.bf16 %v2837_v56, %v2836_v5 }
 0x382   :  { %2378 = vrot.lane.b32.xlu1 %v12002_v46, %s9290_s16  ;;  %2376 = vrot.lane.b32.xlu0 %v12005_v38, %s9290_s16 }
 0x383   :  { %8704 = vmatprep.mubr.bf16.mxu0 %v2878_v51 }
 0x384   :  { %v626_v45 = vpop.permute.xlu1 %625  ;;  %v624_v29 = vpop.permute.xlu0 %623 }
 0x385   :  { %767 = vst.msk [vmem:[#allocation3 + $0x198] sm:$0xff] %vm715_vm4, %v626_v45  ;;  %766 = vst.msk [vmem:[#allocation3 + $0x190] sm:$0xff] %vm715_vm4, %v624_v29 }
 0x386   :  { %2641 = vrot.lane.b32.xlu1 %v11967_v39, %s9291_s23  ;;  %2639 = vrot.lane.b32.xlu0 %v11970_v1, %s9291_s23 }
 0x388   :  { %v1040_v40 = vpop.permute.xlu1 %1039  ;;  %v2839_v34 = vld [vmem:[#allocation3 + $0x178] sm:$0xff]  ;;  %v1038_v35 = vpop.permute.xlu0 %1037  ;;  %v2838_v23 = vld [vmem:[#allocation3 + $0x170] sm:$0xff] }
 0x389   :  { %1183 = vst.msk [vmem:[#allocation3 + $0x188] sm:$0xff] %vm1133_vm5, %v1040_v40  ;;  %1182 = vst.msk [vmem:[#allocation3 + $0x180] sm:$0xff] %vm1133_vm5, %v1038_v35  ;;  %v2879_v32 = vpack.c.bf16 %v2839_v34, %v2838_v23  ;;  %v514_v35 = vrot.slane %v11738_v47, 1 }
 0x38a   :  { %637 = vrot.lane.b32.xlu1 %v11942_v49, %s9283_s13  ;;  %635 = vrot.lane.b32.xlu0 %v11948_v61, %s9283_s13 }
 0x38b   :  { %8705 = vmatmul.mubr.bf16.gmra.mrb[44].mxu0 %v2879_v32 }
 0x38c   :  { %v1044_v30 = vpop.permute.xlu1 %1043  ;;  %v1042_v59 = vpop.permute.xlu0 %1041 }
 0x38d   :  { %1185 = vst.msk [vmem:[#allocation3 + $0x198] sm:$0xff] %vm1133_vm5, %v1044_v30  ;;  %1184 = vst.msk [vmem:[#allocation3 + $0x190] sm:$0xff] %vm1133_vm5, %v1042_v59  ;;  %v516_v30 = vrot.slane %v126_v12, 1 }
 0x38e   :  { %2645 = vrot.lane.b32.xlu1 %v12028_v53, %s9291_s23  ;;  %2643 = vrot.lane.b32.xlu0 %v12031_v14, %s9291_s23 }
 0x390   :  { %v1301_v49 = vpop.permute.xlu1 %1300  ;;  %v1299_v61 = vpop.permute.xlu0 %1298 }
 0x391   :  { %1444 = vst.msk [vmem:[#allocation3 + $0x188] sm:$0xff] %vm1394_vm6, %v1301_v49  ;;  %1443 = vst.msk [vmem:[#allocation3 + $0x180] sm:$0xff] %vm1394_vm6, %v1299_v61  ;;  %v513_v49 = vrot.slane %v11743_v17, 1 }
 0x392   :  { %641 = vrot.lane.b32.xlu1 %v12002_v46, %s9283_s13  ;;  %639 = vrot.lane.b32.xlu0 %v12005_v38, %s9283_s13 }
 0x394   :  { %v1305_v56 = vpop.permute.xlu1 %1304  ;;  %v1303_v7 = vpop.permute.xlu0 %1302 }
 0x395   :  { %1446 = vst.msk [vmem:[#allocation3 + $0x198] sm:$0xff] %vm1394_vm6, %v1305_v56  ;;  %1445 = vst.msk [vmem:[#allocation3 + $0x190] sm:$0xff] %vm1394_vm6, %v1303_v7 }
 0x396   :  { %1055 = vrot.lane.b32.xlu1 %v11967_v39, %s9284_s14  ;;  %1053 = vrot.lane.b32.xlu0 %v11970_v1, %s9284_s14 }
 0x398   :  { %v1570_v5 = vpop.permute.xlu1 %1569  ;;  %v1568_v51 = vpop.permute.xlu0 %1567 }
 0x399   :  { %1713 = vst.msk [vmem:[#allocation3 + $0x188] sm:$0xff] %vm1663_vm7, %v1570_v5  ;;  %1712 = vst.msk [vmem:[#allocation3 + $0x180] sm:$0xff] %vm1663_vm7, %v1568_v51 }
 0x39a   :  { %1059 = vrot.lane.b32.xlu1 %v12028_v53, %s9284_s14  ;;  %1057 = vrot.lane.b32.xlu0 %v12031_v14, %s9284_s14 }
 0x39c   :  { %v1574_v45 = vpop.permute.xlu1 %1573  ;;  %v1572_v29 = vpop.permute.xlu0 %1571 }
 0x39d   :  { %1715 = vst.msk [vmem:[#allocation3 + $0x198] sm:$0xff] %vm1663_vm7, %v1574_v45  ;;  %1714 = vst.msk [vmem:[#allocation3 + $0x190] sm:$0xff] %vm1663_vm7, %v1572_v29  ;;  %v12102_v45 = vsel %vm362_vm0, %v514_v35, %v516_v30 }
 0x39e   :  { %1316 = vrot.lane.b32.xlu1 %v11632_v36, %s9286_s10  ;;  %1314 = vrot.lane.b32.xlu0 %v11637_v62, %s9286_s10  ;;  %v12063_v39 = vpop.f32.mrb[32].mxu0 }
 0x39f   :  { %v12065_v1 = vpop.f32.mrb[33].mxu0  ;;  %v3344_v61 = vmul.f32 %v12063_v39, %v12063_v39 }
 0x3a0   :  { %v1837_v41 = vpop.permute.xlu1 %1836  ;;  %v3272_v40 = vadd.f32 %v11945_v27, %v12065_v1  ;;  %v3342_v34 = vmul.f32 %v12065_v1, %v12065_v1  ;;  %v1835_v36 = vpop.permute.xlu0 %1834 }
 0x3a1   :  { %1980 = vst.msk [vmem:[#allocation3 + $0x188] sm:$0xff] %vm1930_vm8, %v1837_v41  ;;  %v12075_v50 = vpop.f32.mrb[34].mxu0  ;;  %1979 = vst.msk [vmem:[#allocation3 + $0x180] sm:$0xff] %vm1930_vm8, %v1835_v36  ;;  %v934_v36 = vrot.slane %v126_v12, 2 }
 0x3a2   :  { %16117 = vst [vmem:[#allocation8_spill] sm:$0xff] %v12075_v50  ;;  %v12078_v62 = vpop.f32.mrb[35].mxu0  ;;  %1320 = vrot.lane.b32.xlu1 %v11738_v47, %s9286_s10  ;;  %v3405_v23 = vadd.f32 %v11951_v60, %v3342_v34  ;;  %1318 = vrot.lane.b32.xlu0 %v11743_v17, %s9286_s10  ;;  %v3345_v5 = vmul.f32 %v12075_v50, %v12075_v50 }
 0x3a3   :  { %v3273_v27 = vadd.f32 %v3272_v40, %v12078_v62  ;;  %v3343_v32 = vmul.f32 %v12078_v62, %v12078_v62  ;;  %v12108_v40 = vsel %vm362_vm0, %v513_v49, %v514_v35  ;;  %v931_v35 = vrot.slane %v11743_v17, 2 }
 0x3a4   :  { %v1841_v59 = vpop.permute.xlu1 %1840  ;;  %v1839_v60 = vpop.permute.xlu0 %1838 }
 0x3a5   :  { %v3274_v56 = vadd.f32 %v12063_v39, %v3273_v27  ;;  %v3406_v7 = vadd.f32 %v3405_v23, %v3343_v32  ;;  %1982 = vst.msk [vmem:[#allocation3 + $0x198] sm:$0xff] %vm1930_vm8, %v1841_v59  ;;  %1981 = vst.msk [vmem:[#allocation3 + $0x190] sm:$0xff] %vm1930_vm8, %v1839_v60  ;;  %v518_v60 = vrot.slane %v11825_v11, 1 }
 0x3a6   :  { %1585 = vrot.lane.b32.xlu1 %v12002_v46, %s9287_s17  ;;  %1583 = vrot.lane.b32.xlu0 %v12005_v38, %s9287_s17  ;;  %v932_v38 = vrot.slane %v11738_v47, 2 }
 0x3a7   :  { %v3407_v51 = vadd.f32 %v3406_v7, %v3344_v61  ;;  %v12105_v29 = vadd.f32 %v12075_v50, %v3274_v56  ;;  %v129_v61 = vld [vmem:[%s15876_s0 + $0x328] sm:$0x3] }
 0x3a8   :  { %v2098_v41 = vpop.permute.xlu1 %2097  ;;  %v2096_v46 = vpop.permute.xlu0 %2095  ;;  %v12127_v32 = vsel %vm780_vm1, %v932_v38, %v934_v36  ;;  %v12130_v12 = vsel %vm780_vm1, %v931_v35, %v932_v38  ;;  %v521_v7 = vrot.slane %v129_v61, 1 }
 0x3a9   :  { %2241 = vst.msk [vmem:[#allocation3 + $0x188] sm:$0xff] %vm2191_vm9, %v2098_v41  ;;  %v12111_v34 = vadd.f32 %v3407_v51, %v3345_v5  ;;  %2240 = vst.msk [vmem:[#allocation3 + $0x180] sm:$0xff] %vm2191_vm9, %v2096_v46 }
 0x3aa   :  { %1589 = vrot.lane.b32.xlu1 %v12102_v45, %s9287_s17  ;;  %1587 = vrot.lane.b32.xlu0 %v12108_v40, %s9287_s17 }
 0x3ac   :  { %v2102_v23 = vpop.permute.xlu1 %2101  ;;  %v2100_v27 = vpop.permute.xlu0 %2099 }
 0x3ad   :  { %2243 = vst.msk [vmem:[#allocation3 + $0x198] sm:$0xff] %vm2191_vm9, %v2102_v23  ;;  %2242 = vst.msk [vmem:[#allocation3 + $0x190] sm:$0xff] %vm2191_vm9, %v2100_v27 }
 0x3ae   :  { %1852 = vrot.lane.b32.xlu1 %v12028_v53, %s9288_s20  ;;  %1850 = vrot.lane.b32.xlu0 %v12031_v14, %s9288_s20 }
 0x3b0   :  { %v2367_v30 = vpop.permute.xlu1 %2366  ;;  %v2365_v59 = vpop.permute.xlu0 %2364 }
 0x3b1   :  { %2510 = vst.msk [vmem:[#allocation3 + $0x188] sm:$0xff] %vm2460_vm10, %v2367_v30  ;;  %2509 = vst.msk [vmem:[#allocation3 + $0x180] sm:$0xff] %vm2460_vm10, %v2365_v59  ;;  %v937_v59 = vrot.slane %v11820_v31, 2 }
 0x3b2   :  { %1856 = vrot.lane.b32.xlu1 %v12127_v32, %s9288_s20  ;;  %1854 = vrot.lane.b32.xlu0 %v12130_v12, %s9288_s20 }
 0x3b4   :  { %v2371_v53 = vpop.permute.xlu1 %2370  ;;  %v2369_v14 = vpop.permute.xlu0 %2368 }
 0x3b5   :  { %2512 = vst.msk [vmem:[#allocation3 + $0x198] sm:$0xff] %vm2460_vm10, %v2371_v53  ;;  %2511 = vst.msk [vmem:[#allocation3 + $0x190] sm:$0xff] %vm2460_vm10, %v2369_v14  ;;  %v939_v53 = vrot.slane %v129_v61, 2 }
 0x3b6   :  { %2113 = vrot.lane.b32.xlu1 %v11738_v47, %s9289_s25  ;;  %2111 = vrot.lane.b32.xlu0 %v11743_v17, %s9289_s25  ;;  %v519_v47 = vrot.slane %v11820_v31, 1 }
 0x3b8   :  { %v2634_v49 = vpop.permute.xlu1 %2633  ;;  %v2632_v56 = vpop.permute.xlu0 %2631  ;;  %v12162_v51 = vsel %vm362_vm0, %v519_v47, %v521_v7  ;;  %v12165_v46 = vsel %vm362_vm0, %v518_v60, %v519_v47  ;;  %v12188_v60 = vsel %vm780_vm1, %v937_v59, %v939_v53 }
 0x3b9   :  { %2777 = vst.msk [vmem:[#allocation3 + $0x188] sm:$0xff] %vm2727_vm11, %v2634_v49  ;;  %2776 = vst.msk [vmem:[#allocation3 + $0x180] sm:$0xff] %vm2727_vm11, %v2632_v56  ;;  %v936_v56 = vrot.slane %v11825_v11, 2 }
 0x3ba   :  { %2117 = vrot.lane.b32.xlu1 %v11820_v31, %s9289_s25  ;;  %2115 = vrot.lane.b32.xlu0 %v11825_v11, %s9289_s25 }
 0x3bc   :  { %v630_v17 = vpop.permute.xlu1 %629  ;;  %v628_v5 = vpop.permute.xlu0 %627 }
 0x3bd   :  { %769 = vst.msk [vmem:[#allocation3 + $0x1a8] sm:$0xff] %vm715_vm4, %v630_v17  ;;  %768 = vst.msk [vmem:[#allocation3 + $0x1a0] sm:$0xff] %vm715_vm4, %v628_v5  ;;  %v12191_v5 = vsel %vm780_vm1, %v936_v56, %v937_v59 }
 0x3be   :  { %2382 = vrot.lane.b32.xlu1 %v12102_v45, %s9290_s16  ;;  %2380 = vrot.lane.b32.xlu0 %v12108_v40, %s9290_s16 }
 0x3c0   :  { %v2638_v41 = vpop.permute.xlu1 %2637  ;;  %v2841_v38 = vld [vmem:[#allocation3 + $0x188] sm:$0xff]  ;;  %v2636_v36 = vpop.permute.xlu0 %2635  ;;  %v2840_v23 = vld [vmem:[#allocation3 + $0x180] sm:$0xff] }
 0x3c1   :  { %2779 = vst.msk [vmem:[#allocation3 + $0x198] sm:$0xff] %vm2727_vm11, %v2638_v41  ;;  %2778 = vst.msk [vmem:[#allocation3 + $0x190] sm:$0xff] %vm2727_vm11, %v2636_v36  ;;  %v2880_v35 = vpack.c.bf16 %v2841_v38, %v2840_v23 }
 0x3c2   :  { %2386 = vrot.lane.b32.xlu1 %v12162_v51, %s9290_s16  ;;  %2384 = vrot.lane.b32.xlu0 %v12165_v46, %s9290_s16 }
 0x3c3   :  { %8708 = vmatprep.mubr.bf16.mxu0 %v2880_v35 }
 0x3c4   :  { %v634_v27 = vpop.permute.xlu1 %633  ;;  %v632_v30 = vpop.permute.xlu0 %631 }
 0x3c5   :  { %771 = vst.msk [vmem:[#allocation3 + $0x1b8] sm:$0xff] %vm715_vm4, %v634_v27  ;;  %770 = vst.msk [vmem:[#allocation3 + $0x1b0] sm:$0xff] %vm715_vm4, %v632_v30 }
 0x3c6   :  { %2649 = vrot.lane.b32.xlu1 %v12127_v32, %s9291_s23  ;;  %2647 = vrot.lane.b32.xlu0 %v12130_v12, %s9291_s23 }
 0x3c8   :  { %v1048_v14 = vpop.permute.xlu1 %1047  ;;  %v2843_v49 = vld [vmem:[#allocation3 + $0x198] sm:$0xff]  ;;  %v1046_v47 = vpop.permute.xlu0 %1045  ;;  %v2842_v7 = vld [vmem:[#allocation3 + $0x190] sm:$0xff] }
 0x3c9   :  { %1187 = vst.msk [vmem:[#allocation3 + $0x1a8] sm:$0xff] %vm1133_vm5, %v1048_v14  ;;  %1186 = vst.msk [vmem:[#allocation3 + $0x1a0] sm:$0xff] %vm1133_vm5, %v1046_v47  ;;  %v2881_v17 = vpack.c.bf16 %v2843_v49, %v2842_v7  ;;  %v130_v14 = vld [vmem:[%s15876_s0 + $0x330] sm:$0xff] }
 0x3ca   :  { %645 = vrot.lane.b32.xlu1 %v12102_v45, %s9283_s13  ;;  %643 = vrot.lane.b32.xlu0 %v12108_v40, %s9283_s13 }
 0x3cb   :  { %8709 = vmatmul.mubr.bf16.gmra.mrb[48].mxu0 %v2881_v17 }
 0x3cc   :  { %v1052_v61 = vpop.permute.xlu1 %1051  ;;  %v1050_v41 = vpop.permute.xlu0 %1049 }
 0x3cd   :  { %1189 = vst.msk [vmem:[#allocation3 + $0x1b8] sm:$0xff] %vm1133_vm5, %v1052_v61  ;;  %1188 = vst.msk [vmem:[#allocation3 + $0x1b0] sm:$0xff] %vm1133_vm5, %v1050_v41 }
 0x3ce   :  { %2653 = vrot.lane.b32.xlu1 %v12188_v60, %s9291_s23  ;;  %2651 = vrot.lane.b32.xlu0 %v12191_v5, %s9291_s23 }
 0x3d0   :  { %v1309_v45 = vpop.permute.xlu1 %1308  ;;  %v1307_v40 = vpop.permute.xlu0 %1306 }
 0x3d1   :  { %1448 = vst.msk [vmem:[#allocation3 + $0x1a8] sm:$0xff] %vm1394_vm6, %v1309_v45  ;;  %1447 = vst.msk [vmem:[#allocation3 + $0x1a0] sm:$0xff] %vm1394_vm6, %v1307_v40  ;;  %v1466_v40 = vrot.slane %v130_v14, 1 }
 0x3d2   :  { %649 = vrot.lane.b32.xlu1 %v12162_v51, %s9283_s13  ;;  %647 = vrot.lane.b32.xlu0 %v12165_v46, %s9283_s13 }
 0x3d4   :  { %v1313_v38 = vpop.permute.xlu1 %1312  ;;  %v1311_v36 = vpop.permute.xlu0 %1310 }
 0x3d5   :  { %1450 = vst.msk [vmem:[#allocation3 + $0x1b8] sm:$0xff] %vm1394_vm6, %v1313_v38  ;;  %1449 = vst.msk [vmem:[#allocation3 + $0x1b0] sm:$0xff] %vm1394_vm6, %v1311_v36 }
 0x3d6   :  { %1063 = vrot.lane.b32.xlu1 %v12127_v32, %s9284_s14  ;;  %1061 = vrot.lane.b32.xlu0 %v12130_v12, %s9284_s14  ;;  %v131_v12 = vld [vmem:[%s15876_s0 + $0x338] sm:$0xff] }
 0x3d7   :  { %v1467_v17 = vrot.slane %v131_v12, 1 }
 0x3d8   :  { %v1578_v23 = vpop.permute.xlu1 %1577  ;;  %v1576_v35 = vpop.permute.xlu0 %1575 }
 0x3d9   :  { %1717 = vst.msk [vmem:[#allocation3 + $0x1a8] sm:$0xff] %vm1663_vm7, %v1578_v23  ;;  %1716 = vst.msk [vmem:[#allocation3 + $0x1a0] sm:$0xff] %vm1663_vm7, %v1576_v35 }
 0x3da   :  { %1067 = vrot.lane.b32.xlu1 %v12188_v60, %s9284_s14  ;;  %1065 = vrot.lane.b32.xlu0 %v12191_v5, %s9284_s14 }
 0x3dc   :  { %v1582_v27 = vpop.permute.xlu1 %1581  ;;  %v1580_v30 = vpop.permute.xlu0 %1579 }
 0x3dd   :  { %1719 = vst.msk [vmem:[#allocation3 + $0x1b8] sm:$0xff] %vm1663_vm7, %v1582_v27  ;;  %1718 = vst.msk [vmem:[#allocation3 + $0x1b0] sm:$0xff] %vm1663_vm7, %v1580_v30 }
 0x3de   :  { %1324 = vrot.lane.b32.xlu1 %v11820_v31, %s9286_s10  ;;  %1322 = vrot.lane.b32.xlu0 %v11825_v11, %s9286_s10  ;;  %v12223_v32 = vpop.f32.mrb[36].mxu0  ;;  %v132_v31 = vld [vmem:[%s15876_s0 + $0x340] sm:$0x3] }
 0x3df   :  { %16118 = vst [vmem:[#allocation9_spill] sm:$0xff] %v12223_v32  ;;  %v12228_v59 = vpop.f32.mrb[37].mxu0  ;;  %v1469_v45 = vrot.slane %v132_v31, 1  ;;  %v3348_v36 = vmul.f32 %v12223_v32, %v12223_v32 }
 0x3e0   :  { %16119 = vst [vmem:[#allocation10_spill] sm:$0xff] %v12228_v59  ;;  %v1845_v53 = vpop.permute.xlu1 %1844  ;;  %v3276_v11 = vadd.f32 %v12105_v29, %v12228_v59  ;;  %v3346_v49 = vmul.f32 %v12228_v59, %v12228_v59  ;;  %v1843_v56 = vpop.permute.xlu0 %1842 }
 0x3e1   :  { %1984 = vst.msk [vmem:[#allocation3 + $0x1a8] sm:$0xff] %vm1930_vm8, %v1845_v53  ;;  %v12241_v47 = vpop.f32.mrb[38].mxu0  ;;  %1983 = vst.msk [vmem:[#allocation3 + $0x1a0] sm:$0xff] %vm1930_vm8, %v1843_v56  ;;  %v1470_v53 = vsel %vm362_vm0, %v1467_v17, %v1469_v45  ;;  %v1468_v56 = vsel %vm362_vm0, %v1466_v40, %v1467_v17 }
 0x3e2   :  { %16120 = vst [vmem:[#allocation11_spill] sm:$0xff] %v12241_v47  ;;  %v12244_v7 = vpop.f32.mrb[39].mxu0  ;;  %1328 = vrot.lane.b32.xlu1 %v131_v12, %s9286_s10  ;;  %v3409_v61 = vadd.f32 %v12111_v34, %v3346_v49  ;;  %1326 = vrot.lane.b32.xlu0 %v130_v14, %s9286_s10  ;;  %v3349_v34 = vmul.f32 %v12241_v47, %v12241_v47 }
 0x3e3   :  { %16121 = vst [vmem:[#allocation12_spill] sm:$0xff] %v12244_v7  ;;  %v3277_v41 = vadd.f32 %v3276_v11, %v12244_v7  ;;  %v3347_v29 = vmul.f32 %v12244_v7, %v12244_v7  ;;  %v12664_v7 = vld [vmem:[%s15880_s4 + $0xf0] sm:$0xff]  }
 0x3e4   :  { %v1849_v38 = vpop.permute.xlu1 %1848  ;;  %v1847_v27 = vpop.permute.xlu0 %1846 }
 0x3e5   :  { %v3278_v23 = vadd.f32 %v12223_v32, %v3277_v41  ;;  %v3410_v35 = vadd.f32 %v3409_v61, %v3347_v29  ;;  %1986 = vst.msk [vmem:[#allocation3 + $0x1b8] sm:$0xff] %vm1930_vm8, %v1849_v38  ;;  %1985 = vst.msk [vmem:[#allocation3 + $0x1b0] sm:$0xff] %vm1930_vm8, %v1847_v27  ;;  %v1733_v29 = vrot.slane %v130_v14, 2  ;;  %v133_v27 = vld [vmem:[%s15876_s0 + $0x348] sm:$0xff] }
 0x3e6   :  { %1593 = vrot.lane.b32.xlu1 %v12162_v51, %s9287_s17  ;;  %1591 = vrot.lane.b32.xlu0 %v12165_v46, %s9287_s17  ;;  %v1734_v51 = vrot.slane %v131_v12, 2  ;;  %v1736_v46 = vrot.slane %v132_v31, 2 }
 0x3e7   :  { %v3411_v30 = vadd.f32 %v3410_v35, %v3348_v36  ;;  %v12265_v11 = vadd.f32 %v12241_v47, %v3278_v23 }
 0x3e8   :  { %v2106_v49 = vpop.permute.xlu1 %2105  ;;  %v2104_v61 = vpop.permute.xlu0 %2103  ;;  %v1737_v17 = vsel %vm780_vm1, %v1734_v51, %v1736_v46  ;;  %v1735_v36 = vsel %vm780_vm1, %v1733_v29, %v1734_v51 }
 0x3e9   :  { %2245 = vst.msk [vmem:[#allocation3 + $0x1a8] sm:$0xff] %vm2191_vm9, %v2106_v49  ;;  %v12269_v41 = vadd.f32 %v3411_v30, %v3349_v34  ;;  %2244 = vst.msk [vmem:[#allocation3 + $0x1a0] sm:$0xff] %vm2191_vm9, %v2104_v61  ;;  %v135_v34 = vld [vmem:[%s15876_s0 + $0x358] sm:$0x3]  ;;  %v2263_v49 = vrot.slane %v133_v27, 1 }
 0x3ea   :  { %1597 = vrot.lane.b32.xlu1 %v1470_v53, %s9287_s17  ;;  %1595 = vrot.lane.b32.xlu0 %v1468_v56, %s9287_s17 }
 0x3ec   :  { %v2110_v45 = vpop.permute.xlu1 %2109  ;;  %v2108_v38 = vpop.permute.xlu0 %2107 }
 0x3ed   :  { %2247 = vst.msk [vmem:[#allocation3 + $0x1b8] sm:$0xff] %vm2191_vm9, %v2110_v45  ;;  %2246 = vst.msk [vmem:[#allocation3 + $0x1b0] sm:$0xff] %vm2191_vm9, %v2108_v38 }
 0x3ee   :  { %1860 = vrot.lane.b32.xlu1 %v12188_v60, %s9288_s20  ;;  %1858 = vrot.lane.b32.xlu0 %v12191_v5, %s9288_s20  ;;  %v134_v5 = vld [vmem:[%s15876_s0 + $0x350] sm:$0xff] }
 0x3f0   :  { %v2375_v40 = vpop.permute.xlu1 %2374  ;;  %v2373_v31 = vpop.permute.xlu0 %2372 }
 0x3f1   :  { %2514 = vst.msk [vmem:[#allocation3 + $0x1a8] sm:$0xff] %vm2460_vm10, %v2375_v40  ;;  %2513 = vst.msk [vmem:[#allocation3 + $0x1a0] sm:$0xff] %vm2460_vm10, %v2373_v31 }
 0x3f2   :  { %1864 = vrot.lane.b32.xlu1 %v1737_v17, %s9288_s20  ;;  %1862 = vrot.lane.b32.xlu0 %v1735_v36, %s9288_s20 }
 0x3f4   :  { %v2379_v23 = vpop.permute.xlu1 %2378  ;;  %v2377_v60 = vpop.permute.xlu0 %2376 }
 0x3f5   :  { %2516 = vst.msk [vmem:[#allocation3 + $0x1b8] sm:$0xff] %vm2460_vm10, %v2379_v23  ;;  %2515 = vst.msk [vmem:[#allocation3 + $0x1b0] sm:$0xff] %vm2460_vm10, %v2377_v60  ;;  %v2531_v60 = vrot.slane %v134_v5, 2 }
 0x3f6   :  { %2121 = vrot.lane.b32.xlu1 %v131_v12, %s9289_s25  ;;  %2119 = vrot.lane.b32.xlu0 %v130_v14, %s9289_s25  ;;  %v2264_v12 = vrot.slane %v134_v5, 1  ;;  %v2266_v14 = vrot.slane %v135_v34, 1 }
 0x3f8   :  { %v2642_v35 = vpop.permute.xlu1 %2641  ;;  %v2640_v30 = vpop.permute.xlu0 %2639  ;;  %v2267_v46 = vsel %vm362_vm0, %v2264_v12, %v2266_v14  ;;  %v2265_v45 = vsel %vm362_vm0, %v2263_v49, %v2264_v12 }
 0x3f9   :  { %2781 = vst.msk [vmem:[#allocation3 + $0x1a8] sm:$0xff] %vm2727_vm11, %v2642_v35  ;;  %2780 = vst.msk [vmem:[#allocation3 + $0x1a0] sm:$0xff] %vm2727_vm11, %v2640_v30 }
 0x3fa   :  { %2125 = vrot.lane.b32.xlu1 %v134_v5, %s9289_s25  ;;  %2123 = vrot.lane.b32.xlu0 %v133_v27, %s9289_s25 }
 0x3fc   :  { %v638_v61 = vpop.permute.xlu1 %637  ;;  %v636_v51 = vpop.permute.xlu0 %635 }
 0x3fd   :  { %773 = vst.msk [vmem:[#allocation3 + $0x1c8] sm:$0xff] %vm715_vm4, %v638_v61  ;;  %772 = vst.msk [vmem:[#allocation3 + $0x1c0] sm:$0xff] %vm715_vm4, %v636_v51 }
 0x3fe   :  { %2390 = vrot.lane.b32.xlu1 %v1470_v53, %s9290_s16  ;;  %2388 = vrot.lane.b32.xlu0 %v1468_v56, %s9290_s16  ;;  %v2533_v53 = vrot.slane %v135_v34, 2  ;;  %v2530_v56 = vrot.slane %v133_v27, 2 }
 0x400   :  { %v2646_v29 = vpop.permute.xlu1 %2645  ;;  %v2845_v38 = vld [vmem:[#allocation3 + $0x1a8] sm:$0xff]  ;;  %v2644_v40 = vpop.permute.xlu0 %2643  ;;  %v2844_v31 = vld [vmem:[#allocation3 + $0x1a0] sm:$0xff]  ;;  %v2534_v12 = vsel %vm780_vm1, %v2531_v60, %v2533_v53  ;;  %v2532_v5 = vsel %vm780_vm1, %v2530_v56, %v2531_v60 }
 0x401   :  { %2783 = vst.msk [vmem:[#allocation3 + $0x1b8] sm:$0xff] %vm2727_vm11, %v2646_v29  ;;  %2782 = vst.msk [vmem:[#allocation3 + $0x1b0] sm:$0xff] %vm2727_vm11, %v2644_v40  ;;  %v2882_v23 = vpack.c.bf16 %v2845_v38, %v2844_v31 }
 0x402   :  { %2394 = vrot.lane.b32.xlu1 %v2267_v46, %s9290_s16  ;;  %2392 = vrot.lane.b32.xlu0 %v2265_v45, %s9290_s16 }
 0x403   :  { %8712 = vmatprep.mubr.bf16.mxu0 %v2882_v23 }
 0x404   :  { %v642_v35 = vpop.permute.xlu1 %641  ;;  %v640_v30 = vpop.permute.xlu0 %639 }
 0x405   :  { %775 = vst.msk [vmem:[#allocation3 + $0x1d8] sm:$0xff] %vm715_vm4, %v642_v35  ;;  %774 = vst.msk [vmem:[#allocation3 + $0x1d0] sm:$0xff] %vm715_vm4, %v640_v30 }
 0x406   :  { %2657 = vrot.lane.b32.xlu1 %v1737_v17, %s9291_s23  ;;  %2655 = vrot.lane.b32.xlu0 %v1735_v36, %s9291_s23 }
 0x408   :  { %v1056_v14 = vpop.permute.xlu1 %1055  ;;  %v2847_v49 = vld [vmem:[#allocation3 + $0x1b8] sm:$0xff]  ;;  %v1054_v27 = vpop.permute.xlu0 %1053  ;;  %v2846_v34 = vld [vmem:[#allocation3 + $0x1b0] sm:$0xff] }
 0x409   :  { %1191 = vst.msk [vmem:[#allocation3 + $0x1c8] sm:$0xff] %vm1133_vm5, %v1056_v14  ;;  %1190 = vst.msk [vmem:[#allocation3 + $0x1c0] sm:$0xff] %vm1133_vm5, %v1054_v27  ;;  %v2883_v61 = vpack.c.bf16 %v2847_v49, %v2846_v34 }
 0x40a   :  { %2661 = vrot.lane.b32.xlu1 %v2534_v12, %s9291_s23  ;;  %2659 = vrot.lane.b32.xlu0 %v2532_v5, %s9291_s23 }
 0x40b   :  { %8713 = vmatmul.mubr.bf16.gmra.mrb[52].mxu0 %v2883_v61 }
 0x40c   :  { %v1060_v17 = vpop.permute.xlu1 %1059  ;;  %v1058_v36 = vpop.permute.xlu0 %1057 }
 0x40d   :  { %1193 = vst.msk [vmem:[#allocation3 + $0x1d8] sm:$0xff] %vm1133_vm5, %v1060_v17  ;;  %1192 = vst.msk [vmem:[#allocation3 + $0x1d0] sm:$0xff] %vm1133_vm5, %v1058_v36 }
 0x410   :  { %v1317_v51 = vpop.permute.xlu1 %1316  ;;  %v1315_v46 = vpop.permute.xlu0 %1314 }
 0x411   :  { %1452 = vst.msk [vmem:[#allocation3 + $0x1c8] sm:$0xff] %vm1394_vm6, %v1317_v51  ;;  %1451 = vst.msk [vmem:[#allocation3 + $0x1c0] sm:$0xff] %vm1394_vm6, %v1315_v46 }
 0x414   :  { %v1321_v29 = vpop.permute.xlu1 %1320  ;;  %v1319_v45 = vpop.permute.xlu0 %1318 }
 0x415   :  { %1454 = vst.msk [vmem:[#allocation3 + $0x1d8] sm:$0xff] %vm1394_vm6, %v1321_v29  ;;  %1453 = vst.msk [vmem:[#allocation3 + $0x1d0] sm:$0xff] %vm1394_vm6, %v1319_v45 }
 0x418   :  { %v1586_v38 = vpop.permute.xlu1 %1585  ;;  %v1584_v40 = vpop.permute.xlu0 %1583 }
 0x419   :  { %1721 = vst.msk [vmem:[#allocation3 + $0x1c8] sm:$0xff] %vm1663_vm7, %v1586_v38  ;;  %1720 = vst.msk [vmem:[#allocation3 + $0x1c0] sm:$0xff] %vm1663_vm7, %v1584_v40 }
 0x41c   :  { %v1590_v31 = vpop.permute.xlu1 %1589  ;;  %v1588_v23 = vpop.permute.xlu0 %1587 }
 0x41d   :  { %1723 = vst.msk [vmem:[#allocation3 + $0x1d8] sm:$0xff] %vm1663_vm7, %v1590_v31  ;;  %1722 = vst.msk [vmem:[#allocation3 + $0x1d0] sm:$0xff] %vm1663_vm7, %v1588_v23 }
 0x41e   :  { %v12333_v60 = vpop.f32.mrb[40].mxu0 }
 0x41f   :  { %16122 = vst [vmem:[#allocation13_spill] sm:$0xff] %v12333_v60  ;;  %v12335_v53 = vpop.f32.mrb[41].mxu0  ;;  %v3352_v61 = vmul.f32 %v12333_v60, %v12333_v60 }
 0x420   :  { %16123 = vst [vmem:[#allocation14_spill] sm:$0xff] %v12335_v53  ;;  %v1853_v56 = vpop.permute.xlu1 %1852  ;;  %v3280_v35 = vadd.f32 %v12265_v11, %v12335_v53  ;;  %v3350_v30 = vmul.f32 %v12335_v53, %v12335_v53  ;;  %v1851_v12 = vpop.permute.xlu0 %1850 }
 0x421   :  { %1988 = vst.msk [vmem:[#allocation3 + $0x1c8] sm:$0xff] %vm1930_vm8, %v1853_v56  ;;  %v12342_v14 = vpop.f32.mrb[42].mxu0  ;;  %1987 = vst.msk [vmem:[#allocation3 + $0x1c0] sm:$0xff] %vm1930_vm8, %v1851_v12 }
 0x422   :  { %16124 = vst [vmem:[#allocation15_spill] sm:$0xff] %v12342_v14  ;;  %v12345_v5 = vpop.f32.mrb[43].mxu0  ;;  %v3413_v49 = vadd.f32 %v12269_v41, %v3350_v30  ;;  %v3353_v41 = vmul.f32 %v12342_v14, %v12342_v14 }
 0x423   :  { %16125 = vst [vmem:[#allocation16_spill] sm:$0xff] %v12345_v5  ;;  %v3281_v27 = vadd.f32 %v3280_v35, %v12345_v5  ;;  %v3351_v34 = vmul.f32 %v12345_v5, %v12345_v5  ;;  %v9252_v5 = vld [vmem:[#allocation2 + $0x8] sm:$0xff] }
 0x424   :  { %v1857_v11 = vpop.permute.xlu1 %1856  ;;  %v1855_v51 = vpop.permute.xlu0 %1854  ;;  %v12654_v53 = vrot.slane %v9252_v5, 1 }
 0x425   :  { %v3282_v17 = vadd.f32 %v12333_v60, %v3281_v27  ;;  %v3414_v36 = vadd.f32 %v3413_v49, %v3351_v34  ;;  %1990 = vst.msk [vmem:[#allocation3 + $0x1d8] sm:$0xff] %vm1930_vm8, %v1857_v11  ;;  %1989 = vst.msk [vmem:[#allocation3 + $0x1d0] sm:$0xff] %vm1930_vm8, %v1855_v51 }
 0x426   :  { %16143 = vst [vmem:[#allocation33_spill] sm:$0xff] %v12654_v53 }
 0x427   :  { %v3415_v46 = vadd.f32 %v3414_v36, %v3352_v61  ;;  %v12359_v29 = vadd.f32 %v12342_v14, %v3282_v17 }
 0x428   :  { %v2114_v45 = vpop.permute.xlu1 %2113  ;;  %v2112_v38 = vpop.permute.xlu0 %2111 }
 0x429   :  { %2249 = vst.msk [vmem:[#allocation3 + $0x1c8] sm:$0xff] %vm2191_vm9, %v2114_v45  ;;  %v12362_v40 = vadd.f32 %v3415_v46, %v3353_v41  ;;  %2248 = vst.msk [vmem:[#allocation3 + $0x1c0] sm:$0xff] %vm2191_vm9, %v2112_v38 }
 0x42c   :  { %v2118_v31 = vpop.permute.xlu1 %2117  ;;  %v2116_v23 = vpop.permute.xlu0 %2115 }
 0x42d   :  { %2251 = vst.msk [vmem:[#allocation3 + $0x1d8] sm:$0xff] %vm2191_vm9, %v2118_v31  ;;  %2250 = vst.msk [vmem:[#allocation3 + $0x1d0] sm:$0xff] %vm2191_vm9, %v2116_v23 }
 0x430   :  { %v2383_v56 = vpop.permute.xlu1 %2382  ;;  %v2381_v35 = vpop.permute.xlu0 %2380 }
 0x431   :  { %2518 = vst.msk [vmem:[#allocation3 + $0x1c8] sm:$0xff] %vm2460_vm10, %v2383_v56  ;;  %2517 = vst.msk [vmem:[#allocation3 + $0x1c0] sm:$0xff] %vm2460_vm10, %v2381_v35 }
 0x434   :  { %v2387_v30 = vpop.permute.xlu1 %2386  ;;  %v2385_v12 = vpop.permute.xlu0 %2384 }
 0x435   :  { %2520 = vst.msk [vmem:[#allocation3 + $0x1d8] sm:$0xff] %vm2460_vm10, %v2387_v30  ;;  %2519 = vst.msk [vmem:[#allocation3 + $0x1d0] sm:$0xff] %vm2460_vm10, %v2385_v12 }
 0x438   :  { %v2650_v49 = vpop.permute.xlu1 %2649  ;;  %v2648_v27 = vpop.permute.xlu0 %2647 }
 0x439   :  { %2785 = vst.msk [vmem:[#allocation3 + $0x1c8] sm:$0xff] %vm2727_vm11, %v2650_v49  ;;  %2784 = vst.msk [vmem:[#allocation3 + $0x1c0] sm:$0xff] %vm2727_vm11, %v2648_v27 }
 0x43c   :  { %v646_v34 = vpop.permute.xlu1 %645  ;;  %v644_v11 = vpop.permute.xlu0 %643 }
 0x43d   :  { %777 = vst.msk [vmem:[#allocation3 + $0x1e8] sm:$0xff] %vm715_vm4, %v646_v34  ;;  %776 = vst.msk [vmem:[#allocation3 + $0x1e0] sm:$0xff] %vm715_vm4, %v644_v11 }
 0x440   :  { %v2654_v61 = vpop.permute.xlu1 %2653  ;;  %v2849_v17 = vld [vmem:[#allocation3 + $0x1c8] sm:$0xff]  ;;  %v2652_v36 = vpop.permute.xlu0 %2651  ;;  %v2848_v51 = vld [vmem:[#allocation3 + $0x1c0] sm:$0xff] }
 0x441   :  { %2787 = vst.msk [vmem:[#allocation3 + $0x1d8] sm:$0xff] %vm2727_vm11, %v2654_v61  ;;  %2786 = vst.msk [vmem:[#allocation3 + $0x1d0] sm:$0xff] %vm2727_vm11, %v2652_v36  ;;  %v2884_v41 = vpack.c.bf16 %v2849_v17, %v2848_v51 }
 0x443   :  { %8716 = vmatprep.mubr.bf16.mxu0 %v2884_v41 }
 0x444   :  { %v650_v46 = vpop.permute.xlu1 %649  ;;  %v648_v45 = vpop.permute.xlu0 %647 }
 0x445   :  { %779 = vst.msk [vmem:[#allocation3 + $0x1f8] sm:$0xff] %vm715_vm4, %v650_v46  ;;  %778 = vst.msk [vmem:[#allocation3 + $0x1f0] sm:$0xff] %vm715_vm4, %v648_v45 }
 0x448   :  { %v1064_v38 = vpop.permute.xlu1 %1063  ;;  %v2851_v31 = vld [vmem:[#allocation3 + $0x1d8] sm:$0xff]  ;;  %v1062_v23 = vpop.permute.xlu0 %1061  ;;  %v2850_v56 = vld [vmem:[#allocation3 + $0x1d0] sm:$0xff] }
 0x449   :  { %1195 = vst.msk [vmem:[#allocation3 + $0x1e8] sm:$0xff] %vm1133_vm5, %v1064_v38  ;;  %1194 = vst.msk [vmem:[#allocation3 + $0x1e0] sm:$0xff] %vm1133_vm5, %v1062_v23  ;;  %v2885_v35 = vpack.c.bf16 %v2851_v31, %v2850_v56 }
 0x44b   :  { %8717 = vmatmul.mubr.bf16.gmra.mrb[56].mxu0 %v2885_v35 }
 0x44c   :  { %v1068_v30 = vpop.permute.xlu1 %1067  ;;  %v1066_v12 = vpop.permute.xlu0 %1065 }
 0x44d   :  { %1197 = vst.msk [vmem:[#allocation3 + $0x1f8] sm:$0xff] %vm1133_vm5, %v1068_v30  ;;  %1196 = vst.msk [vmem:[#allocation3 + $0x1f0] sm:$0xff] %vm1133_vm5, %v1066_v12 }
 0x450   :  { %v1325_v49 = vpop.permute.xlu1 %1324  ;;  %v1323_v27 = vpop.permute.xlu0 %1322 }
 0x451   :  { %1456 = vst.msk [vmem:[#allocation3 + $0x1e8] sm:$0xff] %vm1394_vm6, %v1325_v49  ;;  %1455 = vst.msk [vmem:[#allocation3 + $0x1e0] sm:$0xff] %vm1394_vm6, %v1323_v27 }
 0x454   :  { %v1329_v34 = vpop.permute.xlu1 %1328  ;;  %v1327_v11 = vpop.permute.xlu0 %1326 }
 0x455   :  { %1458 = vst.msk [vmem:[#allocation3 + $0x1f8] sm:$0xff] %vm1394_vm6, %v1329_v34  ;;  %1457 = vst.msk [vmem:[#allocation3 + $0x1f0] sm:$0xff] %vm1394_vm6, %v1327_v11 }
 0x458   :  { %v1594_v61 = vpop.permute.xlu1 %1593  ;;  %v1592_v17 = vpop.permute.xlu0 %1591 }
 0x459   :  { %1725 = vst.msk [vmem:[#allocation3 + $0x1e8] sm:$0xff] %vm1663_vm7, %v1594_v61  ;;  %1724 = vst.msk [vmem:[#allocation3 + $0x1e0] sm:$0xff] %vm1663_vm7, %v1592_v17 }
 0x45c   :  { %v1598_v36 = vpop.permute.xlu1 %1597  ;;  %v1596_v51 = vpop.permute.xlu0 %1595 }
 0x45d   :  { %1727 = vst.msk [vmem:[#allocation3 + $0x1f8] sm:$0xff] %vm1663_vm7, %v1598_v36  ;;  %1726 = vst.msk [vmem:[#allocation3 + $0x1f0] sm:$0xff] %vm1663_vm7, %v1596_v51 }
 0x45e   :  { %v12391_v41 = vpop.f32.mrb[44].mxu0 }
 0x45f   :  { %16126 = vst [vmem:[#allocation17_spill] sm:$0xff] %v12391_v41  ;;  %v12393_v46 = vpop.f32.mrb[45].mxu0  ;;  %v3356_v27 = vmul.f32 %v12391_v41, %v12391_v41 }
 0x460   :  { %16127 = vst [vmem:[#allocation18_spill] sm:$0xff] %v12393_v46  ;;  %v1861_v45 = vpop.permute.xlu1 %1860  ;;  %v3284_v38 = vadd.f32 %v12359_v29, %v12393_v46  ;;  %v3354_v31 = vmul.f32 %v12393_v46, %v12393_v46  ;;  %v1859_v23 = vpop.permute.xlu0 %1858 }
 0x461   :  { %1992 = vst.msk [vmem:[#allocation3 + $0x1e8] sm:$0xff] %vm1930_vm8, %v1861_v45  ;;  %v12400_v56 = vpop.f32.mrb[46].mxu0  ;;  %1991 = vst.msk [vmem:[#allocation3 + $0x1e0] sm:$0xff] %vm1930_vm8, %v1859_v23 }
 0x462   :  { %16128 = vst [vmem:[#allocation19_spill] sm:$0xff] %v12400_v56  ;;  %v12403_v35 = vpop.f32.mrb[47].mxu0  ;;  %v3417_v30 = vadd.f32 %v12362_v40, %v3354_v31  ;;  %v3357_v40 = vmul.f32 %v12400_v56, %v12400_v56 }
 0x463   :  { %16129 = vst [vmem:[#allocation20_spill] sm:$0xff] %v12403_v35  ;;  %v3285_v12 = vadd.f32 %v3284_v38, %v12403_v35  ;;  %v3355_v49 = vmul.f32 %v12403_v35, %v12403_v35 }
 0x464   :  { %v1865_v29 = vpop.permute.xlu1 %1864  ;;  %v1863_v61 = vpop.permute.xlu0 %1862 }
 0x465   :  { %v3286_v34 = vadd.f32 %v12391_v41, %v3285_v12  ;;  %v3418_v11 = vadd.f32 %v3417_v30, %v3355_v49  ;;  %1994 = vst.msk [vmem:[#allocation3 + $0x1f8] sm:$0xff] %vm1930_vm8, %v1865_v29  ;;  %1993 = vst.msk [vmem:[#allocation3 + $0x1f0] sm:$0xff] %vm1930_vm8, %v1863_v61 }
 0x467   :  { %v3419_v17 = vadd.f32 %v3418_v11, %v3356_v27  ;;  %v3287_v36 = vadd.f32 %v12400_v56, %v3286_v34 }
 0x468   :  { %v2122_v51 = vpop.permute.xlu1 %2121  ;;  %v2120_v45 = vpop.permute.xlu0 %2119 }
 0x469   :  { %2253 = vst.msk [vmem:[#allocation3 + $0x1e8] sm:$0xff] %vm2191_vm9, %v2122_v51  ;;  %v3420_v38 = vadd.f32 %v3419_v17, %v3357_v40  ;;  %2252 = vst.msk [vmem:[#allocation3 + $0x1e0] sm:$0xff] %vm2191_vm9, %v2120_v45 }
 0x46c   :  { %v2126_v31 = vpop.permute.xlu1 %2125  ;;  %v2124_v23 = vpop.permute.xlu0 %2123 }
 0x46d   :  { %2255 = vst.msk [vmem:[#allocation3 + $0x1f8] sm:$0xff] %vm2191_vm9, %v2126_v31  ;;  %2254 = vst.msk [vmem:[#allocation3 + $0x1f0] sm:$0xff] %vm2191_vm9, %v2124_v23 }
 0x470   :  { %v2391_v30 = vpop.permute.xlu1 %2390  ;;  %v2389_v12 = vpop.permute.xlu0 %2388 }
 0x471   :  { %2522 = vst.msk [vmem:[#allocation3 + $0x1e8] sm:$0xff] %vm2460_vm10, %v2391_v30  ;;  %2521 = vst.msk [vmem:[#allocation3 + $0x1e0] sm:$0xff] %vm2460_vm10, %v2389_v12 }
 0x474   :  { %v2395_v49 = vpop.permute.xlu1 %2394  ;;  %v2393_v29 = vpop.permute.xlu0 %2392 }
 0x475   :  { %2524 = vst.msk [vmem:[#allocation3 + $0x1f8] sm:$0xff] %vm2460_vm10, %v2395_v49  ;;  %2523 = vst.msk [vmem:[#allocation3 + $0x1f0] sm:$0xff] %vm2460_vm10, %v2393_v29 }
 0x478   :  { %v2658_v27 = vpop.permute.xlu1 %2657  ;;  %v2656_v34 = vpop.permute.xlu0 %2655 }
 0x479   :  { %2789 = vst.msk [vmem:[#allocation3 + $0x1e8] sm:$0xff] %vm2727_vm11, %v2658_v27  ;;  %2788 = vst.msk [vmem:[#allocation3 + $0x1e0] sm:$0xff] %vm2727_vm11, %v2656_v34 }
 0x47c   :  { %v2662_v11 = vpop.permute.xlu1 %2661  ;;  %v2660_v61 = vpop.permute.xlu0 %2659 }
 0x47d   :  { %2791 = vst.msk [vmem:[#allocation3 + $0x1f8] sm:$0xff] %vm2727_vm11, %v2662_v11  ;;  %2790 = vst.msk [vmem:[#allocation3 + $0x1f0] sm:$0xff] %vm2727_vm11, %v2660_v61 }
 0x480   :  { %v2853_v40 = vld [vmem:[#allocation3 + $0x1e8] sm:$0xff]  ;;  %v2852_v17 = vld [vmem:[#allocation3 + $0x1e0] sm:$0xff] }
 0x481   :  { %v2886_v51 = vpack.c.bf16 %v2853_v40, %v2852_v17 }
 0x483   :  { %8720 = vmatprep.mubr.bf16.mxu0 %v2886_v51 }
 0x484   :  { %v2855_v45 = vld [vmem:[#allocation3 + $0x1f8] sm:$0xff]  ;;  %v2854_v31 = vld [vmem:[#allocation3 + $0x1f0] sm:$0xff] }
 0x485   :  { %v2887_v23 = vpack.c.bf16 %v2855_v45, %v2854_v31 }
 0x487   :  { %8721 = vmatmul.mubr.bf16.gmra.mrb[60].mxu0 %v2887_v23 }
 0x49e   :  { %v12429_v30 = vpop.f32.mrb[48].mxu0 }
 0x49f   :  { %16130 = vst [vmem:[#allocation21_spill] sm:$0xff] %v12429_v30  ;;  %v12431_v12 = vpop.f32.mrb[49].mxu0  ;;  %v3360_v17 = vmul.f32 %v12429_v30, %v12429_v30 }
 0x4a0   :  { %16131 = vst [vmem:[#allocation22_spill] sm:$0xff] %v12431_v12  ;;  %v3288_v49 = vadd.f32 %v3287_v36, %v12431_v12  ;;  %v3358_v29 = vmul.f32 %v12431_v12, %v12431_v12  ;;  %v12436_v27 = vpop.f32.mrb[50].mxu0 }
 0x4a1   :  { %16132 = vst [vmem:[#allocation23_spill] sm:$0xff] %v12436_v27  ;;  %v12438_v34 = vpop.f32.mrb[51].mxu0  ;;  %v3361_v36 = vmul.f32 %v12436_v27, %v12436_v27 }
 0x4a2   :  { %16133 = vst [vmem:[#allocation24_spill] sm:$0xff] %v12438_v34  ;;  %v3421_v11 = vadd.f32 %v3420_v38, %v3358_v29  ;;  %v3289_v61 = vadd.f32 %v3288_v49, %v12438_v34  ;;  %v3359_v40 = vmul.f32 %v12438_v34, %v12438_v34  ;;  %v9176_v38 = vld [vmem:[%s15880_s4] sm:$0xff]   ;;  %v15884_v49 = vmov 0  }
 0x4a3   :  { %6543 = vmatprep.subr.bf16.mxu0 %v15884_v49  ;;  %8804 = vmatprep.subr.bf16.mxu1 %v15884_v49 }
 0x4a4   :  { %v3290_v51 = vadd.f32 %v12429_v30, %v3289_v61  ;;  %v3422_v45 = vadd.f32 %v3421_v11, %v3359_v40  ;;  %6544 = vmatpush1.bf16.msra.mxu0 %v9176_v38  ;;  %v9177_v11 = vld [vmem:[%s15880_s4 + $0x8] sm:$0xff]  }
 0x4a5   :  { %6545 = vmatprep.subr.bf16.mxu0 %v15884_v49 }
 0x4a6   :  { %v3423_v31 = vadd.f32 %v3422_v45, %v3360_v17  ;;  %v3291_v23 = vadd.f32 %v12436_v27, %v3290_v51 }
 0x4a8   :  { %v3424_v29 = vadd.f32 %v3423_v31, %v3361_v36  ;;  %6546 = vmatpush1.bf16.msra.mxu0 %v9177_v11 }
 0x4a9   :  { %6547 = vmatprep.subr.bf16.mxu0 %v15884_v49 }
 0x4de   :  { %v12459_v61 = vpop.f32.mrb[52].mxu0 }
 0x4df   :  { %16134 = vst [vmem:[#allocation25_spill] sm:$0xff] %v12459_v61  ;;  %v12461_v40 = vpop.f32.mrb[53].mxu0  ;;  %v3364_v49 = vmul.f32 %v12459_v61, %v12459_v61 }
 0x4e0   :  { %16135 = vst [vmem:[#allocation26_spill] sm:$0xff] %v12461_v40  ;;  %v3292_v17 = vadd.f32 %v3291_v23, %v12461_v40  ;;  %v3362_v51 = vmul.f32 %v12461_v40, %v12461_v40  ;;  %v12466_v45 = vpop.f32.mrb[54].mxu0 }
 0x4e1   :  { %16136 = vst [vmem:[#allocation27_spill] sm:$0xff] %v12466_v45  ;;  %v12468_v36 = vpop.f32.mrb[55].mxu0  ;;  %v3365_v23 = vmul.f32 %v12466_v45, %v12466_v45 }
 0x4e2   :  { %16137 = vst [vmem:[#allocation28_spill] sm:$0xff] %v12468_v36  ;;  %v3425_v31 = vadd.f32 %v3424_v29, %v3362_v51  ;;  %v3293_v38 = vadd.f32 %v3292_v17, %v12468_v36  ;;  %v3363_v11 = vmul.f32 %v12468_v36, %v12468_v36  ;;  %v12482_v29 = vld [vmem:[%s15880_s4 + $0x80] sm:$0xff]   ;;  %v16138_v17 = vmov 0   ;;  %v9179_v51 = vld [vmem:[%s15880_s4 + $0x10] sm:$0xff]  }
 0x4e3   :  { %8820 = vmatpush1.bf16.msra.mxu1 %v12482_v29  ;;  %6548 = vmatpush1.bf16.msra.mxu0 %v9179_v51  ;;  %v12536_v51 = vld [vmem:[%s15880_s4 + $0xa8] sm:$0xff]  }
 0x4e4   :  { %v3294_v27 = vadd.f32 %v12459_v61, %v3293_v38  ;;  %v3426_v30 = vadd.f32 %v3425_v31, %v3363_v11  ;;  %8805 = vmatprep.subr.bf16.mxu1 %v16138_v17  ;;  %6549 = vmatprep.subr.bf16.mxu0 %v16138_v17  ;;  %v12514_v31 = vld [vmem:[%s15880_s4 + $0x98] sm:$0xff]   ;;  %v9185_v38 = vld [vmem:[%s15880_s4 + $0x28] sm:$0xff]   ;;  %v12525_v11 = vld [vmem:[%s15880_s4 + $0xa0] sm:$0xff]  }
 0x4e6   :  { %v3427_v40 = vadd.f32 %v3426_v30, %v3364_v49  ;;  %v3295_v34 = vadd.f32 %v12466_v45, %v3294_v27  ;;  %v12492_v30 = vld [vmem:[%s15880_s4 + $0x88] sm:$0xff]   ;;  %v9181_v27 = vld [vmem:[%s15880_s4 + $0x18] sm:$0xff]   ;;  %v12503_v49 = vld [vmem:[%s15880_s4 + $0x90] sm:$0xff]  }
 0x4e7   :  { %8821 = vmatpush1.bf16.msra.mxu1 %v12492_v30  ;;  %6550 = vmatpush1.bf16.msra.mxu0 %v9181_v27  ;;  %v9189_v27 = vld [vmem:[%s15880_s4 + $0x38] sm:$0xff]  }
 0x4e8   :  { %v3428_v12 = vadd.f32 %v3427_v40, %v3365_v23  ;;  %8806 = vmatprep.subr.bf16.mxu1 %v16138_v17  ;;  %6551 = vmatprep.subr.bf16.mxu0 %v16138_v17  ;;  %v9183_v40 = vld [vmem:[%s15880_s4 + $0x20] sm:$0xff]   ;;  %v9187_v23 = vld [vmem:[%s15880_s4 + $0x30] sm:$0xff]  }
 0x4eb   :  { %8822 = vmatpush1.bf16.msra.mxu1 %v12503_v49  ;;  %6552 = vmatpush1.bf16.msra.mxu0 %v9183_v40 }
 0x4ec   :  { %8807 = vmatprep.subr.bf16.mxu1 %v16138_v17  ;;  %6553 = vmatprep.subr.bf16.mxu0 %v16138_v17 }
 0x4ef   :  { %8823 = vmatpush1.bf16.msra.mxu1 %v12514_v31  ;;  %6554 = vmatpush1.bf16.msra.mxu0 %v9185_v38 }
 0x4f0   :  { %8808 = vmatprep.subr.bf16.mxu1 %v16138_v17  ;;  %6555 = vmatprep.subr.bf16.mxu0 %v16138_v17 }
 0x4f3   :  { %8824 = vmatpush1.bf16.msra.mxu1 %v12525_v11  ;;  %6556 = vmatpush1.bf16.msra.mxu0 %v9187_v23  ;;  %v12551_v23 = vld [vmem:[%s15880_s4 + $0xb0] sm:$0xff]  }
 0x4f4   :  { %8809 = vmatprep.subr.bf16.mxu1 %v16138_v17  ;;  %6557 = vmatprep.subr.bf16.mxu0 %v16138_v17 }
 0x4f7   :  { %8825 = vmatpush1.bf16.msra.mxu1 %v12536_v51  ;;  %6558 = vmatpush1.bf16.msra.mxu0 %v9189_v27  ;;  %v9191_v27 = vld [vmem:[%s15880_s4 + $0x40] sm:$0xff]  }
 0x4f8   :  { %8810 = vmatprep.subr.bf16.mxu1 %v16138_v17  ;;  %6559 = vmatprep.subr.bf16.mxu0 %v16138_v17 }
 0x4fb   :  { %8826 = vmatpush1.bf16.msra.mxu1 %v12551_v23  ;;  %6560 = vmatpush1.bf16.msra.mxu0 %v9191_v27 }
 0x4fc   :  { %8811 = vmatprep.subr.bf16.mxu1 %v16138_v17  ;;  %6561 = vmatprep.subr.bf16.mxu0 %v16138_v17 }
 0x51e   :  { %v12543_v40 = vpop.f32.mrb[56].mxu0 }
 0x51f   :  { %16139 = vst [vmem:[#allocation29_spill] sm:$0xff] %v12543_v40  ;;  %v12546_v38 = vpop.f32.mrb[57].mxu0 }
 0x520   :  { %16140 = vst [vmem:[#allocation30_spill] sm:$0xff] %v12546_v38  ;;  %v3296_v45 = vadd.f32 %v3295_v34, %v12546_v38  ;;  %v3366_v61 = vmul.f32 %v12546_v38, %v12546_v38  ;;  %v12557_v36 = vpop.f32.mrb[58].mxu0  ;;  %v12572_v34 = vld [vmem:[%s15880_s4 + $0xb8] sm:$0xff]   ;;  %v3368_v38 = vmul.f32 %v12543_v40, %v12543_v40 }
 0x521   :  { %16141 = vst [vmem:[#allocation31_spill] sm:$0xff] %v12557_v36  ;;  %v12562_v56 = vpop.f32.mrb[59].mxu0  ;;  %8827 = vmatpush1.bf16.msra.mxu1 %v12572_v34  ;;  %v3369_v27 = vmul.f32 %v12557_v36, %v12557_v36 }
 0x522   :  { %16142 = vst [vmem:[#allocation32_spill] sm:$0xff] %v12562_v56  ;;  %v3429_v41 = vadd.f32 %v3428_v12, %v3366_v61  ;;  %v3297_v35 = vadd.f32 %v3296_v45, %v12562_v56  ;;  %v3367_v46 = vmul.f32 %v12562_v56, %v12562_v56  ;;  %v9193_v45 = vld [vmem:[%s15880_s4 + $0x48] sm:$0xff]   ;;  %8812 = vmatprep.subr.bf16.mxu1 %v16138_v17 }
 0x523   :  { %6562 = vmatpush1.bf16.msra.mxu0 %v9193_v45  ;;  %v12626_v45 = vld [vmem:[%s15880_s4 + $0xd8] sm:$0xff]  }
 0x524   :  { %v3298_v12 = vadd.f32 %v12543_v40, %v3297_v35  ;;  %v3430_v61 = vadd.f32 %v3429_v41, %v3367_v46  ;;  %v12591_v41 = vld [vmem:[%s15880_s4 + $0xc0] sm:$0xff]   ;;  %6563 = vmatprep.subr.bf16.mxu0 %v16138_v17  ;;  %v9195_v35 = vld [vmem:[%s15880_s4 + $0x50] sm:$0xff]   ;;  %v9205_v40 = vld [vmem:[%s15880_s4 + $0x78] sm:$0xff]  }
 0x525   :  { %8828 = vmatpush1.bf16.msra.mxu1 %v12591_v41 }
 0x526   :  { %v3431_v56 = vadd.f32 %v3430_v61, %v3368_v38  ;;  %v12585_v14 = vadd.f32 %v12557_v36, %v3298_v12  ;;  %8813 = vmatprep.subr.bf16.mxu1 %v16138_v17  ;;  %v12604_v38 = vld [vmem:[%s15880_s4 + $0xc8] sm:$0xff]   ;;  %v12615_v12 = vld [vmem:[%s15880_s4 + $0xd0] sm:$0xff]   ;;  %v9199_v61 = vld [vmem:[%s15880_s4 + $0x60] sm:$0xff]  }
 0x527   :  { %6564 = vmatpush1.bf16.msra.mxu0 %v9195_v35  ;;  %v12637_v35 = vld [vmem:[%s15880_s4 + $0xe0] sm:$0xff]   ;;  %v12648_v36 = vld [vmem:[%s15880_s4 + $0xe8] sm:$0xff]  }
 0x528   :  { %v12594_v46 = vadd.f32 %v3431_v56, %v3369_v27  ;;  %6565 = vmatprep.subr.bf16.mxu0 %v16138_v17  ;;  %v9197_v56 = vld [vmem:[%s15880_s4 + $0x58] sm:$0xff]   ;;  %v9201_v27 = vld [vmem:[%s15880_s4 + $0x68] sm:$0xff]  }
 0x529   :  { %8829 = vmatpush1.bf16.msra.mxu1 %v12604_v38 }
 0x52a   :  { %8814 = vmatprep.subr.bf16.mxu1 %v16138_v17 }
 0x52b   :  { %6566 = vmatpush1.bf16.msra.mxu0 %v9197_v56  ;;  %v9203_v56 = vld [vmem:[%s15880_s4 + $0x70] sm:$0xff]  }
 0x52c   :  { %6567 = vmatprep.subr.bf16.mxu0 %v16138_v17 }
 0x52d   :  { %8830 = vmatpush1.bf16.msra.mxu1 %v12615_v12 }
 0x52e   :  { %8815 = vmatprep.subr.bf16.mxu1 %v16138_v17 }
 0x52f   :  { %6568 = vmatpush1.bf16.msra.mxu0 %v9199_v61  ;;  %v3807_v61 = vld [vmem:[#allocation2] sm:$0xff] }
 0x530   :  { %6569 = vmatprep.subr.bf16.mxu0 %v16138_v17  ;;  %v4075_v60 = vrot.slane %v3807_v61, 1  ;;  %v5679_v59 = vpack.c.bf16 %v9252_v5, %v3807_v61 }
 0x531   :  { %8831 = vmatpush1.bf16.msra.mxu1 %v12626_v45 }
 0x532   :  { %8816 = vmatprep.subr.bf16.mxu1 %v16138_v17  ;;  %v4077_v47 = vsel %vm362_vm0, %v4075_v60, %v12654_v53  ;;  %v12672_v60 = vld [vmem:[%s15880_s4 + $0xf8] sm:$0xff]  }
 0x533   :  { %6570 = vmatpush1.bf16.msra.mxu0 %v9201_v27  ;;  %v3809_v27 = vld [vmem:[#allocation2 + $0x10] sm:$0x3] }
 0x534   :  { %6571 = vmatprep.subr.bf16.mxu0 %v16138_v17 }
 0x535   :  { %8832 = vmatpush1.bf16.msra.mxu1 %v12637_v35 }
 0x536   :  { %8817 = vmatprep.subr.bf16.mxu1 %v16138_v17 }
 0x537   :  { %6572 = vmatpush1.bf16.msra.mxu0 %v9203_v56  ;;  %v4078_v56 = vrot.slane %v3809_v27, 1 }
 0x538   :  { %6573 = vmatprep.subr.bf16.mxu0 %v16138_v17 }
 0x539   :  { %8833 = vmatpush1.bf16.msra.mxu1 %v12648_v36  ;;  %v4079_v32 = vsel %vm362_vm0, %v12654_v53, %v4078_v56  ;;  %v16166_v53 = vld [vmem:[#allocation26_spill] sm:$0xff] }
 0x53a   :  { %8818 = vmatprep.subr.bf16.mxu1 %v16138_v17  ;;  %v5680_v50 = vpack.c.bf16 %v4079_v32, %v4077_v47 }
 0x53b   :  { %6574 = vmatpush1.bf16.msra.mxu0 %v9205_v40 }
 0x53c   :  { %6832 = vmatprep.subr.bf16.mxu0 %v16138_v17  ;;  %6575 = vmatprep.mubr.bf16.mxu0 %v5680_v50 }
 0x53d   :  { %8834 = vmatpush1.bf16.msra.mxu1 %v12664_v7 }
 0x53e   :  { %6576 = vmatmul.mubr.bf16.vlgmr.msra.gmra.mrb[64].mxu0 %v5679_v59  ;;  %8819 = vmatprep.subr.bf16.mxu1 %v16138_v17 }
 0x53f   :  { %6833 = vmatpush1.bf16.msra.mxu0 %v12482_v29 }
 0x540   :  { %6834 = vmatprep.subr.bf16.mxu0 %v16138_v17 }
 0x541   :  { %8835 = vmatpush1.bf16.msra.mxu1 %v12672_v60 }
 0x542   :  { %7121 = vmatprep.subr.bf16.mxu1 %v16138_v17 }
 0x543   :  { %6835 = vmatpush1.bf16.msra.mxu0 %v12492_v30 }
 0x544   :  { %6836 = vmatprep.subr.bf16.mxu0 %v16138_v17 }
 0x547   :  { %6837 = vmatpush1.bf16.msra.mxu0 %v12503_v49 }
 0x548   :  { %6838 = vmatprep.subr.bf16.mxu0 %v16138_v17 }
 0x54b   :  { %6839 = vmatpush1.bf16.msra.mxu0 %v12514_v31 }
 0x54c   :  { %6840 = vmatprep.subr.bf16.mxu0 %v16138_v17 }
 0x54f   :  { %6841 = vmatpush1.bf16.msra.mxu0 %v12525_v11 }
 0x550   :  { %6842 = vmatprep.subr.bf16.mxu0 %v16138_v17 }
 0x553   :  { %6843 = vmatpush1.bf16.msra.mxu0 %v12536_v51 }
 0x554   :  { %6844 = vmatprep.subr.bf16.mxu0 %v16138_v17 }
 0x557   :  { %6845 = vmatpush1.bf16.msra.mxu0 %v12551_v23 }
 0x558   :  { %6846 = vmatprep.subr.bf16.mxu0 %v16138_v17 }
 0x55a   :  { %v12689_v50 = vpop.f32.mrb[60].mxu0 }
 0x55b   :  { %v12692_v32 = vpop.f32.mrb[61].mxu0  ;;  %6847 = vmatpush1.bf16.msra.mxu0 %v12572_v34  ;;  %v3372_v11 = vmul.f32 %v12689_v50, %v12689_v50 }
 0x55c   :  { %v3300_v59 = vadd.f32 %v12585_v14, %v12692_v32  ;;  %v3370_v47 = vmul.f32 %v12692_v32, %v12692_v32  ;;  %v12699_v5 = vpop.f32.mrb[62].mxu0  ;;  %6848 = vmatprep.subr.bf16.mxu0 %v16138_v17 }
 0x55d   :  { %v3229_v29 = vpop.f32.mrb[63].mxu0  ;;  %v3373_v40 = vmul.f32 %v12699_v5, %v12699_v5 }
 0x55e   :  { %v3433_v30 = vadd.f32 %v12594_v46, %v3370_v47  ;;  %v3301_v49 = vadd.f32 %v3300_v59, %v3229_v29  ;;  %v3371_v31 = vmul.f32 %v3229_v29, %v3229_v29 }
 0x55f   :  { %6849 = vmatpush1.bf16.msra.mxu0 %v12591_v41 }
 0x560   :  { %v3302_v51 = vadd.f32 %v12689_v50, %v3301_v49  ;;  %v3434_v14 = vadd.f32 %v3433_v30, %v3371_v31  ;;  %6850 = vmatprep.subr.bf16.mxu0 %v16138_v17 }
 0x562   :  { %v3303_v23 = vadd.f32 %v12699_v5, %v3302_v51  ;;  %v3435_v61 = vadd.f32 %v3434_v14, %v3372_v11 }
 0x563   :  { %6851 = vmatpush1.bf16.msra.mxu0 %v12604_v38 }
 0x564   :  { %v3304_v46 = vrot.slane %v3303_v23, 4  ;;  %v3436_v34 = vadd.f32 %v3435_v61, %v3373_v40  ;;  %6852 = vmatprep.subr.bf16.mxu0 %v16138_v17 }
 0x566   :  { %v3305_v27 = vadd.f32 %v3304_v46, %v3303_v23  ;;  %v3437_v56 = vrot.slane %v3436_v34, 4 }
 0x567   :  { %6853 = vmatpush1.bf16.msra.mxu0 %v12615_v12 }
 0x568   :  { %v3306_v59 = vrot.slane %v3305_v27, 2  ;;  %v3438_v47 = vadd.f32 %v3437_v56, %v3436_v34  ;;  %6854 = vmatprep.subr.bf16.mxu0 %v16138_v17 }
 0x56a   :  { %v3307_v30 = vadd.f32 %v3306_v59, %v3305_v27  ;;  %v3439_v49 = vrot.slane %v3438_v47, 2  ;;  %v3452_v59 = vld [vmem:[%s15879_s3] sm:$0x1] }
 0x56b   :  { %6855 = vmatpush1.bf16.msra.mxu0 %v12626_v45  ;;  %v3455_v45 = vlaneseq }
 0x56c   :  { %v3308_v31 = vrot.slane %v3307_v30, 1  ;;  %v3440_v41 = vadd.f32 %v3439_v49, %v3438_v47  ;;  %6856 = vmatprep.subr.bf16.mxu0 %v16138_v17 }
 0x56d   :  { %v3456_v34 = vshrl.u32 %v3455_v45, 7  ;;  %v16150_v45 = vld [vmem:[#allocation14_spill] sm:$0xff] }
 0x56e   :  { %v3309_v11 = vadd.f32 %v3308_v31, %v3307_v30  ;;  %v3441_v51 = vrot.slane %v3440_v41, 1 }
 0x56f   :  { %6857 = vmatpush1.bf16.msra.mxu0 %v12637_v35  ;;  %v3450_v35 = vld [vmem:[%s15878_s2] sm:$0x1]  ;;  %v12728_v27 = vsub.s32 0, %v3456_v34 }
 0x570   :  { %v3442_v14 = vadd.f32 %v3441_v51, %v3440_v41  ;;  %v3443_v38 = vmul.f32 0.001953125, %v3309_v11  ;;  %6858 = vmatprep.subr.bf16.mxu0 %v16138_v17 }
 0x571   :  { %16144 = vst [vmem:[#allocation34_spill] sm:$0xff] %v12728_v27 }
 0x572   :  { %v3444_v40 = vmul.f32 0.001953125, %v3442_v14  ;;  %v3445_v23 = vmul.f32 %v3443_v38, %v3443_v38 }
 0x573   :  { %6859 = vmatpush1.bf16.msra.mxu0 %v12648_v36 }
 0x574   :  { %v3446_v61 = vsub.f32 %v3444_v40, %v3445_v23  ;;  %6860 = vmatprep.subr.bf16.mxu0 %v16138_v17  ;;  %v16145_v40 = vld [vmem:[#allocation8_spill] sm:$0xff]  ;;  %v16146_v23 = vld [vmem:[#allocation10_spill] sm:$0xff] }
 0x576   :  { %v3447_v12 = vmax.f32 %v3446_v61, 0.0  ;;  %v16147_v61 = vld [vmem:[#allocation12_spill] sm:$0xff] }
 0x577   :  { %6861 = vmatpush1.bf16.msra.mxu0 %v12664_v7 }
 0x578   :  { %v3448_v46 = vadd.f32 1e-05, %v3447_v12  ;;  %6862 = vmatprep.subr.bf16.mxu0 %v16138_v17  ;;  %v16148_v12 = vld [vmem:[#allocation9_spill] sm:$0xff]  ;;  %v16168_v17 = vld [vmem:[#allocation28_spill] sm:$0xff] }
 0x57a   :  { %9248 = vrsqrt.f32 %v3448_v46  ;;  %v16149_v46 = vld [vmem:[#allocation11_spill] sm:$0xff] }
 0x57b   :  { %6863 = vmatpush1.bf16.msra.mxu0 %v12672_v60 }
 0x584   :  { %v9249_v56 = vpop.eup %9248 }
 0x585   :  { %v3451_v36 = vmul.f32 %v9249_v56, %v3450_v35  ;;  %v16151_v35 = vld [vmem:[#allocation16_spill] sm:$0xff] }
 0x587   :  { %v3453_v47 = vmul.f32 %v3451_v36, %v3443_v38  ;;  %v12734_v7 = vrot.slane %v3451_v36, %v12728_v27  ;;  %v16152_v36 = vld [vmem:[#allocation13_spill] sm:$0xff] }
 0x589   :  { %v3454_v30 = vsub.f32 %v3452_v59, %v3453_v47  ;;  %v3520_v60 = vmul.f32 %v12734_v7, %v3229_v29  ;;  %v12739_v49 = vmul.f32 %v12734_v7, %v10578_v22  ;;  %v12743_v31 = vmul.f32 %v12734_v7, %v10587_v6  ;;  %v16153_v47 = vld [vmem:[#allocation15_spill] sm:$0xff] }
 0x58a   :  { %v12747_v41 = vmul.f32 %v10576_v21, %v12734_v7  ;;  %v12751_v11 = vmul.f32 %v10584_v26, %v12734_v7  ;;  %v12755_v51 = vmul.f32 %v12734_v7, %v10769_v55  ;;  %v12759_v22 = vmul.f32 %v12734_v7, %v10787_v0 }
 0x58b   :  { %v12762_v29 = vrot.slane %v3454_v30, %v12728_v27  ;;  %v12766_v6 = vmul.f32 %v10762_v52, %v12734_v7  ;;  %v12770_v21 = vmul.f32 %v10784_v63, %v12734_v7  ;;  %v12774_v26 = vmul.f32 %v12734_v7, %v10965_v4  ;;  %v16164_v27 = vld [vmem:[#allocation23_spill] sm:$0xff] }
 0x58c   :  { %v12778_v55 = vmul.f32 %v12734_v7, %v10978_v9  ;;  %v12782_v0 = vmul.f32 %v10963_v2, %v12734_v7  ;;  %v12786_v52 = vmul.f32 %v10975_v13, %v12734_v7  ;;  %v12790_v63 = vmul.f32 %v12734_v7, %v11153_v44 }
 0x58d   :  { %v3590_v14 = vadd.f32 %v12762_v29, %v3520_v60  ;;  %v12795_v4 = vmul.f32 %v12734_v7, %v11166_v20  ;;  %v12799_v9 = vmul.f32 %v11151_v48, %v12734_v7  ;;  %v12803_v2 = vmul.f32 %v11163_v33, %v12734_v7  ;;  %v16154_v60 = vld [vmem:[#allocation18_spill] sm:$0xff] }
 0x58e   :  { %v12807_v13 = vmul.f32 %v12734_v7, %v11341_v37  ;;  %v12811_v44 = vmul.f32 %v12734_v7, %v11354_v54  ;;  %v12815_v20 = vmul.f32 %v11339_v57, %v12734_v7  ;;  %v12819_v48 = vmul.f32 %v11351_v19, %v12734_v7 }
 0x58f   :  { %v3654_v38 = vmax.f32 %v3590_v14, 0.0  ;;  %v12823_v33 = vmul.f32 %v12734_v7, %v11529_v58  ;;  %v12827_v37 = vmul.f32 %v12734_v7, %v11542_v28  ;;  %v12831_v54 = vmul.f32 %v11527_v42, %v12734_v7 }
 0x590   :  { %v12835_v57 = vmul.f32 %v11539_v25, %v12734_v7  ;;  %v12839_v19 = vmul.f32 %v12734_v7, %v11717_v18  ;;  %v12843_v58 = vmul.f32 %v12734_v7, %v11730_v3  ;;  %v12847_v28 = vmul.f32 %v11715_v15, %v12734_v7 }
 0x591   :  { %3804 = vst [vmem:[#allocation2 + $0x321] sm:$0xff] %v3654_v38  ;;  %v12851_v42 = vmul.f32 %v11727_v8, %v12734_v7  ;;  %v12855_v25 = vmul.f32 %v12734_v7, %v11905_v43  ;;  %v12859_v18 = vmul.f32 %v12734_v7, %v11918_v16  ;;  %v12863_v3 = vmul.f32 %v11903_v24, %v12734_v7  ;;  %v16155_v38 = vld [vmem:[#allocation20_spill] sm:$0xff] }
 0x592   :  { %v12867_v15 = vmul.f32 %v11915_v10, %v12734_v7  ;;  %v12871_v8 = vmul.f32 %v12734_v7, %v12065_v1  ;;  %v12875_v43 = vmul.f32 %v12734_v7, %v12078_v62  ;;  %v12879_v16 = vmul.f32 %v12063_v39, %v12734_v7 }
 0x593   :  { %v12883_v24 = vmul.f32 %v16145_v40, %v12734_v7  ;;  %v12887_v10 = vmul.f32 %v12734_v7, %v16146_v23  ;;  %v12891_v1 = vmul.f32 %v12734_v7, %v16147_v61  ;;  %v12895_v62 = vmul.f32 %v16148_v12, %v12734_v7  ;;  %v16156_v23 = vld [vmem:[#allocation17_spill] sm:$0xff]  ;;  %v16157_v12 = vld [vmem:[#allocation19_spill] sm:$0xff] }
 0x594   :  { %v12899_v39 = vmul.f32 %v16149_v46, %v12734_v7  ;;  %v12903_v34 = vmul.f32 %v12734_v7, %v16150_v45  ;;  %v12907_v56 = vmul.f32 %v12734_v7, %v16151_v35  ;;  %v12911_v59 = vmul.f32 %v16152_v36, %v12734_v7  ;;  %v16158_v45 = vld [vmem:[#allocation22_spill] sm:$0xff]  ;;  %v16160_v36 = vld [vmem:[#allocation24_spill] sm:$0xff] }
 0x595   :  { %v12915_v30 = vmul.f32 %v16153_v47, %v12734_v7  ;;  %v12919_v14 = vmul.f32 %v12734_v7, %v16154_v60  ;;  %v12923_v40 = vmul.f32 %v12734_v7, %v16155_v38  ;;  %v12927_v61 = vmul.f32 %v16156_v23, %v12734_v7  ;;  %v16162_v60 = vld [vmem:[#allocation21_spill] sm:$0xff] }
 0x596   :  { %v12931_v46 = vmul.f32 %v16157_v12, %v12734_v7  ;;  %v12935_v35 = vmul.f32 %v12734_v7, %v16158_v45  ;;  %v12939_v47 = vmul.f32 %v12734_v7, %v16160_v36  ;;  %v12943_v38 = vmul.f32 %v16162_v60, %v12734_v7 }
 0x597   :  { %v12947_v23 = vmul.f32 %v16164_v27, %v12734_v7  ;;  %v12951_v12 = vmul.f32 %v12734_v7, %v16166_v53  ;;  %v12955_v45 = vmul.f32 %v12734_v7, %v16168_v17 }
 0x598   :  { %16159 = vst [vmem:[#allocation8_spill] sm:$0xff] %v12935_v35  ;;  %16161 = vst [vmem:[#allocation10_spill] sm:$0xff] %v12939_v47  ;;  %v16170_v35 = vld [vmem:[#allocation25_spill] sm:$0xff]  ;;  %v16171_v47 = vld [vmem:[#allocation27_spill] sm:$0xff] }
 0x599   :  { %16163 = vst [vmem:[#allocation12_spill] sm:$0xff] %v12943_v38  ;;  %16165 = vst [vmem:[#allocation9_spill] sm:$0xff] %v12947_v23  ;;  %v12959_v36 = vmul.f32 %v16170_v35, %v12734_v7  ;;  %v12963_v60 = vmul.f32 %v16171_v47, %v12734_v7  ;;  %v16172_v38 = vld [vmem:[#allocation30_spill] sm:$0xff]  ;;  %v16173_v23 = vld [vmem:[#allocation32_spill] sm:$0xff]  ;;  %v12983_v47 = vmul.f32 %v12734_v7, %v12692_v32 }
 0x59a   :  { %16167 = vst [vmem:[#allocation11_spill] sm:$0xff] %v12951_v12  ;;  %16169 = vst [vmem:[#allocation14_spill] sm:$0xff] %v12955_v45  ;;  %v12967_v27 = vmul.f32 %v12734_v7, %v16172_v38  ;;  %v12971_v53 = vmul.f32 %v12734_v7, %v16173_v23  ;;  %v16174_v12 = vld [vmem:[#allocation29_spill] sm:$0xff]  ;;  %v16175_v45 = vld [vmem:[#allocation31_spill] sm:$0xff]  ;;  %v12987_v38 = vmul.f32 %v12689_v50, %v12734_v7 }
 0x59b   :  { %v12975_v17 = vmul.f32 %v16174_v12, %v12734_v7  ;;  %v12979_v35 = vmul.f32 %v16175_v45, %v12734_v7  ;;  %v12991_v23 = vmul.f32 %v12699_v5, %v12734_v7  ;;  %v12995_v12 = vadd.f32 %v12762_v29, %v12739_v49 }
 0x59c   :  { %v12999_v45 = vadd.f32 %v12762_v29, %v12743_v31  ;;  %v13003_v32 = vadd.f32 %v12762_v29, %v12747_v41  ;;  %v13007_v50 = vadd.f32 %v12762_v29, %v12751_v11  ;;  %v13011_v5 = vadd.f32 %v12762_v29, %v12755_v51 }
 0x59d   :  { %v13015_v7 = vadd.f32 %v12762_v29, %v12759_v22  ;;  %v13019_v49 = vadd.f32 %v12762_v29, %v12766_v6  ;;  %v13023_v31 = vadd.f32 %v12762_v29, %v12770_v21  ;;  %v13027_v41 = vadd.f32 %v12762_v29, %v12774_v26 }
 0x59e   :  { %v13031_v11 = vadd.f32 %v12762_v29, %v12778_v55  ;;  %v13035_v51 = vadd.f32 %v12762_v29, %v12782_v0  ;;  %v13039_v22 = vadd.f32 %v12762_v29, %v12786_v52  ;;  %v13043_v6 = vadd.f32 %v12762_v29, %v12790_v63 }
 0x59f   :  { %v13047_v21 = vadd.f32 %v12762_v29, %v12795_v4  ;;  %v13051_v26 = vadd.f32 %v12762_v29, %v12799_v9  ;;  %v13055_v55 = vadd.f32 %v12762_v29, %v12803_v2  ;;  %v13059_v0 = vadd.f32 %v12762_v29, %v12807_v13 }
 0x5a0   :  { %v13063_v52 = vadd.f32 %v12762_v29, %v12811_v44  ;;  %v13067_v63 = vadd.f32 %v12762_v29, %v12815_v20  ;;  %v13071_v4 = vadd.f32 %v12762_v29, %v12819_v48  ;;  %v13075_v9 = vadd.f32 %v12762_v29, %v12823_v33 }
 0x5a1   :  { %v13079_v2 = vadd.f32 %v12762_v29, %v12827_v37  ;;  %v13083_v13 = vadd.f32 %v12762_v29, %v12831_v54  ;;  %v13087_v44 = vadd.f32 %v12762_v29, %v12835_v57  ;;  %v13091_v20 = vadd.f32 %v12762_v29, %v12839_v19 }
 0x5a2   :  { %v13095_v48 = vadd.f32 %v12762_v29, %v12843_v58  ;;  %v13099_v33 = vadd.f32 %v12762_v29, %v12847_v28  ;;  %v13103_v37 = vadd.f32 %v12762_v29, %v12851_v42  ;;  %v13107_v54 = vadd.f32 %v12762_v29, %v12855_v25 }
 0x5a3   :  { %v13111_v57 = vadd.f32 %v12762_v29, %v12859_v18  ;;  %v13115_v19 = vadd.f32 %v12762_v29, %v12863_v3  ;;  %v13119_v58 = vadd.f32 %v12762_v29, %v12867_v15  ;;  %v13123_v28 = vadd.f32 %v12762_v29, %v12871_v8 }
 0x5a4   :  { %v13127_v42 = vadd.f32 %v12762_v29, %v12875_v43  ;;  %v13131_v25 = vadd.f32 %v12762_v29, %v12879_v16  ;;  %v13135_v18 = vadd.f32 %v12762_v29, %v12883_v24  ;;  %v13139_v3 = vadd.f32 %v12762_v29, %v12887_v10 }
 0x5a5   :  { %v13143_v15 = vadd.f32 %v12762_v29, %v12891_v1  ;;  %v13147_v8 = vadd.f32 %v12762_v29, %v12895_v62  ;;  %v13151_v43 = vadd.f32 %v12762_v29, %v12899_v39  ;;  %v13155_v16 = vadd.f32 %v12762_v29, %v12903_v34 }
 0x5a6   :  { %v13159_v24 = vadd.f32 %v12762_v29, %v12907_v56  ;;  %v13163_v10 = vadd.f32 %v12762_v29, %v12911_v59  ;;  %v13167_v1 = vadd.f32 %v12762_v29, %v12915_v30  ;;  %v13171_v62 = vadd.f32 %v12762_v29, %v12919_v14  ;;  %v16181_v59 = vld [vmem:[#allocation8_spill] sm:$0xff] }
 0x5a7   :  { %v13175_v39 = vadd.f32 %v12762_v29, %v12923_v40  ;;  %v13179_v34 = vadd.f32 %v12762_v29, %v12927_v61  ;;  %v13183_v56 = vadd.f32 %v12762_v29, %v12931_v46  ;;  %v13187_v30 = vadd.f32 %v12762_v29, %v16181_v59 }
 0x5a8   :  { %16176 = vst [vmem:[#allocation16_spill] sm:$0xff] %v13167_v1  ;;  %16177 = vst [vmem:[#allocation13_spill] sm:$0xff] %v13171_v62  ;;  %v16182_v1 = vld [vmem:[#allocation10_spill] sm:$0xff]  ;;  %v16183_v62 = vld [vmem:[#allocation12_spill] sm:$0xff] }
 0x5a9   :  { %16178 = vst [vmem:[#allocation15_spill] sm:$0xff] %v13175_v39  ;;  %16179 = vst [vmem:[#allocation18_spill] sm:$0xff] %v13179_v34  ;;  %v13191_v14 = vadd.f32 %v12762_v29, %v16182_v1  ;;  %v13195_v40 = vadd.f32 %v12762_v29, %v16183_v62  ;;  %v16184_v39 = vld [vmem:[#allocation9_spill] sm:$0xff]  ;;  %v16185_v34 = vld [vmem:[#allocation11_spill] sm:$0xff]  ;;  %v13211_v1 = vadd.f32 %v12762_v29, %v12959_v36 }
 0x5aa   :  { %16180 = vst [vmem:[#allocation20_spill] sm:$0xff] %v13183_v56  ;;  %v13199_v61 = vadd.f32 %v12762_v29, %v16184_v39  ;;  %v13203_v46 = vadd.f32 %v12762_v29, %v16185_v34  ;;  %v16186_v56 = vld [vmem:[#allocation14_spill] sm:$0xff]  ;;  %v13215_v62 = vadd.f32 %v12762_v29, %v12963_v60  ;;  %v13219_v39 = vadd.f32 %v12762_v29, %v12967_v27 }
 0x5ab   :  { %v13207_v59 = vadd.f32 %v12762_v29, %v16186_v56  ;;  %v13223_v34 = vadd.f32 %v12762_v29, %v12971_v53  ;;  %v13227_v56 = vadd.f32 %v12762_v29, %v12975_v17  ;;  %v13231_v36 = vadd.f32 %v12762_v29, %v12979_v35 }
 0x5ac   :  { %v13235_v60 = vadd.f32 %v12762_v29, %v12983_v47  ;;  %v13239_v27 = vadd.f32 %v12762_v29, %v12987_v38  ;;  %v13243_v53 = vadd.f32 %v12762_v29, %v12991_v23  ;;  %v3594_v17 = vmax.f32 %v12999_v45, 0.0 }
 0x5ad   :  { %16187 = vst [vmem:[#allocation17_spill] sm:$0xff] %v13223_v34  ;;  %16188 = vst [vmem:[#allocation19_spill] sm:$0xff] %v13227_v56  ;;  %v3593_v34 = vmax.f32 %v12995_v12, 0.0  ;;  %v3595_v56 = vmax.f32 %v13003_v32, 0.0  ;;  %v3596_v35 = vmax.f32 %v13007_v50, 0.0  ;;  %v3598_v47 = vmax.f32 %v13015_v7, 0.0 }
 0x5ae   :  { %16189 = vst [vmem:[#allocation22_spill] sm:$0xff] %v13231_v36  ;;  %16190 = vst [vmem:[#allocation24_spill] sm:$0xff] %v13235_v60  ;;  %v3597_v36 = vmax.f32 %v13011_v5, 0.0  ;;  %v3599_v60 = vmax.f32 %v13019_v49, 0.0  ;;  %v3600_v38 = vmax.f32 %v13023_v31, 0.0  ;;  %v3602_v29 = vmax.f32 %v13031_v11, 0.0 }
 0x5af   :  { %16191 = vst [vmem:[#allocation21_spill] sm:$0xff] %v13239_v27  ;;  %v3601_v27 = vmax.f32 %v13027_v41, 0.0  ;;  %3743 = vst [vmem:[#allocation2 + $0x19] sm:$0xff] %v3593_v34  ;;  %v3603_v23 = vmax.f32 %v13035_v51, 0.0  ;;  %v3604_v12 = vmax.f32 %v13039_v22, 0.0  ;;  %v3605_v45 = vmax.f32 %v13043_v6, 0.0 }
 0x5b0   :  { %3744 = vst [vmem:[#allocation2 + $0x21] sm:$0xff] %v3594_v17  ;;  %3745 = vst [vmem:[#allocation2 + $0x31] sm:$0xff] %v3595_v56  ;;  %v3606_v32 = vmax.f32 %v13047_v21, 0.0  ;;  %v3607_v50 = vmax.f32 %v13051_v26, 0.0  ;;  %v3608_v5 = vmax.f32 %v13055_v55, 0.0  ;;  %v3609_v7 = vmax.f32 %v13059_v0, 0.0 }
 0x5b1   :  { %3746 = vst [vmem:[#allocation2 + $0x39] sm:$0xff] %v3596_v35  ;;  %3747 = vst [vmem:[#allocation2 + $0x49] sm:$0xff] %v3597_v36  ;;  %v3610_v49 = vmax.f32 %v13063_v52, 0.0  ;;  %v3611_v31 = vmax.f32 %v13067_v63, 0.0  ;;  %v3612_v41 = vmax.f32 %v13071_v4, 0.0  ;;  %v3613_v11 = vmax.f32 %v13075_v9, 0.0 }
 0x5b2   :  { %3748 = vst [vmem:[#allocation2 + $0x51] sm:$0xff] %v3598_v47  ;;  %3749 = vst [vmem:[#allocation2 + $0x61] sm:$0xff] %v3599_v60  ;;  %v3614_v51 = vmax.f32 %v13079_v2, 0.0  ;;  %v3615_v22 = vmax.f32 %v13083_v13, 0.0  ;;  %v3616_v6 = vmax.f32 %v13087_v44, 0.0  ;;  %v3617_v21 = vmax.f32 %v13091_v20, 0.0 }
 0x5b3   :  { %3750 = vst [vmem:[#allocation2 + $0x69] sm:$0xff] %v3600_v38  ;;  %3751 = vst [vmem:[#allocation2 + $0x79] sm:$0xff] %v3601_v27  ;;  %v3618_v26 = vmax.f32 %v13095_v48, 0.0  ;;  %v3619_v55 = vmax.f32 %v13099_v33, 0.0  ;;  %v3620_v0 = vmax.f32 %v13103_v37, 0.0  ;;  %v3621_v52 = vmax.f32 %v13107_v54, 0.0 }
 0x5b4   :  { %3752 = vst [vmem:[#allocation2 + $0x81] sm:$0xff] %v3602_v29  ;;  %3753 = vst [vmem:[#allocation2 + $0x91] sm:$0xff] %v3603_v23  ;;  %v3622_v63 = vmax.f32 %v13111_v57, 0.0  ;;  %v3623_v4 = vmax.f32 %v13115_v19, 0.0  ;;  %v3624_v9 = vmax.f32 %v13119_v58, 0.0  ;;  %v3625_v2 = vmax.f32 %v13123_v28, 0.0 }
 0x5b5   :  { %3754 = vst [vmem:[#allocation2 + $0x99] sm:$0xff] %v3604_v12  ;;  %3755 = vst [vmem:[#allocation2 + $0xa9] sm:$0xff] %v3605_v45  ;;  %v3626_v13 = vmax.f32 %v13127_v42, 0.0  ;;  %v3627_v44 = vmax.f32 %v13131_v25, 0.0  ;;  %v3628_v20 = vmax.f32 %v13135_v18, 0.0  ;;  %v3629_v48 = vmax.f32 %v13139_v3, 0.0 }
 0x5b6   :  { %3756 = vst [vmem:[#allocation2 + $0xb1] sm:$0xff] %v3606_v32  ;;  %3757 = vst [vmem:[#allocation2 + $0xc1] sm:$0xff] %v3607_v50  ;;  %v3630_v33 = vmax.f32 %v13143_v15, 0.0  ;;  %v3631_v37 = vmax.f32 %v13147_v8, 0.0  ;;  %v3632_v54 = vmax.f32 %v13151_v43, 0.0  ;;  %v3633_v57 = vmax.f32 %v13155_v16, 0.0 }
 0x5b7   :  { %3758 = vst [vmem:[#allocation2 + $0xc9] sm:$0xff] %v3608_v5  ;;  %3759 = vst [vmem:[#allocation2 + $0xd9] sm:$0xff] %v3609_v7  ;;  %v3634_v19 = vmax.f32 %v13159_v24, 0.0  ;;  %v3635_v58 = vmax.f32 %v13163_v10, 0.0  ;;  %v16192_v28 = vld [vmem:[#allocation16_spill] sm:$0xff]  ;;  %v16193_v25 = vld [vmem:[#allocation13_spill] sm:$0xff] }
 0x5b8   :  { %3760 = vst [vmem:[#allocation2 + $0xe1] sm:$0xff] %v3610_v49  ;;  %3761 = vst [vmem:[#allocation2 + $0xf1] sm:$0xff] %v3611_v31  ;;  %v3636_v42 = vmax.f32 %v16192_v28, 0.0  ;;  %v3637_v18 = vmax.f32 %v16193_v25, 0.0  ;;  %v16194_v3 = vld [vmem:[#allocation15_spill] sm:$0xff]  ;;  %v16195_v8 = vld [vmem:[#allocation18_spill] sm:$0xff] }
 0x5b9   :  { %3762 = vst [vmem:[#allocation2 + $0xf9] sm:$0xff] %v3612_v41  ;;  %3763 = vst [vmem:[#allocation2 + $0x109] sm:$0xff] %v3613_v11  ;;  %v3638_v15 = vmax.f32 %v16194_v3, 0.0  ;;  %v3639_v43 = vmax.f32 %v16195_v8, 0.0  ;;  %v16196_v16 = vld [vmem:[#allocation20_spill] sm:$0xff]  ;;  %v3641_v56 = vmax.f32 %v13187_v30, 0.0 }
 0x5ba   :  { %3764 = vst [vmem:[#allocation2 + $0x111] sm:$0xff] %v3614_v51  ;;  %3765 = vst [vmem:[#allocation2 + $0x121] sm:$0xff] %v3615_v22  ;;  %v3640_v34 = vmax.f32 %v16196_v16, 0.0  ;;  %v3642_v24 = vmax.f32 %v13191_v14, 0.0  ;;  %v3643_v10 = vmax.f32 %v13195_v40, 0.0  ;;  %v3644_v36 = vmax.f32 %v13199_v61, 0.0 }
 0x5bb   :  { %3766 = vst [vmem:[#allocation2 + $0x129] sm:$0xff] %v3616_v6  ;;  %3767 = vst [vmem:[#allocation2 + $0x139] sm:$0xff] %v3617_v21  ;;  %v3645_v60 = vmax.f32 %v13203_v46, 0.0  ;;  %v13298_v27 = vld [vmem:[#allocation2 + $0x18] sm:$0xff]  ;;  %v13300_v17 = vld [vmem:[#allocation2 + $0x20] sm:$0xff]  ;;  %v3646_v30 = vmax.f32 %v13207_v59, 0.0 }
 0x5bc   :  { %3768 = vst [vmem:[#allocation2 + $0x141] sm:$0xff] %v3618_v26  ;;  %3769 = vst [vmem:[#allocation2 + $0x151] sm:$0xff] %v3619_v55  ;;  %v3647_v35 = vmax.f32 %v13211_v1, 0.0  ;;  %v3648_v14 = vmax.f32 %v13215_v62, 0.0  ;;  %v3649_v40 = vmax.f32 %v13219_v39, 0.0  ;;  %v16197_v46 = vld [vmem:[#allocation17_spill] sm:$0xff] }
 0x5bd   :  { %3770 = vst [vmem:[#allocation2 + $0x159] sm:$0xff] %v3620_v0  ;;  %3771 = vst [vmem:[#allocation2 + $0x169] sm:$0xff] %v3621_v52  ;;  %v13306_v61 = vld [vmem:[#allocation2 + $0x28] sm:$0x3]  ;;  %v3650_v47 = vmax.f32 %v16197_v46, 0.0  ;;  %v16198_v38 = vld [vmem:[#allocation19_spill] sm:$0xff] }
 0x5be   :  { %3772 = vst [vmem:[#allocation2 + $0x171] sm:$0xff] %v3622_v63  ;;  %3773 = vst [vmem:[#allocation2 + $0x181] sm:$0xff] %v3623_v4  ;;  %v3651_v29 = vmax.f32 %v16198_v38, 0.0  ;;  %v16199_v23 = vld [vmem:[#allocation22_spill] sm:$0xff]  ;;  %v16200_v45 = vld [vmem:[#allocation24_spill] sm:$0xff]  ;;  %v3656_v50 = vmax.f32 %v13243_v53, 0.0 }
 0x5bf   :  { %3774 = vst [vmem:[#allocation2 + $0x189] sm:$0xff] %v3624_v9  ;;  %3775 = vst [vmem:[#allocation2 + $0x1c9] sm:$0xff] %v3625_v2  ;;  %v3652_v12 = vmax.f32 %v16199_v23, 0.0  ;;  %v3653_v59 = vmax.f32 %v16200_v45, 0.0  ;;  %v13312_v1 = vld [vmem:[#allocation2 + $0x30] sm:$0xff]  ;;  %v13314_v62 = vld [vmem:[#allocation2 + $0x38] sm:$0xff] }
 0x5c0   :  { %3776 = vst [vmem:[#allocation2 + $0x1d1] sm:$0xff] %v3626_v13  ;;  %3777 = vst [vmem:[#allocation2 + $0x1e1] sm:$0xff] %v3627_v44  ;;  %v16201_v39 = vld [vmem:[#allocation21_spill] sm:$0xff]  ;;  %v4080_v5 = vrot.slane %v13298_v27, 1  ;;  %v4081_v7 = vrot.slane %v13300_v17, 1  ;;  %v4083_v31 = vrot.slane %v13306_v61, 1  ;;  %v13349_v13 = vpack.c.bf16 %v13300_v17, %v13298_v27 }
 0x5c1   :  { %3778 = vst [vmem:[#allocation2 + $0x1e9] sm:$0xff] %v3628_v20  ;;  %3779 = vst [vmem:[#allocation2 + $0x1f9] sm:$0xff] %v3629_v48  ;;  %v3655_v32 = vmax.f32 %v16201_v39, 0.0  ;;  %v13320_v49 = vld [vmem:[#allocation2 + $0x40] sm:$0x3]  ;;  %v4085_v22 = vrot.slane %v13312_v1, 1 }
 0x5c2   :  { %3780 = vst [vmem:[#allocation2 + $0x201] sm:$0xff] %v3630_v33  ;;  %3781 = vst [vmem:[#allocation2 + $0x211] sm:$0xff] %v3631_v37  ;;  %v4082_v53 = vsel %vm362_vm0, %v4080_v5, %v4081_v7  ;;  %v4086_v6 = vrot.slane %v13314_v62, 1  ;;  %v4084_v26 = vsel %vm362_vm0, %v4081_v7, %v4083_v31  ;;  %v4088_v52 = vrot.slane %v13320_v49, 1  ;;  %v13351_v44 = vld [vmem:[#allocation2 + $0x48] sm:$0xff]  ;;  %v13369_v28 = vld [vmem:[#allocation2 + $0x50] sm:$0xff] }
 0x5c3   :  { %3782 = vst [vmem:[#allocation2 + $0x219] sm:$0xff] %v3632_v54  ;;  %3783 = vst [vmem:[#allocation2 + $0x229] sm:$0xff] %v3633_v57  ;;  %v13343_v4 = vpack.c.bf16 %v4084_v26, %v4082_v53  ;;  %v4090_v3 = vrot.slane %v13351_v44, 1  ;;  %v9210_v45 = vld [vmem:[%s15880_s4 + $0x110] sm:$0xff]   ;;  %v9211_v26 = vld [vmem:[%s15880_s4 + $0x118] sm:$0xff]  }
 0x5c4   :  { %3784 = vst [vmem:[#allocation2 + $0x231] sm:$0xff] %v3634_v19  ;;  %3785 = vst [vmem:[#allocation2 + $0x241] sm:$0xff] %v3635_v58  ;;  %v4087_v33 = vsel %vm362_vm0, %v4085_v22, %v4086_v6  ;;  %v9208_v19 = vld [vmem:[%s15880_s4 + $0x100] sm:$0xff]   ;;  %v4089_v58 = vsel %vm362_vm0, %v4086_v6, %v4088_v52 }
 0x5c5   :  { %3786 = vst [vmem:[#allocation2 + $0x249] sm:$0xff] %v3636_v42  ;;  %3787 = vst [vmem:[#allocation2 + $0x259] sm:$0xff] %v3637_v18  ;;  %6583 = vmatprep.mubr.bf16.mxu0 %v13343_v4  ;;  %v13371_v42 = vld [vmem:[#allocation2 + $0x58] sm:$0x3]  ;;  %v13375_v18 = vpack.c.bf16 %v4089_v58, %v4087_v33  ;;  %v13448_v33 = vld [vmem:[#allocation2 + $0x80] sm:$0xff] }
 0x5c6   :  { %3788 = vst [vmem:[#allocation2 + $0x261] sm:$0xff] %v3638_v15  ;;  %3789 = vst [vmem:[#allocation2 + $0x271] sm:$0xff] %v3639_v43  ;;  %6584 = vmatmul.mubr.bf16.gmra.mrb[68].mxu0 %v13349_v13 }
 0x5c7   :  { %3790 = vst [vmem:[#allocation2 + $0x279] sm:$0xff] %v3640_v34  ;;  %3791 = vst [vmem:[#allocation2 + $0x289] sm:$0xff] %v3641_v56  ;;  %v13326_v11 = vld [vmem:[#allocation2 + $0x1e0] sm:$0xff]  ;;  %6591 = vmatprep.mubr.bf16.mxu0 %v13375_v18  ;;  %v4091_v34 = vrot.slane %v13369_v28, 1  ;;  %v4093_v56 = vrot.slane %v13371_v42, 1 }
 0x5c8   :  { %3792 = vst [vmem:[#allocation2 + $0x291] sm:$0xff] %v3642_v24  ;;  %3793 = vst [vmem:[#allocation2 + $0x2a1] sm:$0xff] %v3643_v10  ;;  %v13323_v41 = vld [vmem:[#allocation2 + $0x1f8] sm:$0xff]  ;;  %v13328_v51 = vld [vmem:[#allocation2 + $0x1e8] sm:$0xff]  ;;  %v4453_v0 = vrot.slane %v13326_v11, 2  ;;  %v16210_v10 = vmov 0  }
 0x5c9   :  { %3794 = vst [vmem:[#allocation2 + $0x2a9] sm:$0xff] %v3644_v36  ;;  %3795 = vst [vmem:[#allocation2 + $0x2b9] sm:$0xff] %v3645_v60  ;;  %v13332_v21 = vld [vmem:[#allocation2 + $0x200] sm:$0xff]  ;;  %v13335_v55 = vld [vmem:[#allocation2 + $0x1f0] sm:$0x3]  ;;  %v4454_v9 = vrot.slane %v13328_v51, 2  ;;  %v4092_v36 = vsel %vm362_vm0, %v4090_v3, %v4091_v34  ;;  %v4094_v60 = vsel %vm362_vm0, %v4091_v34, %v4093_v56  ;;  %v13457_v3 = vpack.c.bf16 %v13369_v28, %v13351_v44 }
 0x5ca   :  { %3796 = vst [vmem:[#allocation2 + $0x2c1] sm:$0xff] %v3646_v30  ;;  %3797 = vst [vmem:[#allocation2 + $0x2d1] sm:$0xff] %v3647_v35  ;;  %v13341_v63 = vpack.c.bf16 %v13332_v21, %v13323_v41  ;;  %v4456_v2 = vrot.slane %v13335_v55, 2  ;;  %v13355_v20 = vld [vmem:[#allocation2 + $0x210] sm:$0xff]  ;;  %v13357_v48 = vld [vmem:[#allocation2 + $0x218] sm:$0xff]  ;;  %v4458_v15 = vrot.slane %v13323_v41, 2  ;;  %v13412_v23 = vpack.c.bf16 %v4094_v60, %v4092_v36 }
 0x5cb   :  { %3798 = vst [vmem:[#allocation2 + $0x2d9] sm:$0xff] %v3648_v14  ;;  %3799 = vst [vmem:[#allocation2 + $0x2e9] sm:$0xff] %v3649_v40  ;;  %v13360_v37 = vld [vmem:[#allocation2 + $0x208] sm:$0x3]  ;;  %v4455_v54 = vsel %vm780_vm1, %v4453_v0, %v4454_v9  ;;  %v4459_v8 = vrot.slane %v13332_v21, 2  ;;  %v13382_v43 = vpack.c.bf16 %v13357_v48, %v13355_v20  ;;  %v13396_v30 = vld [vmem:[#allocation2 + $0x60] sm:$0xff] }
 0x5cc   :  { %3800 = vst [vmem:[#allocation2 + $0x2f1] sm:$0xff] %v3650_v47  ;;  %3801 = vst [vmem:[#allocation2 + $0x301] sm:$0xff] %v3651_v29  ;;  %7008 = vmatprep.mubr.bf16.mxu1 %v13341_v63  ;;  %v4457_v57 = vsel %vm780_vm1, %v4454_v9, %v4456_v2  ;;  %v4461_v16 = vrot.slane %v13360_v37, 2  ;;  %v9209_v24 = vld [vmem:[%s15880_s4 + $0x108] sm:$0xff]   ;;  %v13400_v14 = vld [vmem:[#allocation2 + $0x70] sm:$0x3]  ;;  %v13406_v47 = vpack.c.bf16 %v13314_v62, %v13312_v1 }
 0x5cd   :  { %3802 = vst [vmem:[#allocation2 + $0x309] sm:$0xff] %v3652_v12  ;;  %3803 = vst [vmem:[#allocation2 + $0x319] sm:$0xff] %v3653_v59  ;;  %v13373_v25 = vpack.c.bf16 %v4457_v57, %v4455_v54  ;;  %v13398_v35 = vld [vmem:[#allocation2 + $0x68] sm:$0xff]  ;;  %v4460_v40 = vsel %vm780_vm1, %v4458_v15, %v4459_v8  ;;  %v13410_v29 = vld [vmem:[#allocation2 + $0x230] sm:$0xff]  ;;  %v4095_v59 = vrot.slane %v13396_v30, 1  ;;  %v4463_v5 = vrot.slane %v13355_v20, 2 }
 0x5ce   :  { %3805 = vst [vmem:[#allocation2 + $0x331] sm:$0xff] %v3655_v32  ;;  %3806 = vst [vmem:[#allocation2 + $0x339] sm:$0xff] %v3656_v50  ;;  %v4462_v46 = vsel %vm780_vm1, %v4459_v8, %v4461_v16  ;;  %v13408_v38 = vld [vmem:[#allocation2 + $0x228] sm:$0xff]  ;;  %v13414_v12 = vld [vmem:[#allocation2 + $0x220] sm:$0x3]  ;;  %6592 = vmatmul.mubr.bf16.gmra.mrb[72].mxu0 %v13406_v47  ;;  %v4096_v39 = vrot.slane %v13398_v35, 1 }
 0x5cf   :  { %16202 = vst [vmem:[#allocation23_spill] sm:$0xff] %v13341_v63  ;;  %16203 = vst [vmem:[#allocation26_spill] sm:$0xff] %v13343_v4  ;;  %7009 = vmatmul.mubr.bf16.vlgmr.msra.gmra.mrb[0].mxu1 %v13373_v25  ;;  %v4098_v32 = vrot.slane %v13400_v14, 1  ;;  %v13423_v50 = vpack.c.bf16 %v4462_v46, %v4460_v40  ;;  %6599 = vmatprep.mubr.bf16.mxu0 %v13412_v23  ;;  %v4464_v7 = vrot.slane %v13357_v48, 2  ;;  %v4466_v53 = vrot.slane %v13414_v12, 2  ;;  %v13446_v2 = vld [vmem:[#allocation2 + $0x78] sm:$0xff] }
 0x5d0   :  { %16204 = vst [vmem:[#allocation28_spill] sm:$0xff] %v13349_v13  ;;  %16205 = vst [vmem:[#allocation25_spill] sm:$0xff] %v13355_v20  ;;  %7122 = vmatpush1.bf16.msra.mxu1 %v9208_v19  ;;  %7016 = vmatprep.mubr.bf16.mxu1 %v13382_v43  ;;  %v13431_v31 = vpack.c.bf16 %v13410_v29, %v13408_v38  ;;  %v4097_v22 = vsel %vm362_vm0, %v4095_v59, %v4096_v39  ;;  %v13441_v0 = vld [vmem:[#allocation2 + $0x238] sm:$0x3]  ;;  %v13450_v54 = vld [vmem:[#allocation2 + $0x88] sm:$0x3] }
 0x5d1   :  { %16206 = vst [vmem:[#allocation27_spill] sm:$0xff] %v13357_v48  ;;  %16207 = vst [vmem:[#allocation30_spill] sm:$0xff] %v13373_v25  ;;  %7123 = vmatprep.subr.bf16.mxu1 %v16210_v10  ;;  %v4099_v6 = vsel %vm362_vm0, %v4096_v39, %v4098_v32  ;;  %v4465_v19 = vsel %vm780_vm1, %v4463_v5, %v4464_v7  ;;  %v4467_v58 = vsel %vm780_vm1, %v4464_v7, %v4466_v53  ;;  %v13459_v15 = vld [vmem:[#allocation2 + $0x240] sm:$0xff]  ;;  %v13463_v34 = vld [vmem:[#allocation2 + $0x248] sm:$0xff] }
 0x5d2   :  { %16208 = vst [vmem:[#allocation32_spill] sm:$0xff] %v13375_v18  ;;  %16209 = vst [vmem:[#allocation29_spill] sm:$0xff] %v13382_v43  ;;  %v4468_v8 = vrot.slane %v13408_v38, 2  ;;  %v4469_v16 = vrot.slane %v13410_v29, 2  ;;  %v13465_v56 = vpack.c.bf16 %v4099_v6, %v4097_v22  ;;  %v9212_v36 = vld [vmem:[%s15880_s4 + $0x120] sm:$0xff]   ;;  %v4100_v40 = vrot.slane %v13446_v2, 1 }
 0x5d3   :  { %16211 = vst [vmem:[#allocation31_spill] sm:$0xff] %v13406_v47  ;;  %16212 = vst [vmem:[#allocation8_spill] sm:$0xff] %v13408_v38  ;;  %v4101_v46 = vrot.slane %v13448_v33, 1  ;;  %v13476_v59 = vld [vmem:[#allocation2 + $0x250] sm:$0x3]  ;;  %v13480_v5 = vpack.c.bf16 %v4467_v58, %v4465_v19  ;;  %v13484_v53 = vld [vmem:[#allocation2 + $0x258] sm:$0xff]  ;;  %v13496_v19 = vpack.c.bf16 %v13463_v34, %v13459_v15 }
 0x5d4   :  { %16213 = vst [vmem:[#allocation10_spill] sm:$0xff] %v13410_v29  ;;  %16214 = vst [vmem:[#allocation12_spill] sm:$0xff] %v13412_v23  ;;  %7124 = vmatpush1.bf16.msra.mxu1 %v9209_v24  ;;  %v4471_v24 = vrot.slane %v13441_v0, 2  ;;  %v13487_v22 = vld [vmem:[#allocation2 + $0x90] sm:$0xff]  ;;  %v13489_v6 = vld [vmem:[#allocation2 + $0x98] sm:$0xff]  ;;  %v4473_v39 = vrot.slane %v13459_v15, 2  ;;  %v4470_v57 = vsel %vm780_vm1, %v4468_v8, %v4469_v16 }
 0x5d5   :  { %16215 = vst [vmem:[#allocation9_spill] sm:$0xff] %v13414_v12  ;;  %16216 = vst [vmem:[#allocation11_spill] sm:$0xff] %v13423_v50  ;;  %7125 = vmatprep.subr.bf16.mxu1 %v16210_v10  ;;  %v4474_v32 = vrot.slane %v13463_v34, 2  ;;  %v13498_v58 = vld [vmem:[#allocation2 + $0x260] sm:$0xff]  ;;  %v4476_v52 = vrot.slane %v13476_v59, 2  ;;  %v4105_v8 = vrot.slane %v13487_v22, 1 }
 0x5d6   :  { %16217 = vst [vmem:[#allocation14_spill] sm:$0xff] %v13431_v31  ;;  %16218 = vst [vmem:[#allocation16_spill] sm:$0xff] %v13441_v0  ;;  %6600 = vmatmul.mubr.bf16.gmra.mrb[76].mxu0 %v13457_v3  ;;  %v13500_v7 = vld [vmem:[#allocation2 + $0xa0] sm:$0x3]  ;;  %v4472_v60 = vsel %vm780_vm1, %v4469_v16, %v4471_v24  ;;  %v13510_v9 = vld [vmem:[#allocation2 + $0x268] sm:$0x3] }
 0x5d7   :  { %7017 = vmatmul.mubr.bf16.gmra.mrb[4].mxu1 %v13423_v50  ;;  %16219 = vst [vmem:[#allocation13_spill] sm:$0xff] %v13457_v3  ;;  %16220 = vst [vmem:[#allocation15_spill] sm:$0xff] %v13459_v15  ;;  %6607 = vmatprep.mubr.bf16.mxu0 %v13465_v56  ;;  %v4102_v3 = vsel %vm362_vm0, %v4100_v40, %v4101_v46  ;;  %v4106_v16 = vrot.slane %v13489_v6, 1  ;;  %v9213_v24 = vld [vmem:[%s15880_s4 + $0x128] sm:$0xff]   ;;  %v4478_v13 = vrot.slane %v13484_v53, 2  ;;  %v13525_v40 = vld [vmem:[#allocation2 + $0x278] sm:$0xff] }
 0x5d8   :  { %7024 = vmatprep.mubr.bf16.mxu1 %v13431_v31  ;;  %7126 = vmatpush1.bf16.msra.mxu1 %v9210_v45  ;;  %16221 = vst [vmem:[#allocation18_spill] sm:$0xff] %v13463_v34  ;;  %16222 = vst [vmem:[#allocation20_spill] sm:$0xff] %v13465_v56  ;;  %v4103_v45 = vrot.slane %v13450_v54, 1  ;;  %v4481_v47 = vrot.slane %v13510_v9, 2  ;;  %v13537_v31 = vld [vmem:[#allocation2 + $0xa8] sm:$0xff]  ;;  %v13539_v25 = vld [vmem:[#allocation2 + $0xb0] sm:$0xff]  ;;  %v4475_v56 = vsel %vm780_vm1, %v4473_v39, %v4474_v32 }
 0x5d9   :  { %7127 = vmatprep.subr.bf16.mxu1 %v16210_v10  ;;  %16223 = vst [vmem:[#allocation17_spill] sm:$0xff] %v13476_v59  ;;  %16224 = vst [vmem:[#allocation19_spill] sm:$0xff] %v13480_v5  ;;  %v13541_v43 = vld [vmem:[#allocation2 + $0xb8] sm:$0x3]  ;;  %v4477_v23 = vsel %vm780_vm1, %v4474_v32, %v4476_v52  ;;  %v13561_v39 = vld [vmem:[#allocation2 + $0x280] sm:$0x3] }
 0x5da   :  { %16225 = vst [vmem:[#allocation22_spill] sm:$0xff] %v13484_v53  ;;  %16226 = vst [vmem:[#allocation24_spill] sm:$0xff] %v13489_v6  ;;  %v4104_v50 = vsel %vm362_vm0, %v4101_v46, %v4103_v45  ;;  %v13529_v46 = vpack.c.bf16 %v4472_v60, %v4470_v57  ;;  %v4479_v45 = vrot.slane %v13498_v58, 2  ;;  %v13548_v57 = vpack.c.bf16 %v13448_v33, %v13446_v2  ;;  %v13565_v52 = vld [vmem:[#allocation2 + $0x290] sm:$0xff]  ;;  %v13602_v59 = vld [vmem:[#allocation2 + $0x2a0] sm:$0xff] }
 0x5db   :  { %16227 = vst [vmem:[#allocation21_spill] sm:$0xff] %v13496_v19  ;;  %16228 = vst [vmem:[#allocation35_spill] sm:$0xff] %v13498_v58  ;;  %v13543_v63 = vpack.c.bf16 %v4104_v50, %v4102_v3  ;;  %v13556_v50 = vld [vmem:[#allocation2 + $0x288] sm:$0xff]  ;;  %v9214_v3 = vld [vmem:[%s15880_s4 + $0x130] sm:$0xff]   ;;  %v4110_v32 = vrot.slane %v13537_v31, 1  ;;  %v4484_v18 = vrot.slane %v13525_v40, 2 }
 0x5dc   :  { %7128 = vmatpush1.bf16.msra.mxu1 %v9211_v26  ;;  %16229 = vst [vmem:[#allocation36_spill] sm:$0xff] %v13500_v7  ;;  %v13507_v26 = vpack.c.bf16 %v13398_v35, %v13396_v30  ;;  %16231 = vst [vmem:[#allocation38_spill] sm:$0xff] %v13510_v9  ;;  %v4107_v9 = vsel %vm362_vm0, %v4105_v8, %v4106_v16  ;;  %v4111_v8 = vrot.slane %v13539_v25, 1  ;;  %v9216_v38 = vld [vmem:[%s15880_s4 + $0x140] sm:$0xff]   ;;  %v13637_v29 = vld [vmem:[#allocation2 + $0x2b8] sm:$0xff] }
 0x5dd   :  { %7129 = vmatprep.subr.bf16.mxu1 %v16210_v10  ;;  %16233 = vst [vmem:[#allocation40_spill] sm:$0xff] %v13525_v40  ;;  %16234 = vst [vmem:[#allocation41_spill] sm:$0xff] %v13529_v46  ;;  %v13610_v34 = vpack.c.bf16 %v13565_v52, %v13556_v50 }
 0x5de   :  { %16230 = vst [vmem:[#allocation37_spill] sm:$0xff] %v13507_v26  ;;  %16236 = vst [vmem:[#allocation43_spill] sm:$0xff] %v13537_v31  ;;  %6608 = vmatmul.mubr.bf16.gmra.mrb[80].mxu0 %v13507_v26 }
 0x5df   :  { %7025 = vmatmul.mubr.bf16.gmra.mrb[8].mxu1 %v13480_v5  ;;  %v13515_v5 = vld [vmem:[#allocation2 + $0x270] sm:$0xff]  ;;  %16237 = vst [vmem:[#allocation44_spill] sm:$0xff] %v13539_v25  ;;  %16238 = vst [vmem:[#allocation45_spill] sm:$0xff] %v13541_v43  ;;  %6615 = vmatprep.mubr.bf16.mxu0 %v13543_v63 }
 0x5e0   :  { %7032 = vmatprep.mubr.bf16.mxu1 %v13496_v19  ;;  %7130 = vmatpush1.bf16.msra.mxu1 %v9212_v36  ;;  %16232 = vst [vmem:[#allocation39_spill] sm:$0xff] %v13515_v5  ;;  %v4108_v36 = vrot.slane %v13500_v7, 1  ;;  %v13534_v19 = vpack.c.bf16 %v13498_v58, %v13484_v53  ;;  %16239 = vst [vmem:[#allocation46_spill] sm:$0xff] %v13543_v63  ;;  %v4483_v4 = vrot.slane %v13515_v5, 2 }
 0x5e1   :  { %7131 = vmatprep.subr.bf16.mxu1 %v16210_v10  ;;  %16240 = vst [vmem:[#allocation47_spill] sm:$0xff] %v13548_v57  ;;  %16241 = vst [vmem:[#allocation48_spill] sm:$0xff] %v13556_v50  ;;  %v13574_v26 = vpack.c.bf16 %v13525_v40, %v13515_v5  ;;  %v4480_v63 = vsel %vm780_vm1, %v4478_v13, %v4479_v45  ;;  %v13582_v53 = vpack.c.bf16 %v4477_v23, %v4475_v56  ;;  %v13590_v40 = vld [vmem:[#allocation2 + $0xc0] sm:$0xff]  ;;  %v13592_v13 = vld [vmem:[#allocation2 + $0xc8] sm:$0xff] }
 0x5e2   :  { %16235 = vst [vmem:[#allocation42_spill] sm:$0xff] %v13534_v19  ;;  %16242 = vst [vmem:[#allocation49_spill] sm:$0xff] %v13561_v39  ;;  %v4109_v60 = vsel %vm362_vm0, %v4106_v16, %v4108_v36  ;;  %v4482_v16 = vsel %vm780_vm1, %v4479_v45, %v4481_v47  ;;  %v9215_v36 = vld [vmem:[%s15880_s4 + $0x138] sm:$0xff]   ;;  %v13586_v58 = vpack.c.bf16 %v13489_v6, %v13487_v22  ;;  %v4486_v5 = vrot.slane %v13561_v39, 2  ;;  %v13594_v47 = vld [vmem:[#allocation2 + $0xd0] sm:$0x3] }
 0x5e3   :  { %16243 = vst [vmem:[#allocation50_spill] sm:$0xff] %v13565_v52  ;;  %16244 = vst [vmem:[#allocation51_spill] sm:$0xff] %v13574_v26  ;;  %v13597_v45 = vpack.c.bf16 %v4109_v60, %v4107_v9  ;;  %v4488_v56 = vrot.slane %v13556_v50, 2  ;;  %v13604_v39 = vld [vmem:[#allocation2 + $0x298] sm:$0x3]  ;;  %v13606_v15 = vpack.c.bf16 %v4482_v16, %v4480_v63  ;;  %v4112_v9 = vsel %vm362_vm0, %v4110_v32, %v4111_v8  ;;  %v13615_v23 = vld [vmem:[#allocation2 + $0x2a8] sm:$0xff] }
 0x5e4   :  { %7132 = vmatpush1.bf16.msra.mxu1 %v9213_v24  ;;  %v4113_v24 = vrot.slane %v13541_v43, 1  ;;  %16245 = vst [vmem:[#allocation52_spill] sm:$0xff] %v13582_v53  ;;  %16246 = vst [vmem:[#allocation53_spill] sm:$0xff] %v13586_v58  ;;  %v4115_v0 = vrot.slane %v13590_v40, 1  ;;  %v4116_v63 = vrot.slane %v13592_v13, 1  ;;  %v4118_v16 = vrot.slane %v13594_v47, 1 }
 0x5e5   :  { %7133 = vmatprep.subr.bf16.mxu1 %v16210_v10  ;;  %16247 = vst [vmem:[#allocation54_spill] sm:$0xff] %v13590_v40  ;;  %16248 = vst [vmem:[#allocation55_spill] sm:$0xff] %v13592_v13  ;;  %v13623_v50 = vld [vmem:[#allocation2 + $0xe0] sm:$0xff]  ;;  %v4487_v32 = vsel %vm780_vm1, %v4484_v18, %v4486_v5  ;;  %v4493_v5 = vrot.slane %v13602_v59, 2  ;;  %v4494_v43 = vrot.slane %v13615_v23, 2  ;;  %v13762_v6 = vld [vmem:[#allocation2 + $0x128] sm:$0xff] }
 0x5e6   :  { %16249 = vst [vmem:[#allocation56_spill] sm:$0xff] %v13594_v47  ;;  %16250 = vst [vmem:[#allocation57_spill] sm:$0xff] %v13597_v45  ;;  %v4114_v60 = vsel %vm362_vm0, %v4111_v8, %v4113_v24  ;;  %v13630_v8 = vpack.c.bf16 %v13539_v25, %v13537_v31  ;;  %6616 = vmatmul.mubr.bf16.gmra.mrb[84].mxu0 %v13548_v57  ;;  %v13645_v24 = vld [vmem:[#allocation2 + $0x2c0] sm:$0xff]  ;;  %v13652_v25 = vpack.c.bf16 %v13615_v23, %v13602_v59  ;;  %v13658_v57 = vld [vmem:[#allocation2 + $0xf0] sm:$0xff] }
 0x5e7   :  { %7033 = vmatmul.mubr.bf16.gmra.mrb[12].mxu1 %v13529_v46  ;;  %v4489_v46 = vrot.slane %v13565_v52, 2  ;;  %16251 = vst [vmem:[#allocation58_spill] sm:$0xff] %v13602_v59  ;;  %16252 = vst [vmem:[#allocation59_spill] sm:$0xff] %v13604_v39  ;;  %v13625_v52 = vld [vmem:[#allocation2 + $0xe8] sm:$0x3]  ;;  %v13640_v47 = vpack.c.bf16 %v4114_v60, %v4112_v9  ;;  %6623 = vmatprep.mubr.bf16.mxu0 %v13597_v45  ;;  %v4121_v60 = vrot.slane %v13623_v50, 1 }
 0x5e8   :  { %7040 = vmatprep.mubr.bf16.mxu1 %v13534_v19  ;;  %7134 = vmatpush1.bf16.msra.mxu1 %v9214_v3  ;;  %16253 = vst [vmem:[#allocation60_spill] sm:$0xff] %v13606_v15  ;;  %16254 = vst [vmem:[#allocation61_spill] sm:$0xff] %v13610_v34  ;;  %v13617_v19 = vld [vmem:[#allocation2 + $0xd8] sm:$0xff]  ;;  %v4485_v3 = vsel %vm780_vm1, %v4483_v4, %v4484_v18  ;;  %v4491_v4 = vrot.slane %v13604_v39, 2  ;;  %v13647_v39 = vld [vmem:[#allocation2 + $0x2b0] sm:$0x3]  ;;  %v4117_v45 = vsel %vm362_vm0, %v4115_v0, %v4116_v63 }
 0x5e9   :  { %7135 = vmatprep.subr.bf16.mxu1 %v16210_v10  ;;  %16255 = vst [vmem:[#allocation62_spill] sm:$0xff] %v13615_v23  ;;  %16256 = vst [vmem:[#allocation63_spill] sm:$0xff] %v13617_v19  ;;  %v4120_v9 = vrot.slane %v13617_v19, 1  ;;  %v4123_v18 = vrot.slane %v13625_v52, 1  ;;  %v13662_v31 = vpack.c.bf16 %v4487_v32, %v4485_v3  ;;  %v4119_v12 = vsel %vm362_vm0, %v4116_v63, %v4118_v16  ;;  %v13667_v23 = vld [vmem:[#allocation2 + $0x100] sm:$0x3] }
 0x5ea   :  { %16257 = vst [vmem:[#allocation64_spill] sm:$0xff] %v13623_v50  ;;  %16258 = vst [vmem:[#allocation65_spill] sm:$0xff] %v13625_v52  ;;  %v4490_v59 = vsel %vm780_vm1, %v4488_v56, %v4489_v46  ;;  %v4492_v20 = vsel %vm780_vm1, %v4489_v46, %v4491_v4  ;;  %v13673_v52 = vpack.c.bf16 %v13592_v13, %v13590_v40  ;;  %v9217_v0 = vld [vmem:[%s15880_s4 + $0x148] sm:$0xff]   ;;  %v4498_v56 = vrot.slane %v13637_v29, 2  ;;  %v13685_v16 = vld [vmem:[#allocation2 + $0x2d0] sm:$0xff] }
 0x5eb   :  { %16259 = vst [vmem:[#allocation66_spill] sm:$0xff] %v13630_v8  ;;  %16260 = vst [vmem:[#allocation67_spill] sm:$0xff] %v13637_v29  ;;  %v13680_v63 = vld [vmem:[#allocation2 + $0x2c8] sm:$0x3]  ;;  %v4496_v46 = vrot.slane %v13647_v39, 2  ;;  %v13687_v32 = vld [vmem:[#allocation2 + $0x2d8] sm:$0xff]  ;;  %v13691_v3 = vpack.c.bf16 %v4119_v12, %v4117_v45  ;;  %v4124_v13 = vsel %vm362_vm0, %v4121_v60, %v4123_v18  ;;  %v13702_v40 = vpack.c.bf16 %v13645_v24, %v13637_v29 }
 0x5ec   :  { %16261 = vst [vmem:[#allocation68_spill] sm:$0xff] %v13640_v47  ;;  %7136 = vmatpush1.bf16.msra.mxu1 %v9215_v36  ;;  %16262 = vst [vmem:[#allocation69_spill] sm:$0xff] %v13645_v24  ;;  %v13660_v36 = vld [vmem:[#allocation2 + $0xf8] sm:$0xff]  ;;  %v4125_v4 = vrot.slane %v13658_v57, 1  ;;  %v4501_v7 = vrot.slane %v13680_v63, 2  ;;  %v13705_v12 = vld [vmem:[#allocation2 + $0x108] sm:$0xff]  ;;  %v4495_v18 = vsel %vm780_vm1, %v4493_v5, %v4494_v43 }
 0x5ed   :  { %16263 = vst [vmem:[#allocation70_spill] sm:$0xff] %v13647_v39  ;;  %16264 = vst [vmem:[#allocation71_spill] sm:$0xff] %v13652_v25  ;;  %7137 = vmatprep.subr.bf16.mxu1 %v16210_v10  ;;  %v4126_v48 = vrot.slane %v13660_v36, 1  ;;  %v4499_v39 = vrot.slane %v13645_v24, 2  ;;  %v13707_v45 = vld [vmem:[#allocation2 + $0x110] sm:$0xff]  ;;  %v4497_v24 = vsel %vm780_vm1, %v4494_v43, %v4496_v46  ;;  %v4130_v43 = vrot.slane %v13705_v12, 1 }
 0x5ee   :  { %16265 = vst [vmem:[#allocation72_spill] sm:$0xff] %v13658_v57  ;;  %16266 = vst [vmem:[#allocation73_spill] sm:$0xff] %v13660_v36  ;;  %v13718_v29 = vld [vmem:[#allocation2 + $0x2e0] sm:$0x3]  ;;  %6624 = vmatmul.mubr.bf16.gmra.mrb[88].mxu0 %v13586_v58  ;;  %v4504_v46 = vrot.slane %v13687_v32, 2 }
 0x5ef   :  { %16267 = vst [vmem:[#allocation74_spill] sm:$0xff] %v13662_v31  ;;  %16268 = vst [vmem:[#allocation75_spill] sm:$0xff] %v13667_v23  ;;  %7041 = vmatmul.mubr.bf16.gmra.mrb[16].mxu1 %v13582_v53  ;;  %v4122_v53 = vsel %vm362_vm0, %v4120_v9, %v4121_v60  ;;  %v13709_v9 = vld [vmem:[#allocation2 + $0x118] sm:$0x3]  ;;  %v4127_v5 = vsel %vm362_vm0, %v4125_v4, %v4126_v48  ;;  %6631 = vmatprep.mubr.bf16.mxu0 %v13640_v47 }
 0x5f0   :  { %16269 = vst [vmem:[#allocation76_spill] sm:$0xff] %v13673_v52  ;;  %16270 = vst [vmem:[#allocation77_spill] sm:$0xff] %v13680_v63  ;;  %7048 = vmatprep.mubr.bf16.mxu1 %v13574_v26  ;;  %7138 = vmatpush1.bf16.msra.mxu1 %v9216_v38  ;;  %v4128_v38 = vrot.slane %v13667_v23, 1  ;;  %v13697_v26 = vpack.c.bf16 %v4492_v20, %v4490_v59  ;;  %v13714_v20 = vpack.c.bf16 %v13623_v50, %v13617_v19  ;;  %v9218_v50 = vld [vmem:[%s15880_s4 + $0x150] sm:$0xff]   ;;  %v13729_v59 = vld [vmem:[#allocation2 + $0x2e8] sm:$0xff] }
 0x5f1   :  { %16271 = vst [vmem:[#allocation78_spill] sm:$0xff] %v13685_v16  ;;  %16272 = vst [vmem:[#allocation79_spill] sm:$0xff] %v13687_v32  ;;  %7139 = vmatprep.subr.bf16.mxu1 %v16210_v10  ;;  %v13721_v63 = vpack.c.bf16 %v4124_v13, %v4122_v53  ;;  %v4503_v23 = vrot.slane %v13685_v16, 2  ;;  %v13734_v53 = vld [vmem:[#allocation2 + $0x2f0] sm:$0xff]  ;;  %v4131_v13 = vrot.slane %v13707_v45, 1  ;;  %v4500_v4 = vsel %vm780_vm1, %v4498_v56, %v4499_v39  ;;  %v13760_v56 = vld [vmem:[#allocation2 + $0x120] sm:$0xff] }
 0x5f2   :  { %16273 = vst [vmem:[#allocation80_spill] sm:$0xff] %v13691_v3  ;;  %16274 = vst [vmem:[#allocation81_spill] sm:$0xff] %v13697_v26  ;;  %v4129_v60 = vsel %vm362_vm0, %v4126_v48, %v4128_v38  ;;  %v4502_v58 = vsel %vm780_vm1, %v4499_v39, %v4501_v7  ;;  %v9219_v48 = vld [vmem:[%s15880_s4 + $0x158] sm:$0xff]   ;;  %v4506_v38 = vrot.slane %v13718_v29, 2  ;;  %v13747_v47 = vpack.c.bf16 %v4497_v24, %v4495_v18  ;;  %v13758_v39 = vld [vmem:[#allocation2 + $0x300] sm:$0xff] }
 0x5f3   :  { %16275 = vst [vmem:[#allocation82_spill] sm:$0xff] %v13702_v40  ;;  %16276 = vst [vmem:[#allocation83_spill] sm:$0xff] %v13709_v9  ;;  %v13751_v19 = vpack.c.bf16 %v13687_v32, %v13685_v16  ;;  %v13765_v24 = vpack.c.bf16 %v4129_v60, %v4127_v5  ;;  %v13770_v16 = vld [vmem:[#allocation2 + $0x308] sm:$0xff]  ;;  %v13772_v7 = vld [vmem:[#allocation2 + $0x130] sm:$0x3]  ;;  %v13774_v32 = vpack.c.bf16 %v4502_v58, %v4500_v4 }
 0x5f4   :  { %16277 = vst [vmem:[#allocation84_spill] sm:$0xff] %v13714_v20  ;;  %16278 = vst [vmem:[#allocation85_spill] sm:$0xff] %v13718_v29  ;;  %7140 = vmatpush1.bf16.msra.mxu1 %v9217_v0  ;;  %v4133_v0 = vrot.slane %v13709_v9, 1  ;;  %v13755_v9 = vpack.c.bf16 %v13660_v36, %v13658_v57  ;;  %v4509_v29 = vrot.slane %v13734_v53, 2  ;;  %v13778_v36 = vpack.c.bf16 %v13734_v53, %v13729_v59  ;;  %v13804_v4 = vld [vmem:[#allocation2 + $0x138] sm:$0xff] }
 0x5f5   :  { %16279 = vst [vmem:[#allocation86_spill] sm:$0xff] %v13721_v63  ;;  %16280 = vst [vmem:[#allocation87_spill] sm:$0xff] %v13729_v59  ;;  %7141 = vmatprep.subr.bf16.mxu1 %v16210_v10  ;;  %v4132_v60 = vsel %vm362_vm0, %v4130_v43, %v4131_v13  ;;  %v4505_v5 = vsel %vm780_vm1, %v4503_v23, %v4504_v46  ;;  %v4507_v18 = vsel %vm780_vm1, %v4504_v46, %v4506_v38 }
 0x5f6   :  { %16281 = vst [vmem:[#allocation88_spill] sm:$0xff] %v13734_v53  ;;  %16282 = vst [vmem:[#allocation89_spill] sm:$0xff] %v13747_v47  ;;  %v4136_v57 = vrot.slane %v13762_v6, 1  ;;  %v13789_v58 = vpack.c.bf16 %v13707_v45, %v13705_v12  ;;  %6632 = vmatmul.mubr.bf16.gmra.mrb[92].mxu0 %v13630_v8  ;;  %v4513_v46 = vrot.slane %v13758_v39, 2  ;;  %v4368_v43 = vrot.slane %v13298_v27, 2 }
 0x5f7   :  { %7049 = vmatmul.mubr.bf16.gmra.mrb[20].mxu1 %v13606_v15  ;;  %16283 = vst [vmem:[#allocation90_spill] sm:$0xff] %v13751_v19  ;;  %16284 = vst [vmem:[#allocation91_spill] sm:$0xff] %v13755_v9  ;;  %v4508_v15 = vrot.slane %v13729_v59, 2  ;;  %v9220_v59 = vld [vmem:[%s15880_s4 + $0x160] sm:$0xff]   ;;  %6639 = vmatprep.mubr.bf16.mxu0 %v13691_v3  ;;  %v13808_v53 = vpack.c.bf16 %v4507_v18, %v4505_v5  ;;  %v4369_v38 = vrot.slane %v13300_v17, 2  ;;  %v4371_v8 = vrot.slane %v13306_v61, 2 }
 0x5f8   :  { %16285 = vst [vmem:[#allocation92_spill] sm:$0xff] %v13758_v39  ;;  %7056 = vmatprep.mubr.bf16.mxu1 %v13610_v34  ;;  %16286 = vst [vmem:[#allocation93_spill] sm:$0xff] %v13765_v24  ;;  %7142 = vmatpush1.bf16.msra.mxu1 %v9218_v50  ;;  %v4134_v50 = vsel %vm362_vm0, %v4131_v13, %v4133_v0  ;;  %v4135_v34 = vrot.slane %v13760_v56, 1  ;;  %v4138_v13 = vrot.slane %v13772_v7, 1  ;;  %v13794_v0 = vld [vmem:[#allocation2 + $0x2f8] sm:$0x3] }
 0x5f9   :  { %16287 = vst [vmem:[#allocation94_spill] sm:$0xff] %v13774_v32  ;;  %16288 = vst [vmem:[#allocation95_spill] sm:$0xff] %v13778_v36  ;;  %7143 = vmatprep.subr.bf16.mxu1 %v16210_v10  ;;  %v13797_v23 = vpack.c.bf16 %v4134_v50, %v4132_v60  ;;  %v13812_v60 = vpack.c.bf16 %v13770_v16, %v13758_v39  ;;  %v13817_v50 = vld [vmem:[#allocation2 + $0x148] sm:$0x3]  ;;  %v4510_v3 = vsel %vm780_vm1, %v4508_v15, %v4509_v29  ;;  %v13828_v39 = vld [vmem:[#allocation2 + $0x318] sm:$0xff] }
 0x5fa   :  { %16289 = vst [vmem:[#allocation96_spill] sm:$0xff] %v13789_v58  ;;  %16290 = vst [vmem:[#allocation97_spill] sm:$0xff] %v13794_v0  ;;  %v4137_v27 = vsel %vm362_vm0, %v4135_v34, %v4136_v57  ;;  %v4511_v18 = vrot.slane %v13794_v0, 2  ;;  %v13826_v5 = vpack.c.bf16 %v13762_v6, %v13760_v56  ;;  %v4139_v17 = vsel %vm362_vm0, %v4136_v57, %v4138_v13 }
 0x5fb   :  { %16291 = vst [vmem:[#allocation98_spill] sm:$0xff] %v13797_v23  ;;  %16292 = vst [vmem:[#allocation99_spill] sm:$0xff] %v13808_v53  ;;  %v4140_v61 = vrot.slane %v13804_v4, 1  ;;  %v4370_v34 = vsel %vm780_vm1, %v4368_v43, %v4369_v38  ;;  %v4372_v15 = vsel %vm780_vm1, %v4369_v38, %v4371_v8  ;;  %v9221_v53 = vld [vmem:[%s15880_s4 + $0x168] sm:$0xff]   ;;  %v4373_v57 = vrot.slane %v13312_v1, 2 }
 0x5fc   :  { %7144 = vmatpush1.bf16.msra.mxu1 %v9219_v48  ;;  %16293 = vst [vmem:[#allocation100_spill] sm:$0xff] %v13812_v60  ;;  %v13815_v48 = vld [vmem:[#allocation2 + $0x140] sm:$0xff]  ;;  %16294 = vst [vmem:[#allocation101_spill] sm:$0xff] %v13817_v50  ;;  %v4374_v8 = vrot.slane %v13314_v62, 2  ;;  %v13851_v38 = vpack.c.bf16 %v4139_v17, %v4137_v27  ;;  %v16302_v43 = vrot.slane %v13323_v41, 1 }
 0x5fd   :  { %7145 = vmatprep.subr.bf16.mxu1 %v16210_v10  ;;  %16295 = vst [vmem:[#allocation102_spill] sm:$0xff] %v13826_v5  ;;  %v13830_v60 = vld [vmem:[#allocation2 + $0x320] sm:$0xff]  ;;  %v4141_v0 = vrot.slane %v13815_v48, 1  ;;  %v4143_v5 = vrot.slane %v13817_v50, 1  ;;  %v16328_v50 = vld [vmem:[#allocation15_spill] sm:$0xff] }
 0x5fe   :  { %16296 = vst [vmem:[#allocation103_spill] sm:$0xff] %v13851_v38  ;;  %v13858_v1 = vpack.c.bf16 %v13830_v60, %v13828_v39  ;;  %v4375_v13 = vsel %vm780_vm1, %v4373_v57, %v4374_v8  ;;  %6640 = vmatmul.mubr.bf16.gmra.mrb[96].mxu0 %v13673_v52  ;;  %v4381_v57 = vrot.slane %v13371_v42, 2  ;;  %v13890_v42 = vld [vmem:[#allocation2 + $0x160] sm:$0x3] }
 0x5ff   :  { %7057 = vmatmul.mubr.bf16.gmra.mrb[24].mxu1 %v13662_v31  ;;  %v13843_v31 = vpack.c.bf16 %v4372_v15, %v4370_v34  ;;  %v4378_v34 = vrot.slane %v13351_v44, 2  ;;  %v13860_v15 = vld [vmem:[#allocation2 + $0x310] sm:$0x3]  ;;  %v4144_v27 = vsel %vm362_vm0, %v4141_v0, %v4143_v5  ;;  %6647 = vmatprep.mubr.bf16.mxu0 %v13721_v63 }
 0x600   :  { %7064 = vmatprep.mubr.bf16.mxu1 %v13652_v25  ;;  %7146 = vmatpush1.bf16.msra.mxu1 %v9220_v59  ;;  %v4376_v59 = vrot.slane %v13320_v49, 2  ;;  %v4512_v25 = vsel %vm780_vm1, %v4509_v29, %v4511_v18  ;;  %16297 = vst [vmem:[#allocation104_spill] sm:$0xff] %v13858_v1  ;;  %v4379_v49 = vrot.slane %v13369_v28, 2  ;;  %v4142_v29 = vsel %vm362_vm0, %v4140_v61, %v4141_v0  ;;  %v13868_v44 = vld [vmem:[#allocation2 + $0x150] sm:$0xff]  ;;  %v13886_v0 = vld [vmem:[#allocation2 + $0x158] sm:$0xff] }
 0x601   :  { %7147 = vmatprep.subr.bf16.mxu1 %v16210_v10  ;;  %v9222_v18 = vld [vmem:[%s15880_s4 + $0x170] sm:$0xff]   ;;  %v13877_v28 = vpack.c.bf16 %v4512_v25, %v4510_v3  ;;  %v16299_v61 = vrot.slane %v13770_v16, 2  ;;  %v4383_v3 = vrot.slane %v13396_v30, 2  ;;  %v9223_v30 = vld [vmem:[%s15880_s4 + $0x178] sm:$0xff]  }
 0x602   :  { %v4377_v62 = vsel %vm780_vm1, %v4374_v8, %v4376_v59  ;;  %v4380_v5 = vsel %vm780_vm1, %v4378_v34, %v4379_v49  ;;  %v4382_v25 = vsel %vm780_vm1, %v4379_v49, %v4381_v57  ;;  %v4384_v59 = vrot.slane %v13398_v35, 2 }
 0x603   :  { %v13873_v17 = vpack.c.bf16 %v4377_v62, %v4375_v13  ;;  %16298 = vst [vmem:[#allocation105_spill] sm:$0xff] %v13877_v28  ;;  %v4386_v34 = vrot.slane %v13400_v14, 2  ;;  %v4165_v49 = vrot.slane %v13326_v11, 1  ;;  %v4168_v57 = vrot.slane %v13335_v55, 1  ;;  %v16315_v13 = vld [vmem:[#allocation10_spill] sm:$0xff]  ;;  %v16323_v62 = vld [vmem:[#allocation55_spill] sm:$0xff] }
 0x604   :  { %7148 = vmatpush1.bf16.msra.mxu1 %v9221_v53  ;;  %v13883_v53 = vsel %vm780_vm1, %v4513_v46, %v16299_v61  ;;  %v13896_v46 = vpack.c.bf16 %v4144_v27, %v4142_v29  ;;  %v13899_v61 = vpack.c.bf16 %v4382_v25, %v4380_v5  ;;  %v4385_v35 = vsel %vm780_vm1, %v4383_v3, %v4384_v59  ;;  %v16317_v27 = vld [vmem:[#allocation8_spill] sm:$0xff] }
 0x605   :  { %7149 = vmatprep.subr.bf16.mxu1 %v16210_v10  ;;  %v4166_v29 = vrot.slane %v13328_v51, 1  ;;  %v4387_v14 = vsel %vm780_vm1, %v4384_v59, %v4386_v34  ;;  %v4389_v3 = vrot.slane %v13448_v33, 2  ;;  %v4391_v11 = vrot.slane %v13450_v54, 2 }
 0x606   :  { %16300 = vst [vmem:[#allocation106_spill] sm:$0xff] %v13896_v46  ;;  %v13915_v5 = vpack.c.bf16 %v4387_v14, %v4385_v35  ;;  %v16301_v8 = vrot.slane %v13332_v21, 1  ;;  %v4173_v55 = vrot.slane %v13360_v37, 1  ;;  %6648 = vmatmul.mubr.bf16.gmra.mrb[100].mxu0 %v13714_v20  ;;  %v16303_v35 = vld [vmem:[#allocation24_spill] sm:$0xff]  ;;  %v16308_v14 = vld [vmem:[#allocation25_spill] sm:$0xff]  ;;  %v16337_v20 = vld [vmem:[#allocation22_spill] sm:$0xff] }
 0x607   :  { %7065 = vmatmul.mubr.bf16.gmra.mrb[28].mxu1 %v13697_v26  ;;  %v4167_v25 = vsel %vm362_vm0, %v4165_v49, %v4166_v29  ;;  %v4169_v51 = vsel %vm362_vm0, %v4166_v29, %v4168_v57  ;;  %v4392_v54 = vsel %vm780_vm1, %v4389_v3, %v4391_v11  ;;  %v4394_v49 = vrot.slane %v16303_v35, 2  ;;  %6655 = vmatprep.mubr.bf16.mxu0 %v13765_v24  ;;  %v16311_v11 = vld [vmem:[#allocation9_spill] sm:$0xff]  ;;  %v14087_v26 = vld [vmem:[#allocation2 + $0x170] sm:$0xff] }
 0x608   :  { %7072 = vmatprep.mubr.bf16.mxu1 %v13702_v40  ;;  %7150 = vmatpush1.bf16.msra.mxu1 %v9222_v18  ;;  %v4388_v18 = vrot.slane %v13446_v2, 2  ;;  %v4172_v59 = vsel %vm362_vm0, %v16302_v43, %v16301_v8  ;;  %v4393_v2 = vrot.slane %v13487_v22, 2  ;;  %v13929_v34 = vpack.c.bf16 %v4169_v51, %v4167_v25  ;;  %v16305_v43 = vld [vmem:[#allocation36_spill] sm:$0xff]  ;;  %v16388_v40 = vld [vmem:[#allocation87_spill] sm:$0xff] }
 0x609   :  { %7151 = vmatprep.subr.bf16.mxu1 %v16210_v10  ;;  %v16304_v37 = vmov %v16301_v8  ;;  %v4396_v8 = vrot.slane %v16305_v43, 2  ;;  %v16309_v57 = vrot.slane %v16308_v14, 1  ;;  %v4178_v51 = vrot.slane %v16311_v11, 1  ;;  %v16320_v11 = vld [vmem:[#allocation16_spill] sm:$0xff] }
 0x60a   :  { %v4390_v33 = vsel %vm780_vm1, %v4388_v18, %v4389_v3  ;;  %v4174_v22 = vsel %vm362_vm0, %v16304_v37, %v4173_v55  ;;  %v4395_v3 = vsel %vm780_vm1, %v4393_v2, %v4394_v49  ;;  %v16313_v55 = vld [vmem:[#allocation44_spill] sm:$0xff]  ;;  %v16314_v37 = vld [vmem:[#allocation45_spill] sm:$0xff]  ;;  %v16316_v14 = vrot.slane %v16315_v13, 1 }
 0x60b   :  { %v13936_v41 = vpack.c.bf16 %v4392_v54, %v4390_v33  ;;  %v13947_v25 = vpack.c.bf16 %v4174_v22, %v4172_v59  ;;  %v16312_v33 = vld [vmem:[#allocation43_spill] sm:$0xff]  ;;  %v4397_v21 = vsel %vm780_vm1, %v4394_v49, %v4396_v8  ;;  %v4399_v35 = vrot.slane %v16313_v55, 2  ;;  %v16321_v8 = vld [vmem:[#allocation54_spill] sm:$0xff] }
 0x60c   :  { %7152 = vmatpush1.bf16.msra.mxu1 %v9223_v30  ;;  %v16306_v30 = vld [vmem:[#allocation27_spill] sm:$0xff]  ;;  %v4398_v54 = vrot.slane %v16312_v33, 2  ;;  %v4401_v43 = vrot.slane %v16314_v37, 2  ;;  %v13962_v2 = vpack.c.bf16 %v4397_v21, %v4395_v3  ;;  %v4183_v49 = vrot.slane %v16320_v11, 1  ;;  %v16325_v21 = vld [vmem:[#allocation56_spill] sm:$0xff] }
 0x60d   :  { %7410 = vmatprep.subr.bf16.mxu1 %v16210_v10  ;;  %v16307_v29 = vrot.slane %v16306_v30, 1  ;;  %16310 = vst [vmem:[#allocation24_spill] sm:$0xff] %v13947_v25  ;;  %v16319_v22 = vrot.slane %v16306_v30, 1  ;;  %v4403_v33 = vrot.slane %v16321_v8, 2  ;;  %v16324_v3 = vrot.slane %v16315_v13, 1 }
 0x60e   :  { %v4400_v37 = vsel %vm780_vm1, %v4398_v54, %v4399_v35  ;;  %v16329_v8 = vrot.slane %v16328_v50, 1  ;;  %6656 = vmatmul.mubr.bf16.gmra.mrb[104].mxu0 %v13755_v9  ;;  %v16343_v9 = vld [vmem:[#allocation73_spill] sm:$0xff] }
 0x60f   :  { %v4177_v18 = vsel %vm362_vm0, %v16309_v57, %v16307_v29  ;;  %7073 = vmatmul.mubr.bf16.gmra.mrb[32].mxu1 %v13747_v47  ;;  %v16318_v29 = vrot.slane %v16317_v27, 1  ;;  %v4179_v57 = vsel %vm362_vm0, %v16319_v22, %v4178_v51  ;;  %v4402_v27 = vsel %vm780_vm1, %v4399_v35, %v4401_v43  ;;  %v16326_v22 = vld [vmem:[#allocation18_spill] sm:$0xff]  ;;  %v16331_v35 = vld [vmem:[#allocation17_spill] sm:$0xff]  ;;  %v16332_v43 = vld [vmem:[#allocation63_spill] sm:$0xff]  ;;  %6663 = vmatprep.mubr.bf16.mxu0 %v13797_v23 }
 0x610   :  { %7080 = vmatprep.mubr.bf16.mxu1 %v13751_v19  ;;  %v13969_v55 = vpack.c.bf16 %v4179_v57, %v4177_v18  ;;  %v4184_v30 = vsel %vm362_vm0, %v16324_v3, %v4183_v49  ;;  %v4406_v51 = vrot.slane %v16325_v21, 2  ;;  %v16327_v11 = vrot.slane %v16326_v22, 1  ;;  %v16333_v49 = vld [vmem:[#allocation64_spill] sm:$0xff]  ;;  %v16334_v3 = vld [vmem:[#allocation65_spill] sm:$0xff]  ;;  %v16335_v47 = vld [vmem:[#allocation35_spill] sm:$0xff] }
 0x611   :  { %v4182_v59 = vsel %vm362_vm0, %v16318_v29, %v16316_v14  ;;  %v4404_v14 = vrot.slane %v16323_v62, 2  ;;  %v13974_v29 = vpack.c.bf16 %v4402_v27, %v4400_v37  ;;  %v4188_v62 = vrot.slane %v16331_v35, 1  ;;  %v16340_v35 = vld [vmem:[#allocation38_spill] sm:$0xff] }
 0x612   :  { %16322 = vst [vmem:[#allocation36_spill] sm:$0xff] %v13969_v55  ;;  %v4187_v18 = vsel %vm362_vm0, %v16329_v8, %v16327_v11  ;;  %v13985_v57 = vpack.c.bf16 %v4184_v30, %v4182_v59  ;;  %v4408_v37 = vrot.slane %v16332_v43, 2  ;;  %v4409_v27 = vrot.slane %v16333_v49, 2 }
 0x613   :  { %v4405_v54 = vsel %vm780_vm1, %v4403_v33, %v4404_v14  ;;  %v4407_v13 = vsel %vm780_vm1, %v4404_v14, %v4406_v51  ;;  %v4411_v21 = vrot.slane %v16334_v3, 2  ;;  %v16336_v50 = vrot.slane %v16335_v47, 1  ;;  %v16341_v51 = vld [vmem:[#allocation72_spill] sm:$0xff] }
 0x614   :  { %16330 = vst [vmem:[#allocation27_spill] sm:$0xff] %v13985_v57  ;;  %v16338_v11 = vrot.slane %v16337_v20, 1  ;;  %v14000_v33 = vpack.c.bf16 %v4407_v13, %v4405_v54  ;;  %v16339_v30 = vrot.slane %v16326_v22, 1  ;;  %v4193_v14 = vrot.slane %v16340_v35, 1  ;;  %v16345_v13 = vld [vmem:[#allocation75_spill] sm:$0xff] }
 0x615   :  { %v4413_v43 = vrot.slane %v16341_v51, 2  ;;  %v4410_v3 = vsel %vm780_vm1, %v4408_v37, %v4409_v27  ;;  %v4412_v20 = vsel %vm780_vm1, %v4409_v27, %v4411_v21  ;;  %v16344_v22 = vrot.slane %v16335_v47, 1  ;;  %v16351_v21 = vld [vmem:[#allocation49_spill] sm:$0xff] }
 0x616   :  { %v4192_v59 = vsel %vm362_vm0, %v16338_v11, %v16336_v50  ;;  %v4189_v8 = vsel %vm362_vm0, %v16339_v30, %v4188_v62  ;;  %v4414_v50 = vrot.slane %v16343_v9, 2  ;;  %v14013_v54 = vpack.c.bf16 %v4412_v20, %v4410_v3  ;;  %v16346_v30 = vld [vmem:[#allocation40_spill] sm:$0xff]  ;;  %v16352_v20 = vld [vmem:[#allocation83_spill] sm:$0xff]  ;;  %6664 = vmatmul.mubr.bf16.gmra.mrb[108].mxu0 %v13789_v58 }
 0x617   :  { %v14007_v49 = vpack.c.bf16 %v4189_v8, %v4187_v18  ;;  %7081 = vmatmul.mubr.bf16.gmra.mrb[36].mxu1 %v13774_v32  ;;  %v4194_v62 = vsel %vm362_vm0, %v16344_v22, %v4193_v14  ;;  %v4416_v11 = vrot.slane %v16345_v13, 2  ;;  %v16347_v35 = vrot.slane %v16346_v30, 1  ;;  %v16348_v18 = vld [vmem:[#allocation39_spill] sm:$0xff]  ;;  %v16353_v13 = vld [vmem:[#allocation50_spill] sm:$0xff]  ;;  %v16355_v32 = vld [vmem:[#allocation48_spill] sm:$0xff]  ;;  %6671 = vmatprep.mubr.bf16.mxu0 %v13851_v38 }
 0x618   :  { %v16349_v8 = vrot.slane %v16348_v18, 1  ;;  %7088 = vmatprep.mubr.bf16.mxu1 %v13778_v36  ;;  %v14025_v27 = vpack.c.bf16 %v4194_v62, %v4192_v59  ;;  %v4415_v9 = vsel %vm780_vm1, %v4413_v43, %v4414_v50  ;;  %v4198_v51 = vrot.slane %v16351_v21, 1  ;;  %v16358_v21 = vld [vmem:[#allocation59_spill] sm:$0xff]  ;;  %v16376_v58 = vld [vmem:[#allocation100_spill] sm:$0xff] }
 0x619   :  { %16342 = vst [vmem:[#allocation25_spill] sm:$0xff] %v14007_v49  ;;  %v4418_v47 = vrot.slane %v13705_v12, 2  ;;  %v4417_v14 = vsel %vm780_vm1, %v4414_v50, %v4416_v11  ;;  %v4419_v3 = vrot.slane %v13707_v45, 2  ;;  %v4421_v22 = vrot.slane %v16352_v20, 2 }
 0x61a   :  { %v4197_v37 = vsel %vm362_vm0, %v16349_v8, %v16347_v35  ;;  %16350 = vst [vmem:[#allocation9_spill] sm:$0xff] %v14025_v27  ;;  %v16354_v18 = vrot.slane %v16353_v13, 1  ;;  %v16356_v35 = vrot.slane %v16355_v32, 1  ;;  %v14038_v59 = vpack.c.bf16 %v4417_v14, %v4415_v9 }
 0x61b   :  { %v16357_v43 = vrot.slane %v16346_v30, 1  ;;  %v4203_v12 = vrot.slane %v16358_v21, 1  ;;  %v4423_v50 = vrot.slane %v13760_v56, 2  ;;  %v4420_v45 = vsel %vm780_vm1, %v4418_v47, %v4419_v3  ;;  %v16367_v21 = vld [vmem:[#allocation101_spill] sm:$0xff] }
 0x61c   :  { %v4202_v8 = vsel %vm362_vm0, %v16356_v35, %v16354_v18  ;;  %v4422_v20 = vsel %vm780_vm1, %v4419_v3, %v4421_v22  ;;  %v4424_v32 = vrot.slane %v13762_v6, 2  ;;  %v16360_v30 = vmov %v16354_v18  ;;  %v16361_v18 = vld [vmem:[#allocation62_spill] sm:$0xff] }
 0x61d   :  { %v4199_v62 = vsel %vm362_vm0, %v16357_v43, %v4198_v51  ;;  %v14051_v9 = vpack.c.bf16 %v4422_v20, %v4420_v45  ;;  %v4204_v51 = vsel %vm362_vm0, %v16360_v30, %v4203_v12  ;;  %v4426_v14 = vrot.slane %v13772_v7, 2  ;;  %v16366_v22 = vld [vmem:[#allocation70_spill] sm:$0xff]  ;;  %v16368_v45 = vld [vmem:[#allocation69_spill] sm:$0xff]  ;;  %v16370_v30 = vld [vmem:[#allocation67_spill] sm:$0xff] }
 0x61e   :  { %v14045_v11 = vpack.c.bf16 %v4199_v62, %v4197_v37  ;;  %v16362_v56 = vrot.slane %v16361_v18, 1  ;;  %v16363_v37 = vld [vmem:[#allocation58_spill] sm:$0xff]  ;;  %v14063_v3 = vpack.c.bf16 %v4204_v51, %v4202_v8  ;;  %v4425_v6 = vsel %vm780_vm1, %v4423_v50, %v4424_v32  ;;  %v16372_v8 = vld [vmem:[#allocation99_spill] sm:$0xff]  ;;  %v14077_v51 = vld [vmem:[#allocation2 + $0x168] sm:$0xff] }
 0x61f   :  { %v16364_v35 = vrot.slane %v16363_v37, 1  ;;  %v4208_v43 = vrot.slane %v16366_v22, 1  ;;  %v4428_v13 = vrot.slane %v13804_v4, 2  ;;  %v4427_v62 = vsel %vm780_vm1, %v4424_v32, %v4426_v14  ;;  %7089 = vmatmul.mubr.bf16.gmra.mrb[40].mxu1 %v16372_v8  ;;  %v16375_v14 = vld [vmem:[#allocation77_spill] sm:$0xff]  ;;  %v16380_v8 = vld [vmem:[#allocation79_spill] sm:$0xff] }
 0x620   :  { %16359 = vst [vmem:[#allocation43_spill] sm:$0xff] %v14045_v11  ;;  %16365 = vst [vmem:[#allocation44_spill] sm:$0xff] %v14063_v3  ;;  %v4429_v7 = vrot.slane %v13815_v48, 2  ;;  %v4431_v12 = vrot.slane %v16367_v21, 2  ;;  %v16369_v20 = vrot.slane %v16368_v45, 1  ;;  %v14079_v50 = vpack.c.bf16 %v4427_v62, %v4425_v6  ;;  %7096 = vmatprep.mubr.bf16.mxu1 %v16376_v58  ;;  %v16382_v58 = vld [vmem:[#allocation78_spill] sm:$0xff] }
 0x621   :  { %v4207_v47 = vsel %vm362_vm0, %v16364_v35, %v16362_v56  ;;  %v16371_v56 = vrot.slane %v16370_v30, 1  ;;  %v16374_v35 = vrot.slane %v16361_v18, 1  ;;  %v4213_v22 = vrot.slane %v16375_v14, 1  ;;  %v14089_v30 = vld [vmem:[#allocation2 + $0x178] sm:$0x3] }
 0x622   :  { %16373 = vst [vmem:[#allocation45_spill] sm:$0xff] %v14079_v50  ;;  %v4433_v21 = vrot.slane %v13868_v44, 2  ;;  %v4432_v6 = vsel %vm780_vm1, %v4429_v7, %v4431_v12  ;;  %v4434_v18 = vrot.slane %v13886_v0, 2  ;;  %v4436_v14 = vrot.slane %v13890_v42, 2 }
 0x623   :  { %v4212_v37 = vsel %vm362_vm0, %v16371_v56, %v16369_v20  ;;  %v4209_v32 = vsel %vm362_vm0, %v16374_v35, %v4208_v43  ;;  %v4430_v56 = vsel %vm780_vm1, %v4428_v13, %v4429_v7  ;;  %v16379_v43 = vrot.slane %v16368_v45, 1  ;;  %v16385_v7 = vld [vmem:[#allocation85_spill] sm:$0xff] }
 0x624   :  { %v14091_v20 = vpack.c.bf16 %v4209_v32, %v4207_v47  ;;  %v14096_v62 = vpack.c.bf16 %v4432_v6, %v4430_v56  ;;  %v16381_v52 = vrot.slane %v16380_v8, 1  ;;  %v16383_v36 = vrot.slane %v16382_v58, 1 }
 0x625   :  { %v4214_v35 = vsel %vm362_vm0, %v16379_v43, %v4213_v22  ;;  %v4435_v13 = vsel %vm780_vm1, %v4433_v21, %v4434_v18  ;;  %v4218_v12 = vrot.slane %v16385_v7, 1  ;;  %v4438_v56 = vrot.slane %v14077_v51, 2  ;;  %v16386_v43 = vld [vmem:[#allocation88_spill] sm:$0xff]  ;;  %v3909_v21 = vld [vmem:[#allocation2 + $0x330] sm:$0xff] }
 0x626   :  { %16377 = vst [vmem:[#allocation10_spill] sm:$0xff] %v14091_v20  ;;  %16378 = vst [vmem:[#allocation8_spill] sm:$0xff] %v14096_v62  ;;  %v4217_v47 = vsel %vm362_vm0, %v16383_v36, %v16381_v52  ;;  %v14107_v32 = vpack.c.bf16 %v4214_v35, %v4212_v37  ;;  %v4437_v45 = vsel %vm780_vm1, %v4434_v18, %v4436_v14  ;;  %v4439_v22 = vrot.slane %v14087_v26, 2  ;;  %v16390_v36 = vld [vmem:[#allocation102_spill] sm:$0xff]  ;;  %v3910_v35 = vld [vmem:[#allocation2 + $0x338] sm:$0xff] }
 0x627   :  { %v4441_v6 = vrot.slane %v14089_v30, 2  ;;  %v16387_v19 = vrot.slane %v16386_v43, 1  ;;  %v16389_v58 = vrot.slane %v16388_v40, 1  ;;  %6672 = vmatmul.mubr.bf16.gmra.mrb[112].mxu0 %v16390_v36  ;;  %v14123_v37 = vpack.c.bf16 %v13815_v48, %v13804_v4  ;;  %v16393_v62 = vld [vmem:[#allocation97_spill] sm:$0xff]  ;;  %v14150_v36 = vld [vmem:[#allocation2 + $0x1d8] sm:$0x3]  ;;  %7097 = vmatmul.mubr.bf16.gmra.mrb[44].mxu1 %v13877_v28 }
 0x628   :  { %16384 = vst [vmem:[#allocation16_spill] sm:$0xff] %v14107_v32  ;;  %v14125_v7 = vpack.c.bf16 %v4437_v45, %v4435_v13  ;;  %v16392_v18 = vrot.slane %v16380_v8, 1  ;;  %v4223_v38 = vrot.slane %v16393_v62, 1  ;;  %6679 = vmatprep.mubr.bf16.mxu0 %v13896_v46  ;;  %v16395_v40 = vrot.slane %v13868_v44, 1  ;;  %v14137_v4 = vld [vmem:[#allocation2 + $0x1c8] sm:$0xff]  ;;  %7104 = vmatprep.mubr.bf16.mxu1 %v13858_v1 }
 0x629   :  { %v4222_v52 = vsel %vm362_vm0, %v16389_v58, %v16387_v19  ;;  %v16394_v19 = vrot.slane %v13886_v0, 1  ;;  %v4440_v13 = vsel %vm780_vm1, %v4438_v56, %v4439_v22  ;;  %v4442_v8 = vsel %vm780_vm1, %v4439_v22, %v4441_v6 }
 0x62a   :  { %16391 = vst [vmem:[#allocation54_spill] sm:$0xff] %v14125_v7  ;;  %v4219_v14 = vsel %vm362_vm0, %v16392_v18, %v4218_v12  ;;  %v16397_v12 = vrot.slane %v13890_v42, 1  ;;  %v14148_v18 = vld [vmem:[#allocation2 + $0x1d0] sm:$0xff]  ;;  %v14152_v7 = vpack.c.bf16 %v4442_v8, %v4440_v13  ;;  %v16401_v56 = vrot.slane %v13770_v16, 1 }
 0x62b   :  { %v4147_v58 = vsel %vm362_vm0, %v16395_v40, %v16394_v19  ;;  %v14139_v48 = vpack.c.bf16 %v4219_v14, %v4217_v47  ;;  %v16398_v62 = vmov %v16394_v19  ;;  %v16400_v19 = vrot.slane %v16386_v43, 1  ;;  %v16402_v14 = vld [vmem:[#allocation92_spill] sm:$0xff] }
 0x62c   :  { %v4149_v45 = vsel %vm362_vm0, %v16398_v62, %v16397_v12  ;;  %16399 = vst [vmem:[#allocation56_spill] sm:$0xff] %v14152_v7  ;;  %v16403_v22 = vrot.slane %v16402_v14, 1  ;;  %v4726_v6 = vrot.slane %v3909_v21, 1  ;;  %v4727_v40 = vrot.slane %v3910_v35, 1  ;;  %v3908_v14 = vld [vmem:[#allocation2 + $0x328] sm:$0x3] }
 0x62d   :  { %16396 = vst [vmem:[#allocation55_spill] sm:$0xff] %v14139_v48  ;;  %v4224_v47 = vsel %vm362_vm0, %v16400_v19, %v4223_v38  ;;  %v4228_v62 = vrot.slane %v13860_v15, 1  ;;  %v16405_v43 = vrot.slane %v13860_v15, 2  ;;  %v16406_v38 = vrot.slane %v13770_v16, 2  ;;  %v3911_v15 = vld [vmem:[#allocation2 + $0x340] sm:$0x3] }
 0x62e   :  { %v4227_v42 = vsel %vm362_vm0, %v16403_v22, %v16401_v56  ;;  %v14163_v12 = vpack.c.bf16 %v4224_v47, %v4222_v52  ;;  %v4804_v8 = vrot.slane %v3909_v21, 2  ;;  %v4805_v19 = vrot.slane %v3910_v35, 2 }
 0x62f   :  { %v4517_v13 = vsel %vm780_vm1, %v16406_v38, %v16405_v43  ;;  %v4448_v56 = vrot.slane %v14137_v4, 2  ;;  %v14173_v22 = vpack.c.bf16 %v4149_v45, %v4147_v58  ;;  %v16408_v52 = vrot.slane %v13770_v16, 1  ;;  %v14182_v38 = vld [vmem:[#allocation2 + $0x180] sm:$0xff]  ;;  %6680 = vmatmul.mubr.bf16.gmra.mrb[116].mxu0 %v14123_v37 }
 0x630   :  { %16404 = vst [vmem:[#allocation18_spill] sm:$0xff] %v14163_v12  ;;  %v4449_v28 = vrot.slane %v14148_v18, 2  ;;  %v4451_v1 = vrot.slane %v14150_v36, 2  ;;  %v4150_v7 = vrot.slane %v14077_v51, 1  ;;  %v4151_v43 = vrot.slane %v14087_v26, 1  ;;  %v14184_v12 = vld [vmem:[#allocation2 + $0x188] sm:$0xff] }
 0x631   :  { %16407 = vst [vmem:[#allocation15_spill] sm:$0xff] %v14173_v22  ;;  %v4229_v47 = vsel %vm362_vm0, %v16408_v52, %v4228_v62  ;;  %v16410_v58 = vrot.slane %v13830_v60, 1  ;;  %v16411_v16 = vrot.slane %v13828_v39, 1  ;;  %v4153_v62 = vrot.slane %v14089_v30, 1  ;;  %6687 = vmatprep.mubr.bf16.mxu0 %v14173_v22 }
 0x632   :  { %v14186_v46 = vpack.c.bf16 %v4229_v47, %v4227_v42  ;;  %v4450_v52 = vsel %vm780_vm1, %v4448_v56, %v4449_v28  ;;  %v4452_v48 = vsel %vm780_vm1, %v4449_v28, %v4451_v1  ;;  %v4233_v32 = vrot.slane %v3908_v14, 1 }
 0x633   :  { %v4232_v45 = vsel %vm362_vm0, %v16411_v16, %v16410_v58  ;;  %v14197_v50 = vpack.c.bf16 %v4452_v48, %v4450_v52  ;;  %v4806_v42 = vsel %vm780_vm1, %v4804_v8, %v4805_v19  ;;  %v4807_v47 = vrot.slane %v3911_v15, 2 }
 0x634   :  { %16409 = vst [vmem:[#allocation17_spill] sm:$0xff] %v14186_v46  ;;  %v4728_v46 = vsel %vm362_vm0, %v4726_v6, %v4727_v40  ;;  %v14202_v23 = vpack.c.bf16 %v4517_v13, %v13883_v53  ;;  %v16413_v30 = vmov %v16410_v58  ;;  %v4729_v1 = vrot.slane %v3911_v15, 1  ;;  %v14218_v53 = vld [vmem:[#allocation2 + $0x1b0] sm:$0xff]  ;;  %v14220_v13 = vld [vmem:[#allocation2 + $0x1c0] sm:$0x3] }
 0x635   :  { %v4234_v56 = vsel %vm362_vm0, %v16413_v30, %v4233_v32  ;;  %v14210_v28 = vpack.c.bf16 %v14184_v12, %v14182_v38  ;;  %v14212_v48 = vpack.c.bf16 %v3910_v35, %v3909_v21  ;;  %v4521_v8 = vrot.slane %v3908_v14, 2  ;;  %v9224_v30 = vld [vmem:[%s15880_s4 + $0x180] sm:$0xff]  }
 0x636   :  { %16412 = vst [vmem:[#allocation63_spill] sm:$0xff] %v14202_v23  ;;  %v14214_v58 = vpack.c.bf16 %v4234_v56, %v4232_v45  ;;  %v4808_v6 = vsel %vm780_vm1, %v4805_v19, %v4807_v47  ;;  %7105 = vmatmul.mubr.bf16.gmra.mrb[48].mxu1 %v14202_v23  ;;  %v4730_v32 = vsel %vm362_vm0, %v4727_v40, %v4729_v1  ;;  %v16416_v19 = vrot.slane %v13830_v60, 2 }
 0x637   :  { %16414 = vst [vmem:[#allocation64_spill] sm:$0xff] %v14212_v48  ;;  %v14222_v16 = vpack.c.bf16 %v4808_v6, %v4806_v42  ;;  %7112 = vmatprep.mubr.bf16.mxu1 %v14212_v48  ;;  %v4152_v21 = vsel %vm362_vm0, %v4150_v7, %v4151_v43  ;;  %v4154_v35 = vsel %vm362_vm0, %v4151_v43, %v4153_v62  ;;  %v16417_v15 = vrot.slane %v13828_v39, 2  ;;  %v16419_v39 = vld [vmem:[#allocation33_spill] sm:$0xff]  ;;  %v16420_v6 = vld [vmem:[#allocation26_spill] sm:$0xff]  ;;  %v16438_v48 = vld [vmem:[#allocation71_spill] sm:$0xff] }
 0x638   :  { %16415 = vst [vmem:[#allocation65_spill] sm:$0xff] %v14214_v58  ;;  %v14228_v14 = vpack.c.bf16 %v4730_v32, %v4728_v46  ;;  %v16418_v52 = vmov %v16416_v19  ;;  %v14240_v40 = vpack.c.bf16 %v13886_v0, %v13868_v44  ;;  %v4155_v7 = vrot.slane %v14218_v53, 1 }
 0x639   :  { %v4520_v45 = vsel %vm780_vm1, %v16417_v15, %v16416_v19  ;;  %v4522_v42 = vsel %vm780_vm1, %v16418_v52, %v4521_v8  ;;  %v4158_v43 = vrot.slane %v14220_v13, 1  ;;  %v14244_v46 = vpack.c.bf16 %v4154_v35, %v4152_v21  ;;  %v9225_v35 = vld [vmem:[%s15880_s4 + $0x188] sm:$0xff]  }
 0x63a   :  { %6688 = vmatmul.mubr.bf16.gmra.mrb[120].mxu0 %v14240_v40  ;;  %v14247_v62 = vpack.c.bf16 %v4522_v42, %v4520_v45  ;;  %v4157_v60 = vsel %vm362_vm0, %v4155_v7, %v16419_v39  ;;  %v14258_v0 = vpack.c.bf16 %v14087_v26, %v14077_v51  ;;  %v4160_v56 = vrot.slane %v14137_v4, 1  ;;  %v14269_v26 = vld [vmem:[#allocation2 + $0x8] sm:$0xff]  ;;  %v9255_v45 = vld [vmem:[#allocation2 + $0x10] sm:$0x3] }
 0x63b   :  { %6695 = vmatprep.mubr.bf16.mxu0 %v14244_v46  ;;  %v4159_v47 = vsel %vm362_vm0, %v16419_v39, %v4158_v43  ;;  %v4161_v1 = vrot.slane %v14148_v18, 1  ;;  %v4163_v8 = vrot.slane %v14150_v36, 1  ;;  %16421 = vst [vmem:[#allocation35_spill] sm:$0xff] %v14269_v26  ;;  %v5823_v51 = vpack.c.bf16 %v14269_v26, %v14218_v53  ;;  %v9254_v36 = vld [vmem:[#allocation2] sm:$0xff]  ;;  %v9226_v7 = vld [vmem:[%s15880_s4 + $0x190] sm:$0xff]  }
 0x63c   :  { %v5824_v44 = vpack.c.bf16 %v4159_v47, %v4157_v60  ;;  %v4363_v19 = vrot.slane %v9254_v36, 2  ;;  %v14280_v15 = vrot.slane %v14269_v26, 2  ;;  %v4366_v52 = vrot.slane %v9255_v45, 2  ;;  %v16422_v43 = vld [vmem:[#allocation32_spill] sm:$0xff]  ;;  %v9227_v47 = vld [vmem:[%s15880_s4 + $0x198] sm:$0xff]   ;;  %v9233_v45 = vld [vmem:[%s15880_s4 + $0x1c8] sm:$0xff]  }
 0x63d   :  { %v4162_v32 = vsel %vm362_vm0, %v4160_v56, %v4161_v1  ;;  %v4164_v21 = vsel %vm362_vm0, %v4161_v1, %v4163_v8  ;;  %v9228_v56 = vld [vmem:[%s15880_s4 + $0x1a0] sm:$0xff]   ;;  %v9257_v8 = vld [vmem:[#allocation2 + $0x1e8] sm:$0xff]  ;;  %v3857_v26 = vld [vmem:[#allocation2 + $0x190] sm:$0x3] }
 0x63e   :  { %7113 = vmatmul.mubr.bf16.gmra.mrb[52].mxu1 %v14247_v62  ;;  %v14282_v42 = vpack.c.bf16 %v4164_v21, %v4162_v32  ;;  %v14292_v39 = vsel %vm780_vm1, %v4363_v19, %v14280_v15  ;;  %v14296_v60 = vsel %vm780_vm1, %v14280_v15, %v4366_v52  ;;  %v16423_v1 = vld [vmem:[#allocation12_spill] sm:$0xff]  ;;  %v9231_v21 = vld [vmem:[%s15880_s4 + $0x1b8] sm:$0xff]   ;;  %v16426_v19 = vld [vmem:[#allocation46_spill] sm:$0xff] }
 0x63f   :  { %7153 = vmatprep.mubr.bf16.mxu1 %v13843_v31  ;;  %v16424_v32 = vld [vmem:[#allocation20_spill] sm:$0xff]  ;;  %v16427_v52 = vld [vmem:[#allocation29_spill] sm:$0xff] }
 0x640   :  { %v9232_v36 = vld [vmem:[%s15880_s4 + $0x1c0] sm:$0xff]  }
 0x642   :  { %6696 = vmatmul.mubr.bf16.gmra.mrb[124].mxu0 %v14258_v0 }
 0x643   :  { %6703 = vmatprep.mubr.bf16.mxu0 %v5824_v44  ;;  %v16437_v44 = vld [vmem:[#allocation45_spill] sm:$0xff] }
 0x646   :  { %7154 = vmatmul.mubr.bf16.vlgmr.msra.gmra.mrb[56].mxu1 %v16420_v6 }
 0x647   :  { %7411 = vmatpush1.bf16.msra.mxu1 %v9224_v30  ;;  %7161 = vmatprep.mubr.bf16.mxu1 %v13873_v17  ;;  %v14307_v30 = vpack.c.bf16 %v14148_v18, %v14137_v4  ;;  %v9229_v4 = vld [vmem:[%s15880_s4 + $0x1a8] sm:$0xff]   ;;  %v9256_v18 = vld [vmem:[#allocation2 + $0x1e0] sm:$0xff] }
 0x648   :  { %7412 = vmatprep.subr.bf16.mxu1 %v16210_v10  ;;  %v14321_v6 = vpack.c.bf16 %v9257_v8, %v9256_v18  ;;  %v9235_v18 = vld [vmem:[%s15880_s4 + $0x1d8] sm:$0xff]   ;;  %v16431_v8 = vld [vmem:[#allocation21_spill] sm:$0xff] }
 0x64a   :  { %6704 = vmatmul.mubr.bf16.gmra.mrb[128].mxu0 %v5823_v51  ;;  %v9230_v51 = vld [vmem:[%s15880_s4 + $0x1b0] sm:$0xff]  }
 0x64b   :  { %7413 = vmatpush1.bf16.msra.mxu1 %v9225_v35  ;;  %6711 = vmatprep.mubr.bf16.mxu0 %v14282_v42  ;;  %v16425_v35 = vld [vmem:[#allocation23_spill] sm:$0xff] }
 0x64c   :  { %7414 = vmatprep.subr.bf16.mxu1 %v16210_v10 }
 0x64e   :  { %7162 = vmatmul.mubr.bf16.gmra.mrb[60].mxu1 %v16422_v43 }
 0x64f   :  { %7169 = vmatprep.mubr.bf16.mxu1 %v13899_v61  ;;  %7415 = vmatpush1.bf16.msra.mxu1 %v9226_v7  ;;  %v9234_v7 = vld [vmem:[%s15880_s4 + $0x1d0] sm:$0xff]  }
 0x650   :  { %7416 = vmatprep.subr.bf16.mxu1 %v16210_v10 }
 0x652   :  { %6712 = vmatmul.mubr.bf16.gmra.mrb[132].mxu0 %v14307_v30 }
 0x653   :  { %7417 = vmatpush1.bf16.msra.mxu1 %v9227_v47  ;;  %6719 = vmatprep.mubr.bf16.mxu0 %v13929_v34  ;;  %v16428_v47 = vld [vmem:[#allocation57_spill] sm:$0xff] }
 0x654   :  { %7418 = vmatprep.subr.bf16.mxu1 %v16210_v10 }
 0x656   :  { %7170 = vmatmul.mubr.bf16.gmra.mrb[64].mxu1 %v16423_v1 }
 0x657   :  { %7177 = vmatprep.mubr.bf16.mxu1 %v13915_v5  ;;  %7419 = vmatpush1.bf16.msra.mxu1 %v9228_v56  ;;  %v16429_v56 = vld [vmem:[#allocation14_spill] sm:$0xff] }
 0x658   :  { %7420 = vmatprep.subr.bf16.mxu1 %v16210_v10 }
 0x65a   :  { %6720 = vmatmul.mubr.bf16.gmra.mrb[136].mxu0 %v14321_v6 }
 0x65b   :  { %7421 = vmatpush1.bf16.msra.mxu1 %v9229_v4  ;;  %6727 = vmatprep.mubr.bf16.mxu0 %v13947_v25  ;;  %v16430_v4 = vld [vmem:[#allocation68_spill] sm:$0xff] }
 0x65c   :  { %7422 = vmatprep.subr.bf16.mxu1 %v16210_v10 }
 0x65e   :  { %7178 = vmatmul.mubr.bf16.gmra.mrb[68].mxu1 %v16424_v32  ;;  %v9240_v32 = vld [vmem:[%s15880_s4 + $0x1f8] sm:$0xff]  }
 0x65f   :  { %7185 = vmatprep.mubr.bf16.mxu1 %v13936_v41  ;;  %7423 = vmatpush1.bf16.msra.mxu1 %v9230_v51  ;;  %v16432_v51 = vld [vmem:[#allocation80_spill] sm:$0xff] }
 0x660   :  { %7424 = vmatprep.subr.bf16.mxu1 %v16210_v10 }
 0x662   :  { %6728 = vmatmul.mubr.bf16.gmra.mrb[140].mxu0 %v16425_v35  ;;  %v16445_v35 = vld [vmem:[#allocation54_spill] sm:$0xff] }
 0x663   :  { %7425 = vmatpush1.bf16.msra.mxu1 %v9231_v21  ;;  %6735 = vmatprep.mubr.bf16.mxu0 %v13969_v55  ;;  %v16433_v21 = vld [vmem:[#allocation42_spill] sm:$0xff] }
 0x664   :  { %7426 = vmatprep.subr.bf16.mxu1 %v16210_v10 }
 0x666   :  { %7186 = vmatmul.mubr.bf16.gmra.mrb[72].mxu1 %v16426_v19  ;;  %v4724_v19 = vrot.slane %v3857_v26, 1 }
 0x667   :  { %7193 = vmatprep.mubr.bf16.mxu1 %v13962_v2  ;;  %7427 = vmatpush1.bf16.msra.mxu1 %v9232_v36  ;;  %v9236_v36 = vld [vmem:[%s15880_s4 + $0x1e0] sm:$0xff]  }
 0x668   :  { %7428 = vmatprep.subr.bf16.mxu1 %v16210_v10 }
 0x66a   :  { %6736 = vmatmul.mubr.bf16.gmra.mrb[144].mxu0 %v16427_v52  ;;  %v16444_v52 = vld [vmem:[#allocation106_spill] sm:$0xff] }
 0x66b   :  { %7429 = vmatpush1.bf16.msra.mxu1 %v9233_v45  ;;  %6743 = vmatprep.mubr.bf16.mxu0 %v13985_v57  ;;  %v16434_v45 = vld [vmem:[#allocation51_spill] sm:$0xff] }
 0x66c   :  { %7430 = vmatprep.subr.bf16.mxu1 %v16210_v10 }
 0x66e   :  { %7194 = vmatmul.mubr.bf16.gmra.mrb[76].mxu1 %v16428_v47  ;;  %v4722_v47 = vrot.slane %v14184_v12, 1 }
 0x66f   :  { %7201 = vmatprep.mubr.bf16.mxu1 %v13974_v29  ;;  %7431 = vmatpush1.bf16.msra.mxu1 %v9234_v7  ;;  %v16435_v7 = vld [vmem:[#allocation61_spill] sm:$0xff] }
 0x670   :  { %7432 = vmatprep.subr.bf16.mxu1 %v16210_v10 }
 0x672   :  { %6744 = vmatmul.mubr.bf16.gmra.mrb[148].mxu0 %v16429_v56  ;;  %v16443_v56 = vld [vmem:[#allocation55_spill] sm:$0xff] }
 0x673   :  { %6751 = vmatprep.mubr.bf16.mxu0 %v14007_v49  ;;  %7433 = vmatpush1.bf16.msra.mxu1 %v9235_v18  ;;  %v16436_v18 = vld [vmem:[#allocation98_spill] sm:$0xff] }
 0x674   :  { %7434 = vmatprep.subr.bf16.mxu1 %v16210_v10 }
 0x676   :  { %7202 = vmatmul.mubr.bf16.gmra.mrb[80].mxu1 %v16430_v4  ;;  %v4721_v4 = vrot.slane %v14182_v38, 1 }
 0x677   :  { %7209 = vmatprep.mubr.bf16.mxu1 %v14000_v33  ;;  %7435 = vmatpush1.bf16.msra.mxu1 %v9236_v36  ;;  %v9237_v36 = vld [vmem:[%s15880_s4 + $0x1e8] sm:$0xff]  }
 0x678   :  { %7436 = vmatprep.subr.bf16.mxu1 %v16210_v10 }
 0x67a   :  { %6752 = vmatmul.mubr.bf16.gmra.mrb[152].mxu0 %v16431_v8  ;;  %v16442_v8 = vld [vmem:[#allocation82_spill] sm:$0xff] }
 0x67b   :  { %6759 = vmatprep.mubr.bf16.mxu0 %v14025_v27  ;;  %7437 = vmatpush1.bf16.msra.mxu1 %v9237_v36  ;;  %v9238_v36 = vld [vmem:[%s15880_s4 + $0x1f0] sm:$0xff]  }
 0x67c   :  { %7438 = vmatprep.subr.bf16.mxu1 %v16210_v10 }
 0x67e   :  { %7210 = vmatmul.mubr.bf16.gmra.mrb[84].mxu1 %v16432_v51  ;;  %v16450_v51 = vld [vmem:[#allocation17_spill] sm:$0xff] }
 0x67f   :  { %7217 = vmatprep.mubr.bf16.mxu1 %v14013_v54  ;;  %7439 = vmatpush1.bf16.msra.mxu1 %v9238_v36  ;;  %v9239_v36 = vld [vmem:[%s15880_s4 + $0x200] sm:$0xff]  }
 0x680   :  { %7440 = vmatprep.subr.bf16.mxu1 %v16210_v10  ;;  %8724 = vmatprep.subr.bf16.mxu0 %v9239_v36 }
 0x682   :  { %6760 = vmatmul.mubr.bf16.gmra.mrb[156].mxu0 %v16433_v21  ;;  %v16440_v21 = vld [vmem:[#allocation103_spill] sm:$0xff] }
 0x683   :  { %6767 = vmatprep.mubr.bf16.mxu0 %v14045_v11  ;;  %7441 = vmatpush1.bf16.msra.mxu1 %v9240_v32  ;;  %v9241_v32 = vld [vmem:[%s15880_s4 + $0x208] sm:$0xff]  }
 0x686   :  { %7218 = vmatmul.mubr.bf16.gmra.mrb[88].mxu1 %v13721_v63  ;;  %v16449_v63 = vld [vmem:[#allocation95_spill] sm:$0xff] }
 0x687   :  { %7225 = vmatprep.mubr.bf16.mxu1 %v14038_v59 }
 0x68a   :  { %6768 = vmatmul.mubr.bf16.gmra.mrb[160].mxu0 %v16434_v45  ;;  %v16439_v45 = vld [vmem:[#allocation16_spill] sm:$0xff] }
 0x68b   :  { %6775 = vmatprep.mubr.bf16.mxu0 %v14063_v3 }
 0x68e   :  { %7226 = vmatmul.mubr.bf16.gmra.mrb[92].mxu1 %v13765_v24  ;;  %v16448_v24 = vld [vmem:[#allocation56_spill] sm:$0xff] }
 0x68f   :  { %7233 = vmatprep.mubr.bf16.mxu1 %v14051_v9 }
 0x692   :  { %6776 = vmatmul.mubr.bf16.gmra.mrb[164].mxu0 %v16435_v7  ;;  %v16441_v7 = vld [vmem:[#allocation8_spill] sm:$0xff] }
 0x693   :  { %6783 = vmatprep.mubr.bf16.mxu0 %v14091_v20 }
 0x696   :  { %7234 = vmatmul.mubr.bf16.gmra.mrb[96].mxu1 %v16436_v18  ;;  %v4802_v18 = vrot.slane %v3857_v26, 2  ;;  %v16454_v26 = vld [vmem:[#allocation30_spill] sm:$0xff] }
 0x697   :  { %7241 = vmatprep.mubr.bf16.mxu1 %v16437_v44 }
 0x69a   :  { %6784 = vmatmul.mubr.bf16.gmra.mrb[168].mxu0 %v16438_v48  ;;  %v16446_v48 = vld [vmem:[#allocation90_spill] sm:$0xff] }
 0x69b   :  { %6791 = vmatprep.mubr.bf16.mxu0 %v16439_v45 }
 0x69e   :  { %7242 = vmatmul.mubr.bf16.gmra.mrb[100].mxu1 %v16440_v21  ;;  %v16447_v21 = vld [vmem:[#allocation18_spill] sm:$0xff] }
 0x69f   :  { %7249 = vmatprep.mubr.bf16.mxu1 %v16441_v7 }
 0x6a2   :  { %6792 = vmatmul.mubr.bf16.gmra.mrb[172].mxu0 %v16442_v8  ;;  %v4799_v8 = vrot.slane %v14182_v38, 2  ;;  %v16453_v38 = vld [vmem:[#allocation28_spill] sm:$0xff] }
 0x6a3   :  { %6799 = vmatprep.mubr.bf16.mxu0 %v16443_v56 }
 0x6a6   :  { %7250 = vmatmul.mubr.bf16.gmra.mrb[104].mxu1 %v16444_v52  ;;  %v4800_v52 = vrot.slane %v14184_v12, 2  ;;  %v16452_v12 = vld [vmem:[#allocation104_spill] sm:$0xff] }
 0x6a7   :  { %7257 = vmatprep.mubr.bf16.mxu1 %v16445_v35 }
 0x6a8   :  { %v4801_v10 = vsel %vm780_vm1, %v4799_v8, %v4800_v52  ;;  %v4725_v8 = vsel %vm362_vm0, %v4722_v47, %v4724_v19  ;;  %v16455_v19 = vpack.c.bf16 %v14296_v60, %v14292_v39  ;;  %v16458_v39 = vld [vmem:[#allocation13_spill] sm:$0xff]  ;;  %v9244_v60 = vld [vmem:[%s15880_s4 + $0x220] sm:$0xff]  }
 0x6aa   :  { %6800 = vmatmul.mubr.bf16.gmra.mrb[176].mxu0 %v16446_v48  ;;  %v4803_v48 = vsel %vm780_vm1, %v4800_v52, %v4802_v18  ;;  %v4723_v52 = vsel %vm362_vm0, %v4721_v4, %v4722_v47  ;;  %v16456_v47 = vld [vmem:[#allocation31_spill] sm:$0xff]  ;;  %v9242_v4 = vld [vmem:[%s15880_s4 + $0x210] sm:$0xff]  }
 0x6ab   :  { %6807 = vmatprep.mubr.bf16.mxu0 %v16447_v21  ;;  %v14425_v18 = vpack.c.bf16 %v4725_v8, %v4723_v52  ;;  %v9245_v52 = vld [vmem:[%s15880_s4 + $0x228] sm:$0xff]   ;;  %v9246_v8 = vld [vmem:[%s15880_s4 + $0x230] sm:$0xff]  }
 0x6ae   :  { %7258 = vmatmul.mubr.bf16.gmra.mrb[108].mxu1 %v14173_v22  ;;  %v14413_v22 = vpack.c.bf16 %v4803_v48, %v4801_v10  ;;  %v16451_v48 = vld [vmem:[#allocation100_spill] sm:$0xff]  ;;  %v9243_v10 = vld [vmem:[%s15880_s4 + $0x218] sm:$0xff]  }
 0x6af   :  { %7265 = vmatprep.mubr.bf16.mxu1 %v16448_v24 }
 0x6b2   :  { %6808 = vmatmul.mubr.bf16.gmra.mrb[180].mxu0 %v16449_v63  ;;  %v16471_v63 = vld [vmem:[#allocation89_spill] sm:$0xff] }
 0x6b3   :  { %6815 = vmatprep.mubr.bf16.mxu0 %v16450_v51 }
 0x6b6   :  { %7266 = vmatmul.mubr.bf16.gmra.mrb[112].mxu1 %v14244_v46 }
 0x6b7   :  { %7273 = vmatprep.mubr.bf16.mxu1 %v14413_v22 }
 0x6ba   :  { %6816 = vmatmul.mubr.bf16.gmra.mrb[184].mxu0 %v16451_v48  ;;  %v16470_v48 = vld [vmem:[#allocation84_spill] sm:$0xff] }
 0x6bb   :  { %6823 = vmatprep.mubr.bf16.mxu0 %v14214_v58 }
 0x6be   :  { %7274 = vmatmul.mubr.bf16.gmra.mrb[116].mxu1 %v14425_v18 }
 0x6bf   :  { %7281 = vmatprep.mubr.bf16.mxu1 %v14197_v50 }
 0x6c2   :  { %6824 = vmatmul.mubr.bf16.gmra.mrb[188].mxu0 %v16452_v12  ;;  %v16468_v12 = vld [vmem:[#allocation76_spill] sm:$0xff] }
 0x6c3   :  { %6864 = vmatprep.mubr.bf16.mxu0 %v16453_v38  ;;  %v16461_v38 = vld [vmem:[#allocation41_spill] sm:$0xff] }
 0x6c6   :  { %7282 = vmatmul.mubr.bf16.gmra.mrb[120].mxu1 %v14282_v42  ;;  %v16457_v42 = vld [vmem:[#allocation11_spill] sm:$0xff] }
 0x6c7   :  { %7289 = vmatprep.mubr.bf16.mxu1 %v16454_v26 }
 0x6ca   :  { %6865 = vmatmul.mubr.bf16.vlgmr.msra.gmra.mrb[64].mxu0 %v16455_v19  ;;  %v16462_v19 = vld [vmem:[#allocation47_spill] sm:$0xff] }
 0x6cb   :  { %6872 = vmatprep.mubr.bf16.mxu0 %v16456_v47  ;;  %8725 = vmatpush3.bf16.msra.mxu0 %v9239_v36  ;;  %v16459_v36 = vld [vmem:[#allocation19_spill] sm:$0xff] }
 0x6cc   :  { %8726 = vmatprep.subr.bf16.mxu0 %v9241_v32 }
 0x6ce   :  { %7290 = vmatmul.mubr.bf16.gmra.mrb[124].mxu1 %v13929_v34 }
 0x6cf   :  { %7297 = vmatprep.mubr.bf16.mxu1 %v16457_v42  ;;  %8727 = vmatpush3.bf16.msra.mxu0 %v9241_v32  ;;  %v9247_v32 = vld [vmem:[%s15880_s4 + $0x238] sm:$0xff]  }
 0x6d0   :  { %8728 = vmatprep.subr.bf16.mxu0 %v9242_v4 }
 0x6d2   :  { %6873 = vmatmul.mubr.bf16.gmra.mrb[68].mxu0 %v13843_v31  ;;  %v16460_v31 = vld [vmem:[#allocation37_spill] sm:$0xff] }
 0x6d3   :  { %6880 = vmatprep.mubr.bf16.mxu0 %v16458_v39  ;;  %8729 = vmatpush3.bf16.msra.mxu0 %v9242_v4  ;;  %v16463_v4 = vld [vmem:[#allocation52_spill] sm:$0xff] }
 0x6d4   :  { %8730 = vmatprep.subr.bf16.mxu0 %v9243_v10 }
 0x6d6   :  { %7298 = vmatmul.mubr.bf16.gmra.mrb[0].mxu1 %v13947_v25 }
 0x6d7   :  { %7305 = vmatprep.mubr.bf16.mxu1 %v16459_v36  ;;  %8731 = vmatpush3.bf16.msra.mxu0 %v9243_v10  ;;  %v16464_v10 = vld [vmem:[#allocation53_spill] sm:$0xff] }
 0x6d8   :  { %8732 = vmatprep.subr.bf16.mxu0 %v9244_v60 }
 0x6da   :  { %6881 = vmatmul.mubr.bf16.gmra.mrb[72].mxu0 %v13873_v17 }
 0x6db   :  { %6888 = vmatprep.mubr.bf16.mxu0 %v16460_v31  ;;  %8733 = vmatpush3.bf16.msra.mxu0 %v9244_v60  ;;  %v16465_v60 = vld [vmem:[#allocation60_spill] sm:$0xff] }
 0x6dc   :  { %8734 = vmatprep.subr.bf16.mxu0 %v9245_v52 }
 0x6de   :  { %7306 = vmatmul.mubr.bf16.gmra.mrb[4].mxu1 %v13969_v55  ;;  %v16477_v55 = vld [vmem:[#allocation105_spill] sm:$0xff] }
 0x6df   :  { %7313 = vmatprep.mubr.bf16.mxu1 %v16461_v38  ;;  %8735 = vmatpush3.bf16.msra.mxu0 %v9245_v52  ;;  %v16466_v52 = vld [vmem:[#allocation66_spill] sm:$0xff] }
 0x6e0   :  { %8736 = vmatprep.subr.bf16.mxu0 %v9246_v8 }
 0x6e2   :  { %6889 = vmatmul.mubr.bf16.gmra.mrb[76].mxu0 %v13899_v61 }
 0x6e3   :  { %6896 = vmatprep.mubr.bf16.mxu0 %v16462_v19  ;;  %8737 = vmatpush3.bf16.msra.mxu0 %v9246_v8  ;;  %v16467_v8 = vld [vmem:[#allocation74_spill] sm:$0xff] }
 0x6e4   :  { %8738 = vmatprep.subr.bf16.mxu0 %v9247_v32 }
 0x6e6   :  { %7314 = vmatmul.mubr.bf16.gmra.mrb[8].mxu1 %v13985_v57  ;;  %v16475_v57 = vld [vmem:[#allocation99_spill] sm:$0xff] }
 0x6e7   :  { %7321 = vmatprep.mubr.bf16.mxu1 %v16463_v4  ;;  %8739 = vmatpush3.bf16.msra.mxu0 %v9247_v32  ;;  %v16469_v32 = vld [vmem:[#allocation81_spill] sm:$0xff] }
 0x6ea   :  { %6897 = vmatmul.mubr.bf16.gmra.mrb[80].mxu0 %v13915_v5 }
 0x6eb   :  { %6904 = vmatprep.mubr.bf16.mxu0 %v16464_v10 }
 0x6ee   :  { %7322 = vmatmul.mubr.bf16.gmra.mrb[12].mxu1 %v14007_v49  ;;  %v16473_v49 = vld [vmem:[#allocation94_spill] sm:$0xff] }
 0x6ef   :  { %7329 = vmatprep.mubr.bf16.mxu1 %v16465_v60 }
 0x6f2   :  { %6905 = vmatmul.mubr.bf16.gmra.mrb[84].mxu0 %v13936_v41 }
 0x6f3   :  { %6912 = vmatprep.mubr.bf16.mxu0 %v16466_v52 }
 0x6f6   :  { %7330 = vmatmul.mubr.bf16.gmra.mrb[16].mxu1 %v14025_v27  ;;  %v16472_v27 = vld [vmem:[#allocation91_spill] sm:$0xff] }
 0x6f7   :  { %7337 = vmatprep.mubr.bf16.mxu1 %v16467_v8 }
 0x6fa   :  { %6913 = vmatmul.mubr.bf16.gmra.mrb[88].mxu0 %v13962_v2 }
 0x6fb   :  { %6920 = vmatprep.mubr.bf16.mxu0 %v16468_v12 }
 0x6fe   :  { %7338 = vmatmul.mubr.bf16.gmra.mrb[20].mxu1 %v14045_v11  ;;  %v16474_v11 = vld [vmem:[#allocation96_spill] sm:$0xff] }
 0x6ff   :  { %7345 = vmatprep.mubr.bf16.mxu1 %v16469_v32 }
 0x702   :  { %6921 = vmatmul.mubr.bf16.gmra.mrb[92].mxu0 %v13974_v29 }
 0x703   :  { %6928 = vmatprep.mubr.bf16.mxu0 %v16470_v48 }
 0x706   :  { %7346 = vmatmul.mubr.bf16.gmra.mrb[24].mxu1 %v14063_v3  ;;  %v16476_v3 = vld [vmem:[#allocation102_spill] sm:$0xff] }
 0x707   :  { %7353 = vmatprep.mubr.bf16.mxu1 %v16471_v63 }
 0x70a   :  { %6929 = vmatmul.mubr.bf16.gmra.mrb[96].mxu0 %v14000_v33 }
 0x70b   :  { %6936 = vmatprep.mubr.bf16.mxu0 %v16472_v27 }
 0x70e   :  { %7354 = vmatmul.mubr.bf16.gmra.mrb[28].mxu1 %v14091_v20 }
 0x70f   :  { %7361 = vmatprep.mubr.bf16.mxu1 %v16473_v49 }
 0x712   :  { %6937 = vmatmul.mubr.bf16.gmra.mrb[100].mxu0 %v14013_v54 }
 0x713   :  { %6944 = vmatprep.mubr.bf16.mxu0 %v16474_v11 }
 0x716   :  { %7362 = vmatmul.mubr.bf16.gmra.mrb[32].mxu1 %v16439_v45 }
 0x717   :  { %7369 = vmatprep.mubr.bf16.mxu1 %v16475_v57 }
 0x71a   :  { %6945 = vmatmul.mubr.bf16.gmra.mrb[104].mxu0 %v14038_v59 }
 0x71b   :  { %6952 = vmatprep.mubr.bf16.mxu0 %v16476_v3 }
 0x71e   :  { %7370 = vmatmul.mubr.bf16.gmra.mrb[36].mxu1 %v16443_v56 }
 0x71f   :  { %7377 = vmatprep.mubr.bf16.mxu1 %v16477_v55 }
 0x722   :  { %6953 = vmatmul.mubr.bf16.gmra.mrb[108].mxu0 %v14051_v9 }
 0x723   :  { %6960 = vmatprep.mubr.bf16.mxu0 %v14123_v37 }
 0x726   :  { %7378 = vmatmul.mubr.bf16.gmra.mrb[40].mxu1 %v16447_v21 }
 0x727   :  { %7385 = vmatprep.mubr.bf16.mxu1 %v14202_v23 }
 0x72a   :  { %6961 = vmatmul.mubr.bf16.gmra.mrb[112].mxu0 %v16437_v44 }
 0x72b   :  { %6968 = vmatprep.mubr.bf16.mxu0 %v14240_v40 }
 0x72d   :  { %v14508_v45 = vpop.f32.mrb[136].mxu0 }
 0x72e   :  { %7386 = vmatmul.mubr.bf16.gmra.mrb[44].mxu1 %v16450_v51  ;;  %16478 = vst [vmem:[#allocation22_spill] sm:$0xff] %v14508_v45  ;;  %v6723_v56 = vpop.f32.mrb[137].mxu0 }
 0x72f   :  { %7393 = vmatprep.mubr.bf16.mxu1 %v14247_v62  ;;  %v14511_v20 = vpop.f32.mrb[138].mxu0 }
 0x730   :  { %16479 = vst [vmem:[#allocation38_spill] sm:$0xff] %v14511_v20  ;;  %v6726_v25 = vpop.f32.mrb[139].mxu0 }
 0x732   :  { %6969 = vmatmul.mubr.bf16.gmra.mrb[116].mxu0 %v16441_v7 }
 0x733   :  { %6976 = vmatprep.mubr.bf16.mxu0 %v14258_v0 }
 0x735   :  { %v14516_v21 = vpop.f32.mrb[140].mxu0 }
 0x736   :  { %7394 = vmatmul.mubr.bf16.gmra.mrb[48].mxu1 %v14214_v58  ;;  %16480 = vst [vmem:[#allocation72_spill] sm:$0xff] %v14516_v21  ;;  %v6731_v23 = vpop.f32.mrb[141].mxu0  ;;  %v4443_v21 = vrot.slane %v14218_v53, 2 }
 0x737   :  { %7401 = vmatprep.mubr.bf16.mxu1 %v14222_v16  ;;  %v14519_v51 = vpop.f32.mrb[142].mxu0  ;;  %v4446_v23 = vrot.slane %v14220_v13, 2 }
 0x738   :  { %v6734_v45 = vpop.f32.mrb[143].mxu0 }
 0x739   :  { %v4445_v45 = vsel %vm780_vm1, %v4443_v21, %v14280_v15  ;;  %v16483_v21 = vld [vmem:[#allocation20_spill] sm:$0xff] }
 0x73a   :  { %6977 = vmatmul.mubr.bf16.gmra.mrb[120].mxu0 %v16445_v35 }
 0x73b   :  { %6984 = vmatprep.mubr.bf16.mxu0 %v14210_v28 }
 0x73d   :  { %v14524_v25 = vpop.f32.mrb[144].mxu0 }
 0x73e   :  { %7402 = vmatmul.mubr.bf16.gmra.mrb[52].mxu1 %v14228_v14  ;;  %16481 = vst [vmem:[#allocation73_spill] sm:$0xff] %v14524_v25  ;;  %v6739_v56 = vpop.f32.mrb[145].mxu0  ;;  %v4447_v25 = vsel %vm780_vm1, %v14280_v15, %v4446_v23 }
 0x73f   :  { %7442 = vmatprep.mubr.bf16.mxu1 %v16422_v43  ;;  %v14527_v20 = vpop.f32.mrb[146].mxu0  ;;  %v5825_v56 = vpack.c.bf16 %v4447_v25, %v4445_v45  ;;  %v16484_v25 = vld [vmem:[#allocation46_spill] sm:$0xff] }
 0x740   :  { %v6742_v58 = vpop.f32.mrb[147].mxu0 }
 0x742   :  { %6985 = vmatmul.mubr.bf16.gmra.mrb[124].mxu0 %v16448_v24 }
 0x743   :  { %6992 = vmatprep.mubr.bf16.mxu0 %v14307_v30 }
 0x745   :  { %v14538_v43 = vpop.f32.mrb[148].mxu0 }
 0x746   :  { %7443 = vmatmul.mubr.bf16.vlgmr.msra.gmra.mrb[56].mxu1 %v16456_v47  ;;  %16482 = vst [vmem:[#allocation75_spill] sm:$0xff] %v14538_v43  ;;  %v6747_v53 = vpop.f32.mrb[149].mxu0 }
 0x747   :  { %7450 = vmatprep.mubr.bf16.mxu1 %v16423_v1  ;;  %v14541_v13 = vpop.f32.mrb[150].mxu0 }
 0x748   :  { %v6750_v58 = vpop.f32.mrb[151].mxu0 }
 0x74a   :  { %6993 = vmatmul.mubr.bf16.gmra.mrb[128].mxu0 %v5825_v56 }
 0x74b   :  { %7000 = vmatprep.mubr.bf16.mxu0 %v14321_v6 }
 0x74d   :  { %v14545_v30 = vpop.f32.mrb[152].mxu0 }
 0x74e   :  { %7451 = vmatmul.mubr.bf16.gmra.mrb[60].mxu1 %v16458_v39  ;;  %v6755_v23 = vpop.f32.mrb[153].mxu0 }
 0x74f   :  { %7458 = vmatprep.mubr.bf16.mxu1 %v16483_v21  ;;  %v14548_v47 = vpop.f32.mrb[154].mxu0 }
 0x750   :  { %v6758_v43 = vpop.f32.mrb[155].mxu0 }
 0x752   :  { %7001 = vmatmul.mubr.bf16.gmra.mrb[132].mxu0 %v14197_v50  ;;  %v16486_v50 = vld [vmem:[#allocation57_spill] sm:$0xff] }
 0x753   :  { %8740 = vmatprep.mubr.bf16.mxu0 %v13873_v17 }
 0x755   :  { %v14553_v1 = vpop.f32.mrb[156].mxu0 }
 0x756   :  { %7459 = vmatmul.mubr.bf16.gmra.mrb[64].mxu1 %v16460_v31  ;;  %v6763_v45 = vpop.f32.mrb[157].mxu0 }
 0x757   :  { %7466 = vmatprep.mubr.bf16.mxu1 %v16484_v25  ;;  %v14556_v39 = vpop.f32.mrb[158].mxu0 }
 0x758   :  { %v6766_v53 = vpop.f32.mrb[159].mxu0 }
 0x75a   :  { %8741 = vmatmul.mubr.bf16.vlgmr.msra.gmra.mrb[192].mxu0 %v13899_v61  ;;  %v16489_v61 = vld [vmem:[#allocation68_spill] sm:$0xff] }
 0x75b   :  { %8744 = vmatprep.mubr.bf16.mxu0 %v13915_v5 }
 0x75d   :  { %v14561_v43 = vpop.f32.mrb[160].mxu0 }
 0x75e   :  { %7467 = vmatmul.mubr.bf16.gmra.mrb[68].mxu1 %v16462_v19  ;;  %16485 = vst [vmem:[#allocation40_spill] sm:$0xff] %v14561_v43  ;;  %v6771_v17 = vpop.f32.mrb[161].mxu0 }
 0x75f   :  { %7474 = vmatprep.mubr.bf16.mxu1 %v16486_v50  ;;  %v14564_v31 = vpop.f32.mrb[162].mxu0 }
 0x760   :  { %16487 = vst [vmem:[#allocation39_spill] sm:$0xff] %v14564_v31  ;;  %v6774_v56 = vpop.f32.mrb[163].mxu0 }
 0x761   :  { %v14600_v56 = vld [vmem:[#allocation2 + $0x198] sm:$0xff] }
 0x762   :  { %8745 = vmatmul.mubr.bf16.gmra.mrb[196].mxu0 %v13936_v41  ;;  %v16492_v41 = vld [vmem:[#allocation80_spill] sm:$0xff] }
 0x763   :  { %8748 = vmatprep.mubr.bf16.mxu0 %v13962_v2 }
 0x765   :  { %v14569_v58 = vpop.f32.mrb[164].mxu0 }
 0x766   :  { %7475 = vmatmul.mubr.bf16.gmra.mrb[72].mxu1 %v16464_v10  ;;  %16488 = vst [vmem:[#allocation49_spill] sm:$0xff] %v14569_v58  ;;  %v6779_v5 = vpop.f32.mrb[165].mxu0 }
 0x767   :  { %7482 = vmatprep.mubr.bf16.mxu1 %v16489_v61  ;;  %v14572_v19 = vpop.f32.mrb[166].mxu0  ;;  %v3860_v61 = vld [vmem:[#allocation2 + $0x1a8] sm:$0x3] }
 0x768   :  { %16490 = vst [vmem:[#allocation83_spill] sm:$0xff] %v14572_v19  ;;  %v6782_v21 = vpop.f32.mrb[167].mxu0 }
 0x769   :  { %v5025_v21 = vrot.slane %v14600_v56, 2 }
 0x76a   :  { %8749 = vmatmul.mubr.bf16.gmra.mrb[200].mxu0 %v13974_v29  ;;  %v16495_v29 = vld [vmem:[#allocation86_spill] sm:$0xff] }
 0x76b   :  { %8752 = vmatprep.mubr.bf16.mxu0 %v14000_v33 }
 0x76d   :  { %v14577_v23 = vpop.f32.mrb[168].mxu0 }
 0x76e   :  { %7483 = vmatmul.mubr.bf16.gmra.mrb[76].mxu1 %v16466_v52  ;;  %16491 = vst [vmem:[#allocation50_spill] sm:$0xff] %v14577_v23  ;;  %v6787_v2 = vpop.f32.mrb[169].mxu0 }
 0x76f   :  { %7490 = vmatprep.mubr.bf16.mxu1 %v16492_v41  ;;  %v14580_v10 = vpop.f32.mrb[170].mxu0  ;;  %v5028_v41 = vrot.slane %v3860_v61, 2 }
 0x770   :  { %16493 = vst [vmem:[#allocation48_spill] sm:$0xff] %v14580_v10  ;;  %v6790_v25 = vpop.f32.mrb[171].mxu0 }
 0x771   :  { %v16504_v25 = vld [vmem:[#allocation103_spill] sm:$0xff] }
 0x772   :  { %8753 = vmatmul.mubr.bf16.gmra.mrb[204].mxu0 %v14013_v54  ;;  %v16498_v54 = vld [vmem:[#allocation93_spill] sm:$0xff] }
 0x773   :  { %8756 = vmatprep.mubr.bf16.mxu0 %v14038_v59 }
 0x775   :  { %v14585_v45 = vpop.f32.mrb[172].mxu0 }
 0x776   :  { %7491 = vmatmul.mubr.bf16.gmra.mrb[80].mxu1 %v16468_v12  ;;  %16494 = vst [vmem:[#allocation59_spill] sm:$0xff] %v14585_v45  ;;  %v6795_v33 = vpop.f32.mrb[173].mxu0 }
 0x777   :  { %7498 = vmatprep.mubr.bf16.mxu1 %v16495_v29  ;;  %v14588_v52 = vpop.f32.mrb[174].mxu0 }
 0x778   :  { %16496 = vst [vmem:[#allocation62_spill] sm:$0xff] %v14588_v52  ;;  %v6798_v53 = vpop.f32.mrb[175].mxu0 }
 0x77a   :  { %8757 = vmatmul.mubr.bf16.gmra.mrb[208].mxu0 %v14051_v9 }
 0x77b   :  { %8760 = vmatprep.mubr.bf16.mxu0 %v16437_v44  ;;  %v16501_v44 = vld [vmem:[#allocation98_spill] sm:$0xff] }
 0x77d   :  { %v14593_v50 = vpop.f32.mrb[176].mxu0 }
 0x77e   :  { %7499 = vmatmul.mubr.bf16.gmra.mrb[84].mxu1 %v16470_v48  ;;  %16497 = vst [vmem:[#allocation58_spill] sm:$0xff] %v14593_v50  ;;  %v6803_v59 = vpop.f32.mrb[177].mxu0 }
 0x77f   :  { %7506 = vmatprep.mubr.bf16.mxu1 %v16498_v54  ;;  %v14596_v12 = vpop.f32.mrb[178].mxu0 }
 0x780   :  { %16499 = vst [vmem:[#allocation70_spill] sm:$0xff] %v14596_v12  ;;  %v6806_v17 = vpop.f32.mrb[179].mxu0  ;;  %v16533_v12 = vld [vmem:[#allocation95_spill] sm:$0xff] }
 0x782   :  { %8761 = vmatmul.mubr.bf16.gmra.mrb[212].mxu0 %v16441_v7 }
 0x783   :  { %8764 = vmatprep.mubr.bf16.mxu0 %v16445_v35  ;;  %v5027_v35 = vsel %vm780_vm1, %v5025_v21, %v14280_v15 }
 0x785   :  { %v14603_v9 = vpop.f32.mrb[180].mxu0 }
 0x786   :  { %7507 = vmatmul.mubr.bf16.gmra.mrb[88].mxu1 %v16472_v27  ;;  %16500 = vst [vmem:[#allocation101_spill] sm:$0xff] %v14603_v9  ;;  %v6811_v48 = vpop.f32.mrb[181].mxu0  ;;  %v5029_v27 = vsel %vm780_vm1, %v14280_v15, %v5028_v41 }
 0x787   :  { %7514 = vmatprep.mubr.bf16.mxu1 %v16501_v44  ;;  %v14606_v5 = vpop.f32.mrb[182].mxu0  ;;  %v5822_v33 = vpack.c.bf16 %v5029_v27, %v5027_v35  ;;  %v16509_v48 = vld [vmem:[#allocation15_spill] sm:$0xff]  ;;  %v4950_v27 = vrot.slane %v3860_v61, 1 }
 0x788   :  { %16502 = vst [vmem:[#allocation69_spill] sm:$0xff] %v14606_v5  ;;  %v6814_v2 = vpop.f32.mrb[183].mxu0  ;;  %v16510_v35 = vld [vmem:[#allocation35_spill] sm:$0xff] }
 0x789   :  { %v4947_v2 = vrot.slane %v14600_v56, 1 }
 0x78a   :  { %8765 = vmatmul.mubr.bf16.gmra.mrb[216].mxu0 %v16448_v24 }
 0x78b   :  { %8768 = vmatprep.mubr.bf16.mxu0 %v14413_v22  ;;  %v16507_v22 = vld [vmem:[#allocation106_spill] sm:$0xff] }
 0x78d   :  { %v14616_v7 = vpop.f32.mrb[184].mxu0 }
 0x78e   :  { %7515 = vmatmul.mubr.bf16.gmra.mrb[92].mxu1 %v16474_v11  ;;  %16503 = vst [vmem:[#allocation67_spill] sm:$0xff] %v14616_v7  ;;  %v6819_v29 = vpop.f32.mrb[185].mxu0 }
 0x78f   :  { %7522 = vmatprep.mubr.bf16.mxu1 %v16504_v25  ;;  %v14619_v53 = vpop.f32.mrb[186].mxu0 }
 0x790   :  { %16505 = vst [vmem:[#allocation77_spill] sm:$0xff] %v14619_v53  ;;  %v6822_v54 = vpop.f32.mrb[187].mxu0  ;;  %v16532_v53 = vld [vmem:[#allocation18_spill] sm:$0xff] }
 0x791   :  { %v5820_v54 = vpack.c.bf16 %v16510_v35, %v14600_v56  ;;  %v16529_v56 = vld [vmem:[#allocation82_spill] sm:$0xff] }
 0x792   :  { %8769 = vmatmul.mubr.bf16.gmra.mrb[220].mxu0 %v5822_v33 }
 0x793   :  { %8772 = vmatprep.mubr.bf16.mxu0 %v16454_v26 }
 0x795   :  { %v14623_v24 = vpop.f32.mrb[188].mxu0 }
 0x796   :  { %7523 = vmatmul.mubr.bf16.gmra.mrb[96].mxu1 %v16476_v3  ;;  %16506 = vst [vmem:[#allocation79_spill] sm:$0xff] %v14623_v24  ;;  %v6827_v59 = vpop.f32.mrb[189].mxu0  ;;  %v16531_v24 = vld [vmem:[#allocation90_spill] sm:$0xff] }
 0x797   :  { %7530 = vmatprep.mubr.bf16.mxu1 %v16507_v22  ;;  %v14626_v11 = vpop.f32.mrb[190].mxu0  ;;  %v14666_v22 = vld [vmem:[#allocation2 + $0x348] sm:$0xff] }
 0x798   :  { %16508 = vst [vmem:[#allocation78_spill] sm:$0xff] %v14626_v11  ;;  %v6830_v17 = vpop.f32.mrb[191].mxu0  ;;  %v16530_v11 = vld [vmem:[#allocation55_spill] sm:$0xff] }
 0x79a   :  { %8773 = vmatmul.mubr.bf16.gmra.mrb[224].mxu0 %v16457_v42 }
 0x79b   :  { %8776 = vmatprep.mubr.bf16.mxu0 %v16459_v36 }
 0x79d   :  { %v14631_v44 = vpop.f32.mrb[64].mxu0 }
 0x79e   :  { %7531 = vmatmul.mubr.bf16.gmra.mrb[100].mxu1 %v14123_v37  ;;  %v6868_v26 = vpop.f32.mrb[65].mxu0 }
 0x79f   :  { %7538 = vmatprep.mubr.bf16.mxu1 %v16509_v48  ;;  %v14634_v3 = vpop.f32.mrb[66].mxu0 }
 0x7a0   :  { %v6871_v21 = vpop.f32.mrb[67].mxu0 }
 0x7a1   :  { %v16511_v21 = vld [vmem:[#allocation63_spill] sm:$0xff] }
 0x7a2   :  { %8777 = vmatmul.mubr.bf16.gmra.mrb[228].mxu0 %v16461_v38  ;;  %v4948_v38 = vrot.slane %v16510_v35, 1 }
 0x7a3   :  { %8780 = vmatprep.mubr.bf16.mxu0 %v16463_v4 }
 0x7a4   :  { %v4949_v25 = vsel %vm362_vm0, %v4947_v2, %v4948_v38 }
 0x7a5   :  { %v14639_v41 = vpop.f32.mrb[68].mxu0 }
 0x7a6   :  { %7539 = vmatmul.mubr.bf16.gmra.mrb[104].mxu1 %v14240_v40  ;;  %v6876_v42 = vpop.f32.mrb[69].mxu0 }
 0x7a7   :  { %7546 = vmatprep.mubr.bf16.mxu1 %v14244_v46  ;;  %v14642_v37 = vpop.f32.mrb[70].mxu0 }
 0x7a8   :  { %v6879_v36 = vpop.f32.mrb[71].mxu0 }
 0x7a9   :  { %v16512_v36 = vld [vmem:[#allocation24_spill] sm:$0xff] }
 0x7aa   :  { %8781 = vmatmul.mubr.bf16.gmra.mrb[232].mxu0 %v16465_v60  ;;  %v4951_v60 = vsel %vm362_vm0, %v4948_v38, %v4950_v27 }
 0x7ab   :  { %8784 = vmatprep.mubr.bf16.mxu0 %v16467_v8  ;;  %v5821_v8 = vpack.c.bf16 %v4951_v60, %v4949_v25  ;;  %v16514_v60 = vld [vmem:[#allocation36_spill] sm:$0xff] }
 0x7ad   :  { %v14649_v40 = vpop.f32.mrb[72].mxu0 }
 0x7ae   :  { %7547 = vmatmul.mubr.bf16.gmra.mrb[108].mxu1 %v14258_v0  ;;  %v6884_v46 = vpop.f32.mrb[73].mxu0 }
 0x7af   :  { %7554 = vmatprep.mubr.bf16.mxu1 %v14425_v18  ;;  %v14652_v4 = vpop.f32.mrb[74].mxu0  ;;  %v16513_v46 = vld [vmem:[#allocation23_spill] sm:$0xff] }
 0x7b0   :  { %v6887_v29 = vpop.f32.mrb[75].mxu0 }
 0x7b2   :  { %8785 = vmatmul.mubr.bf16.gmra.mrb[236].mxu0 %v16469_v32  ;;  %v3914_v32 = vld [vmem:[#allocation2 + $0x358] sm:$0x3] }
 0x7b3   :  { %8788 = vmatprep.mubr.bf16.mxu0 %v16471_v63  ;;  %v4952_v63 = vrot.slane %v14666_v22, 1 }
 0x7b5   :  { %v14659_v0 = vpop.f32.mrb[76].mxu0  ;;  %v14673_v17 = vsel %vm362_vm0, %v4952_v63, %v4948_v38 }
 0x7b6   :  { %7555 = vmatmul.mubr.bf16.gmra.mrb[112].mxu1 %v14210_v28  ;;  %v6892_v61 = vpop.f32.mrb[77].mxu0  ;;  %v4955_v28 = vrot.slane %v3914_v32, 1 }
 0x7b7   :  { %7562 = vmatprep.mubr.bf16.mxu1 %v5821_v8  ;;  %v14661_v18 = vpop.f32.mrb[78].mxu0 }
 0x7b8   :  { %v6895_v33 = vpop.f32.mrb[79].mxu0  ;;  %v14676_v48 = vsel %vm362_vm0, %v4948_v38, %v4955_v28  ;;  %v5033_v38 = vrot.slane %v3914_v32, 2  ;;  %v16517_v28 = vld [vmem:[#allocation14_spill] sm:$0xff] }
 0x7ba   :  { %8789 = vmatmul.mubr.bf16.gmra.mrb[240].mxu0 %v16473_v49 }
 0x7bb   :  { %8792 = vmatprep.mubr.bf16.mxu0 %v16475_v57 }
 0x7bd   :  { %v14670_v59 = vpop.f32.mrb[80].mxu0 }
 0x7be   :  { %7563 = vmatmul.mubr.bf16.gmra.mrb[116].mxu1 %v5820_v54  ;;  %v6900_v49 = vpop.f32.mrb[81].mxu0  ;;  %v16516_v54 = vld [vmem:[#allocation27_spill] sm:$0xff] }
 0x7bf   :  { %7570 = vmatprep.mubr.bf16.mxu1 %v13929_v34  ;;  %v14681_v26 = vpop.f32.mrb[82].mxu0  ;;  %v5030_v34 = vrot.slane %v14666_v22, 2 }
 0x7c0   :  { %v6903_v57 = vpop.f32.mrb[83].mxu0 }
 0x7c1   :  { %v16518_v57 = vld [vmem:[#allocation25_spill] sm:$0xff] }
 0x7c2   :  { %8793 = vmatmul.mubr.bf16.gmra.mrb[244].mxu0 %v16477_v55  ;;  %v5032_v55 = vsel %vm780_vm1, %v5030_v34, %v14280_v15  ;;  %v16519_v34 = vld [vmem:[#allocation21_spill] sm:$0xff] }
 0x7c3   :  { %8796 = vmatprep.mubr.bf16.mxu0 %v16511_v21 }
 0x7c5   :  { %v14686_v42 = vpop.f32.mrb[84].mxu0 }
 0x7c6   :  { %7571 = vmatmul.mubr.bf16.gmra.mrb[120].mxu1 %v14321_v6  ;;  %v6908_v2 = vpop.f32.mrb[85].mxu0  ;;  %v5034_v6 = vsel %vm780_vm1, %v14280_v15, %v5033_v38 }
 0x7c7   :  { %7578 = vmatprep.mubr.bf16.mxu1 %v16512_v36  ;;  %v14689_v35 = vpop.f32.mrb[86].mxu0  ;;  %v5966_v8 = vpack.c.bf16 %v5034_v6, %v5032_v55 }
 0x7c8   :  { %v6911_v27 = vpop.f32.mrb[87].mxu0 }
 0x7c9   :  { %v16520_v27 = vld [vmem:[#allocation9_spill] sm:$0xff] }
 0x7ca   :  { %8797 = vmatmul.mubr.bf16.gmra.mrb[248].mxu0 %v14247_v62  ;;  %v16515_v62 = vld [vmem:[#allocation29_spill] sm:$0xff] }
 0x7cb   :  { %8800 = vmatprep.mubr.bf16.mxu0 %v14222_v16 }
 0x7cd   :  { %v14699_v25 = vpop.f32.mrb[88].mxu0 }
 0x7ce   :  { %7579 = vmatmul.mubr.bf16.gmra.mrb[124].mxu1 %v16513_v46  ;;  %v6916_v29 = vpop.f32.mrb[89].mxu0 }
 0x7cf   :  { %7586 = vmatprep.mubr.bf16.mxu1 %v16514_v60  ;;  %v14702_v61 = vpop.f32.mrb[90].mxu0  ;;  %v16521_v60 = vld [vmem:[#allocation42_spill] sm:$0xff] }
 0x7d0   :  { %v6919_v33 = vpop.f32.mrb[91].mxu0 }
 0x7d2   :  { %8801 = vmatmul.mubr.bf16.gmra.mrb[252].mxu0 %v5966_v8  ;;  %v16522_v8 = vld [vmem:[#allocation43_spill] sm:$0xff] }
 0x7d5   :  { %v14705_v16 = vpop.f32.mrb[92].mxu0 }
 0x7d6   :  { %7587 = vmatmul.mubr.bf16.gmra.mrb[0].mxu1 %v16515_v62  ;;  %v6924_v32 = vpop.f32.mrb[93].mxu0 }
 0x7d7   :  { %7594 = vmatprep.mubr.bf16.mxu1 %v16516_v54  ;;  %v14708_v15 = vpop.f32.mrb[94].mxu0  ;;  %v16523_v32 = vld [vmem:[#allocation51_spill] sm:$0xff] }
 0x7d8   :  { %v6927_v63 = vpop.f32.mrb[95].mxu0 }
 0x7dd   :  { %v14711_v49 = vpop.f32.mrb[96].mxu0 }
 0x7de   :  { %7595 = vmatmul.mubr.bf16.gmra.mrb[4].mxu1 %v16517_v28  ;;  %v6932_v21 = vpop.f32.mrb[97].mxu0  ;;  %v16524_v28 = vld [vmem:[#allocation44_spill] sm:$0xff] }
 0x7df   :  { %7602 = vmatprep.mubr.bf16.mxu1 %v16518_v57  ;;  %v14714_v36 = vpop.f32.mrb[98].mxu0 }
 0x7e0   :  { %v6935_v2 = vpop.f32.mrb[99].mxu0 }
 0x7e5   :  { %v14717_v38 = vpop.f32.mrb[100].mxu0 }
 0x7e6   :  { %7603 = vmatmul.mubr.bf16.gmra.mrb[8].mxu1 %v16519_v34  ;;  %v6940_v55 = vpop.f32.mrb[101].mxu0  ;;  %v16525_v34 = vld [vmem:[#allocation61_spill] sm:$0xff] }
 0x7e7   :  { %7610 = vmatprep.mubr.bf16.mxu1 %v16520_v27  ;;  %v14720_v6 = vpop.f32.mrb[102].mxu0  ;;  %v16526_v55 = vld [vmem:[#allocation10_spill] sm:$0xff] }
 0x7e8   :  { %v6943_v46 = vpop.f32.mrb[103].mxu0 }
 0x7ed   :  { %v14723_v29 = vpop.f32.mrb[104].mxu0 }
 0x7ee   :  { %7611 = vmatmul.mubr.bf16.gmra.mrb[12].mxu1 %v16521_v60  ;;  %v6948_v33 = vpop.f32.mrb[105].mxu0 }
 0x7ef   :  { %7618 = vmatprep.mubr.bf16.mxu1 %v16522_v8  ;;  %v14726_v62 = vpop.f32.mrb[106].mxu0  ;;  %v16527_v33 = vld [vmem:[#allocation71_spill] sm:$0xff] }
 0x7f0   :  { %v6951_v54 = vpop.f32.mrb[107].mxu0 }
 0x7f5   :  { %v14729_v63 = vpop.f32.mrb[108].mxu0 }
 0x7f6   :  { %7619 = vmatmul.mubr.bf16.gmra.mrb[16].mxu1 %v16523_v32  ;;  %v6956_v57 = vpop.f32.mrb[109].mxu0  ;;  %v16528_v32 = vld [vmem:[#allocation16_spill] sm:$0xff] }
 0x7f7   :  { %7626 = vmatprep.mubr.bf16.mxu1 %v16524_v28  ;;  %v14732_v21 = vpop.f32.mrb[110].mxu0 }
 0x7f8   :  { %v6959_v2 = vpop.f32.mrb[111].mxu0 }
 0x7fd   :  { %v14735_v27 = vpop.f32.mrb[112].mxu0 }
 0x7fe   :  { %7627 = vmatmul.mubr.bf16.gmra.mrb[20].mxu1 %v16525_v34  ;;  %v6964_v46 = vpop.f32.mrb[113].mxu0 }
 0x7ff   :  { %7634 = vmatprep.mubr.bf16.mxu1 %v16526_v55  ;;  %v14738_v60 = vpop.f32.mrb[114].mxu0 }
 0x800   :  { %v6967_v8 = vpop.f32.mrb[115].mxu0 }
 0x805   :  { %v14741_v54 = vpop.f32.mrb[116].mxu0 }
 0x806   :  { %7635 = vmatmul.mubr.bf16.gmra.mrb[24].mxu1 %v16527_v33  ;;  %v6972_v28 = vpop.f32.mrb[117].mxu0 }
 0x807   :  { %7642 = vmatprep.mubr.bf16.mxu1 %v16528_v32  ;;  %v14744_v57 = vpop.f32.mrb[118].mxu0 }
 0x808   :  { %v6975_v2 = vpop.f32.mrb[119].mxu0 }
 0x80d   :  { %v14747_v34 = vpop.f32.mrb[120].mxu0 }
 0x80e   :  { %7643 = vmatmul.mubr.bf16.gmra.mrb[28].mxu1 %v16529_v56  ;;  %v6980_v55 = vpop.f32.mrb[121].mxu0 }
 0x80f   :  { %7650 = vmatprep.mubr.bf16.mxu1 %v16530_v11  ;;  %v14750_v46 = vpop.f32.mrb[122].mxu0 }
 0x810   :  { %v6983_v8 = vpop.f32.mrb[123].mxu0 }
 0x815   :  { %v14753_v33 = vpop.f32.mrb[124].mxu0 }
 0x816   :  { %7651 = vmatmul.mubr.bf16.gmra.mrb[32].mxu1 %v16531_v24  ;;  %v6988_v32 = vpop.f32.mrb[125].mxu0  ;;  %v16534_v24 = vld [vmem:[#allocation17_spill] sm:$0xff] }
 0x817   :  { %7658 = vmatprep.mubr.bf16.mxu1 %v16532_v53  ;;  %v14756_v28 = vpop.f32.mrb[126].mxu0 }
 0x818   :  { %v6991_v7 = vpop.f32.mrb[127].mxu0 }
 0x819   :  { %v7444_v2 = vpop.f32.mrb[56].mxu1 }
 0x81a   :  { %v8836_v56 = vadd.f32 %v7444_v2, %v14631_v44  ;;  %v7446_v5 = vpop.f32.mrb[57].mxu1 }
 0x81b   :  { %v7447_v9 = vpop.f32.mrb[58].mxu1 }
 0x81c   :  { %v8837_v11 = vadd.f32 %v7447_v9, %v14634_v3  ;;  %v7449_v55 = vpop.f32.mrb[59].mxu1  ;;  %v16535_v9 = vld [vmem:[#allocation100_spill] sm:$0xff] }
 0x81d   :  { %v14761_v8 = vpop.f32.mrb[128].mxu0 }
 0x81e   :  { %7659 = vmatmul.mubr.bf16.gmra.mrb[36].mxu1 %v16533_v12  ;;  %v6996_v50 = vpop.f32.mrb[129].mxu0  ;;  %v16536_v12 = vld [vmem:[#allocation65_spill] sm:$0xff] }
 0x81f   :  { %7666 = vmatprep.mubr.bf16.mxu1 %v16534_v24  ;;  %v14764_v53 = vpop.f32.mrb[130].mxu0 }
 0x820   :  { %v6999_v52 = vpop.f32.mrb[131].mxu0 }
 0x821   :  { %v7452_v32 = vpop.f32.mrb[60].mxu1 }
 0x822   :  { %v8838_v7 = vadd.f32 %v7452_v32, %v14639_v41  ;;  %v7454_v45 = vpop.f32.mrb[61].mxu1 }
 0x823   :  { %v7455_v44 = vpop.f32.mrb[62].mxu1 }
 0x824   :  { %v8839_v5 = vadd.f32 %v7455_v44, %v14642_v37  ;;  %v7457_v2 = vpop.f32.mrb[63].mxu1  ;;  %v16537_v37 = vld [vmem:[#allocation104_spill] sm:$0xff] }
 0x825   :  { %v14769_v3 = vpop.f32.mrb[132].mxu0 }
 0x826   :  { %7667 = vmatmul.mubr.bf16.gmra.mrb[40].mxu1 %v16535_v9  ;;  %v7004_v55 = vpop.f32.mrb[133].mxu0 }
 0x827   :  { %7674 = vmatprep.mubr.bf16.mxu1 %v16536_v12  ;;  %v14772_v24 = vpop.f32.mrb[134].mxu0 }
 0x828   :  { %v7007_v10 = vpop.f32.mrb[135].mxu0 }
 0x829   :  { %v7460_v50 = vpop.f32.mrb[64].mxu1 }
 0x82a   :  { %v8840_v52 = vadd.f32 %v7460_v50, %v14649_v40  ;;  %v7462_v23 = vpop.f32.mrb[65].mxu1 }
 0x82b   :  { %v7463_v41 = vpop.f32.mrb[66].mxu1 }
 0x82c   :  { %v8841_v45 = vadd.f32 %v7463_v41, %v14652_v4  ;;  %v7465_v32 = vpop.f32.mrb[67].mxu1 }
 0x82d   :  { %v8742_v44 = vpop.f32.mrb[192].mxu0 }
 0x82e   :  { %7675 = vmatmul.mubr.bf16.gmra.mrb[44].mxu1 %v16537_v37  ;;  %v14778_v2 = vadd.f32 %v8838_v7, %v8742_v44  ;;  %v7733_v9 = vpop.f32.mrb[193].mxu0 }
 0x82f   :  { %7682 = vmatprep.mubr.bf16.mxu1 %v14228_v14  ;;  %v14780_v12 = vadd.f32 %v8836_v56, %v7733_v9  ;;  %v8743_v55 = vpop.f32.mrb[194].mxu0  ;;  %v16542_v14 = vld [vmem:[#allocation64_spill] sm:$0xff] }
 0x830   :  { %16538 = vst [vmem:[#allocation85_spill] sm:$0xff] %v14778_v2  ;;  %v14782_v10 = vadd.f32 %v8839_v5, %v8743_v55  ;;  %v7736_v40 = vpop.f32.mrb[195].mxu0  ;;  %v16544_v5 = vpack.c.bf16 %v14676_v48, %v14673_v17 }
 0x831   :  { %16539 = vst [vmem:[#allocation88_spill] sm:$0xff] %v14780_v12  ;;  %v7468_v19 = vpop.f32.mrb[68].mxu1  ;;  %v14785_v4 = vadd.f32 %v8837_v11, %v7736_v40 }
 0x832   :  { %16540 = vst [vmem:[#allocation87_spill] sm:$0xff] %v14782_v10  ;;  %v8842_v23 = vadd.f32 %v7468_v19, %v14659_v0  ;;  %v7470_v50 = vpop.f32.mrb[69].mxu1 }
 0x833   :  { %16541 = vst [vmem:[#allocation97_spill] sm:$0xff] %v14785_v4  ;;  %v7471_v41 = vpop.f32.mrb[70].mxu1  ;;  %v9258_v50 = vld [vmem:[#allocation2 + $0x8] sm:$0xff] }
 0x834   :  { %v8843_v32 = vadd.f32 %v7471_v41, %v14661_v18  ;;  %v7473_v37 = vpop.f32.mrb[71].mxu1  ;;  %v5964_v41 = vpack.c.bf16 %v9258_v50, %v14666_v22 }
 0x835   :  { %v8746_v7 = vpop.f32.mrb[196].mxu0 }
 0x836   :  { %7683 = vmatmul.mubr.bf16.gmra.mrb[48].mxu1 %v16542_v14  ;;  %v14789_v44 = vadd.f32 %v8842_v23, %v8746_v7  ;;  %v7749_v56 = vpop.f32.mrb[197].mxu0 }
 0x837   :  { %7690 = vmatprep.mubr.bf16.mxu1 %v16544_v5  ;;  %v14794_v9 = vadd.f32 %v8840_v52, %v7749_v56  ;;  %v8747_v19 = vpop.f32.mrb[198].mxu0 }
 0x838   :  { %16543 = vst [vmem:[#allocation92_spill] sm:$0xff] %v14789_v44  ;;  %v14796_v11 = vadd.f32 %v8843_v32, %v8747_v19  ;;  %v7752_v55 = vpop.f32.mrb[199].mxu0 }
 0x839   :  { %16545 = vst [vmem:[#allocation33_spill] sm:$0xff] %v14794_v9  ;;  %v7476_v0 = vpop.f32.mrb[72].mxu1  ;;  %v14800_v37 = vadd.f32 %v8841_v45, %v7752_v55 }
 0x83a   :  { %16546 = vst [vmem:[#allocation26_spill] sm:$0xff] %v14796_v11  ;;  %v8844_v18 = vadd.f32 %v7476_v0, %v14670_v59  ;;  %v7478_v40 = vpop.f32.mrb[73].mxu1 }
 0x83b   :  { %v7479_v23 = vpop.f32.mrb[74].mxu1  ;;  %16547 = vst [vmem:[#allocation32_spill] sm:$0xff] %v14800_v37 }
 0x83c   :  { %v8845_v14 = vadd.f32 %v7479_v23, %v14681_v26  ;;  %v7481_v17 = vpop.f32.mrb[75].mxu1 }
 0x83d   :  { %v8750_v48 = vpop.f32.mrb[200].mxu0 }
 0x83e   :  { %7691 = vmatmul.mubr.bf16.gmra.mrb[52].mxu1 %v5964_v41  ;;  %v7765_v52 = vpop.f32.mrb[201].mxu0 }
 0x83f   :  { %v14803_v7 = vadd.f32 %v8844_v18, %v7765_v52  ;;  %v8751_v32 = vpop.f32.mrb[202].mxu0 }
 0x840   :  { %v7768_v5 = vpop.f32.mrb[203].mxu0 }
 0x841   :  { %16548 = vst [vmem:[#allocation12_spill] sm:$0xff] %v14803_v7  ;;  %v7484_v56 = vpop.f32.mrb[76].mxu1  ;;  %v14806_v0 = vadd.f32 %v8845_v14, %v7768_v5 }
 0x842   :  { %v8846_v59 = vadd.f32 %v7484_v56, %v14686_v42  ;;  %v7486_v19 = vpop.f32.mrb[77].mxu1 }
 0x843   :  { %16549 = vst [vmem:[#allocation45_spill] sm:$0xff] %v14806_v0  ;;  %v7487_v22 = vpop.f32.mrb[78].mxu1 }
 0x844   :  { %v14808_v40 = vadd.f32 %v8846_v59, %v8750_v48  ;;  %v8847_v45 = vadd.f32 %v7487_v22, %v14689_v35  ;;  %v7489_v26 = vpop.f32.mrb[79].mxu1 }
 0x845   :  { %v8754_v50 = vpop.f32.mrb[204].mxu0 }
 0x846   :  { %16550 = vst [vmem:[#allocation8_spill] sm:$0xff] %v14808_v40  ;;  %v14811_v55 = vadd.f32 %v8847_v45, %v8751_v32  ;;  %v7781_v41 = vpop.f32.mrb[205].mxu0  ;;  %v8058_v45 = vmul.f32 %v14785_v4, %v14785_v4 }
 0x847   :  { %v8755_v18 = vpop.f32.mrb[206].mxu0 }
 0x848   :  { %16551 = vst [vmem:[#allocation54_spill] sm:$0xff] %v14811_v55  ;;  %v7784_v17 = vpop.f32.mrb[207].mxu0 }
 0x849   :  { %v7492_v23 = vpop.f32.mrb[80].mxu1 }
 0x84a   :  { %v8848_v52 = vadd.f32 %v7492_v23, %v14699_v25  ;;  %v7494_v58 = vpop.f32.mrb[81].mxu1 }
 0x84b   :  { %v7495_v42 = vpop.f32.mrb[82].mxu1 }
 0x84c   :  { %v8849_v14 = vadd.f32 %v7495_v42, %v14702_v61  ;;  %v14815_v56 = vadd.f32 %v8848_v52, %v7781_v41  ;;  %v7497_v48 = vpop.f32.mrb[83].mxu1  ;;  %v8057_v61 = vmul.f32 %v14780_v12, %v14780_v12  ;;  %v7988_v41 = vadd.f32 %v14785_v4, %v14780_v12 }
 0x84d   :  { %v8758_v35 = vpop.f32.mrb[208].mxu0 }
 0x84e   :  { %16552 = vst [vmem:[#allocation56_spill] sm:$0xff] %v14815_v56  ;;  %v14817_v5 = vadd.f32 %v8849_v14, %v7784_v17  ;;  %v7797_v59 = vpop.f32.mrb[209].mxu0  ;;  %v8121_v42 = vadd.f32 %v8058_v45, %v8057_v61 }
 0x84f   :  { %v8759_v32 = vpop.f32.mrb[210].mxu0 }
 0x850   :  { %16553 = vst [vmem:[#allocation28_spill] sm:$0xff] %v14817_v5  ;;  %v7800_v22 = vpop.f32.mrb[211].mxu0 }
 0x851   :  { %v7500_v19 = vpop.f32.mrb[84].mxu1 }
 0x852   :  { %v8850_v26 = vadd.f32 %v7500_v19, %v14705_v16  ;;  %v7502_v25 = vpop.f32.mrb[85].mxu1  ;;  %v8059_v16 = vmul.f32 %v14778_v2, %v14778_v2  ;;  %v7989_v19 = vadd.f32 %v7988_v41, %v14778_v2  ;;  %v8061_v41 = vmul.f32 %v14794_v9, %v14794_v9 }
 0x853   :  { %v7503_v58 = vpop.f32.mrb[86].mxu1 }
 0x854   :  { %v14826_v23 = vadd.f32 %v8850_v26, %v8754_v50  ;;  %v8851_v17 = vadd.f32 %v7503_v58, %v14708_v15  ;;  %v7505_v52 = vpop.f32.mrb[87].mxu1  ;;  %v8122_v50 = vadd.f32 %v8121_v42, %v8059_v16  ;;  %v7990_v45 = vadd.f32 %v7989_v19, %v14782_v10 }
 0x855   :  { %v14831_v48 = vpop.f32.mrb[212].mxu0 }
 0x856   :  { %16554 = vst [vmem:[#allocation30_spill] sm:$0xff] %v14826_v23  ;;  %v14829_v14 = vadd.f32 %v8851_v17, %v8755_v18  ;;  %v7813_v31 = vpop.f32.mrb[213].mxu0  ;;  %v8060_v18 = vmul.f32 %v14782_v10, %v14782_v10 }
 0x857   :  { %v14836_v25 = vpop.f32.mrb[214].mxu0 }
 0x858   :  { %16555 = vst [vmem:[#allocation31_spill] sm:$0xff] %v14829_v14  ;;  %v7816_v4 = vpop.f32.mrb[215].mxu0  ;;  %v8123_v2 = vadd.f32 %v8122_v50, %v8060_v18 }
 0x859   :  { %v7508_v43 = vpop.f32.mrb[88].mxu1 }
 0x85a   :  { %v8852_v26 = vadd.f32 %v7508_v43, %v14711_v49  ;;  %v7510_v15 = vpop.f32.mrb[89].mxu1  ;;  %v7991_v49 = vadd.f32 %v7990_v45, %v14794_v9 }
 0x85b   :  { %v7511_v58 = vpop.f32.mrb[90].mxu1 }
 0x85c   :  { %v14842_v61 = vadd.f32 %v8852_v26, %v7797_v59  ;;  %v8853_v17 = vadd.f32 %v7511_v58, %v14714_v36  ;;  %v7513_v52 = vpop.f32.mrb[91].mxu1  ;;  %v8124_v26 = vadd.f32 %v8123_v2, %v8061_v41  ;;  %v8062_v36 = vmul.f32 %v14800_v37, %v14800_v37 }
 0x85d   :  { %v14849_v42 = vpop.f32.mrb[216].mxu0  ;;  %v7992_v58 = vadd.f32 %v7991_v49, %v14800_v37  ;;  %v8063_v41 = vmul.f32 %v14789_v44, %v14789_v44 }
 0x85e   :  { %v14847_v12 = vadd.f32 %v8853_v17, %v7800_v22  ;;  %v14851_v43 = vpop.f32.mrb[217].mxu0  ;;  %v8125_v52 = vadd.f32 %v8124_v26, %v8062_v36  ;;  %v8064_v36 = vmul.f32 %v14796_v11, %v14796_v11 }
 0x85f   :  { %v14854_v16 = vpop.f32.mrb[218].mxu0 }
 0x860   :  { %16556 = vst [vmem:[#allocation11_spill] sm:$0xff] %v14847_v12  ;;  %v14856_v59 = vpop.f32.mrb[219].mxu0 }
 0x861   :  { %v7516_v19 = vpop.f32.mrb[92].mxu1 }
 0x862   :  { %v8854_v15 = vadd.f32 %v7516_v19, %v14717_v38  ;;  %v7518_v50 = vpop.f32.mrb[93].mxu1  ;;  %v7993_v38 = vadd.f32 %v7992_v58, %v14789_v44 }
 0x863   :  { %v7519_v22 = vpop.f32.mrb[94].mxu1 }
 0x864   :  { %v14862_v18 = vadd.f32 %v8854_v15, %v8758_v35  ;;  %v8855_v17 = vadd.f32 %v7519_v22, %v14720_v6  ;;  %v7521_v45 = vpop.f32.mrb[95].mxu1  ;;  %v8126_v15 = vadd.f32 %v8125_v52, %v8063_v41  ;;  %v7994_v50 = vadd.f32 %v7993_v38, %v14796_v11 }
 0x865   :  { %v14867_v10 = vpop.f32.mrb[220].mxu0  ;;  %v8065_v45 = vmul.f32 %v14803_v7, %v14803_v7 }
 0x866   :  { %16557 = vst [vmem:[#allocation13_spill] sm:$0xff] %v14862_v18  ;;  %v14865_v9 = vadd.f32 %v8855_v17, %v8759_v32  ;;  %v14869_v2 = vpop.f32.mrb[221].mxu0  ;;  %v8127_v44 = vadd.f32 %v8126_v15, %v8064_v36  ;;  %v7995_v41 = vadd.f32 %v7994_v50, %v14803_v7 }
 0x867   :  { %v14874_v19 = vpop.f32.mrb[222].mxu0 }
 0x868   :  { %16558 = vst [vmem:[#allocation19_spill] sm:$0xff] %v14865_v9  ;;  %v14876_v35 = vpop.f32.mrb[223].mxu0 }
 0x869   :  { %v7524_v49 = vpop.f32.mrb[96].mxu1 }
 0x86a   :  { %v8856_v6 = vadd.f32 %v7524_v49, %v14723_v29  ;;  %v7526_v26 = vpop.f32.mrb[97].mxu1 }
 0x86b   :  { %v7527_v32 = vpop.f32.mrb[98].mxu1 }
 0x86c   :  { %v14882_v22 = vadd.f32 %v8856_v6, %v7813_v31  ;;  %v8857_v17 = vadd.f32 %v7527_v32, %v14726_v62  ;;  %v7529_v58 = vpop.f32.mrb[99].mxu1  ;;  %v8128_v6 = vadd.f32 %v8127_v44, %v8065_v45  ;;  %v8066_v62 = vmul.f32 %v14806_v0, %v14806_v0 }
 0x86d   :  { %v14889_v52 = vpop.f32.mrb[224].mxu0  ;;  %v7996_v32 = vadd.f32 %v7995_v41, %v14806_v0 }
 0x86e   :  { %16559 = vst [vmem:[#allocation37_spill] sm:$0xff] %v14882_v22  ;;  %v14887_v37 = vadd.f32 %v8857_v17, %v7816_v4  ;;  %v14891_v29 = vpop.f32.mrb[225].mxu0  ;;  %v8129_v58 = vadd.f32 %v8128_v6, %v8066_v62 }
 0x86f   :  { %v14894_v49 = vpop.f32.mrb[226].mxu0 }
 0x870   :  { %16560 = vst [vmem:[#allocation41_spill] sm:$0xff] %v14887_v37  ;;  %v14896_v31 = vpop.f32.mrb[227].mxu0 }
 0x871   :  { %v7532_v38 = vpop.f32.mrb[100].mxu1 }
 0x872   :  { %v8858_v26 = vadd.f32 %v7532_v38, %v14729_v63  ;;  %v7534_v15 = vpop.f32.mrb[101].mxu1  ;;  %v8067_v63 = vmul.f32 %v14808_v40, %v14808_v40  ;;  %v7997_v38 = vadd.f32 %v7996_v32, %v14808_v40  ;;  %v8069_v40 = vmul.f32 %v14815_v56, %v14815_v56 }
 0x873   :  { %v7535_v4 = vpop.f32.mrb[102].mxu1  ;;  %v8068_v15 = vmul.f32 %v14811_v55, %v14811_v55 }
 0x874   :  { %v14903_v36 = vadd.f32 %v8858_v26, %v14831_v48  ;;  %v8859_v50 = vadd.f32 %v7535_v4, %v14732_v21  ;;  %v7537_v17 = vpop.f32.mrb[103].mxu1  ;;  %v8130_v21 = vadd.f32 %v8129_v58, %v8067_v63  ;;  %v7998_v4 = vadd.f32 %v7997_v38, %v14811_v55 }
 0x875   :  { %v14909_v44 = vpop.f32.mrb[228].mxu0 }
 0x876   :  { %16561 = vst [vmem:[#allocation47_spill] sm:$0xff] %v14903_v36  ;;  %v14907_v7 = vadd.f32 %v8859_v50, %v14836_v25  ;;  %v14911_v45 = vpop.f32.mrb[229].mxu0  ;;  %v8131_v0 = vadd.f32 %v8130_v21, %v8068_v15 }
 0x877   :  { %v14916_v41 = vpop.f32.mrb[230].mxu0 }
 0x878   :  { %16562 = vst [vmem:[#allocation52_spill] sm:$0xff] %v14907_v7  ;;  %v14918_v26 = vpop.f32.mrb[231].mxu0 }
 0x879   :  { %v7540_v48 = vpop.f32.mrb[104].mxu1 }
 0x87a   :  { %v8860_v6 = vadd.f32 %v7540_v48, %v14735_v27  ;;  %v7542_v62 = vpop.f32.mrb[105].mxu1  ;;  %v7999_v48 = vadd.f32 %v7998_v4, %v14815_v56 }
 0x87b   :  { %v7543_v25 = vpop.f32.mrb[106].mxu1  ;;  %v8070_v62 = vmul.f32 %v14817_v5, %v14817_v5 }
 0x87c   :  { %v14925_v50 = vadd.f32 %v8860_v6, %v14851_v43  ;;  %v8861_v32 = vadd.f32 %v7543_v25, %v14738_v60  ;;  %v7545_v17 = vpop.f32.mrb[107].mxu1  ;;  %v8132_v60 = vadd.f32 %v8131_v0, %v8069_v40  ;;  %v8000_v15 = vadd.f32 %v7999_v48, %v14817_v5 }
 0x87d   :  { %v14933_v27 = vpop.f32.mrb[232].mxu0 }
 0x87e   :  { %16563 = vst [vmem:[#allocation53_spill] sm:$0xff] %v14925_v50  ;;  %v14931_v58 = vadd.f32 %v8861_v32, %v14856_v59  ;;  %v14935_v63 = vpop.f32.mrb[233].mxu0  ;;  %v8071_v32 = vmul.f32 %v14826_v23, %v14826_v23  ;;  %v8133_v55 = vadd.f32 %v8132_v60, %v8070_v62  ;;  %v8001_v0 = vadd.f32 %v8000_v15, %v14826_v23 }
 0x87f   :  { %v14938_v38 = vpop.f32.mrb[234].mxu0 }
 0x880   :  { %16564 = vst [vmem:[#allocation60_spill] sm:$0xff] %v14931_v58  ;;  %v14940_v6 = vpop.f32.mrb[235].mxu0  ;;  %v8134_v48 = vadd.f32 %v8133_v55, %v8071_v32 }
 0x881   :  { %v7548_v43 = vpop.f32.mrb[108].mxu1 }
 0x882   :  { %v8862_v21 = vadd.f32 %v7548_v43, %v14741_v54  ;;  %v7550_v25 = vpop.f32.mrb[109].mxu1 }
 0x883   :  { %v7551_v59 = vpop.f32.mrb[110].mxu1  ;;  %v8072_v25 = vmul.f32 %v14829_v14, %v14829_v14 }
 0x884   :  { %v14949_v4 = vadd.f32 %v8862_v21, %v14849_v42  ;;  %v8863_v17 = vadd.f32 %v7551_v59, %v14744_v57  ;;  %v7553_v56 = vpop.f32.mrb[111].mxu1  ;;  %v8002_v57 = vadd.f32 %v8001_v0, %v14829_v14  ;;  %v8074_v0 = vmul.f32 %v14847_v12, %v14847_v12 }
 0x885   :  { %v14956_v54 = vpop.f32.mrb[236].mxu0  ;;  %v8073_v56 = vmul.f32 %v14842_v61, %v14842_v61  ;;  %v8135_v59 = vadd.f32 %v8134_v48, %v8072_v25 }
 0x886   :  { %v14954_v40 = vadd.f32 %v8863_v17, %v14854_v16  ;;  %v14958_v43 = vpop.f32.mrb[237].mxu0  ;;  %v8003_v55 = vadd.f32 %v8002_v57, %v14842_v61 }
 0x887   :  { %v14962_v5 = vpop.f32.mrb[238].mxu0  ;;  %v8136_v23 = vadd.f32 %v8135_v59, %v8073_v56  ;;  %v8076_v59 = vmul.f32 %v14865_v9, %v14865_v9 }
 0x888   :  { %v14964_v21 = vpop.f32.mrb[239].mxu0  ;;  %v8004_v48 = vadd.f32 %v8003_v55, %v14847_v12 }
 0x889   :  { %v7556_v42 = vpop.f32.mrb[112].mxu1  ;;  %v8137_v57 = vadd.f32 %v8136_v23, %v8074_v0  ;;  %v8077_v23 = vmul.f32 %v14882_v22, %v14882_v22 }
 0x88a   :  { %v8864_v16 = vadd.f32 %v7556_v42, %v14747_v34  ;;  %v7558_v60 = vpop.f32.mrb[113].mxu1  ;;  %v8005_v56 = vadd.f32 %v8004_v48, %v14862_v18 }
 0x88b   :  { %v7559_v62 = vpop.f32.mrb[114].mxu1 }
 0x88c   :  { %v14972_v15 = vadd.f32 %v8864_v16, %v14869_v2  ;;  %v8865_v32 = vadd.f32 %v7559_v62, %v14750_v46  ;;  %v7561_v17 = vpop.f32.mrb[115].mxu1  ;;  %v8075_v2 = vmul.f32 %v14862_v18, %v14862_v18  ;;  %v8006_v12 = vadd.f32 %v8005_v56, %v14865_v9 }
 0x88d   :  { %v14980_v11 = vpop.f32.mrb[240].mxu0  ;;  %v8078_v56 = vmul.f32 %v14887_v37, %v14887_v37 }
 0x88e   :  { %v14978_v14 = vadd.f32 %v8865_v32, %v14876_v35  ;;  %v14982_v34 = vpop.f32.mrb[241].mxu0  ;;  %v8138_v62 = vadd.f32 %v8137_v57, %v8075_v2 }
 0x88f   :  { %v14987_v25 = vpop.f32.mrb[242].mxu0 }
 0x890   :  { %v14989_v42 = vpop.f32.mrb[243].mxu0  ;;  %v8139_v2 = vadd.f32 %v8138_v62, %v8076_v59  ;;  %v8079_v62 = vmul.f32 %v14903_v36, %v14903_v36 }
 0x891   :  { %v7564_v46 = vpop.f32.mrb[116].mxu1 }
 0x892   :  { %v8866_v35 = vadd.f32 %v7564_v46, %v14753_v33  ;;  %v7566_v16 = vpop.f32.mrb[117].mxu1  ;;  %v8007_v46 = vadd.f32 %v8006_v12, %v14882_v22 }
 0x893   :  { %v7567_v60 = vpop.f32.mrb[118].mxu1 }
 0x894   :  { %v14996_v55 = vadd.f32 %v8866_v35, %v14867_v10  ;;  %v8867_v32 = vadd.f32 %v7567_v60, %v14756_v28  ;;  %v7569_v17 = vpop.f32.mrb[119].mxu1  ;;  %v8140_v35 = vadd.f32 %v8139_v2, %v8077_v23 }
 0x895   :  { %v15005_v33 = vpop.f32.mrb[244].mxu0 }
 0x896   :  { %v15003_v0 = vadd.f32 %v8867_v32, %v14874_v19  ;;  %v15007_v48 = vpop.f32.mrb[245].mxu0  ;;  %v8008_v32 = vadd.f32 %v8007_v46, %v14887_v37  ;;  %v8141_v22 = vadd.f32 %v8140_v35, %v8078_v56  ;;  %v8081_v35 = vmul.f32 %v14925_v50, %v14925_v50 }
 0x897   :  { %v15010_v10 = vpop.f32.mrb[246].mxu0 }
 0x898   :  { %v15012_v28 = vpop.f32.mrb[247].mxu0  ;;  %v8009_v23 = vadd.f32 %v8008_v32, %v14903_v36  ;;  %v8142_v46 = vadd.f32 %v8141_v22, %v8079_v62 }
 0x899   :  { %v7572_v57 = vpop.f32.mrb[120].mxu1 }
 0x89a   :  { %v8868_v16 = vadd.f32 %v7572_v57, %v14761_v8  ;;  %v7574_v19 = vpop.f32.mrb[121].mxu1 }
 0x89b   :  { %v7575_v60 = vpop.f32.mrb[122].mxu1  ;;  %v8080_v19 = vmul.f32 %v14907_v7, %v14907_v7 }
 0x89c   :  { %v15021_v12 = vadd.f32 %v8868_v16, %v14891_v29  ;;  %v8869_v59 = vadd.f32 %v7575_v60, %v14764_v53  ;;  %v7577_v17 = vpop.f32.mrb[123].mxu1  ;;  %v8010_v53 = vadd.f32 %v8009_v23, %v14907_v7  ;;  %v8082_v23 = vmul.f32 %v14931_v58, %v14931_v58 }
 0x89d   :  { %v15028_v8 = vpop.f32.mrb[248].mxu0  ;;  %v8143_v32 = vadd.f32 %v8142_v46, %v8080_v19 }
 0x89e   :  { %v15026_v2 = vadd.f32 %v8869_v59, %v14896_v31  ;;  %v15030_v57 = vpop.f32.mrb[249].mxu0  ;;  %v8011_v22 = vadd.f32 %v8010_v53, %v14925_v50 }
 0x89f   :  { %v15034_v37 = vpop.f32.mrb[250].mxu0  ;;  %v8144_v36 = vadd.f32 %v8143_v32, %v8081_v35 }
 0x8a0   :  { %v15036_v16 = vpop.f32.mrb[251].mxu0  ;;  %v8012_v46 = vadd.f32 %v8011_v22, %v14931_v58 }
 0x8a1   :  { %v7580_v29 = vpop.f32.mrb[124].mxu1  ;;  %v8145_v53 = vadd.f32 %v8144_v36, %v8082_v23  ;;  %v8085_v36 = vmul.f32 %v14972_v15, %v14972_v15 }
 0x8a2   :  { %v8870_v31 = vadd.f32 %v7580_v29, %v14769_v3  ;;  %v7582_v56 = vpop.f32.mrb[125].mxu1  ;;  %v8013_v35 = vadd.f32 %v8012_v46, %v14949_v4 }
 0x8a3   :  { %v7583_v60 = vpop.f32.mrb[126].mxu1 }
 0x8a4   :  { %v15044_v62 = vadd.f32 %v8870_v31, %v14889_v52  ;;  %v8871_v59 = vadd.f32 %v7583_v60, %v14772_v24  ;;  %v7585_v17 = vpop.f32.mrb[127].mxu1  ;;  %v8083_v52 = vmul.f32 %v14949_v4, %v14949_v4  ;;  %v16565_v31 = vld [vmem:[#allocation22_spill] sm:$0xff]  ;;  %v8014_v18 = vadd.f32 %v8013_v35, %v14954_v40 }
 0x8a5   :  { %v15052_v9 = vpop.f32.mrb[252].mxu0  ;;  %v16566_v17 = vld [vmem:[#allocation38_spill] sm:$0xff] }
 0x8a6   :  { %v15050_v7 = vadd.f32 %v8871_v59, %v14894_v49  ;;  %v15054_v3 = vpop.f32.mrb[253].mxu0  ;;  %v8146_v32 = vadd.f32 %v8145_v53, %v8083_v52  ;;  %v8084_v59 = vmul.f32 %v14954_v40, %v14954_v40  ;;  %v8015_v52 = vadd.f32 %v8014_v18, %v14972_v15 }
 0x8a7   :  { %v15059_v19 = vpop.f32.mrb[254].mxu0 }
 0x8a8   :  { %v15061_v29 = vpop.f32.mrb[255].mxu0  ;;  %v8147_v46 = vadd.f32 %v8146_v32, %v8084_v59  ;;  %v8016_v35 = vadd.f32 %v8015_v52, %v14978_v14 }
 0x8a9   :  { %v7588_v24 = vpop.f32.mrb[0].mxu1 }
 0x8aa   :  { %v8872_v49 = vadd.f32 %v7588_v24, %v16565_v31  ;;  %v7590_v56 = vpop.f32.mrb[1].mxu1  ;;  %v8148_v53 = vadd.f32 %v8147_v46, %v8085_v36  ;;  %v16567_v31 = vld [vmem:[#allocation72_spill] sm:$0xff]  ;;  %v8017_v59 = vadd.f32 %v8016_v35, %v14996_v55  ;;  %v8088_v46 = vmul.f32 %v15003_v0, %v15003_v0 }
 0x8ab   :  { %v7591_v60 = vpop.f32.mrb[2].mxu1 }
 0x8ac   :  { %v15068_v22 = vadd.f32 %v8872_v49, %v14911_v45  ;;  %v8873_v58 = vadd.f32 %v7591_v60, %v16566_v17  ;;  %v7593_v50 = vpop.f32.mrb[3].mxu1  ;;  %v8086_v45 = vmul.f32 %v14978_v14, %v14978_v14  ;;  %v8087_v60 = vmul.f32 %v14996_v55, %v14996_v55 }
 0x8ae   :  { %v15075_v23 = vadd.f32 %v8873_v58, %v14918_v26  ;;  %v8149_v32 = vadd.f32 %v8148_v53, %v8086_v45 }
 0x8b0   :  { %v8150_v36 = vadd.f32 %v8149_v32, %v8087_v60 }
 0x8b1   :  { %v7596_v24 = vpop.f32.mrb[4].mxu1 }
 0x8b2   :  { %v8874_v49 = vadd.f32 %v7596_v24, %v16567_v31  ;;  %v7598_v56 = vpop.f32.mrb[5].mxu1  ;;  %v8018_v24 = vadd.f32 %v8017_v59, %v15003_v0  ;;  %v16568_v31 = vld [vmem:[#allocation73_spill] sm:$0xff]  ;;  %v8151_v53 = vadd.f32 %v8150_v36, %v8088_v46  ;;  %v8091_v59 = vmul.f32 %v15044_v62, %v15044_v62 }
 0x8b3   :  { %v7599_v50 = vpop.f32.mrb[6].mxu1 }
 0x8b4   :  { %v15085_v26 = vadd.f32 %v8874_v49, %v14909_v44  ;;  %v8875_v58 = vadd.f32 %v7599_v50, %v14519_v51  ;;  %v7601_v18 = vpop.f32.mrb[7].mxu1  ;;  %v8089_v44 = vmul.f32 %v15021_v12, %v15021_v12  ;;  %v8019_v45 = vadd.f32 %v8018_v24, %v15021_v12 }
 0x8b6   :  { %v15090_v17 = vadd.f32 %v8875_v58, %v14916_v41  ;;  %v8152_v60 = vadd.f32 %v8151_v53, %v8089_v44  ;;  %v8090_v58 = vmul.f32 %v15026_v2, %v15026_v2  ;;  %v8020_v32 = vadd.f32 %v8019_v45, %v15026_v2 }
 0x8b7   :  { %v8093_v45 = vmul.f32 %v15068_v22, %v15068_v22 }
 0x8b8   :  { %v8153_v46 = vadd.f32 %v8152_v60, %v8090_v58 }
 0x8b9   :  { %v7604_v52 = vpop.f32.mrb[8].mxu1 }
 0x8ba   :  { %v8876_v49 = vadd.f32 %v7604_v52, %v16568_v31  ;;  %v7606_v51 = vpop.f32.mrb[9].mxu1  ;;  %v16569_v52 = vld [vmem:[#allocation75_spill] sm:$0xff]  ;;  %v8154_v44 = vadd.f32 %v8153_v46, %v8091_v59 }
 0x8bb   :  { %v7607_v56 = vpop.f32.mrb[10].mxu1 }
 0x8bc   :  { %v15100_v41 = vadd.f32 %v8876_v49, %v14935_v63  ;;  %v8877_v50 = vadd.f32 %v7607_v56, %v14527_v20  ;;  %v7609_v35 = vpop.f32.mrb[11].mxu1  ;;  %v8021_v63 = vadd.f32 %v8020_v32, %v15044_v62  ;;  %v8092_v49 = vmul.f32 %v15050_v7, %v15050_v7 }
 0x8be   :  { %v15106_v18 = vadd.f32 %v8877_v50, %v14940_v6  ;;  %v8022_v53 = vadd.f32 %v8021_v63, %v15050_v7  ;;  %v8155_v35 = vadd.f32 %v8154_v44, %v8092_v49  ;;  %v8095_v63 = vmul.f32 %v15085_v26, %v15085_v26 }
 0x8bf   :  { %v8096_v49 = vmul.f32 %v15090_v17, %v15090_v17 }
 0x8c0   :  { %v8023_v60 = vadd.f32 %v8022_v53, %v15068_v22  ;;  %v8156_v32 = vadd.f32 %v8155_v35, %v8093_v45 }
 0x8c1   :  { %v7612_v36 = vpop.f32.mrb[12].mxu1 }
 0x8c2   :  { %v8878_v24 = vadd.f32 %v7612_v36, %v16569_v52  ;;  %v7614_v20 = vpop.f32.mrb[13].mxu1  ;;  %v8024_v46 = vadd.f32 %v8023_v60, %v15075_v23 }
 0x8c3   :  { %v7615_v31 = vpop.f32.mrb[14].mxu1 }
 0x8c4   :  { %v15116_v6 = vadd.f32 %v8878_v24, %v14933_v27  ;;  %v8879_v51 = vadd.f32 %v7615_v31, %v14541_v13  ;;  %v7617_v56 = vpop.f32.mrb[15].mxu1  ;;  %v8094_v27 = vmul.f32 %v15075_v23, %v15075_v23  ;;  %v8025_v31 = vadd.f32 %v8024_v46, %v15085_v26 }
 0x8c6   :  { %v15123_v50 = vadd.f32 %v8879_v51, %v14938_v38  ;;  %v8157_v20 = vadd.f32 %v8156_v32, %v8094_v27  ;;  %v8026_v56 = vadd.f32 %v8025_v31, %v15090_v17 }
 0x8c8   :  { %v8027_v60 = vadd.f32 %v8026_v56, %v15100_v41 }
 0x8c9   :  { %v7620_v58 = vpop.f32.mrb[16].mxu1 }
 0x8ca   :  { %v8880_v59 = vadd.f32 %v7620_v58, %v14545_v30  ;;  %v7622_v13 = vpop.f32.mrb[17].mxu1  ;;  %v8158_v30 = vadd.f32 %v8157_v20, %v8095_v63 }
 0x8cb   :  { %v7623_v36 = vpop.f32.mrb[18].mxu1 }
 0x8cc   :  { %v15133_v38 = vadd.f32 %v8880_v59, %v14958_v43  ;;  %v8881_v52 = vadd.f32 %v7623_v36, %v14548_v47  ;;  %v7625_v24 = vpop.f32.mrb[19].mxu1  ;;  %v8097_v43 = vmul.f32 %v15100_v41, %v15100_v41  ;;  %v8159_v35 = vadd.f32 %v8158_v30, %v8096_v49  ;;  %v16571_v49 = vld [vmem:[#allocation39_spill] sm:$0xff] }
 0x8cd   :  { %v8098_v59 = vmul.f32 %v15106_v18, %v15106_v18  ;;  %v8099_v36 = vmul.f32 %v15116_v6, %v15116_v6  ;;  %v8100_v30 = vmul.f32 %v15123_v50, %v15123_v50 }
 0x8ce   :  { %v15138_v44 = vadd.f32 %v8881_v52, %v14964_v21  ;;  %v8160_v27 = vadd.f32 %v8159_v35, %v8097_v43  ;;  %v16570_v52 = vld [vmem:[#allocation40_spill] sm:$0xff] }
 0x8d0   :  { %v8161_v63 = vadd.f32 %v8160_v27, %v8098_v59 }
 0x8d1   :  { %v7628_v51 = vpop.f32.mrb[20].mxu1 }
 0x8d2   :  { %v8882_v53 = vadd.f32 %v7628_v51, %v14553_v1  ;;  %v7630_v47 = vpop.f32.mrb[21].mxu1  ;;  %v8028_v1 = vadd.f32 %v8027_v60, %v15106_v18  ;;  %v8162_v31 = vadd.f32 %v8161_v63, %v8099_v36  ;;  %v16573_v63 = vld [vmem:[#allocation83_spill] sm:$0xff] }
 0x8d3   :  { %v7631_v45 = vpop.f32.mrb[22].mxu1 }
 0x8d4   :  { %v15148_v21 = vadd.f32 %v8882_v53, %v14956_v54  ;;  %v8883_v58 = vadd.f32 %v7631_v45, %v14556_v39  ;;  %v7633_v32 = vpop.f32.mrb[23].mxu1  ;;  %v8029_v54 = vadd.f32 %v8028_v1, %v15116_v6  ;;  %v8101_v53 = vmul.f32 %v15133_v38, %v15133_v38 }
 0x8d5   :  { %v8163_v45 = vadd.f32 %v8162_v31, %v8100_v30  ;;  %v16572_v32 = vld [vmem:[#allocation49_spill] sm:$0xff] }
 0x8d6   :  { %v15154_v13 = vadd.f32 %v8883_v58, %v14962_v5  ;;  %v8030_v43 = vadd.f32 %v8029_v54, %v15123_v50 }
 0x8d7   :  { %v8164_v58 = vadd.f32 %v8163_v45, %v8101_v53 }
 0x8d8   :  { %v8031_v35 = vadd.f32 %v8030_v43, %v15133_v38  ;;  %v8104_v30 = vmul.f32 %v15154_v13, %v15154_v13 }
 0x8d9   :  { %v7636_v46 = vpop.f32.mrb[24].mxu1 }
 0x8da   :  { %v8884_v24 = vadd.f32 %v7636_v46, %v16570_v52  ;;  %v7638_v39 = vpop.f32.mrb[25].mxu1  ;;  %v8032_v36 = vadd.f32 %v8031_v35, %v15138_v44  ;;  %v8103_v46 = vmul.f32 %v15148_v21, %v15148_v21 }
 0x8db   :  { %v7639_v20 = vpop.f32.mrb[26].mxu1 }
 0x8dc   :  { %v15164_v5 = vadd.f32 %v8884_v24, %v14982_v34  ;;  %v8885_v51 = vadd.f32 %v7639_v20, %v16571_v49  ;;  %v7641_v56 = vpop.f32.mrb[27].mxu1  ;;  %v8102_v34 = vmul.f32 %v15138_v44, %v15138_v44  ;;  %v8033_v39 = vadd.f32 %v8032_v36, %v15148_v21 }
 0x8dd   :  { %v16574_v56 = vld [vmem:[#allocation50_spill] sm:$0xff] }
 0x8de   :  { %v15171_v47 = vadd.f32 %v8885_v51, %v14989_v42  ;;  %v8165_v24 = vadd.f32 %v8164_v58, %v8102_v34  ;;  %v8034_v51 = vadd.f32 %v8033_v39, %v15154_v13  ;;  %v16575_v58 = vld [vmem:[#allocation48_spill] sm:$0xff] }
 0x8e0   :  { %v8166_v31 = vadd.f32 %v8165_v24, %v8103_v46 }
 0x8e1   :  { %v7644_v60 = vpop.f32.mrb[28].mxu1 }
 0x8e2   :  { %v8886_v27 = vadd.f32 %v7644_v60, %v16572_v32  ;;  %v7646_v59 = vpop.f32.mrb[29].mxu1  ;;  %v8167_v35 = vadd.f32 %v8166_v31, %v8104_v30  ;;  %v8035_v60 = vadd.f32 %v8034_v51, %v15164_v5  ;;  %v16577_v51 = vld [vmem:[#allocation62_spill] sm:$0xff] }
 0x8e3   :  { %v7647_v1 = vpop.f32.mrb[30].mxu1  ;;  %v8106_v59 = vmul.f32 %v15171_v47, %v15171_v47 }
 0x8e4   :  { %v15181_v42 = vadd.f32 %v8886_v27, %v14980_v11  ;;  %v8887_v54 = vadd.f32 %v7647_v1, %v16573_v63  ;;  %v7649_v52 = vpop.f32.mrb[31].mxu1  ;;  %v8105_v11 = vmul.f32 %v15164_v5, %v15164_v5  ;;  %v8036_v36 = vadd.f32 %v8035_v60, %v15171_v47 }
 0x8e5   :  { %v16576_v52 = vld [vmem:[#allocation59_spill] sm:$0xff] }
 0x8e6   :  { %v15186_v20 = vadd.f32 %v8887_v54, %v14987_v25  ;;  %v8168_v27 = vadd.f32 %v8167_v35, %v8105_v11  ;;  %v8107_v46 = vmul.f32 %v15181_v42, %v15181_v42 }
 0x8e8   :  { %v8169_v54 = vadd.f32 %v8168_v27, %v8106_v59 }
 0x8e9   :  { %v7652_v49 = vpop.f32.mrb[32].mxu1 }
 0x8ea   :  { %v8888_v43 = vadd.f32 %v7652_v49, %v16574_v56  ;;  %v7654_v53 = vpop.f32.mrb[33].mxu1  ;;  %v8170_v30 = vadd.f32 %v8169_v54, %v8107_v46  ;;  %v8108_v49 = vmul.f32 %v15186_v20, %v15186_v20  ;;  %v16579_v54 = vld [vmem:[#allocation70_spill] sm:$0xff] }
 0x8eb   :  { %v7655_v45 = vpop.f32.mrb[34].mxu1 }
 0x8ec   :  { %v15196_v25 = vadd.f32 %v8888_v43, %v15007_v48  ;;  %v8889_v34 = vadd.f32 %v7655_v45, %v16575_v58  ;;  %v7657_v32 = vpop.f32.mrb[35].mxu1  ;;  %v8037_v48 = vadd.f32 %v8036_v36, %v15181_v42  ;;  %v8171_v35 = vadd.f32 %v8170_v30, %v8108_v49 }
 0x8ed   :  { %v16578_v32 = vld [vmem:[#allocation58_spill] sm:$0xff] }
 0x8ee   :  { %v15202_v1 = vadd.f32 %v8889_v34, %v15012_v28  ;;  %v8038_v43 = vadd.f32 %v8037_v48, %v15186_v20  ;;  %v8109_v53 = vmul.f32 %v15196_v25, %v15196_v25 }
 0x8f0   :  { %v8039_v60 = vadd.f32 %v8038_v43, %v15196_v25  ;;  %v8172_v34 = vadd.f32 %v8171_v35, %v8109_v53 }
 0x8f1   :  { %v7660_v63 = vpop.f32.mrb[36].mxu1 }
 0x8f2   :  { %v8890_v24 = vadd.f32 %v7660_v63, %v16576_v52  ;;  %v7662_v39 = vpop.f32.mrb[37].mxu1  ;;  %v8040_v46 = vadd.f32 %v8039_v60, %v15202_v1 }
 0x8f3   :  { %v7663_v31 = vpop.f32.mrb[38].mxu1 }
 0x8f4   :  { %v15212_v28 = vadd.f32 %v8890_v24, %v15005_v33  ;;  %v8891_v11 = vadd.f32 %v7663_v31, %v16577_v51  ;;  %v7665_v56 = vpop.f32.mrb[39].mxu1  ;;  %v8110_v33 = vmul.f32 %v15202_v1, %v15202_v1 }
 0x8f5   :  { %v16580_v56 = vld [vmem:[#allocation101_spill] sm:$0xff] }
 0x8f6   :  { %v15219_v45 = vadd.f32 %v8891_v11, %v15010_v10  ;;  %v8111_v63 = vmul.f32 %v15212_v28, %v15212_v28  ;;  %v8173_v24 = vadd.f32 %v8172_v34, %v8110_v33  ;;  %v8041_v39 = vadd.f32 %v8040_v46, %v15212_v28  ;;  %v16581_v34 = vld [vmem:[#allocation69_spill] sm:$0xff] }
 0x8f8   :  { %v8174_v30 = vadd.f32 %v8173_v24, %v8111_v63  ;;  %v8112_v49 = vmul.f32 %v15219_v45, %v15219_v45  ;;  %v8042_v11 = vadd.f32 %v8041_v39, %v15219_v45 }
 0x8f9   :  { %v7668_v58 = vpop.f32.mrb[40].mxu1 }
 0x8fa   :  { %v8892_v27 = vadd.f32 %v7668_v58, %v16578_v32  ;;  %v7670_v59 = vpop.f32.mrb[41].mxu1  ;;  %v8175_v60 = vadd.f32 %v8174_v30, %v8112_v49 }
 0x8fb   :  { %v7671_v36 = vpop.f32.mrb[42].mxu1 }
 0x8fc   :  { %v15229_v10 = vadd.f32 %v8892_v27, %v15030_v57  ;;  %v8893_v48 = vadd.f32 %v7671_v36, %v16579_v54  ;;  %v7673_v52 = vpop.f32.mrb[43].mxu1 }
 0x8fd   :  { %v16582_v52 = vld [vmem:[#allocation67_spill] sm:$0xff] }
 0x8fe   :  { %v15234_v31 = vadd.f32 %v8893_v48, %v15036_v16  ;;  %v8113_v57 = vmul.f32 %v15229_v10, %v15229_v10  ;;  %v8043_v58 = vadd.f32 %v8042_v11, %v15229_v10  ;;  %v16583_v11 = vld [vmem:[#allocation77_spill] sm:$0xff] }
 0x900   :  { %v8176_v27 = vadd.f32 %v8175_v60, %v8113_v57  ;;  %v8114_v59 = vmul.f32 %v15234_v31, %v15234_v31  ;;  %v8044_v46 = vadd.f32 %v8043_v58, %v15234_v31 }
 0x901   :  { %v7676_v51 = vpop.f32.mrb[44].mxu1 }
 0x902   :  { %v8894_v43 = vadd.f32 %v7676_v51, %v16580_v56  ;;  %v7678_v53 = vpop.f32.mrb[45].mxu1  ;;  %v8177_v48 = vadd.f32 %v8176_v27, %v8114_v59  ;;  %v16584_v27 = vld [vmem:[#allocation79_spill] sm:$0xff] }
 0x903   :  { %v7679_v35 = vpop.f32.mrb[46].mxu1 }
 0x904   :  { %v15244_v16 = vadd.f32 %v8894_v43, %v15028_v8  ;;  %v8895_v33 = vadd.f32 %v7679_v35, %v16581_v34  ;;  %v7681_v32 = vpop.f32.mrb[47].mxu1 }
 0x906   :  { %v15250_v36 = vadd.f32 %v8895_v33, %v15034_v37  ;;  %v8115_v63 = vmul.f32 %v15244_v16, %v15244_v16  ;;  %v8045_v8 = vadd.f32 %v8044_v46, %v15244_v16 }
 0x908   :  { %v8178_v49 = vadd.f32 %v8177_v48, %v8115_v63  ;;  %v8116_v51 = vmul.f32 %v15250_v36, %v15250_v36  ;;  %v8046_v43 = vadd.f32 %v8045_v8, %v15250_v36  ;;  %v16585_v48 = vld [vmem:[#allocation78_spill] sm:$0xff] }
 0x909   :  { %v7684_v54 = vpop.f32.mrb[48].mxu1 }
 0x90a   :  { %v8896_v24 = vadd.f32 %v7684_v54, %v16582_v52  ;;  %v7686_v39 = vpop.f32.mrb[49].mxu1  ;;  %v8179_v58 = vadd.f32 %v8178_v49, %v8116_v51 }
 0x90b   :  { %v7687_v30 = vpop.f32.mrb[50].mxu1 }
 0x90c   :  { %v8897_v37 = vadd.f32 %v7687_v30, %v16583_v11  ;;  %v15261_v57 = vadd.f32 %v8896_v24, %v15054_v3  ;;  %v7689_v56 = vpop.f32.mrb[51].mxu1 }
 0x90e   :  { %v8117_v53 = vmul.f32 %v15261_v57, %v15261_v57  ;;  %v15267_v35 = vadd.f32 %v8897_v37, %v15061_v29  ;;  %v8047_v60 = vadd.f32 %v8046_v43, %v15261_v57 }
 0x910   :  { %v8180_v33 = vadd.f32 %v8179_v58, %v8117_v53  ;;  %v8118_v32 = vmul.f32 %v15267_v35, %v15267_v35  ;;  %v8048_v63 = vadd.f32 %v8047_v60, %v15267_v35 }
 0x911   :  { %v7692_v34 = vpop.f32.mrb[52].mxu1 }
 0x912   :  { %v8898_v3 = vadd.f32 %v7692_v34, %v16584_v27  ;;  %v7694_v59 = vpop.f32.mrb[53].mxu1  ;;  %v8181_v52 = vadd.f32 %v8180_v33, %v8118_v32 }
 0x913   :  { %v7695_v46 = vpop.f32.mrb[54].mxu1 }
 0x914   :  { %v15275_v54 = vadd.f32 %v8898_v3, %v15052_v9  ;;  %v8899_v29 = vadd.f32 %v7695_v46, %v16585_v48  ;;  %v7697_v8 = vpop.f32.mrb[55].mxu1 }
 0x916   :  { %v8049_v24 = vadd.f32 %v8048_v63, %v15275_v54  ;;  %v8119_v39 = vmul.f32 %v15275_v54, %v15275_v54  ;;  %v7985_v30 = vadd.f32 %v8899_v29, %v15059_v19 }
 0x918   :  { %v8182_v49 = vadd.f32 %v8181_v52, %v8119_v39  ;;  %v8050_v51 = vadd.f32 %v8049_v24, %v7985_v30  ;;  %v8120_v11 = vmul.f32 %v7985_v30, %v7985_v30  ;;  %v8197_v52 = vld [vmem:[%s15881_s5] sm:$0x1]  ;;  %s9293_s5 = smov [#allocation5]  }
 0x91a   :  { %v8051_v37 = vrot.slane %v8050_v51, 4  ;;  %v8183_v56 = vadd.f32 %v8182_v49, %v8120_v11  ;;  %v8199_v49 = vld [vmem:[%s15882_s6] sm:$0x1]  ;;  %v16586_v11 = vld [vmem:[#allocation34_spill] sm:$0xff]  ;;  %s8473_s6 = sshll.u32 %s9293_s5, 4  ;;  %s8474_s6 = int_to_ptr.vmem [resolvable:$true] %s8473_s6 }
 0x91b   :  { %s9259_s19 = scalar_lea.vmem %s8474_s6, 8192  ;;  %p9264_p1 = scmp.lt.s32.totalorder %s8474_s6, %s8474_s6 }
 0x91c   :  { %v8052_v43 = vadd.f32 %v8051_v37, %v8050_v51  ;;  %v8184_v53 = vrot.slane %v8183_v56, 4  ;;  %p9260_p0 = scmp.ne.s32.totalorder %s8474_s6, %s9259_s19  ;;  %p9265_p2 = scmp.lt.s32.totalorder %s9259_s19, %s9259_s19 }
 0x91e   :  { %v8053_v9 = vrot.slane %v8052_v43, 2  ;;  %v8185_v60 = vadd.f32 %v8184_v53, %v8183_v56  ;;  %v16587_v53 = vld [vmem:[#allocation88_spill] sm:$0xff]  ;;  %p9266_p3 = por %p9265_p2, %p9264_p1 }
 0x920   :  { %v8054_v58 = vadd.f32 %v8053_v9, %v8052_v43  ;;  %v8186_v34 = vrot.slane %v8185_v60, 2  ;;  %p9267_p4 = pnand %p9266_p3, %p9260_p0 }
 0x922   :  { %v8055_v27 = vrot.slane %v8054_v58, 1  ;;  %v8187_v33 = vadd.f32 %v8186_v34, %v8185_v60  ;;  %v16588_v60 = vld [vmem:[#allocation97_spill] sm:$0xff] }
 0x923   :  { %v16589_v34 = vld [vmem:[#allocation85_spill] sm:$0xff] }
 0x924   :  { %v8056_v32 = vadd.f32 %v8055_v27, %v8054_v58  ;;  %v8188_v3 = vrot.slane %v8187_v33, 1 }
 0x926   :  { %v8189_v59 = vadd.f32 %v8188_v3, %v8187_v33  ;;  %v8190_v46 = vmul.f32 0.001953125, %v8056_v32  ;;  %v16590_v33 = vld [vmem:[#allocation87_spill] sm:$0xff]  ;;  %v16591_v3 = vld [vmem:[#allocation33_spill] sm:$0xff] }
 0x928   :  { %v8191_v63 = vmul.f32 0.001953125, %v8189_v59  ;;  %v8192_v48 = vmul.f32 %v8190_v46, %v8190_v46 }
 0x92a   :  { %v8193_v19 = vsub.f32 %v8191_v63, %v8192_v48  ;;  %v16593_v48 = vld [vmem:[#allocation92_spill] sm:$0xff] }
 0x92c   :  { %v8194_v29 = vmax.f32 %v8193_v19, 0.0 }
 0x92e   :  { %v8195_v8 = vadd.f32 1e-05, %v8194_v29  ;;  %v16594_v29 = vld [vmem:[#allocation26_spill] sm:$0xff] }
 0x930   :  { %9250 = vrsqrt.f32 %v8195_v8 }
 0x93a   :  { %v9251_v24 = vpop.eup %9250 }
 0x93b   :  { %v8198_v39 = vmul.f32 %v9251_v24, %v8197_v52  ;;  %v16595_v52 = vld [vmem:[#allocation12_spill] sm:$0xff] }
 0x93d   :  { %v8200_v51 = vmul.f32 %v8198_v39, %v8190_v46  ;;  %v15289_v37 = vrot.slane %v8198_v39, %v16586_v11  ;;  %v16596_v39 = vld [vmem:[#allocation45_spill] sm:$0xff] }
 0x93f   :  { %v8201_v56 = vsub.f32 %v8199_v49, %v8200_v51  ;;  %v8269_v43 = vmul.f32 %v15289_v37, %v7985_v30  ;;  %v15294_v9 = vmul.f32 %v15289_v37, %v16587_v53  ;;  %v15298_v58 = vmul.f32 %v15289_v37, %v16588_v60  ;;  %v16592_v30 = vld [vmem:[#allocation32_spill] sm:$0xff] }
 0x940   :  { %v15302_v27 = vmul.f32 %v15289_v37, %v16589_v34  ;;  %v15306_v32 = vmul.f32 %v15289_v37, %v16590_v33  ;;  %v15310_v59 = vmul.f32 %v15289_v37, %v16591_v3  ;;  %v15314_v46 = vmul.f32 %v15289_v37, %v16592_v30  ;;  %v16597_v51 = vld [vmem:[#allocation8_spill] sm:$0xff] }
 0x941   :  { %v15317_v63 = vrot.slane %v8201_v56, %v16586_v11  ;;  %v15321_v19 = vmul.f32 %v15289_v37, %v16593_v48  ;;  %v15325_v8 = vmul.f32 %v15289_v37, %v16594_v29  ;;  %v15329_v24 = vmul.f32 %v15289_v37, %v16595_v52  ;;  %v16598_v56 = vld [vmem:[#allocation54_spill] sm:$0xff]  ;;  %v16599_v60 = vld [vmem:[#allocation56_spill] sm:$0xff]  ;;  %v16605_v52 = vld [vmem:[#allocation31_spill] sm:$0xff] }
 0x942   :  { %v15333_v49 = vmul.f32 %v15289_v37, %v16596_v39  ;;  %v15337_v11 = vmul.f32 %v15289_v37, %v16597_v51  ;;  %v15341_v53 = vmul.f32 %v15289_v37, %v16598_v56  ;;  %v15345_v34 = vmul.f32 %v15289_v37, %v16599_v60  ;;  %v16601_v3 = vld [vmem:[#allocation28_spill] sm:$0xff]  ;;  %v16603_v48 = vld [vmem:[#allocation30_spill] sm:$0xff]  ;;  %v16608_v56 = vld [vmem:[#allocation11_spill] sm:$0xff] }
 0x943   :  { %v8339_v33 = vadd.f32 %v15317_v63, %v8269_v43  ;;  %v15350_v30 = vmul.f32 %v15289_v37, %v16601_v3  ;;  %v15354_v29 = vmul.f32 %v15289_v37, %v16603_v48  ;;  %v15358_v39 = vmul.f32 %v15289_v37, %v16605_v52  ;;  %v16610_v43 = vld [vmem:[#allocation13_spill] sm:$0xff] }
 0x944   :  { %16600 = vst [vmem:[#allocation66_spill] sm:$0xff] %v15345_v34  ;;  %v15362_v51 = vmul.f32 %v15289_v37, %v14842_v61  ;;  %v15366_v60 = vmul.f32 %v15289_v37, %v16608_v56  ;;  %v15370_v3 = vmul.f32 %v15289_v37, %v16610_v43  ;;  %v16613_v34 = vld [vmem:[#allocation37_spill] sm:$0xff] }
 0x945   :  { %16602 = vst [vmem:[#allocation74_spill] sm:$0xff] %v15350_v30  ;;  %16604 = vst [vmem:[#allocation76_spill] sm:$0xff] %v15354_v29  ;;  %v16612_v30 = vld [vmem:[#allocation19_spill] sm:$0xff]  ;;  %v8403_v29 = vmax.f32 %v8339_v33, 0.0  ;;  %v15378_v52 = vmul.f32 %v15289_v37, %v16613_v34  ;;  %v16618_v33 = vld [vmem:[#allocation60_spill] sm:$0xff] }
 0x946   :  { %16606 = vst [vmem:[#allocation81_spill] sm:$0xff] %v15358_v39  ;;  %16607 = vst [vmem:[#allocation84_spill] sm:$0xff] %v15362_v51  ;;  %v15374_v48 = vmul.f32 %v15289_v37, %v16612_v30  ;;  %v16614_v39 = vld [vmem:[#allocation41_spill] sm:$0xff]  ;;  %v16615_v51 = vld [vmem:[#allocation47_spill] sm:$0xff]  ;;  %v15398_v34 = vmul.f32 %v15289_v37, %v16618_v33  ;;  %v15418_v33 = vmul.f32 %v15289_v37, %v14996_v55 }
 0x947   :  { %16609 = vst [vmem:[#allocation89_spill] sm:$0xff] %v15366_v60  ;;  %16611 = vst [vmem:[#allocation91_spill] sm:$0xff] %v15370_v3  ;;  %v15382_v61 = vmul.f32 %v15289_v37, %v16614_v39  ;;  %v15386_v56 = vmul.f32 %v15289_v37, %v16615_v51  ;;  %v16616_v60 = vld [vmem:[#allocation52_spill] sm:$0xff]  ;;  %v16617_v3 = vld [vmem:[#allocation53_spill] sm:$0xff]  ;;  %v15402_v39 = vmul.f32 %v15289_v37, %v14949_v4 }
 0x948   :  { %v15390_v43 = vmul.f32 %v15289_v37, %v16616_v60  ;;  %v15394_v30 = vmul.f32 %v15289_v37, %v16617_v3  ;;  %8467 = vst [vmem:[#allocation5 + $0x1f8] sm:$0xff] %v8403_v29  ;;  %v15406_v51 = vmul.f32 %v15289_v37, %v14954_v40  ;;  %v15410_v60 = vmul.f32 %v15289_v37, %v14972_v15 }
 0x949   :  { %v15414_v3 = vmul.f32 %v15289_v37, %v14978_v14  ;;  %v15422_v4 = vmul.f32 %v15289_v37, %v15003_v0  ;;  %v15426_v40 = vmul.f32 %v15289_v37, %v15021_v12  ;;  %v15430_v15 = vmul.f32 %v15289_v37, %v15026_v2 }
 0x94a   :  { %v15434_v14 = vmul.f32 %v15289_v37, %v15044_v62  ;;  %v15438_v55 = vmul.f32 %v15289_v37, %v15050_v7  ;;  %v15442_v0 = vmul.f32 %v15289_v37, %v15068_v22  ;;  %v15446_v12 = vmul.f32 %v15289_v37, %v15075_v23 }
 0x94b   :  { %v15450_v2 = vmul.f32 %v15289_v37, %v15085_v26  ;;  %v15454_v62 = vmul.f32 %v15289_v37, %v15090_v17  ;;  %v15458_v7 = vmul.f32 %v15289_v37, %v15100_v41  ;;  %v15462_v22 = vmul.f32 %v15289_v37, %v15106_v18 }
 0x94c   :  { %v15466_v23 = vmul.f32 %v15289_v37, %v15116_v6  ;;  %v15470_v26 = vmul.f32 %v15289_v37, %v15123_v50  ;;  %v15474_v17 = vmul.f32 %v15289_v37, %v15133_v38  ;;  %v15478_v41 = vmul.f32 %v15289_v37, %v15138_v44  ;;  %v16625_v29 = vld [vmem:[#allocation74_spill] sm:$0xff] }
 0x94d   :  { %v15482_v18 = vmul.f32 %v15289_v37, %v15148_v21  ;;  %v15486_v6 = vmul.f32 %v15289_v37, %v15154_v13  ;;  %v15490_v50 = vmul.f32 %v15289_v37, %v15164_v5  ;;  %v15494_v38 = vmul.f32 %v15289_v37, %v15171_v47 }
 0x94e   :  { %v15498_v44 = vmul.f32 %v15289_v37, %v15181_v42  ;;  %v15502_v21 = vmul.f32 %v15289_v37, %v15186_v20  ;;  %v15506_v13 = vmul.f32 %v15289_v37, %v15196_v25  ;;  %v15510_v5 = vmul.f32 %v15289_v37, %v15202_v1 }
 0x94f   :  { %v15514_v47 = vmul.f32 %v15289_v37, %v15212_v28  ;;  %v15518_v42 = vmul.f32 %v15289_v37, %v15219_v45  ;;  %v15522_v20 = vmul.f32 %v15289_v37, %v15229_v10  ;;  %v15526_v25 = vmul.f32 %v15289_v37, %v15234_v31 }
 0x950   :  { %v15530_v1 = vmul.f32 %v15289_v37, %v15244_v16  ;;  %v15534_v28 = vmul.f32 %v15289_v37, %v15250_v36  ;;  %v15538_v45 = vmul.f32 %v15289_v37, %v15261_v57  ;;  %v15542_v10 = vmul.f32 %v15289_v37, %v15267_v35 }
 0x951   :  { %v15546_v31 = vmul.f32 %v15289_v37, %v15275_v54  ;;  %v15550_v16 = vadd.f32 %v15317_v63, %v15294_v9  ;;  %v15554_v36 = vadd.f32 %v15317_v63, %v15298_v58  ;;  %v15558_v57 = vadd.f32 %v15317_v63, %v15302_v27 }
 0x952   :  { %v15562_v35 = vadd.f32 %v15317_v63, %v15306_v32  ;;  %v15566_v54 = vadd.f32 %v15317_v63, %v15310_v59  ;;  %v15570_v37 = vadd.f32 %v15317_v63, %v15314_v46  ;;  %v15574_v9 = vadd.f32 %v15317_v63, %v15321_v19  ;;  %v16623_v19 = vld [vmem:[#allocation66_spill] sm:$0xff] }
 0x953   :  { %v15578_v58 = vadd.f32 %v15317_v63, %v15325_v8  ;;  %v15582_v27 = vadd.f32 %v15317_v63, %v15329_v24  ;;  %v15586_v32 = vadd.f32 %v15317_v63, %v15333_v49  ;;  %v15590_v59 = vadd.f32 %v15317_v63, %v15337_v11 }
 0x954   :  { %v15594_v46 = vadd.f32 %v15317_v63, %v15341_v53  ;;  %v15598_v8 = vadd.f32 %v15317_v63, %v16623_v19  ;;  %v15602_v24 = vadd.f32 %v15317_v63, %v16625_v29 }
 0x955   :  { %16619 = vst [vmem:[#allocation94_spill] sm:$0xff] %v15582_v27  ;;  %16620 = vst [vmem:[#allocation96_spill] sm:$0xff] %v15586_v32  ;;  %v16626_v27 = vld [vmem:[#allocation76_spill] sm:$0xff]  ;;  %v16627_v32 = vld [vmem:[#allocation81_spill] sm:$0xff] }
 0x956   :  { %16621 = vst [vmem:[#allocation99_spill] sm:$0xff] %v15590_v59  ;;  %16622 = vst [vmem:[#allocation102_spill] sm:$0xff] %v15594_v46  ;;  %v15606_v49 = vadd.f32 %v15317_v63, %v16626_v27  ;;  %v15610_v11 = vadd.f32 %v15317_v63, %v16627_v32  ;;  %v16628_v59 = vld [vmem:[#allocation84_spill] sm:$0xff]  ;;  %v16629_v46 = vld [vmem:[#allocation89_spill] sm:$0xff]  ;;  %v15626_v27 = vadd.f32 %v15317_v63, %v15374_v48 }
 0x957   :  { %16624 = vst [vmem:[#allocation105_spill] sm:$0xff] %v15598_v8  ;;  %v15614_v53 = vadd.f32 %v15317_v63, %v16628_v59  ;;  %v15618_v19 = vadd.f32 %v15317_v63, %v16629_v46  ;;  %v16630_v8 = vld [vmem:[#allocation91_spill] sm:$0xff]  ;;  %v15630_v32 = vadd.f32 %v15317_v63, %v15378_v52  ;;  %v15634_v59 = vadd.f32 %v15317_v63, %v15382_v61 }
 0x958   :  { %v15622_v29 = vadd.f32 %v15317_v63, %v16630_v8  ;;  %v15638_v46 = vadd.f32 %v15317_v63, %v15386_v56  ;;  %v15642_v8 = vadd.f32 %v15317_v63, %v15390_v43  ;;  %v15646_v48 = vadd.f32 %v15317_v63, %v15394_v30 }
 0x959   :  { %v15650_v52 = vadd.f32 %v15317_v63, %v15398_v34  ;;  %v15654_v61 = vadd.f32 %v15317_v63, %v15402_v39  ;;  %v15658_v56 = vadd.f32 %v15317_v63, %v15406_v51  ;;  %v15662_v43 = vadd.f32 %v15317_v63, %v15410_v60 }
 0x95a   :  { %v15666_v30 = vadd.f32 %v15317_v63, %v15414_v3  ;;  %v15670_v34 = vadd.f32 %v15317_v63, %v15418_v33  ;;  %v15674_v39 = vadd.f32 %v15317_v63, %v15422_v4  ;;  %v15678_v51 = vadd.f32 %v15317_v63, %v15426_v40 }
 0x95b   :  { %v15682_v60 = vadd.f32 %v15317_v63, %v15430_v15  ;;  %v15686_v3 = vadd.f32 %v15317_v63, %v15434_v14  ;;  %v15690_v33 = vadd.f32 %v15317_v63, %v15438_v55  ;;  %v15694_v4 = vadd.f32 %v15317_v63, %v15442_v0 }
 0x95c   :  { %v15698_v40 = vadd.f32 %v15317_v63, %v15446_v12  ;;  %v15702_v15 = vadd.f32 %v15317_v63, %v15450_v2  ;;  %v15706_v14 = vadd.f32 %v15317_v63, %v15454_v62  ;;  %v15710_v55 = vadd.f32 %v15317_v63, %v15458_v7 }
 0x95d   :  { %v15714_v0 = vadd.f32 %v15317_v63, %v15462_v22  ;;  %v15718_v12 = vadd.f32 %v15317_v63, %v15466_v23  ;;  %v15722_v2 = vadd.f32 %v15317_v63, %v15470_v26  ;;  %v15726_v62 = vadd.f32 %v15317_v63, %v15474_v17 }
 0x95e   :  { %v15730_v7 = vadd.f32 %v15317_v63, %v15478_v41  ;;  %v15734_v22 = vadd.f32 %v15317_v63, %v15482_v18  ;;  %v15738_v23 = vadd.f32 %v15317_v63, %v15486_v6  ;;  %v15742_v26 = vadd.f32 %v15317_v63, %v15490_v50 }
 0x95f   :  { %v15746_v17 = vadd.f32 %v15317_v63, %v15494_v38  ;;  %v15750_v41 = vadd.f32 %v15317_v63, %v15498_v44  ;;  %v15754_v18 = vadd.f32 %v15317_v63, %v15502_v21  ;;  %v15758_v6 = vadd.f32 %v15317_v63, %v15506_v13 }
 0x960   :  { %v15762_v50 = vadd.f32 %v15317_v63, %v15510_v5  ;;  %v15766_v38 = vadd.f32 %v15317_v63, %v15514_v47  ;;  %v15770_v44 = vadd.f32 %v15317_v63, %v15518_v42  ;;  %v15774_v21 = vadd.f32 %v15317_v63, %v15522_v20 }
 0x961   :  { %v15778_v13 = vadd.f32 %v15317_v63, %v15526_v25  ;;  %v15782_v5 = vadd.f32 %v15317_v63, %v15530_v1  ;;  %v15786_v47 = vadd.f32 %v15317_v63, %v15534_v28  ;;  %v15790_v42 = vadd.f32 %v15317_v63, %v15538_v45 }
 0x962   :  { %16631 = vst [vmem:[#allocation20_spill] sm:$0xff] %v15766_v38  ;;  %16632 = vst [vmem:[#allocation46_spill] sm:$0xff] %v15770_v44  ;;  %v15794_v20 = vadd.f32 %v15317_v63, %v15542_v10  ;;  %v15798_v25 = vadd.f32 %v15317_v63, %v15546_v31  ;;  %v8341_v1 = vmax.f32 %v15554_v36, 0.0  ;;  %v8343_v28 = vmax.f32 %v15562_v35, 0.0  ;;  %v16641_v63 = vld [vmem:[#allocation96_spill] sm:$0xff]  ;;  %v16643_v36 = vld [vmem:[#allocation102_spill] sm:$0xff] }
 0x963   :  { %16633 = vst [vmem:[#allocation57_spill] sm:$0xff] %v15774_v21  ;;  %16634 = vst [vmem:[#allocation68_spill] sm:$0xff] %v15778_v13  ;;  %v8340_v13 = vmax.f32 %v15550_v16, 0.0  ;;  %v8345_v45 = vmax.f32 %v15570_v37, 0.0  ;;  %v8347_v10 = vmax.f32 %v15578_v58, 0.0  ;;  %v8349_v31 = vmax.f32 %v16641_v63, 0.0 }
 0x964   :  { %16635 = vst [vmem:[#allocation80_spill] sm:$0xff] %v15782_v5  ;;  %16636 = vst [vmem:[#allocation86_spill] sm:$0xff] %v15786_v47  ;;  %v8342_v5 = vmax.f32 %v15558_v57, 0.0  ;;  %v8344_v47 = vmax.f32 %v15566_v54, 0.0  ;;  %v16642_v16 = vld [vmem:[#allocation99_spill] sm:$0xff]  ;;  %v8351_v44 = vmax.f32 %v16643_v36, 0.0 }
 0x965   :  { %16637 = vst [vmem:[#allocation93_spill] sm:$0xff] %v15790_v42  ;;  %16638 = vst [vmem:[#allocation98_spill] sm:$0xff] %v15794_v20  ;;  %v8346_v42 = vmax.f32 %v15574_v9, 0.0  ;;  %v16640_v20 = vld [vmem:[#allocation94_spill] sm:$0xff]  ;;  %v16644_v57 = vld [vmem:[#allocation105_spill] sm:$0xff]  ;;  %v8353_v35 = vmax.f32 %v15602_v24, 0.0 }
 0x966   :  { %16639 = vst [vmem:[#allocation103_spill] sm:$0xff] %v15798_v25  ;;  %v8348_v21 = vmax.f32 %v16640_v20, 0.0  ;;  %8404 = vst [vmem:[#allocation5] sm:$0xff] %v8340_v13  ;;  %v8350_v25 = vmax.f32 %v16642_v16, 0.0  ;;  %v8352_v38 = vmax.f32 %v16644_v57, 0.0  ;;  %v8354_v54 = vmax.f32 %v15606_v49, 0.0 }
 0x967   :  { %8405 = vst [vmem:[#allocation5 + $0x8] sm:$0xff] %v8341_v1  ;;  %8406 = vst [vmem:[#allocation5 + $0x10] sm:$0xff] %v8342_v5  ;;  %v8355_v37 = vmax.f32 %v15610_v11, 0.0  ;;  %v8356_v9 = vmax.f32 %v15614_v53, 0.0  ;;  %v8357_v58 = vmax.f32 %v15618_v19, 0.0  ;;  %v8358_v13 = vmax.f32 %v15622_v29, 0.0 }
 0x968   :  { %8407 = vst [vmem:[#allocation5 + $0x18] sm:$0xff] %v8343_v28  ;;  %8408 = vst [vmem:[#allocation5 + $0x20] sm:$0xff] %v8344_v47  ;;  %v8359_v5 = vmax.f32 %v15626_v27, 0.0  ;;  %v8360_v47 = vmax.f32 %v15630_v32, 0.0  ;;  %v8361_v24 = vmax.f32 %v15634_v59, 0.0  ;;  %v8362_v49 = vmax.f32 %v15638_v46, 0.0 }
 0x969   :  { %8409 = vst [vmem:[#allocation5 + $0x28] sm:$0xff] %v8345_v45  ;;  %8410 = vst [vmem:[#allocation5 + $0x30] sm:$0xff] %v8346_v42  ;;  %v8363_v11 = vmax.f32 %v15642_v8, 0.0  ;;  %v8364_v53 = vmax.f32 %v15646_v48, 0.0  ;;  %v8365_v19 = vmax.f32 %v15650_v52, 0.0  ;;  %v8366_v29 = vmax.f32 %v15654_v61, 0.0 }
 0x96a   :  { %8411 = vst [vmem:[#allocation5 + $0x38] sm:$0xff] %v8347_v10  ;;  %8412 = vst [vmem:[#allocation5 + $0x40] sm:$0xff] %v8348_v21  ;;  %v8367_v27 = vmax.f32 %v15658_v56, 0.0  ;;  %v8368_v32 = vmax.f32 %v15662_v43, 0.0  ;;  %v8369_v59 = vmax.f32 %v15666_v30, 0.0  ;;  %v8370_v46 = vmax.f32 %v15670_v34, 0.0 }
 0x96b   :  { %8413 = vst [vmem:[#allocation5 + $0x48] sm:$0xff] %v8349_v31  ;;  %8414 = vst [vmem:[#allocation5 + $0x50] sm:$0xff] %v8350_v25  ;;  %v8371_v8 = vmax.f32 %v15674_v39, 0.0  ;;  %v8372_v48 = vmax.f32 %v15678_v51, 0.0  ;;  %v8373_v52 = vmax.f32 %v15682_v60, 0.0  ;;  %v8374_v61 = vmax.f32 %v15686_v3, 0.0 }
 0x96c   :  { %8415 = vst [vmem:[#allocation5 + $0x58] sm:$0xff] %v8351_v44  ;;  %8416 = vst [vmem:[#allocation5 + $0x60] sm:$0xff] %v8352_v38  ;;  %v8375_v56 = vmax.f32 %v15690_v33, 0.0  ;;  %v8376_v43 = vmax.f32 %v15694_v4, 0.0  ;;  %v8377_v30 = vmax.f32 %v15698_v40, 0.0  ;;  %v8378_v34 = vmax.f32 %v15702_v15, 0.0 }
 0x96d   :  { %8417 = vst [vmem:[#allocation5 + $0x68] sm:$0xff] %v8353_v35  ;;  %8418 = vst [vmem:[#allocation5 + $0x70] sm:$0xff] %v8354_v54  ;;  %v8379_v39 = vmax.f32 %v15706_v14, 0.0  ;;  %v8380_v51 = vmax.f32 %v15710_v55, 0.0  ;;  %v8381_v60 = vmax.f32 %v15714_v0, 0.0  ;;  %v8382_v3 = vmax.f32 %v15718_v12, 0.0 }
 0x96e   :  { %8419 = vst [vmem:[#allocation5 + $0x78] sm:$0xff] %v8355_v37  ;;  %8420 = vst [vmem:[#allocation5 + $0x80] sm:$0xff] %v8356_v9  ;;  %v8383_v33 = vmax.f32 %v15722_v2, 0.0  ;;  %v8384_v4 = vmax.f32 %v15726_v62, 0.0  ;;  %v8385_v40 = vmax.f32 %v15730_v7, 0.0  ;;  %v8386_v15 = vmax.f32 %v15734_v22, 0.0 }
 0x96f   :  { %8421 = vst [vmem:[#allocation5 + $0x88] sm:$0xff] %v8357_v58  ;;  %8422 = vst [vmem:[#allocation5 + $0x90] sm:$0xff] %v8358_v13  ;;  %v8387_v14 = vmax.f32 %v15738_v23, 0.0  ;;  %v8388_v55 = vmax.f32 %v15742_v26, 0.0  ;;  %v8389_v0 = vmax.f32 %v15746_v17, 0.0  ;;  %v8390_v12 = vmax.f32 %v15750_v41, 0.0 }
 0x970   :  { %8423 = vst [vmem:[#allocation5 + $0x98] sm:$0xff] %v8359_v5  ;;  %8424 = vst [vmem:[#allocation5 + $0xa0] sm:$0xff] %v8360_v47  ;;  %v8391_v2 = vmax.f32 %v15754_v18, 0.0  ;;  %v8392_v62 = vmax.f32 %v15758_v6, 0.0  ;;  %v8393_v7 = vmax.f32 %v15762_v50, 0.0  ;;  %v16645_v22 = vld [vmem:[#allocation20_spill] sm:$0xff] }
 0x971   :  { %8425 = vst [vmem:[#allocation5 + $0xa8] sm:$0xff] %v8361_v24  ;;  %8426 = vst [vmem:[#allocation5 + $0xb0] sm:$0xff] %v8362_v49  ;;  %v8394_v23 = vmax.f32 %v16645_v22, 0.0  ;;  %v16646_v26 = vld [vmem:[#allocation46_spill] sm:$0xff]  ;;  %v16647_v44 = vld [vmem:[#allocation57_spill] sm:$0xff] }
 0x972   :  { %8427 = vst [vmem:[#allocation5 + $0xb8] sm:$0xff] %v8363_v11  ;;  %8428 = vst [vmem:[#allocation5 + $0xc0] sm:$0xff] %v8364_v53  ;;  %v8395_v38 = vmax.f32 %v16646_v26, 0.0  ;;  %v8396_v17 = vmax.f32 %v16647_v44, 0.0  ;;  %v16648_v41 = vld [vmem:[#allocation68_spill] sm:$0xff]  ;;  %v16650_v42 = vld [vmem:[#allocation86_spill] sm:$0xff] }
 0x973   :  { %8429 = vst [vmem:[#allocation5 + $0xc8] sm:$0xff] %v8365_v19  ;;  %8430 = vst [vmem:[#allocation5 + $0xd0] sm:$0xff] %v8366_v29  ;;  %v8397_v18 = vmax.f32 %v16648_v41, 0.0  ;;  %v16649_v6 = vld [vmem:[#allocation80_spill] sm:$0xff]  ;;  %v8399_v20 = vmax.f32 %v16650_v42, 0.0  ;;  %v16651_v25 = vld [vmem:[#allocation93_spill] sm:$0xff] }
 0x974   :  { %8431 = vst [vmem:[#allocation5 + $0xd8] sm:$0xff] %v8367_v27  ;;  %8432 = vst [vmem:[#allocation5 + $0xe0] sm:$0xff] %v8368_v32  ;;  %v8398_v21 = vmax.f32 %v16649_v6, 0.0  ;;  %v8400_v1 = vmax.f32 %v16651_v25, 0.0  ;;  %v16652_v50 = vld [vmem:[#allocation98_spill] sm:$0xff]  ;;  %v16653_v45 = vld [vmem:[#allocation103_spill] sm:$0xff] }
 0x975   :  { %8433 = vst [vmem:[#allocation5 + $0xe8] sm:$0xff] %v8369_v59  ;;  %8434 = vst [vmem:[#allocation5 + $0xf0] sm:$0xff] %v8370_v46  ;;  %v8401_v28 = vmax.f32 %v16652_v50, 0.0  ;;  %v8402_v10 = vmax.f32 %v16653_v45, 0.0 }
 0x976   :  { %8435 = vst [vmem:[#allocation5 + $0xf8] sm:$0xff] %v8371_v8  ;;  %8436 = vst [vmem:[#allocation5 + $0x100] sm:$0xff] %v8372_v48 }
 0x977   :  { %8437 = vst [vmem:[#allocation5 + $0x108] sm:$0xff] %v8373_v52  ;;  %8438 = vst [vmem:[#allocation5 + $0x110] sm:$0xff] %v8374_v61 }
 0x978   :  { %8439 = vst [vmem:[#allocation5 + $0x118] sm:$0xff] %v8375_v56  ;;  %8440 = vst [vmem:[#allocation5 + $0x120] sm:$0xff] %v8376_v43 }
 0x979   :  { %8441 = vst [vmem:[#allocation5 + $0x128] sm:$0xff] %v8377_v30  ;;  %8442 = vst [vmem:[#allocation5 + $0x130] sm:$0xff] %v8378_v34 }
 0x97a   :  { %8443 = vst [vmem:[#allocation5 + $0x138] sm:$0xff] %v8379_v39  ;;  %8444 = vst [vmem:[#allocation5 + $0x140] sm:$0xff] %v8380_v51 }
 0x97b   :  { %8445 = vst [vmem:[#allocation5 + $0x148] sm:$0xff] %v8381_v60  ;;  %8446 = vst [vmem:[#allocation5 + $0x150] sm:$0xff] %v8382_v3 }
 0x97c   :  { %8447 = vst [vmem:[#allocation5 + $0x158] sm:$0xff] %v8383_v33  ;;  %8448 = vst [vmem:[#allocation5 + $0x160] sm:$0xff] %v8384_v4 }
 0x97d   :  { %8449 = vst [vmem:[#allocation5 + $0x168] sm:$0xff] %v8385_v40  ;;  %8450 = vst [vmem:[#allocation5 + $0x170] sm:$0xff] %v8386_v15 }
 0x97e   :  { %8451 = vst [vmem:[#allocation5 + $0x178] sm:$0xff] %v8387_v14  ;;  %8452 = vst [vmem:[#allocation5 + $0x180] sm:$0xff] %v8388_v55 }
 0x97f   :  { %8453 = vst [vmem:[#allocation5 + $0x188] sm:$0xff] %v8389_v0  ;;  %8454 = vst [vmem:[#allocation5 + $0x190] sm:$0xff] %v8390_v12 }
 0x980   :  { %8455 = vst [vmem:[#allocation5 + $0x198] sm:$0xff] %v8391_v2  ;;  %8456 = vst [vmem:[#allocation5 + $0x1a0] sm:$0xff] %v8392_v62 }
 0x981   :  { %8457 = vst [vmem:[#allocation5 + $0x1a8] sm:$0xff] %v8393_v7  ;;  %8458 = vst [vmem:[#allocation5 + $0x1b0] sm:$0xff] %v8394_v23 }
 0x982   :  { %8459 = vst [vmem:[#allocation5 + $0x1b8] sm:$0xff] %v8395_v38  ;;  %8460 = vst [vmem:[#allocation5 + $0x1c0] sm:$0xff] %v8396_v17 }
 0x983   :  { %8461 = vst [vmem:[#allocation5 + $0x1c8] sm:$0xff] %v8397_v18  ;;  %8462 = vst [vmem:[#allocation5 + $0x1d0] sm:$0xff] %v8398_v21 }
 0x984   :  { %8463 = vst [vmem:[#allocation5 + $0x1d8] sm:$0xff] %v8399_v20  ;;  %8464 = vst [vmem:[#allocation5 + $0x1e0] sm:$0xff] %v8400_v1 }
 0x985   :  { %8465 = vst [vmem:[#allocation5 + $0x1e8] sm:$0xff] %v8401_v28  ;;  %8466 = vst [vmem:[#allocation5 + $0x1f0] sm:$0xff] %v8402_v10 }
 0x986   :  { %9270 = shalt.err (!%p9267_p4)
}
 0x987   :  { %s9271_s16 = scalar_lea.hbm %s15883_s7, 8192 }
 0x988   :  { %p9272_p5 = scmp.ne.s32.totalorder %s15883_s7, %s9271_s16  ;;  %p9275_p6 = scmp.lt.u32.totalorder %s9271_s16, %s15883_s7 }
 0x98a   :  { %p9277_p7 = pnand %p9275_p6, %p9272_p5 }
 0x98c   :  { %9280 = shalt.err (!%p9277_p7)
}
 0x98d   :  { %s9294_s26 = smov 128  }
 0x98e   :  { %8479 = dma.vmem_to_hbm [thread:$0]  %s8474_s6, 8192, %s15883_s7, [#allocation6], %s9294_s26, %s9294_s26, %s9284_s14  }
 0x98f   :  { %9281 = dma.done.wait [#allocation6], 8192  }
 0x990   :  { %9282 = vsyncadd [#allocation6], 4294959104 }
 0x991   :  { %8483 = vsyncpa [#allocation6], 1 }

</bundles_post_ra>
